<compile_context>
chip_gen: v7x
topology: tpu7x:2x2x1
jax: 0.10.0
libtpu: 0.0.40
codegen_flags: <defaults>
</compile_context>

<pallas_src>
import functools

import numpy as np

import jax
import jax.numpy as jnp
from jax.experimental import pallas as pl
from jax.experimental.pallas import tpu as pltpu


# ----------------------- static architecture constants ----------------------
K = 5                                   # conv kernel size
H_IN = W_IN = 28                        # MNIST spatial size (required for 320 flatten)
W_PAD = 32                              # image row width padded 28 -> 32 (lane-aligned)
COUT1, COUT2 = 10, 20                   # conv channel counts (fixed by the module)
HP1 = WP1 = (H_IN - K + 1) // 2         # 12: pooled size after conv1
HP2 = WP2 = (HP1 - K + 1) // 2          # 4 : pooled size after conv2
S1, S2 = 2, 2                           # pooled-row chunk heights per GEMM
G1, G2 = HP1 // S1, HP2 // S2           # 6, 2 chunks per stage
R1 = 2 * S1 + K - 1                     # 8 input image rows feeding one conv1 chunk
R2 = 2 * S2 + K - 1                     # 8 a1 rows feeding one conv2 chunk
GP1 = 128                               # conv1 per-pooled-row lane group (pads 10*12=120)
GP2 = 128                               # conv2 per-pooled-row lane group (pads 20*4 = 80)
FC_HIDDEN = 50
FC_H_PAD = 128                          # fc1 hidden padded 50 -> 128


# ----------------------------- weight packing -------------------------------

def _conv_pool_toeplitz(w, in_w, s_out, wp, group_pad, rr_stride, ci_stride):
    """Banded GEMM matrix implementing conv(k=5, valid) + 2x2 max-pool candidates.

    Input (lane) layout of one chunk : row = rr*rr_stride + ci*ci_stride + s,
      rr in [0, 2*s_out + kh - 1), ci in [0, cin), s in [0, in_w).
    Output (lane) layout : col = (p*s_out + ipl)*group_pad + co*wp + jp,
      p = 2*ir + jr in [0, 4).  Lanes with co*wp + jp >= cout*wp are zero padding.
    Entry w[co, ci, di, dj] sits at rr = 2*ipl + ir + di, s = 2*jp + jr + dj.
    The same matrix is valid for every row-chunk (translation invariance).
    """
    cout, cin, kh, kw = w.shape
    assert in_w == 2 * wp + kw - 1
    R = 2 * s_out + kh - 1
    m = np.zeros((R * rr_stride, 4 * s_out * group_pad), np.float32)
    ipl = np.arange(s_out)[:, None, None]          # (s_out, 1, 1)
    co = np.arange(cout)[None, :, None]            # (1, cout, 1)
    jp = np.arange(wp)[None, None, :]              # (1, 1, wp)
    for ir in range(2):
        for jr in range(2):
            p = 2 * ir + jr
            for di in range(kh):
                for dj in range(kw):
                    for ci in range(cin):
                        rr = 2 * ipl + ir + di
                        ss = 2 * jp + jr + dj
                        rows = rr * rr_stride + ci * ci_stride + ss            # (s_out,1,wp)
                        cols = (p * s_out + ipl) * group_pad + co * wp + jp    # (s_out,cout,wp)
                        vals = w[:, ci, di, dj][None, :, None]                 # (1,cout,1)
                        rows_b, cols_b, vals_b = np.broadcast_arrays(rows, cols, vals)
                        m[rows_b, cols_b] = vals_b
    return m


def init_params(key, num_channels=1, num_classes=10):
    ks = jax.random.split(key, 8)
    p = {}
    p["conv1_w"] = 0.1 * jax.random.normal(ks[0], (COUT1, num_channels, K, K), jnp.float32)
    p["conv1_b"] = 0.1 * jax.random.normal(ks[1], (COUT1,), jnp.float32)
    p["conv2_w"] = 0.1 * jax.random.normal(ks[2], (COUT2, COUT1, K, K), jnp.float32)
    p["conv2_b"] = 0.1 * jax.random.normal(ks[3], (COUT2,), jnp.float32)
    p["fc1_w"] = 0.1 * jax.random.normal(ks[4], (FC_HIDDEN, COUT2 * HP2 * WP2), jnp.float32)
    p["fc1_b"] = 0.1 * jax.random.normal(ks[5], (FC_HIDDEN,), jnp.float32)
    p["fc2_w"] = 0.1 * jax.random.normal(ks[6], (num_classes, FC_HIDDEN), jnp.float32)
    p["fc2_b"] = 0.1 * jax.random.normal(ks[7], (num_classes,), jnp.float32)
    return p


def pack_params(params):
    """One-time conversion of PyTorch-layout params into kernel-ready (bf16) matrices."""
    w1 = np.asarray(params["conv1_w"], np.float32)
    b1 = np.asarray(params["conv1_b"], np.float32)
    w2 = np.asarray(params["conv2_w"], np.float32)
    b2 = np.asarray(params["conv2_b"], np.float32)
    f1w = np.asarray(params["fc1_w"], np.float32)
    f1b = np.asarray(params["fc1_b"], np.float32)
    f2w = np.asarray(params["fc2_w"], np.float32)
    f2b = np.asarray(params["fc2_b"], np.float32)
    cin = w1.shape[1]
    num_classes = f2w.shape[0]

    # conv1: input rows (rr, ci, s_pad32); output (p, ipl, [co*12+jp] padded to 128)
    m1 = _conv_pool_toeplitz(w1, in_w=W_IN, s_out=S1, wp=WP1, group_pad=GP1,
                             rr_stride=cin * W_PAD, ci_stride=W_PAD)   # (256*cin, 1024)
    # conv2: input rows (rr, [ci*12+s] padded to 128); output (p, ipl, [co*4+jp] pad 128)
    m2 = _conv_pool_toeplitz(w2, in_w=WP1, s_out=S2, wp=WP2, group_pad=GP2,
                             rr_stride=GP1, ci_stride=WP1)             # (1024, 1024)

    # bias rows matching the (pooled row, 128-lane group) activation layouts
    b1_row = np.zeros((HP1, GP1), np.float32)
    b1_row[:, :COUT1 * WP1] = np.repeat(b1, WP1)[None, :]
    b2_row = np.zeros((HP2, GP2), np.float32)
    b2_row[:, :COUT2 * WP2] = np.repeat(b2, WP2)[None, :]

    # fc1: PyTorch flatten is (c2, i2, j2); a2 lanes are i2*128 + c2*4 + j2 (zero-padded)
    t = f1w.T.reshape(COUT2, HP2, WP2, FC_HIDDEN).transpose(1, 0, 2, 3)  # (i2,c2,j2,out)
    wf1 = np.zeros((HP2, GP2, FC_H_PAD), np.float32)
    wf1[:, :COUT2 * WP2, :FC_HIDDEN] = t.reshape(HP2, COUT2 * WP2, FC_HIDDEN)
    wf1 = wf1.reshape(HP2 * GP2, FC_H_PAD)                               # (512, 128)
    bf1 = np.zeros((1, FC_H_PAD), np.float32)
    bf1[0, :FC_HIDDEN] = f1b
    wf2 = np.zeros((FC_H_PAD, num_classes), np.float32)
    wf2[:FC_HIDDEN, :] = f2w.T                                           # (128, C)
    bf2 = f2b.reshape(1, -1)

    return dict(
        m1=jnp.asarray(m1, jnp.bfloat16), b1=jnp.asarray(b1_row.reshape(1, -1)),
        m2=jnp.asarray(m2, jnp.bfloat16), b2=jnp.asarray(b2_row.reshape(1, -1)),
        wf1=jnp.asarray(wf1, jnp.bfloat16), bf1=jnp.asarray(bf1),
        wf2=jnp.asarray(wf2, jnp.bfloat16), bf2=jnp.asarray(bf2))


# ------------------------------ fused kernel --------------------------------

def _cnn_mnist_kernel(cin, x_ref, m1_ref, b1_ref, m2_ref, b2_ref,
                      wf1_ref, bf1_ref, wf2_ref, bf2_ref, out_ref,
                      a1_ref, a2_ref):
    f32 = jnp.float32
    bf16 = jnp.bfloat16

    # -- stage 1: conv1(5x5) + bias + maxpool(2x2) + relu, chunked over pooled rows
    c1 = S1 * GP1                               # 256 pooled lanes per chunk
    row_w1 = cin * W_PAD                        # x2d lane stride per image row (128-aligned)
    m1 = m1_ref[...]
    for g in range(G1):
        off = 2 * g * S1 * row_w1                                           # 128*cin*g
        xs = x_ref[:, off: off + R1 * row_w1]                               # (TB, 256*cin)
        z = jnp.dot(xs, m1, preferred_element_type=f32)                     # (TB, 1024)
        q = jnp.maximum(jnp.maximum(z[:, 0:c1], z[:, c1:2 * c1]),
                        jnp.maximum(z[:, 2 * c1:3 * c1], z[:, 3 * c1:4 * c1]))
        q = jnp.maximum(q + b1_ref[:, g * c1:(g + 1) * c1], 0.0)
        a1_ref[:, g * c1:(g + 1) * c1] = q.astype(bf16)                     # (i1,[c1,j1]pad)

    # -- stage 2: conv2 + bias + maxpool + relu
    # TODO(synk): nn.Dropout2d omitted -- eval/inference semantics (identity).
    c2 = S2 * GP2                               # 256
    row_w2 = GP1                                # 128 lanes per pooled row of a1
    m2 = m2_ref[...]
    for g in range(G2):
        off = 2 * g * S2 * row_w2                                           # 512*g
        xs = a1_ref[:, off: off + R2 * row_w2]                              # (TB, 1024)
        z = jnp.dot(xs, m2, preferred_element_type=f32)                     # (TB, 1024)
        q = jnp.maximum(jnp.maximum(z[:, 0:c2], z[:, c2:2 * c2]),
                        jnp.maximum(z[:, 2 * c2:3 * c2], z[:, 3 * c2:4 * c2]))
        q = jnp.maximum(q + b2_ref[:, g * c2:(g + 1) * c2], 0.0)
        a2_ref[:, g * c2:(g + 1) * c2] = q.astype(bf16)                     # (i2,[c2,j2]pad)

    # -- fc1 + relu, fc2, log_softmax (fused epilogue)
    # TODO(synk): F.dropout after fc1 omitted -- eval/inference semantics (identity).
    h = jnp.dot(a2_ref[...], wf1_ref[...], preferred_element_type=f32) + bf1_ref[...]
    h = jnp.maximum(h, 0.0)
    logits = jnp.dot(h.astype(bf16), wf2_ref[...], preferred_element_type=f32) + bf2_ref[...]
    mx = jnp.max(logits, axis=1, keepdims=True)
    sh = logits - mx
    lse = jnp.log(jnp.sum(jnp.exp(sh), axis=1, keepdims=True))
    out_ref[...] = (sh - lse).astype(out_ref.dtype)


# ------------------------------- wrapper -------------------------------------

def cnn_mnist_forward(packed, x, tile_batch=256):
    """Eval-mode forward pass of CNNMnist via one fused Pallas TPU kernel."""
    n, cin, h, w = x.shape
    assert (h, w) == (H_IN, W_IN), "CNNMnist requires 28x28 inputs"
    num_classes = packed["wf2"].shape[1]
    feat = H_IN * cin * W_PAD

    # (N, C, 28, 28) -> (N, 28, C, 32) -> (N, 28*C*32): lane-aligned (row, ch, col) layout.
    xt = jnp.transpose(x, (0, 2, 1, 3))
    xt = jnp.pad(xt, ((0, 0), (0, 0), (0, 0), (0, W_PAD - W_IN)))
    x2d = xt.reshape(n, feat).astype(jnp.bfloat16)

    # Batch tile: multiple of 16 (bf16 sublane packing); default 256 fills 256-deep MXU.
    tb = max(16, min(int(tile_batch), -(-n // 16) * 16))
    n_pad = -(-n // tb) * tb
    if n_pad != n:
        x2d = jnp.pad(x2d, ((0, n_pad - n), (0, 0)))
    grid_n = n_pad // tb

    def const2d(a):
        return pl.BlockSpec(a.shape, lambda i: (0, 0))

    flops = 2 * n_pad * (G1 * (R1 * cin * W_PAD) * (4 * S1 * GP1)
                         + G2 * (R2 * GP1) * (4 * S2 * GP2)
                         + (HP2 * GP2) * FC_H_PAD
                         + FC_H_PAD * num_classes)
    weight_bytes = sum(int(np.prod(v.shape)) * v.dtype.itemsize for v in packed.values())
    cost = pl.CostEstimate(
        flops=int(flops),
        transcendentals=int(n_pad * num_classes),
        bytes_accessed=int(n_pad * (feat * 2 + num_classes * 4) + weight_bytes))

    out = pl.pallas_call(
        functools.partial(_cnn_mnist_kernel, cin),
        out_shape=jax.ShapeDtypeStruct((n_pad, num_classes), jnp.float32),
        grid=(grid_n,),
        in_specs=[
            pl.BlockSpec((tb, feat), lambda i: (i, 0)),
            const2d(packed["m1"]), const2d(packed["b1"]),
            const2d(packed["m2"]), const2d(packed["b2"]),
            const2d(packed["wf1"]), const2d(packed["bf1"]),
            const2d(packed["wf2"]), const2d(packed["bf2"]),
        ],
        out_specs=pl.BlockSpec((tb, num_classes), lambda i: (i, 0)),
        scratch_shapes=[
            pltpu.VMEM((tb, HP1 * GP1), jnp.bfloat16),   # pooled conv1 activations (bf16)
            pltpu.VMEM((tb, HP2 * GP2), jnp.bfloat16),   # pooled conv2 activations (bf16)
        ],
        compiler_params=pltpu.CompilerParams(dimension_semantics=("parallel",)),
        cost_estimate=cost,
    )(x2d, packed["m1"], packed["b1"], packed["m2"], packed["b2"],
      packed["wf1"], packed["bf1"], packed["wf2"], packed["bf2"])
    return out[:n]


# --------------------------- plain-JAX reference -----------------------------

def reference_forward(params, x):
    dn = ("NCHW", "OIHW", "NCHW")

    def conv(v, w, b):
        y = jax.lax.conv_general_dilated(v, w, (1, 1), "VALID", dimension_numbers=dn)
        return y + b[None, :, None, None]

    def pool_relu(v):
        n, c, hh, ww = v.shape
        v = v.reshape(n, c, hh // 2, 2, ww // 2, 2).max(axis=(3, 5))
        return jnp.maximum(v, 0.0)

    y = pool_relu(conv(x, params["conv1_w"], params["conv1_b"]))
    y = pool_relu(conv(y, params["conv2_w"], params["conv2_b"]))
    y = y.reshape(y.shape[0], -1)
    y = jnp.maximum(y @ params["fc1_w"].T + params["fc1_b"], 0.0)
    y = y @ params["fc2_w"].T + params["fc2_b"]
    return jax.nn.log_softmax(y, axis=1)


if __name__ == "__main__":
    key = jax.random.PRNGKey(0)
    k_param, k_x = jax.random.split(key)
    batch, num_channels, num_classes = 2, 1, 10
    params = init_params(k_param, num_channels, num_classes)
    packed = pack_params(params)
    # MNIST-shaped input: 28x28 is required so the flatten yields 320 features.
    x = jax.random.normal(k_x, (batch, num_channels, H_IN, W_IN), jnp.float32)

    fwd = jax.jit(cnn_mnist_forward)
    out = jax.block_until_ready(fwd(packed, x))
    assert out.shape == (batch, num_classes)
    assert bool(jnp.all(jnp.isfinite(out))), "non-finite output"

    ref = reference_forward(params, x)
    err = float(jnp.max(jnp.abs(out - ref)))
    assert err < 7e-2, f"mismatch vs plain-JAX reference: max abs err = {err}"
    print("KERNEL_OK")
</pallas_src>

<mosaic_0001>
module attributes {stable_mosaic.version = 11 : i64} {
  func.func @_cnn_mnist_kernel(%arg0: i32, %arg1: memref<16x896xbf16, #tpu.memory_space<vmem>>, %arg2: memref<256x1024xbf16, #tpu.memory_space<vmem>>, %arg3: memref<1x1536xf32, #tpu.memory_space<vmem>>, %arg4: memref<1024x1024xbf16, #tpu.memory_space<vmem>>, %arg5: memref<1x512xf32, #tpu.memory_space<vmem>>, %arg6: memref<512x128xbf16, #tpu.memory_space<vmem>>, %arg7: memref<1x128xf32, #tpu.memory_space<vmem>>, %arg8: memref<128x10xbf16, #tpu.memory_space<vmem>>, %arg9: memref<1x10xf32, #tpu.memory_space<vmem>>, %arg10: memref<16x10xf32, #tpu.memory_space<vmem>>, %arg11: memref<16x1536xbf16, #tpu.memory_space<vmem>>, %arg12: memref<16x512xbf16, #tpu.memory_space<vmem>>) attributes {dimension_semantics = [#tpu.dimension_semantics<parallel>], iteration_bounds = array<i64: 1>, scalar_prefetch = 0 : i64, scratch_operands = 2 : i64, tpu.core_type = #tpu.core_type<tc>, window_params = [{transform_indices = @transform_0, window_bounds = array<i64: 16, 896>}, {pipeline_mode = #tpu.pipeline_mode<synchronous>, transform_indices = @transform_1, window_bounds = array<i64: 256, 1024>}, {pipeline_mode = #tpu.pipeline_mode<synchronous>, transform_indices = @transform_2, window_bounds = array<i64: 1, 1536>}, {pipeline_mode = #tpu.pipeline_mode<synchronous>, transform_indices = @transform_3, window_bounds = array<i64: 1024, 1024>}, {pipeline_mode = #tpu.pipeline_mode<synchronous>, transform_indices = @transform_4, window_bounds = array<i64: 1, 512>}, {pipeline_mode = #tpu.pipeline_mode<synchronous>, transform_indices = @transform_5, window_bounds = array<i64: 512, 128>}, {pipeline_mode = #tpu.pipeline_mode<synchronous>, transform_indices = @transform_6, window_bounds = array<i64: 1, 128>}, {pipeline_mode = #tpu.pipeline_mode<synchronous>, transform_indices = @transform_7, window_bounds = array<i64: 128, 10>}, {pipeline_mode = #tpu.pipeline_mode<synchronous>, transform_indices = @transform_8, window_bounds = array<i64: 1, 10>}, {transform_indices = @transform_9, window_bounds = array<i64: 16, 10>}]} {
    %c0 = arith.constant 0 : index
    %c0_0 = arith.constant 0 : index
    %0 = vector.load %arg2[%c0, %c0_0] : memref<256x1024xbf16, #tpu.memory_space<vmem>>, vector<256x1024xbf16>
    %c0_1 = arith.constant 0 : index
    %c0_2 = arith.constant 0 : index
    %1 = vector.load %arg1[%c0_1, %c0_2] : memref<16x896xbf16, #tpu.memory_space<vmem>>, vector<16x256xbf16>
    %cst = arith.constant dense<0.000000e+00> : vector<16x1024xf32>
    %2 = tpu.matmul %1, %0, %cst {dimension_numbers = #tpu.dot_dimension_numbers<[1], [0], [0], [1], [0, 0, 1, 1], [], []>} : vector<16x256xbf16>, vector<256x1024xbf16>, vector<16x1024xf32> -> vector<16x1024xf32>
    %3 = vector.extract_strided_slice %2 {offsets = [0, 0], sizes = [16, 256], strides = [1, 1]} : vector<16x1024xf32> to vector<16x256xf32>
    %4 = vector.extract_strided_slice %2 {offsets = [0, 256], sizes = [16, 256], strides = [1, 1]} : vector<16x1024xf32> to vector<16x256xf32>
    %5 = arith.maximumf %3, %4 : vector<16x256xf32>
    %6 = vector.extract_strided_slice %2 {offsets = [0, 512], sizes = [16, 256], strides = [1, 1]} : vector<16x1024xf32> to vector<16x256xf32>
    %7 = vector.extract_strided_slice %2 {offsets = [0, 768], sizes = [16, 256], strides = [1, 1]} : vector<16x1024xf32> to vector<16x256xf32>
    %8 = arith.maximumf %6, %7 : vector<16x256xf32>
    %9 = arith.maximumf %5, %8 : vector<16x256xf32>
    %c0_3 = arith.constant 0 : index
    %c0_4 = arith.constant 0 : index
    %10 = vector.load %arg3[%c0_3, %c0_4] : memref<1x1536xf32, #tpu.memory_space<vmem>>, vector<1x256xf32>
    %11 = vector.broadcast %10 : vector<1x256xf32> to vector<16x256xf32>
    %12 = arith.addf %9, %11 : vector<16x256xf32>
    %cst_5 = arith.constant 0.000000e+00 : f32
    %13 = vector.broadcast %cst_5 : f32 to vector<16x256xf32>
    %14 = arith.maximumf %12, %13 : vector<16x256xf32>
    %15 = arith.truncf %14 : vector<16x256xf32> to vector<16x256xbf16>
    %c0_6 = arith.constant 0 : index
    %c0_7 = arith.constant 0 : index
    %16 = vector.load %arg11[%c0_6, %c0_7] : memref<16x1536xbf16, #tpu.memory_space<vmem>>, vector<16x256xbf16>
    tpu.vector_store %arg11[%c0_6, %c0_7], %15 {strides = array<i32>} : memref<16x1536xbf16, #tpu.memory_space<vmem>>, vector<16x256xbf16>,
    %c0_8 = arith.constant 0 : index
    %c128 = arith.constant 128 : index
    %17 = vector.load %arg1[%c0_8, %c128] : memref<16x896xbf16, #tpu.memory_space<vmem>>, vector<16x256xbf16>
    %cst_9 = arith.constant dense<0.000000e+00> : vector<16x1024xf32>
    %18 = tpu.matmul %17, %0, %cst_9 {dimension_numbers = #tpu.dot_dimension_numbers<[1], [0], [0], [1], [0, 0, 1, 1], [], []>} : vector<16x256xbf16>, vector<256x1024xbf16>, vector<16x1024xf32> -> vector<16x1024xf32>
    %19 = vector.extract_strided_slice %18 {offsets = [0, 0], sizes = [16, 256], strides = [1, 1]} : vector<16x1024xf32> to vector<16x256xf32>
    %20 = vector.extract_strided_slice %18 {offsets = [0, 256], sizes = [16, 256], strides = [1, 1]} : vector<16x1024xf32> to vector<16x256xf32>
    %21 = arith.maximumf %19, %20 : vector<16x256xf32>
    %22 = vector.extract_strided_slice %18 {offsets = [0, 512], sizes = [16, 256], strides = [1, 1]} : vector<16x1024xf32> to vector<16x256xf32>
    %23 = vector.extract_strided_slice %18 {offsets = [0, 768], sizes = [16, 256], strides = [1, 1]} : vector<16x1024xf32> to vector<16x256xf32>
    %24 = arith.maximumf %22, %23 : vector<16x256xf32>
    %25 = arith.maximumf %21, %24 : vector<16x256xf32>
    %c0_10 = arith.constant 0 : index
    %c256 = arith.constant 256 : index
    %26 = vector.load %arg3[%c0_10, %c256] : memref<1x1536xf32, #tpu.memory_space<vmem>>, vector<1x256xf32>
    %27 = vector.broadcast %26 : vector<1x256xf32> to vector<16x256xf32>
    %28 = arith.addf %25, %27 : vector<16x256xf32>
    %cst_11 = arith.constant 0.000000e+00 : f32
    %29 = vector.broadcast %cst_11 : f32 to vector<16x256xf32>
    %30 = arith.maximumf %28, %29 : vector<16x256xf32>
    %31 = arith.truncf %30 : vector<16x256xf32> to vector<16x256xbf16>
    %c0_12 = arith.constant 0 : index
    %c256_13 = arith.constant 256 : index
    %32 = vector.load %arg11[%c0_12, %c256_13] : memref<16x1536xbf16, #tpu.memory_space<vmem>>, vector<16x256xbf16>
    tpu.vector_store %arg11[%c0_12, %c256_13], %31 {strides = array<i32>} : memref<16x1536xbf16, #tpu.memory_space<vmem>>, vector<16x256xbf16>,
    %c0_14 = arith.constant 0 : index
    %c256_15 = arith.constant 256 : index
    %33 = vector.load %arg1[%c0_14, %c256_15] : memref<16x896xbf16, #tpu.memory_space<vmem>>, vector<16x256xbf16>
    %cst_16 = arith.constant dense<0.000000e+00> : vector<16x1024xf32>
    %34 = tpu.matmul %33, %0, %cst_16 {dimension_numbers = #tpu.dot_dimension_numbers<[1], [0], [0], [1], [0, 0, 1, 1], [], []>} : vector<16x256xbf16>, vector<256x1024xbf16>, vector<16x1024xf32> -> vector<16x1024xf32>
    %35 = vector.extract_strided_slice %34 {offsets = [0, 0], sizes = [16, 256], strides = [1, 1]} : vector<16x1024xf32> to vector<16x256xf32>
    %36 = vector.extract_strided_slice %34 {offsets = [0, 256], sizes = [16, 256], strides = [1, 1]} : vector<16x1024xf32> to vector<16x256xf32>
    %37 = arith.maximumf %35, %36 : vector<16x256xf32>
    %38 = vector.extract_strided_slice %34 {offsets = [0, 512], sizes = [16, 256], strides = [1, 1]} : vector<16x1024xf32> to vector<16x256xf32>
    %39 = vector.extract_strided_slice %34 {offsets = [0, 768], sizes = [16, 256], strides = [1, 1]} : vector<16x1024xf32> to vector<16x256xf32>
    %40 = arith.maximumf %38, %39 : vector<16x256xf32>
    %41 = arith.maximumf %37, %40 : vector<16x256xf32>
    %c0_17 = arith.constant 0 : index
    %c512 = arith.constant 512 : index
    %42 = vector.load %arg3[%c0_17, %c512] : memref<1x1536xf32, #tpu.memory_space<vmem>>, vector<1x256xf32>
    %43 = vector.broadcast %42 : vector<1x256xf32> to vector<16x256xf32>
    %44 = arith.addf %41, %43 : vector<16x256xf32>
    %cst_18 = arith.constant 0.000000e+00 : f32
    %45 = vector.broadcast %cst_18 : f32 to vector<16x256xf32>
    %46 = arith.maximumf %44, %45 : vector<16x256xf32>
    %47 = arith.truncf %46 : vector<16x256xf32> to vector<16x256xbf16>
    %c0_19 = arith.constant 0 : index
    %c512_20 = arith.constant 512 : index
    %48 = vector.load %arg11[%c0_19, %c512_20] : memref<16x1536xbf16, #tpu.memory_space<vmem>>, vector<16x256xbf16>
    tpu.vector_store %arg11[%c0_19, %c512_20], %47 {strides = array<i32>} : memref<16x1536xbf16, #tpu.memory_space<vmem>>, vector<16x256xbf16>,
    %c0_21 = arith.constant 0 : index
    %c384 = arith.constant 384 : index
    %49 = vector.load %arg1[%c0_21, %c384] : memref<16x896xbf16, #tpu.memory_space<vmem>>, vector<16x256xbf16>
    %cst_22 = arith.constant dense<0.000000e+00> : vector<16x1024xf32>
    %50 = tpu.matmul %49, %0, %cst_22 {dimension_numbers = #tpu.dot_dimension_numbers<[1], [0], [0], [1], [0, 0, 1, 1], [], []>} : vector<16x256xbf16>, vector<256x1024xbf16>, vector<16x1024xf32> -> vector<16x1024xf32>
    %51 = vector.extract_strided_slice %50 {offsets = [0, 0], sizes = [16, 256], strides = [1, 1]} : vector<16x1024xf32> to vector<16x256xf32>
    %52 = vector.extract_strided_slice %50 {offsets = [0, 256], sizes = [16, 256], strides = [1, 1]} : vector<16x1024xf32> to vector<16x256xf32>
    %53 = arith.maximumf %51, %52 : vector<16x256xf32>
    %54 = vector.extract_strided_slice %50 {offsets = [0, 512], sizes = [16, 256], strides = [1, 1]} : vector<16x1024xf32> to vector<16x256xf32>
    %55 = vector.extract_strided_slice %50 {offsets = [0, 768], sizes = [16, 256], strides = [1, 1]} : vector<16x1024xf32> to vector<16x256xf32>
    %56 = arith.maximumf %54, %55 : vector<16x256xf32>
    %57 = arith.maximumf %53, %56 : vector<16x256xf32>
    %c0_23 = arith.constant 0 : index
    %c768 = arith.constant 768 : index
    %58 = vector.load %arg3[%c0_23, %c768] : memref<1x1536xf32, #tpu.memory_space<vmem>>, vector<1x256xf32>
    %59 = vector.broadcast %58 : vector<1x256xf32> to vector<16x256xf32>
    %60 = arith.addf %57, %59 : vector<16x256xf32>
    %cst_24 = arith.constant 0.000000e+00 : f32
    %61 = vector.broadcast %cst_24 : f32 to vector<16x256xf32>
    %62 = arith.maximumf %60, %61 : vector<16x256xf32>
    %63 = arith.truncf %62 : vector<16x256xf32> to vector<16x256xbf16>
    %c0_25 = arith.constant 0 : index
    %c768_26 = arith.constant 768 : index
    %64 = vector.load %arg11[%c0_25, %c768_26] : memref<16x1536xbf16, #tpu.memory_space<vmem>>, vector<16x256xbf16>
    tpu.vector_store %arg11[%c0_25, %c768_26], %63 {strides = array<i32>} : memref<16x1536xbf16, #tpu.memory_space<vmem>>, vector<16x256xbf16>,
    %c0_27 = arith.constant 0 : index
    %c512_28 = arith.constant 512 : index
    %65 = vector.load %arg1[%c0_27, %c512_28] : memref<16x896xbf16, #tpu.memory_space<vmem>>, vector<16x256xbf16>
    %cst_29 = arith.constant dense<0.000000e+00> : vector<16x1024xf32>
    %66 = tpu.matmul %65, %0, %cst_29 {dimension_numbers = #tpu.dot_dimension_numbers<[1], [0], [0], [1], [0, 0, 1, 1], [], []>} : vector<16x256xbf16>, vector<256x1024xbf16>, vector<16x1024xf32> -> vector<16x1024xf32>
    %67 = vector.extract_strided_slice %66 {offsets = [0, 0], sizes = [16, 256], strides = [1, 1]} : vector<16x1024xf32> to vector<16x256xf32>
    %68 = vector.extract_strided_slice %66 {offsets = [0, 256], sizes = [16, 256], strides = [1, 1]} : vector<16x1024xf32> to vector<16x256xf32>
    %69 = arith.maximumf %67, %68 : vector<16x256xf32>
    %70 = vector.extract_strided_slice %66 {offsets = [0, 512], sizes = [16, 256], strides = [1, 1]} : vector<16x1024xf32> to vector<16x256xf32>
    %71 = vector.extract_strided_slice %66 {offsets = [0, 768], sizes = [16, 256], strides = [1, 1]} : vector<16x1024xf32> to vector<16x256xf32>
    %72 = arith.maximumf %70, %71 : vector<16x256xf32>
    %73 = arith.maximumf %69, %72 : vector<16x256xf32>
    %c0_30 = arith.constant 0 : index
    %c1024 = arith.constant 1024 : index
    %74 = vector.load %arg3[%c0_30, %c1024] : memref<1x1536xf32, #tpu.memory_space<vmem>>, vector<1x256xf32>
    %75 = vector.broadcast %74 : vector<1x256xf32> to vector<16x256xf32>
    %76 = arith.addf %73, %75 : vector<16x256xf32>
    %cst_31 = arith.constant 0.000000e+00 : f32
    %77 = vector.broadcast %cst_31 : f32 to vector<16x256xf32>
    %78 = arith.maximumf %76, %77 : vector<16x256xf32>
    %79 = arith.truncf %78 : vector<16x256xf32> to vector<16x256xbf16>
    %c0_32 = arith.constant 0 : index
    %c1024_33 = arith.constant 1024 : index
    %80 = vector.load %arg11[%c0_32, %c1024_33] : memref<16x1536xbf16, #tpu.memory_space<vmem>>, vector<16x256xbf16>
    tpu.vector_store %arg11[%c0_32, %c1024_33], %79 {strides = array<i32>} : memref<16x1536xbf16, #tpu.memory_space<vmem>>, vector<16x256xbf16>,
    %c0_34 = arith.constant 0 : index
    %c640 = arith.constant 640 : index
    %81 = vector.load %arg1[%c0_34, %c640] : memref<16x896xbf16, #tpu.memory_space<vmem>>, vector<16x256xbf16>
    %cst_35 = arith.constant dense<0.000000e+00> : vector<16x1024xf32>
    %82 = tpu.matmul %81, %0, %cst_35 {dimension_numbers = #tpu.dot_dimension_numbers<[1], [0], [0], [1], [0, 0, 1, 1], [], []>} : vector<16x256xbf16>, vector<256x1024xbf16>, vector<16x1024xf32> -> vector<16x1024xf32>
    %83 = vector.extract_strided_slice %82 {offsets = [0, 0], sizes = [16, 256], strides = [1, 1]} : vector<16x1024xf32> to vector<16x256xf32>
    %84 = vector.extract_strided_slice %82 {offsets = [0, 256], sizes = [16, 256], strides = [1, 1]} : vector<16x1024xf32> to vector<16x256xf32>
    %85 = arith.maximumf %83, %84 : vector<16x256xf32>
    %86 = vector.extract_strided_slice %82 {offsets = [0, 512], sizes = [16, 256], strides = [1, 1]} : vector<16x1024xf32> to vector<16x256xf32>
    %87 = vector.extract_strided_slice %82 {offsets = [0, 768], sizes = [16, 256], strides = [1, 1]} : vector<16x1024xf32> to vector<16x256xf32>
    %88 = arith.maximumf %86, %87 : vector<16x256xf32>
    %89 = arith.maximumf %85, %88 : vector<16x256xf32>
    %c0_36 = arith.constant 0 : index
    %c1280 = arith.constant 1280 : index
    %90 = vector.load %arg3[%c0_36, %c1280] : memref<1x1536xf32, #tpu.memory_space<vmem>>, vector<1x256xf32>
    %91 = vector.broadcast %90 : vector<1x256xf32> to vector<16x256xf32>
    %92 = arith.addf %89, %91 : vector<16x256xf32>
    %cst_37 = arith.constant 0.000000e+00 : f32
    %93 = vector.broadcast %cst_37 : f32 to vector<16x256xf32>
    %94 = arith.maximumf %92, %93 : vector<16x256xf32>
    %95 = arith.truncf %94 : vector<16x256xf32> to vector<16x256xbf16>
    %c0_38 = arith.constant 0 : index
    %c1280_39 = arith.constant 1280 : index
    %96 = vector.load %arg11[%c0_38, %c1280_39] : memref<16x1536xbf16, #tpu.memory_space<vmem>>, vector<16x256xbf16>
    tpu.vector_store %arg11[%c0_38, %c1280_39], %95 {strides = array<i32>} : memref<16x1536xbf16, #tpu.memory_space<vmem>>, vector<16x256xbf16>,
    %c0_40 = arith.constant 0 : index
    %c0_41 = arith.constant 0 : index
    %97 = vector.load %arg4[%c0_40, %c0_41] : memref<1024x1024xbf16, #tpu.memory_space<vmem>>, vector<1024x1024xbf16>
    %c0_42 = arith.constant 0 : index
    %c0_43 = arith.constant 0 : index
    %98 = vector.load %arg11[%c0_42, %c0_43] : memref<16x1536xbf16, #tpu.memory_space<vmem>>, vector<16x1024xbf16>
    %cst_44 = arith.constant dense<0.000000e+00> : vector<16x1024xf32>
    %99 = tpu.matmul %98, %97, %cst_44 {dimension_numbers = #tpu.dot_dimension_numbers<[1], [0], [0], [1], [0, 0, 1, 1], [], []>} : vector<16x1024xbf16>, vector<1024x1024xbf16>, vector<16x1024xf32> -> vector<16x1024xf32>
    %100 = vector.extract_strided_slice %99 {offsets = [0, 0], sizes = [16, 256], strides = [1, 1]} : vector<16x1024xf32> to vector<16x256xf32>
    %101 = vector.extract_strided_slice %99 {offsets = [0, 256], sizes = [16, 256], strides = [1, 1]} : vector<16x1024xf32> to vector<16x256xf32>
    %102 = arith.maximumf %100, %101 : vector<16x256xf32>
    %103 = vector.extract_strided_slice %99 {offsets = [0, 512], sizes = [16, 256], strides = [1, 1]} : vector<16x1024xf32> to vector<16x256xf32>
    %104 = vector.extract_strided_slice %99 {offsets = [0, 768], sizes = [16, 256], strides = [1, 1]} : vector<16x1024xf32> to vector<16x256xf32>
    %105 = arith.maximumf %103, %104 : vector<16x256xf32>
    %106 = arith.maximumf %102, %105 : vector<16x256xf32>
    %c0_45 = arith.constant 0 : index
    %c0_46 = arith.constant 0 : index
    %107 = vector.load %arg5[%c0_45, %c0_46] : memref<1x512xf32, #tpu.memory_space<vmem>>, vector<1x256xf32>
    %108 = vector.broadcast %107 : vector<1x256xf32> to vector<16x256xf32>
    %109 = arith.addf %106, %108 : vector<16x256xf32>
    %cst_47 = arith.constant 0.000000e+00 : f32
    %110 = vector.broadcast %cst_47 : f32 to vector<16x256xf32>
    %111 = arith.maximumf %109, %110 : vector<16x256xf32>
    %112 = arith.truncf %111 : vector<16x256xf32> to vector<16x256xbf16>
    %c0_48 = arith.constant 0 : index
    %c0_49 = arith.constant 0 : index
    %113 = vector.load %arg12[%c0_48, %c0_49] : memref<16x512xbf16, #tpu.memory_space<vmem>>, vector<16x256xbf16>
    tpu.vector_store %arg12[%c0_48, %c0_49], %112 {strides = array<i32>} : memref<16x512xbf16, #tpu.memory_space<vmem>>, vector<16x256xbf16>,
    %c0_50 = arith.constant 0 : index
    %c512_51 = arith.constant 512 : index
    %114 = vector.load %arg11[%c0_50, %c512_51] : memref<16x1536xbf16, #tpu.memory_space<vmem>>, vector<16x1024xbf16>
    %cst_52 = arith.constant dense<0.000000e+00> : vector<16x1024xf32>
    %115 = tpu.matmul %114, %97, %cst_52 {dimension_numbers = #tpu.dot_dimension_numbers<[1], [0], [0], [1], [0, 0, 1, 1], [], []>} : vector<16x1024xbf16>, vector<1024x1024xbf16>, vector<16x1024xf32> -> vector<16x1024xf32>
    %116 = vector.extract_strided_slice %115 {offsets = [0, 0], sizes = [16, 256], strides = [1, 1]} : vector<16x1024xf32> to vector<16x256xf32>
    %117 = vector.extract_strided_slice %115 {offsets = [0, 256], sizes = [16, 256], strides = [1, 1]} : vector<16x1024xf32> to vector<16x256xf32>
    %118 = arith.maximumf %116, %117 : vector<16x256xf32>
    %119 = vector.extract_strided_slice %115 {offsets = [0, 512], sizes = [16, 256], strides = [1, 1]} : vector<16x1024xf32> to vector<16x256xf32>
    %120 = vector.extract_strided_slice %115 {offsets = [0, 768], sizes = [16, 256], strides = [1, 1]} : vector<16x1024xf32> to vector<16x256xf32>
    %121 = arith.maximumf %119, %120 : vector<16x256xf32>
    %122 = arith.maximumf %118, %121 : vector<16x256xf32>
    %c0_53 = arith.constant 0 : index
    %c256_54 = arith.constant 256 : index
    %123 = vector.load %arg5[%c0_53, %c256_54] : memref<1x512xf32, #tpu.memory_space<vmem>>, vector<1x256xf32>
    %124 = vector.broadcast %123 : vector<1x256xf32> to vector<16x256xf32>
    %125 = arith.addf %122, %124 : vector<16x256xf32>
    %cst_55 = arith.constant 0.000000e+00 : f32
    %126 = vector.broadcast %cst_55 : f32 to vector<16x256xf32>
    %127 = arith.maximumf %125, %126 : vector<16x256xf32>
    %128 = arith.truncf %127 : vector<16x256xf32> to vector<16x256xbf16>
    %c0_56 = arith.constant 0 : index
    %c256_57 = arith.constant 256 : index
    %129 = vector.load %arg12[%c0_56, %c256_57] : memref<16x512xbf16, #tpu.memory_space<vmem>>, vector<16x256xbf16>
    tpu.vector_store %arg12[%c0_56, %c256_57], %128 {strides = array<i32>} : memref<16x512xbf16, #tpu.memory_space<vmem>>, vector<16x256xbf16>,
    %c0_58 = arith.constant 0 : index
    %c0_59 = arith.constant 0 : index
    %130 = vector.load %arg12[%c0_58, %c0_59] : memref<16x512xbf16, #tpu.memory_space<vmem>>, vector<16x512xbf16>
    %c0_60 = arith.constant 0 : index
    %c0_61 = arith.constant 0 : index
    %131 = vector.load %arg6[%c0_60, %c0_61] : memref<512x128xbf16, #tpu.memory_space<vmem>>, vector<512x128xbf16>
    %cst_62 = arith.constant dense<0.000000e+00> : vector<16x128xf32>
    %132 = tpu.matmul %130, %131, %cst_62 {dimension_numbers = #tpu.dot_dimension_numbers<[1], [0], [0], [1], [0, 0, 1, 1], [], []>} : vector<16x512xbf16>, vector<512x128xbf16>, vector<16x128xf32> -> vector<16x128xf32>
    %c0_63 = arith.constant 0 : index
    %c0_64 = arith.constant 0 : index
    %133 = vector.load %arg7[%c0_63, %c0_64] : memref<1x128xf32, #tpu.memory_space<vmem>>, vector<1x128xf32>
    %134 = vector.broadcast %133 : vector<1x128xf32> to vector<16x128xf32>
    %135 = arith.addf %132, %134 : vector<16x128xf32>
    %cst_65 = arith.constant 0.000000e+00 : f32
    %136 = vector.broadcast %cst_65 : f32 to vector<16x128xf32>
    %137 = arith.maximumf %135, %136 : vector<16x128xf32>
    %138 = arith.truncf %137 : vector<16x128xf32> to vector<16x128xbf16>
    %c0_66 = arith.constant 0 : index
    %c0_67 = arith.constant 0 : index
    %139 = vector.load %arg8[%c0_66, %c0_67] : memref<128x10xbf16, #tpu.memory_space<vmem>>, vector<128x10xbf16>
    %cst_68 = arith.constant dense<0.000000e+00> : vector<16x10xf32>
    %140 = tpu.matmul %138, %139, %cst_68 {dimension_numbers = #tpu.dot_dimension_numbers<[1], [0], [0], [1], [0, 0, 1, 1], [], []>} : vector<16x128xbf16>, vector<128x10xbf16>, vector<16x10xf32> -> vector<16x10xf32>
    %c0_69 = arith.constant 0 : index
    %c0_70 = arith.constant 0 : index
    %141 = vector.load %arg9[%c0_69, %c0_70] : memref<1x10xf32, #tpu.memory_space<vmem>>, vector<1x10xf32>
    %142 = vector.broadcast %141 : vector<1x10xf32> to vector<16x10xf32>
    %143 = arith.addf %140, %142 : vector<16x10xf32>
    %cst_71 = arith.constant dense<0xFF800000> : vector<16xf32>
    %144 = vector.multi_reduction <maximumf>, %143, %cst_71 [1] : vector<16x10xf32> to vector<16xf32>
    %145 = vector.shape_cast %144 : vector<16xf32> to vector<16x1xf32>
    %146 = vector.broadcast %145 : vector<16x1xf32> to vector<16x10xf32>
    %147 = arith.subf %143, %146 : vector<16x10xf32>
    %148 = math.exp %147 : vector<16x10xf32>
    %cst_72 = arith.constant dense<0.000000e+00> : vector<16xf32>
    %149 = vector.multi_reduction <add>, %148, %cst_72 [1] : vector<16x10xf32> to vector<16xf32>
    %150 = vector.shape_cast %149 : vector<16xf32> to vector<16x1xf32>
    %151 = math.log %150 : vector<16x1xf32>
    %152 = vector.broadcast %151 : vector<16x1xf32> to vector<16x10xf32>
    %153 = arith.subf %147, %152 : vector<16x10xf32>
    %c0_73 = arith.constant 0 : index
    %c0_74 = arith.constant 0 : index
    %154 = vector.load %arg10[%c0_73, %c0_74] : memref<16x10xf32, #tpu.memory_space<vmem>>, vector<16x10xf32>
    tpu.vector_store %arg10[%c0_73, %c0_74], %153 {strides = array<i32>} : memref<16x10xf32, #tpu.memory_space<vmem>>, vector<16x10xf32>,
    return
  }
  func.func @transform_0(%arg0: i32) -> (i32, i32) {
    %c0_i32 = arith.constant 0 : i32
    %c0_i32_0 = arith.constant 0 : i32
    return %arg0, %c0_i32 : i32, i32
  }
  func.func @transform_1(%arg0: i32) -> (i32, i32) {
    %c0_i32 = arith.constant 0 : i32
    %c0_i32_0 = arith.constant 0 : i32
    %c0_i32_1 = arith.constant 0 : i32
    return %c0_i32, %c0_i32_0 : i32, i32
  }
  func.func @transform_2(%arg0: i32) -> (i32, i32) {
    %c0_i32 = arith.constant 0 : i32
    %c0_i32_0 = arith.constant 0 : i32
    %c0_i32_1 = arith.constant 0 : i32
    return %c0_i32, %c0_i32_0 : i32, i32
  }
  func.func @transform_3(%arg0: i32) -> (i32, i32) {
    %c0_i32 = arith.constant 0 : i32
    %c0_i32_0 = arith.constant 0 : i32
    %c0_i32_1 = arith.constant 0 : i32
    return %c0_i32, %c0_i32_0 : i32, i32
  }
  func.func @transform_4(%arg0: i32) -> (i32, i32) {
    %c0_i32 = arith.constant 0 : i32
    %c0_i32_0 = arith.constant 0 : i32
    %c0_i32_1 = arith.constant 0 : i32
    return %c0_i32, %c0_i32_0 : i32, i32
  }
  func.func @transform_5(%arg0: i32) -> (i32, i32) {
    %c0_i32 = arith.constant 0 : i32
    %c0_i32_0 = arith.constant 0 : i32
    %c0_i32_1 = arith.constant 0 : i32
    return %c0_i32, %c0_i32_0 : i32, i32
  }
  func.func @transform_6(%arg0: i32) -> (i32, i32) {
    %c0_i32 = arith.constant 0 : i32
    %c0_i32_0 = arith.constant 0 : i32
    %c0_i32_1 = arith.constant 0 : i32
    return %c0_i32, %c0_i32_0 : i32, i32
  }
  func.func @transform_7(%arg0: i32) -> (i32, i32) {
    %c0_i32 = arith.constant 0 : i32
    %c0_i32_0 = arith.constant 0 : i32
    %c0_i32_1 = arith.constant 0 : i32
    return %c0_i32, %c0_i32_0 : i32, i32
  }
  func.func @transform_8(%arg0: i32) -> (i32, i32) {
    %c0_i32 = arith.constant 0 : i32
    %c0_i32_0 = arith.constant 0 : i32
    %c0_i32_1 = arith.constant 0 : i32
    return %c0_i32, %c0_i32_0 : i32, i32
  }
  func.func @transform_9(%arg0: i32) -> (i32, i32) {
    %c0_i32 = arith.constant 0 : i32
    %c0_i32_0 = arith.constant 0 : i32
    return %arg0, %c0_i32 : i32, i32
  }
}

</mosaic_0001>

<bundles_post_ra>
// kernel: cnn_mnist_forward.1
= control target key start
LH: loop header
LB: loop body
LE: loop exit
PB: predicated region body
PF: predicated region fallthrough
CT: control target
= control target key end

     0   :  { %14 = vsyncpa [#allocation5], 0  ;;  %s12126_s0 = inlined_call_operand.vmem [shape: bf16[16,896], index: 0, kind: input, shape index: {}]   ;;  %s12127_s1 = inlined_call_operand.hbm [shape: bf16[256,1024], index: 1, kind: input, shape index: {}]   ;;  %s12128_s2 = inlined_call_operand.hbm [shape: f32[1,1536], index: 2, kind: input, shape index: {}]   ;;  %s12129_s3 = inlined_call_operand.hbm [shape: bf16[1024,1024], index: 3, kind: input, shape index: {}]   ;;  %s12130_s4 = inlined_call_operand.hbm [shape: f32[1,512], index: 4, kind: input, shape index: {}]   ;;  %s12131_s5 = inlined_call_operand.hbm [shape: bf16[512,128], index: 5, kind: input, shape index: {}]   ;;  %s12132_s6 = inlined_call_operand.hbm [shape: f32[1,128], index: 6, kind: input, shape index: {}]   ;;  %s12133_s7 = inlined_call_operand.vmem [shape: bf16[128,10], index: 7, kind: input, shape index: {}]   ;;  %s12134_s8 = inlined_call_operand.hbm [shape: f32[1,10], index: 8, kind: input, shape index: {}]   ;;  %s12135_s9 = inlined_call_operand.vmem [shape: f32[16,10], index: 9, kind: output, shape index: {}]  }
   0x1   :  { %15 = vsyncpa [#allocation7], 0 }
   0x2   :  { %16 = vsyncpa [#allocation10], 0 }
   0x3   :  { %17 = vsyncpa [#allocation13], 0  ;;  %s8347_s30 = smov [#allocation6]   ;;  %s8348_s11 = smov [#allocation9]  }
   0x4   :  { %s38_s10 = sshll.u32 %s8347_s30, 4  ;;  %s60_s12 = sshll.u32 %s8348_s11, 4  ;;  %s39_s10 = int_to_ptr.vmem [resolvable:$true] %s38_s10  ;;  %s61_s12 = int_to_ptr.vmem [resolvable:$true] %s60_s12 }
   0x5   :  { %s8185_s15 = scalar_lea.hbm %s12128_s2, 192 }
   0x6   :  { %p8186_p0 = scmp.ne.s32.totalorder %s12128_s2, %s8185_s15  ;;  %p8189_p1 = scmp.lt.u32.totalorder %s8185_s15, %s12128_s2 }
   0x8   :  { %p8191_p2 = pnand %p8189_p1, %p8186_p0 }
   0xa   :  { %8194 = shalt.err (!%p8191_p2)
}
   0xb   :  { %s8195_s20 = scalar_lea.vmem %s39_s10, 192  ;;  %p8200_p4 = scmp.lt.s32.totalorder %s39_s10, %s39_s10 }
   0xc   :  { %p8196_p3 = scmp.ne.s32.totalorder %s39_s10, %s8195_s20  ;;  %p8201_p5 = scmp.lt.s32.totalorder %s8195_s20, %s8195_s20 }
   0xe   :  { %p8202_p6 = por %p8201_p5, %p8200_p4 }
  0x10   :  { %p8203_p7 = pnand %p8202_p6, %p8196_p3 }
  0x12   :  { %8206 = shalt.err (!%p8203_p7)
}
  0x13   :  { %41 = dma.hbm_to_vmem [thread:$0]  %s12128_s2, 192, %s39_s10, [#allocation7]  }
  0x14   :  { %s8207_s25 = scalar_lea.hbm %s12130_s4, 64 }
  0x15   :  { %p8208_p8 = scmp.ne.s32.totalorder %s12130_s4, %s8207_s25  ;;  %p8211_p9 = scmp.lt.u32.totalorder %s8207_s25, %s12130_s4 }
  0x17   :  { %p8213_p10 = pnand %p8211_p9, %p8208_p8 }
  0x19   :  { %8216 = shalt.err (!%p8213_p10)
}
  0x1a   :  { %s8217_s30 = scalar_lea.vmem %s61_s12, 64  ;;  %p8222_p12 = scmp.lt.s32.totalorder %s61_s12, %s61_s12 }
  0x1b   :  { %p8218_p11 = scmp.ne.s32.totalorder %s61_s12, %s8217_s30  ;;  %p8223_p13 = scmp.lt.s32.totalorder %s8217_s30, %s8217_s30 }
  0x1d   :  { %p8224_p0 = por %p8223_p13, %p8222_p12 }
  0x1f   :  { %p8225_p1 = pnand %p8224_p0, %p8218_p11 }
  0x21   :  { %8228 = shalt.err (!%p8225_p1)
}
  0x22   :  { %63 = dma.hbm_to_vmem [thread:$0]  %s12130_s4, 64, %s61_s12, [#allocation10]  }
  0x23   :  { %s8349_s11 = smov [#allocation12]   ;;  %s8350_s14 = smov [#allocation4]  }
  0x24   :  { %s82_s13 = sshll.u32 %s8349_s11, 4  ;;  %s25_s15 = sshll.u32 %s8350_s14, 4  ;;  %s83_s13 = int_to_ptr.vmem [resolvable:$true] %s82_s13  ;;  %s8434_s15 = int_to_ptr.vmem [resolvable:$true] %s25_s15 }
  0x25   :  { %s8229_s18 = scalar_lea.hbm %s12132_s6, 16 }
  0x26   :  { %p8230_p2 = scmp.ne.s32.totalorder %s12132_s6, %s8229_s18  ;;  %p8233_p3 = scmp.lt.u32.totalorder %s8229_s18, %s12132_s6 }
  0x28   :  { %p8235_p4 = pnand %p8233_p3, %p8230_p2 }
  0x2a   :  { %8238 = shalt.err (!%p8235_p4)
}
  0x2b   :  { %s8239_s4 = scalar_lea.vmem %s83_s13, 16  ;;  %s8243_s12 = scalar_lea.vmem %s83_s13, 32 }
  0x2c   :  { %p8240_p5 = scmp.ne.s32.totalorder %s83_s13, %s8239_s4  ;;  %p8244_p6 = scmp.lt.s32.totalorder %s83_s13, %s83_s13 }
  0x2d   :  { %p8245_p7 = scmp.lt.s32.totalorder %s8243_s12, %s8239_s4 }
  0x2f   :  { %p8246_p8 = por %p8245_p7, %p8244_p6 }
  0x31   :  { %p8247_p9 = pnand %p8246_p8, %p8240_p5 }
  0x33   :  { %8250 = shalt.err (!%p8247_p9)
}
  0x34   :  { %85 = dma.hbm_to_vmem [thread:$0]  %s12132_s6, 16, %s83_s13, [#allocation13]  }
  0x35   :  { %s8251_s27 = scalar_lea.hbm %s12127_s1, 16384 }
  0x36   :  { %p8252_p10 = scmp.ne.s32.totalorder %s12127_s1, %s8251_s27  ;;  %p8255_p11 = scmp.lt.u32.totalorder %s8251_s27, %s12127_s1 }
  0x38   :  { %p8257_p12 = pnand %p8255_p11, %p8252_p10 }
  0x3a   :  { %8260 = shalt.err (!%p8257_p12)
}
  0x3b   :  { %s8261_s10 = scalar_lea.vmem %s8434_s15, 16384  ;;  %p8266_p0 = scmp.lt.s32.totalorder %s8434_s15, %s8434_s15 }
  0x3c   :  { %p8262_p13 = scmp.ne.s32.totalorder %s8434_s15, %s8261_s10  ;;  %p8267_p1 = scmp.lt.s32.totalorder %s8261_s10, %s8261_s10 }
  0x3e   :  { %p8268_p2 = por %p8267_p1, %p8266_p0 }
  0x40   :  { %p8269_p3 = pnand %p8268_p2, %p8262_p13 }
  0x42   :  { %8272 = shalt.err (!%p8269_p3)
}
  0x43   :  { %s8351_s6 = smov 512   ;;  %s8352_s11 = smov 32  }
  0x44   :  { %31 = dma.hbm_to_vmem [thread:$0]  %s12127_s1, 16384, %s8434_s15, [#allocation5], %s8351_s6, %s8351_s6, %s8352_s11  }
  0x45   :  { %s8353_s16 = smov [#allocation8]   ;;  %s8354_s18 = smov [#allocation11]  }
  0x46   :  { %s47_s17 = sshll.u32 %s8353_s16, 4  ;;  %s69_s19 = sshll.u32 %s8354_s18, 4  ;;  %s48_s17 = int_to_ptr.vmem [resolvable:$true] %s47_s17  ;;  %s8465_s19 = int_to_ptr.vmem [resolvable:$true] %s69_s19 }
  0x47   :  { %s8273_s22 = scalar_lea.hbm %s12129_s3, 65536 }
  0x48   :  { %p8274_p4 = scmp.ne.s32.totalorder %s12129_s3, %s8273_s22  ;;  %p8277_p5 = scmp.lt.u32.totalorder %s8273_s22, %s12129_s3 }
  0x4a   :  { %p8279_p6 = pnand %p8277_p5, %p8274_p4 }
  0x4c   :  { %8282 = shalt.err (!%p8279_p6)
}
  0x4d   :  { %s8283_s1 = scalar_lea.vmem %s48_s17, 65536  ;;  %p8288_p8 = scmp.lt.s32.totalorder %s48_s17, %s48_s17 }
  0x4e   :  { %p8284_p7 = scmp.ne.s32.totalorder %s48_s17, %s8283_s1  ;;  %p8289_p9 = scmp.lt.s32.totalorder %s8283_s1, %s8283_s1 }
  0x50   :  { %p8290_p10 = por %p8289_p9, %p8288_p8 }
  0x52   :  { %p8291_p11 = pnand %p8290_p10, %p8284_p7 }
  0x54   :  { %8294 = shalt.err (!%p8291_p11)
}
  0x55   :  { %53 = dma.hbm_to_vmem [thread:$0]  %s12129_s3, 65536, %s48_s17, [#allocation7], %s8351_s6, %s8351_s6, %s8352_s11  }
  0x56   :  { %s8295_s28 = scalar_lea.hbm %s12131_s5, 4096 }
  0x57   :  { %p8296_p12 = scmp.ne.s32.totalorder %s12131_s5, %s8295_s28  ;;  %p8299_p13 = scmp.lt.u32.totalorder %s8295_s28, %s12131_s5 }
  0x59   :  { %p8301_p0 = pnand %p8299_p13, %p8296_p12 }
  0x5b   :  { %8304 = shalt.err (!%p8301_p0)
}
  0x5c   :  { %s8305_s13 = scalar_lea.vmem %s8465_s19, 4096  ;;  %p8310_p2 = scmp.lt.s32.totalorder %s8465_s19, %s8465_s19 }
  0x5d   :  { %p8306_p1 = scmp.ne.s32.totalorder %s8465_s19, %s8305_s13  ;;  %p8311_p3 = scmp.lt.s32.totalorder %s8305_s13, %s8305_s13 }
  0x5f   :  { %p8312_p4 = por %p8311_p3, %p8310_p2 }
  0x61   :  { %p8313_p5 = pnand %p8312_p4, %p8306_p1 }
  0x63   :  { %8316 = shalt.err (!%p8313_p5)
}
  0x64   :  { %s8355_s3 = smov 64   ;;  %s8356_s6 = smov 4  }
  0x65   :  { %75 = dma.hbm_to_vmem [thread:$0]  %s12131_s5, 4096, %s8465_s19, [#allocation10], %s8355_s3, %s8355_s3, %s8356_s6  }
  0x66   :  { %s8357_s16 = smov [#allocation14]   ;;  %s8317_s21 = scalar_lea.hbm %s12134_s8, 16 }
  0x67   :  { %s94_s17 = sshll.u32 %s8357_s16, 4  ;;  %p8318_p6 = scmp.ne.s32.totalorder %s12134_s8, %s8317_s21  ;;  %s95_s17 = int_to_ptr.vmem [resolvable:$true] %s94_s17 }
  0x68   :  { %p8321_p7 = scmp.lt.u32.totalorder %s8317_s21, %s12134_s8 }
  0x6a   :  { %p8323_p8 = pnand %p8321_p7, %p8318_p6 }
  0x6c   :  { %8326 = shalt.err (!%p8323_p8)
}
  0x6d   :  { %s8327_s24 = scalar_lea.vmem %s95_s17, 16  ;;  %s8331_s5 = scalar_lea.vmem %s95_s17, 32 }
  0x6e   :  { %p8328_p9 = scmp.ne.s32.totalorder %s95_s17, %s8327_s24  ;;  %p8332_p10 = scmp.lt.s32.totalorder %s95_s17, %s95_s17 }
  0x6f   :  { %p8333_p11 = scmp.lt.s32.totalorder %s8331_s5, %s8327_s24 }
  0x71   :  { %p8334_p12 = por %p8333_p11, %p8332_p10 }
  0x73   :  { %p8335_p13 = pnand %p8334_p12, %p8328_p9 }
  0x75   :  { %8338 = shalt.err (!%p8335_p13)
}
  0x76   :  { %97 = dma.hbm_to_vmem [thread:$0]  %s12134_s8, 16, %s95_s17, [#allocation13]  }
  0x77   :  { %8339 = dma.done.wait [#allocation5], 16384  }
  0x78   :  { %8340 = vsyncadd [#allocation5], 4294950912 }
  0x79   :  { %8341 = dma.done.wait [#allocation7], 65728  }
  0x7a   :  { %8342 = vsyncadd [#allocation7], 4294901568 }
  0x7b   :  { %8343 = dma.done.wait [#allocation10], 4160  }
  0x7c   :  { %8344 = vsyncadd [#allocation10], 4294963136 }
  0x7d   :  { %8345 = dma.done.wait [#allocation13], 32  }
  0x7e   :  { %8346 = vsyncadd [#allocation13], 4294967264  ;;  %v120_v0 = vld [vmem:[#allocation4] sm:$0xff]  ;;  %v121_v2 = vld [vmem:[#allocation4 + $0x8] sm:$0xff]  ;;  %vm8359_vm0 = vmmov 0   ;;  %vm7208_vm1 = vcmask 80896  }
  0x7f   :  { %v124_v1 = vld [vmem:[#allocation4 + $0x20] sm:$0xff]  ;;  %v125_v4 = vld [vmem:[#allocation4 + $0x28] sm:$0xff] }
  0x80   :  { %v8508_v3 = vcombine.high %v120_v0, %v124_v1  ;;  %v8510_v5 = vcombine.low %v120_v0, %v124_v1  ;;  %v128_v6 = vld [vmem:[#allocation4 + $0x40] sm:$0xff]  ;;  %v8512_v8 = vcombine.high %v121_v2, %v125_v4  ;;  %v8514_v9 = vcombine.low %v121_v2, %v125_v4  ;;  %v129_v11 = vld [vmem:[#allocation4 + $0x48] sm:$0xff] }
  0x81   :  { %v132_v7 = vld [vmem:[#allocation4 + $0x60] sm:$0xff]  ;;  %v133_v12 = vld [vmem:[#allocation4 + $0x68] sm:$0xff] }
  0x82   :  { %12862 = vst [vmem:[#allocation19_spill] sm:$0xff] %v8508_v3  ;;  %12863 = vst [vmem:[#allocation20_spill] sm:$0xff] %v8510_v5  ;;  %v8516_v10 = vcombine.high %v128_v6, %v132_v7  ;;  %v136_v13 = vld [vmem:[#allocation4 + $0x80] sm:$0xff]  ;;  %900 = vmatprep.subr.bf16.mxu0 %v8508_v3  ;;  %v8519_v14 = vcombine.high %v129_v11, %v133_v12  ;;  %v137_v16 = vld [vmem:[#allocation4 + $0x88] sm:$0xff]  ;;  %943 = vmatprep.subr.bf16.mxu1 %v8512_v8 }
  0x83   :  { %12864 = vst [vmem:[#allocation21_spill] sm:$0xff] %v8512_v8  ;;  %12865 = vst [vmem:[#allocation22_spill] sm:$0xff] %v8514_v9  ;;  %v140_v15 = vld [vmem:[#allocation4 + $0xa0] sm:$0xff]  ;;  %v141_v17 = vld [vmem:[#allocation4 + $0xa8] sm:$0xff]  ;;  %901 = vmatpush1.bf16.msra.mxu0 %v8510_v5  ;;  %v8523_v18 = vcombine.low %v128_v6, %v132_v7  ;;  %944 = vmatpush1.bf16.msra.mxu1 %v8514_v9  ;;  %v8527_v19 = vcombine.low %v129_v11, %v133_v12 }
  0x84   :  { %12866 = vst [vmem:[#allocation23_spill] sm:$0xff] %v8516_v10  ;;  %12867 = vst [vmem:[#allocation24_spill] sm:$0xff] %v8519_v14  ;;  %902 = vmatprep.subr.bf16.mxu0 %v8516_v10  ;;  %v8529_v20 = vcombine.high %v136_v13, %v140_v15  ;;  %945 = vmatprep.subr.bf16.mxu1 %v8519_v14  ;;  %v8532_v21 = vcombine.high %v137_v16, %v141_v17  ;;  %v144_v22 = vld [vmem:[#allocation4 + $0xc0] sm:$0xff]  ;;  %v145_v24 = vld [vmem:[#allocation4 + $0xc8] sm:$0xff] }
  0x85   :  { %12868 = vst [vmem:[#allocation25_spill] sm:$0xff] %v8523_v18  ;;  %12869 = vst [vmem:[#allocation26_spill] sm:$0xff] %v8527_v19  ;;  %v148_v23 = vld [vmem:[#allocation4 + $0xe0] sm:$0xff]  ;;  %v149_v25 = vld [vmem:[#allocation4 + $0xe8] sm:$0xff]  ;;  %v8535_v26 = vcombine.low %v136_v13, %v140_v15  ;;  %v8539_v27 = vcombine.low %v137_v16, %v141_v17 }
  0x86   :  { %12870 = vst [vmem:[#allocation27_spill] sm:$0xff] %v8529_v20  ;;  %12871 = vst [vmem:[#allocation28_spill] sm:$0xff] %v8532_v21  ;;  %v8541_v28 = vcombine.high %v144_v22, %v148_v23  ;;  %v8544_v29 = vcombine.high %v145_v24, %v149_v25  ;;  %v152_v30 = vld [vmem:[#allocation4 + $0x100] sm:$0xff]  ;;  %v153_v32 = vld [vmem:[#allocation4 + $0x108] sm:$0xff]  ;;  %v8547_v34 = vcombine.low %v144_v22, %v148_v23 }
  0x87   :  { %903 = vmatpush1.bf16.msra.mxu0 %v8523_v18  ;;  %12872 = vst [vmem:[#allocation29_spill] sm:$0xff] %v8535_v26  ;;  %946 = vmatpush1.bf16.msra.mxu1 %v8527_v19  ;;  %12873 = vst [vmem:[#allocation30_spill] sm:$0xff] %v8539_v27  ;;  %v156_v31 = vld [vmem:[#allocation4 + $0x120] sm:$0xff]  ;;  %v157_v33 = vld [vmem:[#allocation4 + $0x128] sm:$0xff]  ;;  %v8551_v35 = vcombine.low %v145_v24, %v149_v25 }
  0x88   :  { %904 = vmatprep.subr.bf16.mxu0 %v8529_v20  ;;  %12874 = vst [vmem:[#allocation31_spill] sm:$0xff] %v8541_v28  ;;  %947 = vmatprep.subr.bf16.mxu1 %v8532_v21  ;;  %12875 = vst [vmem:[#allocation32_spill] sm:$0xff] %v8544_v29  ;;  %v8553_v36 = vcombine.high %v152_v30, %v156_v31  ;;  %v8556_v37 = vcombine.high %v153_v32, %v157_v33  ;;  %v160_v38 = vld [vmem:[#allocation4 + $0x140] sm:$0xff]  ;;  %v161_v40 = vld [vmem:[#allocation4 + $0x148] sm:$0xff] }
  0x89   :  { %12876 = vst [vmem:[#allocation33_spill] sm:$0xff] %v8547_v34  ;;  %12877 = vst [vmem:[#allocation34_spill] sm:$0xff] %v8551_v35  ;;  %v164_v39 = vld [vmem:[#allocation4 + $0x160] sm:$0xff]  ;;  %v165_v41 = vld [vmem:[#allocation4 + $0x168] sm:$0xff]  ;;  %v8559_v42 = vcombine.low %v152_v30, %v156_v31  ;;  %v8563_v43 = vcombine.low %v153_v32, %v157_v33 }
  0x8a   :  { %12878 = vst [vmem:[#allocation35_spill] sm:$0xff] %v8553_v36  ;;  %12879 = vst [vmem:[#allocation36_spill] sm:$0xff] %v8556_v37  ;;  %v8565_v44 = vcombine.high %v160_v38, %v164_v39  ;;  %v8568_v45 = vcombine.high %v161_v40, %v165_v41  ;;  %v168_v46 = vld [vmem:[#allocation4 + $0x180] sm:$0xff]  ;;  %v169_v48 = vld [vmem:[#allocation4 + $0x188] sm:$0xff]  ;;  %v8571_v50 = vcombine.low %v160_v38, %v164_v39 }
  0x8b   :  { %905 = vmatpush1.bf16.msra.mxu0 %v8535_v26  ;;  %948 = vmatpush1.bf16.msra.mxu1 %v8539_v27  ;;  %12880 = vst [vmem:[#allocation37_spill] sm:$0xff] %v8559_v42  ;;  %12881 = vst [vmem:[#allocation38_spill] sm:$0xff] %v8563_v43  ;;  %v172_v47 = vld [vmem:[#allocation4 + $0x1a0] sm:$0xff]  ;;  %v173_v49 = vld [vmem:[#allocation4 + $0x1a8] sm:$0xff]  ;;  %v8575_v51 = vcombine.low %v161_v40, %v165_v41 }
  0x8c   :  { %906 = vmatprep.subr.bf16.mxu0 %v8541_v28  ;;  %949 = vmatprep.subr.bf16.mxu1 %v8544_v29  ;;  %12882 = vst [vmem:[#allocation39_spill] sm:$0xff] %v8565_v44  ;;  %12883 = vst [vmem:[#allocation40_spill] sm:$0xff] %v8568_v45  ;;  %v8577_v52 = vcombine.high %v168_v46, %v172_v47  ;;  %v8580_v53 = vcombine.high %v169_v48, %v173_v49  ;;  %v176_v54 = vld [vmem:[#allocation4 + $0x1c0] sm:$0xff]  ;;  %v177_v57 = vld [vmem:[#allocation4 + $0x1c8] sm:$0xff] }
  0x8d   :  { %12884 = vst [vmem:[#allocation41_spill] sm:$0xff] %v8571_v50  ;;  %12885 = vst [vmem:[#allocation42_spill] sm:$0xff] %v8575_v51  ;;  %v180_v55 = vld [vmem:[#allocation4 + $0x1e0] sm:$0xff]  ;;  %v181_v58 = vld [vmem:[#allocation4 + $0x1e8] sm:$0xff]  ;;  %v8588_v59 = vcombine.low %v168_v46, %v172_v47  ;;  %v8593_v60 = vcombine.low %v169_v48, %v173_v49 }
  0x8e   :  { %12886 = vst [vmem:[#allocation43_spill] sm:$0xff] %v8577_v52  ;;  %12887 = vst [vmem:[#allocation44_spill] sm:$0xff] %v8580_v53  ;;  %v8585_v56 = vld [vmem:[%s12126_s0 + $0x4] ss:$28 sps:$4 sm:$0xff]   ;;  %v8595_v61 = vcombine.high %v176_v54, %v180_v55  ;;  %v8598_v62 = vcombine.high %v177_v57, %v181_v58  ;;  %v185_v1 = vld [vmem:[#allocation4 + $0x208] sm:$0xff]  ;;  %v8602_v4 = vcombine.low %v176_v54, %v180_v55 }
  0x8f   :  { %907 = vmatpush1.bf16.msra.mxu0 %v8547_v34  ;;  %950 = vmatpush1.bf16.msra.mxu1 %v8551_v35  ;;  %12888 = vst [vmem:[#allocation45_spill] sm:$0xff] %v8588_v59  ;;  %12889 = vst [vmem:[#allocation46_spill] sm:$0xff] %v8593_v60  ;;  %v184_v63 = vld [vmem:[#allocation4 + $0x200] sm:$0xff]  ;;  %v189_v2 = vld [vmem:[#allocation4 + $0x228] sm:$0xff]  ;;  %v8606_v6 = vcombine.low %v177_v57, %v181_v58 }
  0x90   :  { %908 = vmatprep.subr.bf16.mxu0 %v8553_v36  ;;  %951 = vmatprep.subr.bf16.mxu1 %v8556_v37  ;;  %12890 = vst [vmem:[#allocation47_spill] sm:$0xff] %v8595_v61  ;;  %12891 = vst [vmem:[#allocation48_spill] sm:$0xff] %v8598_v62  ;;  %v188_v0 = vld [vmem:[#allocation4 + $0x220] sm:$0xff]  ;;  %v8611_v11 = vcombine.high %v185_v1, %v189_v2  ;;  %v193_v15 = vld [vmem:[#allocation4 + $0x248] sm:$0xff]  ;;  %v8618_v22 = vcombine.low %v185_v1, %v189_v2 }
  0x91   :  { %932 = vmatprep.mubr.bf16.mxu0 %v8585_v56  ;;  %975 = vmatprep.mubr.bf16.mxu1 %v8585_v56  ;;  %12892 = vst [vmem:[#allocation49_spill] sm:$0xff] %v8602_v4  ;;  %12893 = vst [vmem:[#allocation50_spill] sm:$0xff] %v8606_v6  ;;  %v8608_v7 = vcombine.high %v184_v63, %v188_v0  ;;  %v192_v12 = vld [vmem:[#allocation4 + $0x240] sm:$0xff]  ;;  %v197_v16 = vld [vmem:[#allocation4 + $0x268] sm:$0xff]  ;;  %v8614_v17 = vcombine.low %v184_v63, %v188_v0 }
  0x92   :  { %12895 = vst [vmem:[#allocation52_spill] sm:$0xff] %v8611_v11  ;;  %v196_v13 = vld [vmem:[#allocation4 + $0x260] sm:$0xff]  ;;  %12897 = vst [vmem:[#allocation54_spill] sm:$0xff] %v8618_v22  ;;  %v8623_v24 = vcombine.high %v193_v15, %v197_v16  ;;  %v201_v31 = vld [vmem:[#allocation4 + $0x288] sm:$0xff]  ;;  %v8630_v38 = vcombine.low %v193_v15, %v197_v16 }
  0x93   :  { %909 = vmatpush1.bf16.msra.mxu0 %v8559_v42  ;;  %952 = vmatpush1.bf16.msra.mxu1 %v8563_v43  ;;  %12894 = vst [vmem:[#allocation51_spill] sm:$0xff] %v8608_v7  ;;  %12896 = vst [vmem:[#allocation53_spill] sm:$0xff] %v8614_v17  ;;  %v8620_v23 = vcombine.high %v192_v12, %v196_v13  ;;  %v200_v25 = vld [vmem:[#allocation4 + $0x280] sm:$0xff]  ;;  %v205_v32 = vld [vmem:[#allocation4 + $0x2a8] sm:$0xff]  ;;  %v8626_v33 = vcombine.low %v192_v12, %v196_v13 }
  0x94   :  { %910 = vmatprep.subr.bf16.mxu0 %v8565_v44  ;;  %953 = vmatprep.subr.bf16.mxu1 %v8568_v45  ;;  %12899 = vst [vmem:[#allocation56_spill] sm:$0xff] %v8623_v24  ;;  %v204_v30 = vld [vmem:[#allocation4 + $0x2a0] sm:$0xff]  ;;  %12901 = vst [vmem:[#allocation58_spill] sm:$0xff] %v8630_v38  ;;  %v8635_v40 = vcombine.high %v201_v31, %v205_v32  ;;  %v209_v47 = vld [vmem:[#allocation4 + $0x2c8] sm:$0xff]  ;;  %v8642_v54 = vcombine.low %v201_v31, %v205_v32 }
  0x95   :  { %12898 = vst [vmem:[#allocation55_spill] sm:$0xff] %v8620_v23  ;;  %12900 = vst [vmem:[#allocation57_spill] sm:$0xff] %v8626_v33  ;;  %v8632_v39 = vcombine.high %v200_v25, %v204_v30  ;;  %v208_v41 = vld [vmem:[#allocation4 + $0x2c0] sm:$0xff]  ;;  %v213_v48 = vld [vmem:[#allocation4 + $0x2e8] sm:$0xff]  ;;  %v8638_v49 = vcombine.low %v200_v25, %v204_v30 }
  0x96   :  { %12903 = vst [vmem:[#allocation60_spill] sm:$0xff] %v8635_v40  ;;  %v212_v46 = vld [vmem:[#allocation4 + $0x2e0] sm:$0xff]  ;;  %12905 = vst [vmem:[#allocation62_spill] sm:$0xff] %v8642_v54  ;;  %v8647_v57 = vcombine.high %v209_v47, %v213_v48  ;;  %v217_v0 = vld [vmem:[#allocation4 + $0x308] sm:$0xff]  ;;  %v8654_v15 = vcombine.low %v209_v47, %v213_v48 }
  0x97   :  { %911 = vmatpush1.bf16.msra.mxu0 %v8571_v50  ;;  %954 = vmatpush1.bf16.msra.mxu1 %v8575_v51  ;;  %12902 = vst [vmem:[#allocation59_spill] sm:$0xff] %v8632_v39  ;;  %12904 = vst [vmem:[#allocation61_spill] sm:$0xff] %v8638_v49  ;;  %v8644_v55 = vcombine.high %v208_v41, %v212_v46  ;;  %v216_v58 = vld [vmem:[#allocation4 + $0x300] sm:$0xff]  ;;  %v221_v1 = vld [vmem:[#allocation4 + $0x328] sm:$0xff]  ;;  %v8650_v2 = vcombine.low %v208_v41, %v212_v46 }
  0x98   :  { %912 = vmatprep.subr.bf16.mxu0 %v8577_v52  ;;  %955 = vmatprep.subr.bf16.mxu1 %v8580_v53  ;;  %12907 = vst [vmem:[#allocation64_spill] sm:$0xff] %v8647_v57  ;;  %v220_v63 = vld [vmem:[#allocation4 + $0x320] sm:$0xff]  ;;  %12909 = vst [vmem:[#allocation66_spill] sm:$0xff] %v8654_v15  ;;  %v225_v25 = vld [vmem:[#allocation4 + $0x348] sm:$0xff]  ;;  %v8659_v31 = vcombine.high %v217_v0, %v221_v1  ;;  %v8666_v47 = vcombine.low %v217_v0, %v221_v1 }
  0x99   :  { %12906 = vst [vmem:[#allocation63_spill] sm:$0xff] %v8644_v55  ;;  %12908 = vst [vmem:[#allocation65_spill] sm:$0xff] %v8650_v2  ;;  %v224_v12 = vld [vmem:[#allocation4 + $0x340] sm:$0xff]  ;;  %v8656_v16 = vcombine.high %v216_v58, %v220_v63  ;;  %v229_v30 = vld [vmem:[#allocation4 + $0x368] sm:$0xff]  ;;  %v8662_v32 = vcombine.low %v216_v58, %v220_v63 }
  0x9a   :  { %v228_v13 = vld [vmem:[#allocation4 + $0x360] sm:$0xff]  ;;  %12911 = vst [vmem:[#allocation68_spill] sm:$0xff] %v8659_v31  ;;  %12913 = vst [vmem:[#allocation70_spill] sm:$0xff] %v8666_v47  ;;  %v8678_v0 = vcombine.low %v225_v25, %v229_v30 }
  0x9b   :  { %913 = vmatpush1.bf16.msra.mxu0 %v8588_v59  ;;  %956 = vmatpush1.bf16.msra.mxu1 %v8593_v60  ;;  %12910 = vst [vmem:[#allocation67_spill] sm:$0xff] %v8656_v16  ;;  %12912 = vst [vmem:[#allocation69_spill] sm:$0xff] %v8662_v32  ;;  %v232_v41 = vld [vmem:[#allocation4 + $0x380] sm:$0xff]  ;;  %v8668_v48 = vcombine.high %v224_v12, %v228_v13  ;;  %v8674_v58 = vcombine.low %v224_v12, %v228_v13  ;;  %v122_v13 = vld [vmem:[#allocation4 + $0x10] sm:$0xff] }
  0x9c   :  { %914 = vmatprep.subr.bf16.mxu0 %v8595_v61  ;;  %957 = vmatprep.subr.bf16.mxu1 %v8598_v62  ;;  %v236_v46 = vld [vmem:[#allocation4 + $0x3a0] sm:$0xff]  ;;  %12917 = vst [vmem:[#allocation74_spill] sm:$0xff] %v8678_v0 }
  0x9d   :  { %12914 = vst [vmem:[#allocation71_spill] sm:$0xff] %v8668_v48  ;;  %12916 = vst [vmem:[#allocation73_spill] sm:$0xff] %v8674_v58  ;;  %v240_v63 = vld [vmem:[#allocation4 + $0x3c0] sm:$0xff]  ;;  %v8680_v1 = vcombine.high %v232_v41, %v236_v46  ;;  %v8686_v12 = vcombine.low %v232_v41, %v236_v46  ;;  %v130_v46 = vld [vmem:[#allocation4 + $0x50] sm:$0xff] }
  0x9f   :  { %915 = vmatpush1.bf16.msra.mxu0 %v8602_v4  ;;  %958 = vmatpush1.bf16.msra.mxu1 %v8606_v6  ;;  %12918 = vst [vmem:[#allocation75_spill] sm:$0xff] %v8680_v1  ;;  %12920 = vst [vmem:[#allocation77_spill] sm:$0xff] %v8686_v12 }
  0xa0   :  { %916 = vmatprep.subr.bf16.mxu0 %v8608_v7  ;;  %959 = vmatprep.subr.bf16.mxu1 %v8611_v11 }
  0xa3   :  { %917 = vmatpush1.bf16.msra.mxu0 %v8614_v17  ;;  %960 = vmatpush1.bf16.msra.mxu1 %v8618_v22 }
  0xa4   :  { %918 = vmatprep.subr.bf16.mxu0 %v8620_v23  ;;  %961 = vmatprep.subr.bf16.mxu1 %v8623_v24 }
  0xa7   :  { %919 = vmatpush1.bf16.msra.mxu0 %v8626_v33  ;;  %962 = vmatpush1.bf16.msra.mxu1 %v8630_v38 }
  0xa8   :  { %920 = vmatprep.subr.bf16.mxu0 %v8632_v39  ;;  %963 = vmatprep.subr.bf16.mxu1 %v8635_v40 }
  0xab   :  { %921 = vmatpush1.bf16.msra.mxu0 %v8638_v49  ;;  %964 = vmatpush1.bf16.msra.mxu1 %v8642_v54  ;;  %v237_v54 = vld [vmem:[#allocation4 + $0x3a8] sm:$0xff]  ;;  %v143_v49 = vld [vmem:[#allocation4 + $0xb8] sm:$0xff] }
  0xac   :  { %922 = vmatprep.subr.bf16.mxu0 %v8644_v55  ;;  %965 = vmatprep.subr.bf16.mxu1 %v8647_v57  ;;  %v233_v55 = vld [vmem:[#allocation4 + $0x388] sm:$0xff]  ;;  %v8671_v57 = vcombine.high %v225_v25, %v229_v30 }
  0xad   :  { %v8690_v25 = vcombine.low %v233_v55, %v237_v54 }
  0xae   :  { %12915 = vst [vmem:[#allocation72_spill] sm:$0xff] %v8671_v57 }
  0xaf   :  { %923 = vmatpush1.bf16.msra.mxu0 %v8650_v2  ;;  %966 = vmatpush1.bf16.msra.mxu1 %v8654_v15  ;;  %v244_v2 = vld [vmem:[#allocation4 + $0x3e0] sm:$0xff]  ;;  %v245_v15 = vld [vmem:[#allocation4 + $0x3e8] sm:$0xff]  ;;  %12921 = vst [vmem:[#allocation78_spill] sm:$0xff] %v8690_v25 }
  0xb0   :  { %924 = vmatprep.subr.bf16.mxu0 %v8656_v16  ;;  %967 = vmatprep.subr.bf16.mxu1 %v8659_v31  ;;  %v241_v16 = vld [vmem:[#allocation4 + $0x3c8] sm:$0xff]  ;;  %v8683_v31 = vcombine.high %v233_v55, %v237_v54  ;;  %v8692_v30 = vcombine.high %v240_v63, %v244_v2  ;;  %v8698_v41 = vcombine.low %v240_v63, %v244_v2  ;;  %v8707_v55 = vld [vmem:[%s12126_s0] ss:$28 sps:$4 sm:$0xff]  }
  0xb1   :  { %v8702_v54 = vcombine.low %v241_v16, %v245_v15 }
  0xb2   :  { %12919 = vst [vmem:[#allocation76_spill] sm:$0xff] %v8683_v31  ;;  %12922 = vst [vmem:[#allocation79_spill] sm:$0xff] %v8692_v30 }
  0xb3   :  { %925 = vmatpush1.bf16.msra.mxu0 %v8662_v32  ;;  %968 = vmatpush1.bf16.msra.mxu1 %v8666_v47  ;;  %v126_v32 = vld [vmem:[#allocation4 + $0x30] sm:$0xff]  ;;  %v127_v47 = vld [vmem:[#allocation4 + $0x38] sm:$0xff]  ;;  %12924 = vst [vmem:[#allocation81_spill] sm:$0xff] %v8698_v41  ;;  %12925 = vst [vmem:[#allocation82_spill] sm:$0xff] %v8702_v54 }
  0xb4   :  { %926 = vmatprep.subr.bf16.mxu0 %v8668_v48  ;;  %969 = vmatprep.subr.bf16.mxu1 %v8671_v57  ;;  %v123_v48 = vld [vmem:[#allocation4 + $0x18] sm:$0xff]  ;;  %v8695_v57 = vcombine.high %v241_v16, %v245_v15  ;;  %v8715_v63 = vcombine.low %v122_v13, %v126_v32  ;;  %v142_v15 = vld [vmem:[#allocation4 + $0xb0] sm:$0xff] }
  0xb5   :  { %v8712_v2 = vcombine.high %v123_v48, %v127_v47  ;;  %v8719_v16 = vcombine.low %v123_v48, %v127_v47 }
  0xb6   :  { %12923 = vst [vmem:[#allocation80_spill] sm:$0xff] %v8695_v57  ;;  %12928 = vst [vmem:[#allocation85_spill] sm:$0xff] %v8715_v63 }
  0xb7   :  { %927 = vmatpush1.bf16.msra.mxu0 %v8674_v58  ;;  %970 = vmatpush1.bf16.msra.mxu1 %v8678_v0  ;;  %v134_v58 = vld [vmem:[#allocation4 + $0x70] sm:$0xff]  ;;  %v135_v0 = vld [vmem:[#allocation4 + $0x78] sm:$0xff]  ;;  %12927 = vst [vmem:[#allocation84_spill] sm:$0xff] %v8712_v2  ;;  %12929 = vst [vmem:[#allocation86_spill] sm:$0xff] %v8719_v16 }
  0xb8   :  { %928 = vmatprep.subr.bf16.mxu0 %v8680_v1  ;;  %971 = vmatprep.subr.bf16.mxu1 %v8683_v31  ;;  %v8709_v31 = vcombine.high %v122_v13, %v126_v32  ;;  %v131_v1 = vld [vmem:[#allocation4 + $0x58] sm:$0xff]  ;;  %v8729_v32 = vcombine.low %v130_v46, %v134_v58  ;;  %v146_v13 = vld [vmem:[#allocation4 + $0xd0] sm:$0xff] }
  0xb9   :  { %v8733_v47 = vcombine.low %v131_v1, %v135_v0 }
  0xba   :  { %12926 = vst [vmem:[#allocation83_spill] sm:$0xff] %v8709_v31  ;;  %12932 = vst [vmem:[#allocation89_spill] sm:$0xff] %v8729_v32 }
  0xbb   :  { %929 = vmatpush1.bf16.msra.mxu0 %v8686_v12  ;;  %972 = vmatpush1.bf16.msra.mxu1 %v8690_v25  ;;  %v8721_v25 = vcombine.high %v130_v46, %v134_v58  ;;  %v139_v12 = vld [vmem:[#allocation4 + $0x98] sm:$0xff]  ;;  %12933 = vst [vmem:[#allocation90_spill] sm:$0xff] %v8733_v47  ;;  %v154_v46 = vld [vmem:[#allocation4 + $0x110] sm:$0xff] }
  0xbc   :  { %930 = vmatprep.subr.bf16.mxu0 %v8692_v30  ;;  %973 = vmatprep.subr.bf16.mxu1 %v8695_v57  ;;  %v138_v30 = vld [vmem:[#allocation4 + $0x90] sm:$0xff]  ;;  %v8724_v57 = vcombine.high %v131_v1, %v135_v0  ;;  %v8747_v0 = vcombine.low %v139_v12, %v143_v49 }
  0xbd   :  { %12930 = vst [vmem:[#allocation87_spill] sm:$0xff] %v8721_v25  ;;  %v8735_v48 = vcombine.high %v138_v30, %v142_v15  ;;  %v8743_v58 = vcombine.low %v138_v30, %v142_v15 }
  0xbe   :  { %12931 = vst [vmem:[#allocation88_spill] sm:$0xff] %v8724_v57  ;;  %12937 = vst [vmem:[#allocation94_spill] sm:$0xff] %v8747_v0 }
  0xbf   :  { %931 = vmatpush1.bf16.msra.mxu0 %v8698_v41  ;;  %974 = vmatpush1.bf16.msra.mxu1 %v8702_v54  ;;  %12934 = vst [vmem:[#allocation91_spill] sm:$0xff] %v8735_v48  ;;  %v151_v54 = vld [vmem:[#allocation4 + $0xf8] sm:$0xff]  ;;  %v8738_v41 = vcombine.high %v139_v12, %v143_v49  ;;  %12936 = vst [vmem:[#allocation93_spill] sm:$0xff] %v8743_v58 }
  0xc0   :  { %986 = vmatprep.subr.bf16.mxu0 %v8709_v31  ;;  %1029 = vmatprep.subr.bf16.mxu1 %v8712_v2  ;;  %v150_v31 = vld [vmem:[#allocation4 + $0xf0] sm:$0xff]  ;;  %v147_v2 = vld [vmem:[#allocation4 + $0xd8] sm:$0xff] }
  0xc1   :  { %12935 = vst [vmem:[#allocation92_spill] sm:$0xff] %v8738_v41  ;;  %v8749_v1 = vcombine.high %v146_v13, %v150_v31  ;;  %v8755_v30 = vcombine.low %v146_v13, %v150_v31  ;;  %v8759_v15 = vcombine.low %v147_v2, %v151_v54 }
  0xc2   :  { %933 = vmatmul.mubr.bf16.vlgmr.msra.gmra.mrb[0].mxu0 %v8707_v55  ;;  %976 = vmatmul.mubr.bf16.vlgmr.msra.gmra.mrb[0].mxu1 %v8707_v55 }
  0xc3   :  { %987 = vmatpush1.bf16.msra.mxu0 %v8715_v63  ;;  %1030 = vmatpush1.bf16.msra.mxu1 %v8719_v16  ;;  %12938 = vst [vmem:[#allocation95_spill] sm:$0xff] %v8749_v1  ;;  %v155_v16 = vld [vmem:[#allocation4 + $0x118] sm:$0xff]  ;;  %12940 = vst [vmem:[#allocation97_spill] sm:$0xff] %v8755_v30 }
  0xc4   :  { %988 = vmatprep.subr.bf16.mxu0 %v8721_v25  ;;  %1031 = vmatprep.subr.bf16.mxu1 %v8724_v57  ;;  %v8752_v57 = vcombine.high %v147_v2, %v151_v54  ;;  %v158_v25 = vld [vmem:[#allocation4 + $0x130] sm:$0xff]  ;;  %12941 = vst [vmem:[#allocation98_spill] sm:$0xff] %v8759_v15 }
  0xc5   :  { %1018 = vmatprep.mubr.bf16.mxu0 %v8585_v56  ;;  %1061 = vmatprep.mubr.bf16.mxu1 %v8585_v56  ;;  %v159_v56 = vld [vmem:[#allocation4 + $0x138] sm:$0xff]  ;;  %v8761_v49 = vcombine.high %v154_v46, %v158_v25  ;;  %v8767_v31 = vcombine.low %v154_v46, %v158_v25 }
  0xc6   :  { %12939 = vst [vmem:[#allocation96_spill] sm:$0xff] %v8752_v57  ;;  %v8764_v12 = vcombine.high %v155_v16, %v159_v56  ;;  %v8771_v54 = vcombine.low %v155_v16, %v159_v56 }
  0xc7   :  { %989 = vmatpush1.bf16.msra.mxu0 %v8729_v32  ;;  %1032 = vmatpush1.bf16.msra.mxu1 %v8733_v47  ;;  %12942 = vst [vmem:[#allocation99_spill] sm:$0xff] %v8761_v49  ;;  %v163_v47 = vld [vmem:[#allocation4 + $0x158] sm:$0xff]  ;;  %12944 = vst [vmem:[#allocation101_spill] sm:$0xff] %v8767_v31 }
  0xc8   :  { %990 = vmatprep.subr.bf16.mxu0 %v8735_v48  ;;  %1033 = vmatprep.subr.bf16.mxu1 %v8738_v41  ;;  %12943 = vst [vmem:[#allocation100_spill] sm:$0xff] %v8764_v12  ;;  %v162_v41 = vld [vmem:[#allocation4 + $0x150] sm:$0xff]  ;;  %v167_v32 = vld [vmem:[#allocation4 + $0x178] sm:$0xff]  ;;  %12945 = vst [vmem:[#allocation102_spill] sm:$0xff] %v8771_v54 }
  0xc9   :  { %v166_v48 = vld [vmem:[#allocation4 + $0x170] sm:$0xff]  ;;  %v8776_v13 = vcombine.high %v163_v47, %v167_v32  ;;  %v8783_v16 = vcombine.low %v163_v47, %v167_v32 }
  0xca   :  { %v8773_v2 = vcombine.high %v162_v41, %v166_v48  ;;  %v8779_v25 = vcombine.low %v162_v41, %v166_v48 }
  0xcb   :  { %991 = vmatpush1.bf16.msra.mxu0 %v8743_v58  ;;  %1034 = vmatpush1.bf16.msra.mxu1 %v8747_v0  ;;  %12947 = vst [vmem:[#allocation104_spill] sm:$0xff] %v8776_v13  ;;  %v171_v0 = vld [vmem:[#allocation4 + $0x198] sm:$0xff]  ;;  %12949 = vst [vmem:[#allocation106_spill] sm:$0xff] %v8783_v16 }
  0xcc   :  { %992 = vmatprep.subr.bf16.mxu0 %v8749_v1  ;;  %1035 = vmatprep.subr.bf16.mxu1 %v8752_v57  ;;  %12946 = vst [vmem:[#allocation103_spill] sm:$0xff] %v8773_v2  ;;  %v170_v57 = vld [vmem:[#allocation4 + $0x190] sm:$0xff]  ;;  %v175_v58 = vld [vmem:[#allocation4 + $0x1b8] sm:$0xff]  ;;  %12948 = vst [vmem:[#allocation105_spill] sm:$0xff] %v8779_v25 }
  0xcd   :  { %v174_v1 = vld [vmem:[#allocation4 + $0x1b0] sm:$0xff]  ;;  %v8788_v56 = vcombine.high %v171_v0, %v175_v58  ;;  %v8795_v32 = vcombine.low %v171_v0, %v175_v58 }
  0xce   :  { %v8785_v46 = vcombine.high %v170_v57, %v174_v1  ;;  %v8791_v41 = vcombine.low %v170_v57, %v174_v1 }
  0xcf   :  { %993 = vmatpush1.bf16.msra.mxu0 %v8755_v30  ;;  %1036 = vmatpush1.bf16.msra.mxu1 %v8759_v15  ;;  %12951 = vst [vmem:[#allocation108_spill] sm:$0xff] %v8788_v56  ;;  %v179_v15 = vld [vmem:[#allocation4 + $0x1d8] sm:$0xff]  ;;  %12953 = vst [vmem:[#allocation110_spill] sm:$0xff] %v8795_v32 }
  0xd0   :  { %994 = vmatprep.subr.bf16.mxu0 %v8761_v49  ;;  %1037 = vmatprep.subr.bf16.mxu1 %v8764_v12  ;;  %12950 = vst [vmem:[#allocation107_spill] sm:$0xff] %v8785_v46  ;;  %v178_v12 = vld [vmem:[#allocation4 + $0x1d0] sm:$0xff]  ;;  %v183_v30 = vld [vmem:[#allocation4 + $0x1f8] sm:$0xff]  ;;  %12952 = vst [vmem:[#allocation109_spill] sm:$0xff] %v8791_v41 }
  0xd1   :  { %v182_v49 = vld [vmem:[#allocation4 + $0x1f0] sm:$0xff]  ;;  %v8800_v48 = vcombine.high %v179_v15, %v183_v30  ;;  %v8807_v58 = vcombine.low %v179_v15, %v183_v30 }
  0xd2   :  { %v8797_v47 = vcombine.high %v178_v12, %v182_v49  ;;  %v8803_v57 = vcombine.low %v178_v12, %v182_v49 }
  0xd3   :  { %995 = vmatpush1.bf16.msra.mxu0 %v8767_v31  ;;  %1038 = vmatpush1.bf16.msra.mxu1 %v8771_v54  ;;  %12955 = vst [vmem:[#allocation112_spill] sm:$0xff] %v8800_v48  ;;  %v187_v54 = vld [vmem:[#allocation4 + $0x218] sm:$0xff]  ;;  %12957 = vst [vmem:[#allocation114_spill] sm:$0xff] %v8807_v58 }
  0xd4   :  { %996 = vmatprep.subr.bf16.mxu0 %v8773_v2  ;;  %1039 = vmatprep.subr.bf16.mxu1 %v8776_v13  ;;  %12954 = vst [vmem:[#allocation111_spill] sm:$0xff] %v8797_v47  ;;  %v186_v13 = vld [vmem:[#allocation4 + $0x210] sm:$0xff]  ;;  %v191_v31 = vld [vmem:[#allocation4 + $0x238] sm:$0xff]  ;;  %12956 = vst [vmem:[#allocation113_spill] sm:$0xff] %v8803_v57 }
  0xd5   :  { %v190_v2 = vld [vmem:[#allocation4 + $0x230] sm:$0xff]  ;;  %v8812_v1 = vcombine.high %v187_v54, %v191_v31  ;;  %v8819_v30 = vcombine.low %v187_v54, %v191_v31 }
  0xd6   :  { %v8809_v0 = vcombine.high %v186_v13, %v190_v2  ;;  %v8815_v49 = vcombine.low %v186_v13, %v190_v2 }
  0xd7   :  { %997 = vmatpush1.bf16.msra.mxu0 %v8779_v25  ;;  %1040 = vmatpush1.bf16.msra.mxu1 %v8783_v16  ;;  %12959 = vst [vmem:[#allocation116_spill] sm:$0xff] %v8812_v1  ;;  %v195_v16 = vld [vmem:[#allocation4 + $0x258] sm:$0xff]  ;;  %12961 = vst [vmem:[#allocation118_spill] sm:$0xff] %v8819_v30 }
  0xd8   :  { %998 = vmatprep.subr.bf16.mxu0 %v8785_v46  ;;  %1041 = vmatprep.subr.bf16.mxu1 %v8788_v56  ;;  %12958 = vst [vmem:[#allocation115_spill] sm:$0xff] %v8809_v0  ;;  %v194_v56 = vld [vmem:[#allocation4 + $0x250] sm:$0xff]  ;;  %v199_v25 = vld [vmem:[#allocation4 + $0x278] sm:$0xff]  ;;  %12960 = vst [vmem:[#allocation117_spill] sm:$0xff] %v8815_v49 }
  0xd9   :  { %v198_v46 = vld [vmem:[#allocation4 + $0x270] sm:$0xff]  ;;  %v8824_v12 = vcombine.high %v195_v16, %v199_v25  ;;  %v8831_v31 = vcombine.low %v195_v16, %v199_v25 }
  0xda   :  { %v8821_v15 = vcombine.high %v194_v56, %v198_v46  ;;  %v8827_v2 = vcombine.low %v194_v56, %v198_v46 }
  0xdb   :  { %999 = vmatpush1.bf16.msra.mxu0 %v8791_v41  ;;  %1042 = vmatpush1.bf16.msra.mxu1 %v8795_v32  ;;  %12963 = vst [vmem:[#allocation120_spill] sm:$0xff] %v8824_v12  ;;  %v203_v32 = vld [vmem:[#allocation4 + $0x298] sm:$0xff]  ;;  %12965 = vst [vmem:[#allocation122_spill] sm:$0xff] %v8831_v31 }
  0xdc   :  { %1000 = vmatprep.subr.bf16.mxu0 %v8797_v47  ;;  %1043 = vmatprep.subr.bf16.mxu1 %v8800_v48  ;;  %12962 = vst [vmem:[#allocation119_spill] sm:$0xff] %v8821_v15  ;;  %v202_v48 = vld [vmem:[#allocation4 + $0x290] sm:$0xff]  ;;  %v207_v41 = vld [vmem:[#allocation4 + $0x2b8] sm:$0xff]  ;;  %12964 = vst [vmem:[#allocation121_spill] sm:$0xff] %v8827_v2 }
  0xdd   :  { %v206_v47 = vld [vmem:[#allocation4 + $0x2b0] sm:$0xff]  ;;  %v8836_v13 = vcombine.high %v203_v32, %v207_v41  ;;  %v8843_v25 = vcombine.low %v203_v32, %v207_v41 }
  0xde   :  { %v8833_v54 = vcombine.high %v202_v48, %v206_v47  ;;  %v8839_v46 = vcombine.low %v202_v48, %v206_v47 }
  0xdf   :  { %1001 = vmatpush1.bf16.msra.mxu0 %v8803_v57  ;;  %1044 = vmatpush1.bf16.msra.mxu1 %v8807_v58  ;;  %12967 = vst [vmem:[#allocation124_spill] sm:$0xff] %v8836_v13  ;;  %v211_v58 = vld [vmem:[#allocation4 + $0x2d8] sm:$0xff]  ;;  %12969 = vst [vmem:[#allocation126_spill] sm:$0xff] %v8843_v25 }
  0xe0   :  { %1002 = vmatprep.subr.bf16.mxu0 %v8809_v0  ;;  %1045 = vmatprep.subr.bf16.mxu1 %v8812_v1  ;;  %12966 = vst [vmem:[#allocation123_spill] sm:$0xff] %v8833_v54  ;;  %v210_v1 = vld [vmem:[#allocation4 + $0x2d0] sm:$0xff]  ;;  %v215_v57 = vld [vmem:[#allocation4 + $0x2f8] sm:$0xff]  ;;  %12968 = vst [vmem:[#allocation125_spill] sm:$0xff] %v8839_v46 }
  0xe1   :  { %v214_v0 = vld [vmem:[#allocation4 + $0x2f0] sm:$0xff]  ;;  %v8848_v56 = vcombine.high %v211_v58, %v215_v57  ;;  %v8855_v41 = vcombine.low %v211_v58, %v215_v57 }
  0xe2   :  { %v8845_v16 = vcombine.high %v210_v1, %v214_v0  ;;  %v8851_v47 = vcombine.low %v210_v1, %v214_v0 }
  0xe3   :  { %1003 = vmatpush1.bf16.msra.mxu0 %v8815_v49  ;;  %1046 = vmatpush1.bf16.msra.mxu1 %v8819_v30  ;;  %12971 = vst [vmem:[#allocation128_spill] sm:$0xff] %v8848_v56  ;;  %v219_v30 = vld [vmem:[#allocation4 + $0x318] sm:$0xff]  ;;  %12973 = vst [vmem:[#allocation130_spill] sm:$0xff] %v8855_v41 }
  0xe4   :  { %1004 = vmatprep.subr.bf16.mxu0 %v8821_v15  ;;  %1047 = vmatprep.subr.bf16.mxu1 %v8824_v12  ;;  %12970 = vst [vmem:[#allocation127_spill] sm:$0xff] %v8845_v16  ;;  %v218_v12 = vld [vmem:[#allocation4 + $0x310] sm:$0xff]  ;;  %v223_v49 = vld [vmem:[#allocation4 + $0x338] sm:$0xff]  ;;  %12972 = vst [vmem:[#allocation129_spill] sm:$0xff] %v8851_v47 }
  0xe5   :  { %v222_v15 = vld [vmem:[#allocation4 + $0x330] sm:$0xff]  ;;  %v8860_v48 = vcombine.high %v219_v30, %v223_v49  ;;  %v8867_v57 = vcombine.low %v219_v30, %v223_v49 }
  0xe6   :  { %v8857_v32 = vcombine.high %v218_v12, %v222_v15  ;;  %v8863_v0 = vcombine.low %v218_v12, %v222_v15 }
  0xe7   :  { %1005 = vmatpush1.bf16.msra.mxu0 %v8827_v2  ;;  %1048 = vmatpush1.bf16.msra.mxu1 %v8831_v31  ;;  %12975 = vst [vmem:[#allocation132_spill] sm:$0xff] %v8860_v48  ;;  %v227_v31 = vld [vmem:[#allocation4 + $0x358] sm:$0xff] }
  0xe8   :  { %1006 = vmatprep.subr.bf16.mxu0 %v8833_v54  ;;  %1049 = vmatprep.subr.bf16.mxu1 %v8836_v13  ;;  %12974 = vst [vmem:[#allocation131_spill] sm:$0xff] %v8857_v32  ;;  %v226_v13 = vld [vmem:[#allocation4 + $0x350] sm:$0xff]  ;;  %v231_v2 = vld [vmem:[#allocation4 + $0x378] sm:$0xff] }
  0xe9   :  { %v230_v54 = vld [vmem:[#allocation4 + $0x370] sm:$0xff]  ;;  %v8872_v1 = vcombine.high %v227_v31, %v231_v2  ;;  %v8879_v49 = vcombine.low %v227_v31, %v231_v2 }
  0xea   :  { %v8869_v58 = vcombine.high %v226_v13, %v230_v54  ;;  %v8875_v15 = vcombine.low %v226_v13, %v230_v54 }
  0xeb   :  { %1007 = vmatpush1.bf16.msra.mxu0 %v8839_v46  ;;  %1050 = vmatpush1.bf16.msra.mxu1 %v8843_v25  ;;  %12976 = vst [vmem:[#allocation133_spill] sm:$0xff] %v8872_v1  ;;  %v235_v25 = vld [vmem:[#allocation4 + $0x398] sm:$0xff] }
  0xec   :  { %1008 = vmatprep.subr.bf16.mxu0 %v8845_v16  ;;  %1051 = vmatprep.subr.bf16.mxu1 %v8848_v56  ;;  %v234_v56 = vld [vmem:[#allocation4 + $0x390] sm:$0xff]  ;;  %v239_v46 = vld [vmem:[#allocation4 + $0x3b8] sm:$0xff] }
  0xed   :  { %v238_v16 = vld [vmem:[#allocation4 + $0x3b0] sm:$0xff]  ;;  %v8884_v12 = vcombine.high %v235_v25, %v239_v46  ;;  %v8891_v2 = vcombine.low %v235_v25, %v239_v46  ;;  %v8913_v46 = vld [vmem:[%s12126_s0 + $0x8] ss:$28 sps:$4 sm:$0xff]  }
  0xee   :  { %v8881_v30 = vcombine.high %v234_v56, %v238_v16  ;;  %v8887_v54 = vcombine.low %v234_v56, %v238_v16  ;;  %v12981_v25 = vld [vmem:[#allocation62_spill] sm:$0xff]  ;;  %v12982_v56 = vld [vmem:[#allocation63_spill] sm:$0xff] }
  0xef   :  { %1009 = vmatpush1.bf16.msra.mxu0 %v8851_v47  ;;  %1052 = vmatpush1.bf16.msra.mxu1 %v8855_v41  ;;  %12977 = vst [vmem:[#allocation134_spill] sm:$0xff] %v8884_v12  ;;  %v243_v41 = vld [vmem:[#allocation4 + $0x3d8] sm:$0xff] }
  0xf0   :  { %1010 = vmatprep.subr.bf16.mxu0 %v8857_v32  ;;  %1053 = vmatprep.subr.bf16.mxu1 %v8860_v48  ;;  %v242_v48 = vld [vmem:[#allocation4 + $0x3d0] sm:$0xff]  ;;  %v247_v47 = vld [vmem:[#allocation4 + $0x3f8] sm:$0xff] }
  0xf1   :  { %v246_v32 = vld [vmem:[#allocation4 + $0x3f0] sm:$0xff]  ;;  %v8896_v13 = vcombine.high %v243_v41, %v247_v47  ;;  %v8903_v16 = vcombine.low %v243_v41, %v247_v47  ;;  %v12983_v47 = vld [vmem:[#allocation64_spill] sm:$0xff]  ;;  %v12984_v41 = vld [vmem:[#allocation65_spill] sm:$0xff] }
  0xf2   :  { %v8893_v31 = vcombine.high %v242_v48, %v246_v32 }
  0xf3   :  { %1011 = vmatpush1.bf16.msra.mxu0 %v8863_v0  ;;  %1054 = vmatpush1.bf16.msra.mxu1 %v8867_v57  ;;  %12979 = vst [vmem:[#allocation136_spill] sm:$0xff] %v8903_v16 }
  0xf4   :  { %1012 = vmatprep.subr.bf16.mxu0 %v8869_v58  ;;  %1055 = vmatprep.subr.bf16.mxu1 %v8872_v1  ;;  %v8899_v1 = vcombine.low %v242_v48, %v246_v32  ;;  %v12985_v32 = vld [vmem:[#allocation66_spill] sm:$0xff]  ;;  %v12986_v48 = vld [vmem:[#allocation67_spill] sm:$0xff] }
  0xf6   :  { %12978 = vst [vmem:[#allocation135_spill] sm:$0xff] %v8899_v1 }
  0xf7   :  { %1013 = vmatpush1.bf16.msra.mxu0 %v8875_v15  ;;  %1056 = vmatpush1.bf16.msra.mxu1 %v8879_v49 }
  0xf8   :  { %1014 = vmatprep.subr.bf16.mxu0 %v8881_v30  ;;  %1057 = vmatprep.subr.bf16.mxu1 %v8884_v12 }
  0xfb   :  { %1015 = vmatpush1.bf16.msra.mxu0 %v8887_v54  ;;  %1058 = vmatpush1.bf16.msra.mxu1 %v8891_v2 }
  0xfc   :  { %1016 = vmatprep.subr.bf16.mxu0 %v8893_v31  ;;  %1059 = vmatprep.subr.bf16.mxu1 %v8896_v13 }
  0xff   :  { %1017 = vmatpush1.bf16.msra.mxu0 %v8899_v1  ;;  %1060 = vmatpush1.bf16.msra.mxu1 %v8903_v16 }
 0x100   :  { %1120 = vmatprep.subr.bf16.mxu0 %v8508_v3  ;;  %1163 = vmatprep.subr.bf16.mxu1 %v8512_v8 }
 0x102   :  { %1019 = vmatmul.mubr.bf16.vlgmr.msra.gmra.mrb[4].mxu0 %v8707_v55  ;;  %1062 = vmatmul.mubr.bf16.vlgmr.msra.gmra.mrb[4].mxu1 %v8707_v55  ;;  %v12980_v55 = vld [vmem:[#allocation61_spill] sm:$0xff] }
 0x103   :  { %1121 = vmatpush1.bf16.msra.mxu0 %v8510_v5  ;;  %1164 = vmatpush1.bf16.msra.mxu1 %v8514_v9 }
 0x104   :  { %1122 = vmatprep.subr.bf16.mxu0 %v8516_v10  ;;  %1165 = vmatprep.subr.bf16.mxu1 %v8519_v14 }
 0x105   :  { %1152 = vmatprep.mubr.bf16.mxu0 %v8913_v46  ;;  %1195 = vmatprep.mubr.bf16.mxu1 %v8913_v46 }
 0x107   :  { %1123 = vmatpush1.bf16.msra.mxu0 %v8523_v18  ;;  %1166 = vmatpush1.bf16.msra.mxu1 %v8527_v19 }
 0x108   :  { %1124 = vmatprep.subr.bf16.mxu0 %v8529_v20  ;;  %1167 = vmatprep.subr.bf16.mxu1 %v8532_v21 }
 0x10b   :  { %1125 = vmatpush1.bf16.msra.mxu0 %v8535_v26  ;;  %1168 = vmatpush1.bf16.msra.mxu1 %v8539_v27 }
 0x10c   :  { %1126 = vmatprep.subr.bf16.mxu0 %v8541_v28  ;;  %1169 = vmatprep.subr.bf16.mxu1 %v8544_v29 }
 0x10f   :  { %1127 = vmatpush1.bf16.msra.mxu0 %v8547_v34  ;;  %1170 = vmatpush1.bf16.msra.mxu1 %v8551_v35 }
 0x110   :  { %1128 = vmatprep.subr.bf16.mxu0 %v8553_v36  ;;  %1171 = vmatprep.subr.bf16.mxu1 %v8556_v37 }
 0x113   :  { %1129 = vmatpush1.bf16.msra.mxu0 %v8559_v42  ;;  %1172 = vmatpush1.bf16.msra.mxu1 %v8563_v43 }
 0x114   :  { %1130 = vmatprep.subr.bf16.mxu0 %v8565_v44  ;;  %1173 = vmatprep.subr.bf16.mxu1 %v8568_v45 }
 0x117   :  { %1131 = vmatpush1.bf16.msra.mxu0 %v8571_v50  ;;  %1174 = vmatpush1.bf16.msra.mxu1 %v8575_v51 }
 0x118   :  { %1132 = vmatprep.subr.bf16.mxu0 %v8577_v52  ;;  %1175 = vmatprep.subr.bf16.mxu1 %v8580_v53 }
 0x11b   :  { %1133 = vmatpush1.bf16.msra.mxu0 %v8588_v59  ;;  %1176 = vmatpush1.bf16.msra.mxu1 %v8593_v60 }
 0x11c   :  { %1134 = vmatprep.subr.bf16.mxu0 %v8595_v61  ;;  %1177 = vmatprep.subr.bf16.mxu1 %v8598_v62 }
 0x11f   :  { %1135 = vmatpush1.bf16.msra.mxu0 %v8602_v4  ;;  %1178 = vmatpush1.bf16.msra.mxu1 %v8606_v6 }
 0x120   :  { %1136 = vmatprep.subr.bf16.mxu0 %v8608_v7  ;;  %1179 = vmatprep.subr.bf16.mxu1 %v8611_v11 }
 0x123   :  { %1137 = vmatpush1.bf16.msra.mxu0 %v8614_v17  ;;  %1180 = vmatpush1.bf16.msra.mxu1 %v8618_v22 }
 0x124   :  { %1138 = vmatprep.subr.bf16.mxu0 %v8620_v23  ;;  %1181 = vmatprep.subr.bf16.mxu1 %v8623_v24 }
 0x127   :  { %1139 = vmatpush1.bf16.msra.mxu0 %v8626_v33  ;;  %1182 = vmatpush1.bf16.msra.mxu1 %v8630_v38  ;;  %v12987_v33 = vld [vmem:[#allocation68_spill] sm:$0xff]  ;;  %v12988_v38 = vld [vmem:[#allocation69_spill] sm:$0xff] }
 0x128   :  { %1140 = vmatprep.subr.bf16.mxu0 %v8632_v39  ;;  %1183 = vmatprep.subr.bf16.mxu1 %v8635_v40  ;;  %v12989_v39 = vld [vmem:[#allocation70_spill] sm:$0xff]  ;;  %v12990_v40 = vld [vmem:[#allocation71_spill] sm:$0xff] }
 0x12b   :  { %1141 = vmatpush1.bf16.msra.mxu0 %v12980_v55  ;;  %1184 = vmatpush1.bf16.msra.mxu1 %v12981_v25  ;;  %v12991_v55 = vld [vmem:[#allocation72_spill] sm:$0xff]  ;;  %v12992_v25 = vld [vmem:[#allocation73_spill] sm:$0xff] }
 0x12c   :  { %1142 = vmatprep.subr.bf16.mxu0 %v12982_v56  ;;  %1185 = vmatprep.subr.bf16.mxu1 %v12983_v47  ;;  %v12993_v56 = vld [vmem:[#allocation74_spill] sm:$0xff]  ;;  %v12994_v47 = vld [vmem:[#allocation75_spill] sm:$0xff] }
 0x12f   :  { %1143 = vmatpush1.bf16.msra.mxu0 %v12984_v41  ;;  %1186 = vmatpush1.bf16.msra.mxu1 %v12985_v32  ;;  %v12995_v41 = vld [vmem:[#allocation76_spill] sm:$0xff]  ;;  %v12996_v32 = vld [vmem:[#allocation77_spill] sm:$0xff] }
 0x130   :  { %1144 = vmatprep.subr.bf16.mxu0 %v12986_v48  ;;  %1187 = vmatprep.subr.bf16.mxu1 %v12987_v33  ;;  %v12997_v48 = vld [vmem:[#allocation78_spill] sm:$0xff]  ;;  %v12998_v33 = vld [vmem:[#allocation79_spill] sm:$0xff] }
 0x133   :  { %1145 = vmatpush1.bf16.msra.mxu0 %v12988_v38  ;;  %1188 = vmatpush1.bf16.msra.mxu1 %v12989_v39  ;;  %v12999_v38 = vld [vmem:[#allocation80_spill] sm:$0xff] }
 0x134   :  { %1146 = vmatprep.subr.bf16.mxu0 %v12990_v40  ;;  %1189 = vmatprep.subr.bf16.mxu1 %v12991_v55  ;;  %v8982_v55 = vld [vmem:[%s12126_s0 + $0x4] ss:$28 sps:$4 sm:$0xff]   ;;  %v13016_v40 = vld [vmem:[#allocation98_spill] sm:$0xff] }
 0x137   :  { %1147 = vmatpush1.bf16.msra.mxu0 %v12992_v25  ;;  %1190 = vmatpush1.bf16.msra.mxu1 %v12993_v56  ;;  %v13000_v25 = vld [vmem:[#allocation81_spill] sm:$0xff]  ;;  %v13001_v56 = vld [vmem:[#allocation82_spill] sm:$0xff] }
 0x138   :  { %1148 = vmatprep.subr.bf16.mxu0 %v12994_v47  ;;  %1191 = vmatprep.subr.bf16.mxu1 %v12995_v41  ;;  %v13002_v47 = vld [vmem:[#allocation83_spill] sm:$0xff]  ;;  %v13003_v41 = vld [vmem:[#allocation84_spill] sm:$0xff] }
 0x13b   :  { %1149 = vmatpush1.bf16.msra.mxu0 %v12996_v32  ;;  %1192 = vmatpush1.bf16.msra.mxu1 %v12997_v48  ;;  %v13006_v48 = vld [vmem:[#allocation88_spill] sm:$0xff]  ;;  %v13011_v32 = vld [vmem:[#allocation93_spill] sm:$0xff] }
 0x13c   :  { %1150 = vmatprep.subr.bf16.mxu0 %v12998_v33  ;;  %1193 = vmatprep.subr.bf16.mxu1 %v12999_v38  ;;  %v13004_v38 = vld [vmem:[#allocation86_spill] sm:$0xff]  ;;  %v13005_v33 = vld [vmem:[#allocation87_spill] sm:$0xff] }
 0x13f   :  { %1151 = vmatpush1.bf16.msra.mxu0 %v13000_v25  ;;  %1194 = vmatpush1.bf16.msra.mxu1 %v13001_v56  ;;  %v13007_v56 = vld [vmem:[#allocation89_spill] sm:$0xff]  ;;  %v13010_v25 = vld [vmem:[#allocation92_spill] sm:$0xff] }
 0x140   :  { %1206 = vmatprep.subr.bf16.mxu0 %v13002_v47  ;;  %1249 = vmatprep.subr.bf16.mxu1 %v13003_v41  ;;  %v13008_v47 = vld [vmem:[#allocation90_spill] sm:$0xff]  ;;  %v13009_v41 = vld [vmem:[#allocation91_spill] sm:$0xff] }
 0x142   :  { %1153 = vmatmul.mubr.bf16.vlgmr.msra.gmra.mrb[8].mxu0 %v8982_v55  ;;  %1196 = vmatmul.mubr.bf16.vlgmr.msra.gmra.mrb[8].mxu1 %v8982_v55 }
 0x143   :  { %1207 = vmatpush1.bf16.msra.mxu0 %v8715_v63  ;;  %1250 = vmatpush1.bf16.msra.mxu1 %v13004_v38  ;;  %v13012_v63 = vld [vmem:[#allocation94_spill] sm:$0xff]  ;;  %v13013_v38 = vld [vmem:[#allocation95_spill] sm:$0xff] }
 0x144   :  { %1208 = vmatprep.subr.bf16.mxu0 %v13005_v33  ;;  %1251 = vmatprep.subr.bf16.mxu1 %v13006_v48  ;;  %v13014_v33 = vld [vmem:[#allocation96_spill] sm:$0xff]  ;;  %v13015_v48 = vld [vmem:[#allocation97_spill] sm:$0xff] }
 0x145   :  { %1238 = vmatprep.mubr.bf16.mxu0 %v8913_v46  ;;  %1281 = vmatprep.mubr.bf16.mxu1 %v8913_v46  ;;  %v13017_v46 = vld [vmem:[#allocation99_spill] sm:$0xff] }
 0x147   :  { %1209 = vmatpush1.bf16.msra.mxu0 %v13007_v56  ;;  %1252 = vmatpush1.bf16.msra.mxu1 %v13008_v47  ;;  %v13018_v56 = vld [vmem:[#allocation100_spill] sm:$0xff]  ;;  %v13019_v47 = vld [vmem:[#allocation101_spill] sm:$0xff] }
 0x148   :  { %1210 = vmatprep.subr.bf16.mxu0 %v13009_v41  ;;  %1253 = vmatprep.subr.bf16.mxu1 %v13010_v25  ;;  %v13020_v41 = vld [vmem:[#allocation102_spill] sm:$0xff]  ;;  %v13021_v25 = vld [vmem:[#allocation103_spill] sm:$0xff] }
 0x14b   :  { %1211 = vmatpush1.bf16.msra.mxu0 %v13011_v32  ;;  %1254 = vmatpush1.bf16.msra.mxu1 %v13012_v63  ;;  %v13022_v32 = vld [vmem:[#allocation104_spill] sm:$0xff]  ;;  %v13023_v63 = vld [vmem:[#allocation105_spill] sm:$0xff] }
 0x14c   :  { %1212 = vmatprep.subr.bf16.mxu0 %v13013_v38  ;;  %1255 = vmatprep.subr.bf16.mxu1 %v13014_v33  ;;  %v13024_v38 = vld [vmem:[#allocation106_spill] sm:$0xff]  ;;  %v13025_v33 = vld [vmem:[#allocation107_spill] sm:$0xff] }
 0x14f   :  { %1213 = vmatpush1.bf16.msra.mxu0 %v13015_v48  ;;  %1256 = vmatpush1.bf16.msra.mxu1 %v13016_v40  ;;  %v13026_v48 = vld [vmem:[#allocation108_spill] sm:$0xff]  ;;  %v13027_v40 = vld [vmem:[#allocation109_spill] sm:$0xff] }
 0x150   :  { %1214 = vmatprep.subr.bf16.mxu0 %v13017_v46  ;;  %1257 = vmatprep.subr.bf16.mxu1 %v13018_v56  ;;  %v13028_v46 = vld [vmem:[#allocation110_spill] sm:$0xff]  ;;  %v13029_v56 = vld [vmem:[#allocation111_spill] sm:$0xff] }
 0x153   :  { %1215 = vmatpush1.bf16.msra.mxu0 %v13019_v47  ;;  %1258 = vmatpush1.bf16.msra.mxu1 %v13020_v41  ;;  %v13030_v47 = vld [vmem:[#allocation112_spill] sm:$0xff]  ;;  %v13031_v41 = vld [vmem:[#allocation113_spill] sm:$0xff] }
 0x154   :  { %1216 = vmatprep.subr.bf16.mxu0 %v13021_v25  ;;  %1259 = vmatprep.subr.bf16.mxu1 %v13022_v32  ;;  %v13032_v25 = vld [vmem:[#allocation114_spill] sm:$0xff]  ;;  %v13033_v32 = vld [vmem:[#allocation115_spill] sm:$0xff] }
 0x157   :  { %1217 = vmatpush1.bf16.msra.mxu0 %v13023_v63  ;;  %1260 = vmatpush1.bf16.msra.mxu1 %v13024_v38  ;;  %v13034_v63 = vld [vmem:[#allocation116_spill] sm:$0xff]  ;;  %v13035_v38 = vld [vmem:[#allocation117_spill] sm:$0xff] }
 0x158   :  { %1218 = vmatprep.subr.bf16.mxu0 %v13025_v33  ;;  %1261 = vmatprep.subr.bf16.mxu1 %v13026_v48  ;;  %v13036_v33 = vld [vmem:[#allocation118_spill] sm:$0xff]  ;;  %v13037_v48 = vld [vmem:[#allocation119_spill] sm:$0xff] }
 0x15b   :  { %1219 = vmatpush1.bf16.msra.mxu0 %v13027_v40  ;;  %1262 = vmatpush1.bf16.msra.mxu1 %v13028_v46  ;;  %v13038_v40 = vld [vmem:[#allocation120_spill] sm:$0xff]  ;;  %v13039_v46 = vld [vmem:[#allocation121_spill] sm:$0xff] }
 0x15c   :  { %1220 = vmatprep.subr.bf16.mxu0 %v13029_v56  ;;  %1263 = vmatprep.subr.bf16.mxu1 %v13030_v47  ;;  %v13040_v56 = vld [vmem:[#allocation122_spill] sm:$0xff]  ;;  %v13041_v47 = vld [vmem:[#allocation123_spill] sm:$0xff] }
 0x15f   :  { %1221 = vmatpush1.bf16.msra.mxu0 %v13031_v41  ;;  %1264 = vmatpush1.bf16.msra.mxu1 %v13032_v25  ;;  %v13042_v41 = vld [vmem:[#allocation124_spill] sm:$0xff]  ;;  %v13043_v25 = vld [vmem:[#allocation125_spill] sm:$0xff] }
 0x160   :  { %1222 = vmatprep.subr.bf16.mxu0 %v13033_v32  ;;  %1265 = vmatprep.subr.bf16.mxu1 %v13034_v63  ;;  %v13044_v32 = vld [vmem:[#allocation126_spill] sm:$0xff]  ;;  %v13045_v63 = vld [vmem:[#allocation127_spill] sm:$0xff] }
 0x163   :  { %1223 = vmatpush1.bf16.msra.mxu0 %v13035_v38  ;;  %1266 = vmatpush1.bf16.msra.mxu1 %v13036_v33  ;;  %v13046_v38 = vld [vmem:[#allocation128_spill] sm:$0xff]  ;;  %v13047_v33 = vld [vmem:[#allocation129_spill] sm:$0xff] }
 0x164   :  { %1224 = vmatprep.subr.bf16.mxu0 %v13037_v48  ;;  %1267 = vmatprep.subr.bf16.mxu1 %v13038_v40  ;;  %v13048_v48 = vld [vmem:[#allocation130_spill] sm:$0xff]  ;;  %v13049_v40 = vld [vmem:[#allocation131_spill] sm:$0xff] }
 0x167   :  { %1225 = vmatpush1.bf16.msra.mxu0 %v13039_v46  ;;  %1268 = vmatpush1.bf16.msra.mxu1 %v13040_v56  ;;  %v13050_v46 = vld [vmem:[#allocation132_spill] sm:$0xff] }
 0x168   :  { %1226 = vmatprep.subr.bf16.mxu0 %v13041_v47  ;;  %1269 = vmatprep.subr.bf16.mxu1 %v13042_v41 }
 0x16b   :  { %1227 = vmatpush1.bf16.msra.mxu0 %v13043_v25  ;;  %1270 = vmatpush1.bf16.msra.mxu1 %v13044_v32  ;;  %v13051_v25 = vld [vmem:[#allocation133_spill] sm:$0xff] }
 0x16c   :  { %1228 = vmatprep.subr.bf16.mxu0 %v13045_v63  ;;  %1271 = vmatprep.subr.bf16.mxu1 %v13046_v38 }
 0x16f   :  { %1229 = vmatpush1.bf16.msra.mxu0 %v13047_v33  ;;  %1272 = vmatpush1.bf16.msra.mxu1 %v13048_v48 }
 0x170   :  { %1230 = vmatprep.subr.bf16.mxu0 %v13049_v40  ;;  %1273 = vmatprep.subr.bf16.mxu1 %v13050_v46 }
 0x173   :  { %1231 = vmatpush1.bf16.msra.mxu0 %v8863_v0  ;;  %1274 = vmatpush1.bf16.msra.mxu1 %v8867_v57 }
 0x174   :  { %1232 = vmatprep.subr.bf16.mxu0 %v8869_v58  ;;  %1275 = vmatprep.subr.bf16.mxu1 %v13051_v25 }
 0x177   :  { %1233 = vmatpush1.bf16.msra.mxu0 %v8875_v15  ;;  %1276 = vmatpush1.bf16.msra.mxu1 %v8879_v49 }
 0x178   :  { %1234 = vmatprep.subr.bf16.mxu0 %v8881_v30  ;;  %1277 = vmatprep.subr.bf16.mxu1 %v8884_v12  ;;  %v9059_v12 = vld [vmem:[%s12126_s0 + $0xc] ss:$28 sps:$4 sm:$0xff]  }
 0x17b   :  { %1235 = vmatpush1.bf16.msra.mxu0 %v8887_v54  ;;  %1278 = vmatpush1.bf16.msra.mxu1 %v8891_v2 }
 0x17c   :  { %1236 = vmatprep.subr.bf16.mxu0 %v8893_v31  ;;  %1279 = vmatprep.subr.bf16.mxu1 %v8896_v13 }
 0x17f   :  { %1237 = vmatpush1.bf16.msra.mxu0 %v8899_v1  ;;  %1280 = vmatpush1.bf16.msra.mxu1 %v8903_v16 }
 0x180   :  { %1340 = vmatprep.subr.bf16.mxu0 %v8508_v3  ;;  %1383 = vmatprep.subr.bf16.mxu1 %v8512_v8 }
 0x182   :  { %1239 = vmatmul.mubr.bf16.vlgmr.msra.gmra.mrb[12].mxu0 %v8982_v55  ;;  %1282 = vmatmul.mubr.bf16.vlgmr.msra.gmra.mrb[12].mxu1 %v8982_v55 }
 0x183   :  { %1341 = vmatpush1.bf16.msra.mxu0 %v8510_v5  ;;  %1384 = vmatpush1.bf16.msra.mxu1 %v8514_v9 }
 0x184   :  { %1342 = vmatprep.subr.bf16.mxu0 %v8516_v10  ;;  %1385 = vmatprep.subr.bf16.mxu1 %v8519_v14 }
 0x185   :  { %1372 = vmatprep.mubr.bf16.mxu0 %v9059_v12  ;;  %1415 = vmatprep.mubr.bf16.mxu1 %v9059_v12 }
 0x187   :  { %1343 = vmatpush1.bf16.msra.mxu0 %v8523_v18  ;;  %1386 = vmatpush1.bf16.msra.mxu1 %v8527_v19 }
 0x188   :  { %1344 = vmatprep.subr.bf16.mxu0 %v8529_v20  ;;  %1387 = vmatprep.subr.bf16.mxu1 %v8532_v21 }
 0x18b   :  { %1345 = vmatpush1.bf16.msra.mxu0 %v8535_v26  ;;  %1388 = vmatpush1.bf16.msra.mxu1 %v8539_v27 }
 0x18c   :  { %1346 = vmatprep.subr.bf16.mxu0 %v8541_v28  ;;  %1389 = vmatprep.subr.bf16.mxu1 %v8544_v29 }
 0x18f   :  { %1347 = vmatpush1.bf16.msra.mxu0 %v8547_v34  ;;  %1390 = vmatpush1.bf16.msra.mxu1 %v8551_v35  ;;  %v13053_v35 = vld [vmem:[#allocation58_spill] sm:$0xff]  ;;  %v13108_v34 = vld [vmem:[#allocation109_spill] sm:$0xff] }
 0x190   :  { %1348 = vmatprep.subr.bf16.mxu0 %v8553_v36  ;;  %1391 = vmatprep.subr.bf16.mxu1 %v8556_v37 }
 0x193   :  { %1349 = vmatpush1.bf16.msra.mxu0 %v8559_v42  ;;  %1392 = vmatpush1.bf16.msra.mxu1 %v8563_v43 }
 0x194   :  { %1350 = vmatprep.subr.bf16.mxu0 %v8565_v44  ;;  %1393 = vmatprep.subr.bf16.mxu1 %v8568_v45  ;;  %v13054_v44 = vld [vmem:[#allocation59_spill] sm:$0xff] }
 0x195   :  { %v9084_v55 = vpop.f32.mrb[0].mxu0  ;;  %v9087_v28 = vpop.f32.mrb[0].mxu1 }
 0x196   :  { %v9089_v29 = vpop.f32.mrb[1].mxu0  ;;  %v9093_v36 = vpop.f32.mrb[1].mxu1 }
 0x197   :  { %v9095_v37 = vpop.f32.mrb[2].mxu0  ;;  %1351 = vmatpush1.bf16.msra.mxu0 %v8571_v50  ;;  %v9100_v43 = vpop.f32.mrb[2].mxu1  ;;  %1394 = vmatpush1.bf16.msra.mxu1 %v8575_v51  ;;  %v13052_v50 = vld [vmem:[#allocation57_spill] sm:$0xff] }
 0x198   :  { %v9103_v45 = vpop.f32.mrb[3].mxu0  ;;  %1352 = vmatprep.subr.bf16.mxu0 %v8577_v52  ;;  %v9108_v42 = vpop.f32.mrb[3].mxu1  ;;  %1395 = vmatprep.subr.bf16.mxu1 %v8580_v53 }
 0x19b   :  { %1353 = vmatpush1.bf16.msra.mxu0 %v8588_v59  ;;  %1396 = vmatpush1.bf16.msra.mxu1 %v8593_v60 }
 0x19c   :  { %1354 = vmatprep.subr.bf16.mxu0 %v8595_v61  ;;  %1397 = vmatprep.subr.bf16.mxu1 %v8598_v62 }
 0x19f   :  { %1355 = vmatpush1.bf16.msra.mxu0 %v8602_v4  ;;  %1398 = vmatpush1.bf16.msra.mxu1 %v8606_v6  ;;  %v13055_v4 = vld [vmem:[#allocation60_spill] sm:$0xff]  ;;  %v13056_v6 = vld [vmem:[#allocation61_spill] sm:$0xff] }
 0x1a0   :  { %1356 = vmatprep.subr.bf16.mxu0 %v8608_v7  ;;  %1399 = vmatprep.subr.bf16.mxu1 %v8611_v11  ;;  %v13057_v7 = vld [vmem:[#allocation62_spill] sm:$0xff]  ;;  %v13058_v11 = vld [vmem:[#allocation63_spill] sm:$0xff] }
 0x1a3   :  { %1357 = vmatpush1.bf16.msra.mxu0 %v8614_v17  ;;  %1400 = vmatpush1.bf16.msra.mxu1 %v8618_v22  ;;  %v13059_v17 = vld [vmem:[#allocation64_spill] sm:$0xff]  ;;  %v13060_v22 = vld [vmem:[#allocation65_spill] sm:$0xff] }
 0x1a4   :  { %1358 = vmatprep.subr.bf16.mxu0 %v8620_v23  ;;  %1401 = vmatprep.subr.bf16.mxu1 %v8623_v24  ;;  %v13061_v23 = vld [vmem:[#allocation66_spill] sm:$0xff]  ;;  %v13062_v24 = vld [vmem:[#allocation67_spill] sm:$0xff] }
 0x1a7   :  { %1359 = vmatpush1.bf16.msra.mxu0 %v13052_v50  ;;  %1402 = vmatpush1.bf16.msra.mxu1 %v13053_v35  ;;  %v13063_v50 = vld [vmem:[#allocation68_spill] sm:$0xff]  ;;  %v13064_v35 = vld [vmem:[#allocation69_spill] sm:$0xff] }
 0x1a8   :  { %1360 = vmatprep.subr.bf16.mxu0 %v13054_v44  ;;  %1403 = vmatprep.subr.bf16.mxu1 %v13055_v4  ;;  %v13065_v4 = vld [vmem:[#allocation71_spill] sm:$0xff]  ;;  %v13092_v44 = vld [vmem:[#allocation98_spill] sm:$0xff] }
 0x1ab   :  { %1361 = vmatpush1.bf16.msra.mxu0 %v13056_v6  ;;  %1404 = vmatpush1.bf16.msra.mxu1 %v13057_v7  ;;  %v13066_v6 = vld [vmem:[#allocation72_spill] sm:$0xff]  ;;  %v13067_v7 = vld [vmem:[#allocation73_spill] sm:$0xff] }
 0x1ac   :  { %1362 = vmatprep.subr.bf16.mxu0 %v13058_v11  ;;  %1405 = vmatprep.subr.bf16.mxu1 %v13059_v17  ;;  %v13068_v11 = vld [vmem:[#allocation74_spill] sm:$0xff]  ;;  %v13069_v17 = vld [vmem:[#allocation75_spill] sm:$0xff] }
 0x1af   :  { %1363 = vmatpush1.bf16.msra.mxu0 %v13060_v22  ;;  %1406 = vmatpush1.bf16.msra.mxu1 %v13061_v23  ;;  %v13070_v22 = vld [vmem:[#allocation76_spill] sm:$0xff]  ;;  %v13071_v23 = vld [vmem:[#allocation77_spill] sm:$0xff] }
 0x1b0   :  { %1364 = vmatprep.subr.bf16.mxu0 %v13062_v24  ;;  %1407 = vmatprep.subr.bf16.mxu1 %v13063_v50  ;;  %v13072_v24 = vld [vmem:[#allocation78_spill] sm:$0xff]  ;;  %v13073_v50 = vld [vmem:[#allocation79_spill] sm:$0xff] }
 0x1b3   :  { %1365 = vmatpush1.bf16.msra.mxu0 %v13064_v35  ;;  %1408 = vmatpush1.bf16.msra.mxu1 %v12989_v39  ;;  %v13074_v35 = vld [vmem:[#allocation80_spill] sm:$0xff]  ;;  %v13091_v39 = vld [vmem:[#allocation97_spill] sm:$0xff] }
 0x1b4   :  { %1366 = vmatprep.subr.bf16.mxu0 %v13065_v4  ;;  %1409 = vmatprep.subr.bf16.mxu1 %v13066_v6  ;;  %v9152_v6 = vld [vmem:[%s12126_s0 + $0x8] ss:$28 sps:$4 sm:$0xff]  }
 0x1b5   :  { %v13087_v4 = vld [vmem:[#allocation93_spill] sm:$0xff] }
 0x1b7   :  { %1367 = vmatpush1.bf16.msra.mxu0 %v13067_v7  ;;  %1410 = vmatpush1.bf16.msra.mxu1 %v13068_v11  ;;  %v13075_v7 = vld [vmem:[#allocation81_spill] sm:$0xff]  ;;  %v13076_v11 = vld [vmem:[#allocation82_spill] sm:$0xff] }
 0x1b8   :  { %1368 = vmatprep.subr.bf16.mxu0 %v13069_v17  ;;  %1411 = vmatprep.subr.bf16.mxu1 %v13070_v22  ;;  %v13077_v17 = vld [vmem:[#allocation83_spill] sm:$0xff]  ;;  %v13078_v22 = vld [vmem:[#allocation84_spill] sm:$0xff] }
 0x1bb   :  { %1369 = vmatpush1.bf16.msra.mxu0 %v13071_v23  ;;  %1412 = vmatpush1.bf16.msra.mxu1 %v13072_v24  ;;  %v13081_v24 = vld [vmem:[#allocation87_spill] sm:$0xff]  ;;  %v13082_v23 = vld [vmem:[#allocation88_spill] sm:$0xff] }
 0x1bc   :  { %1370 = vmatprep.subr.bf16.mxu0 %v13073_v50  ;;  %1413 = vmatprep.subr.bf16.mxu1 %v13074_v35  ;;  %v13079_v50 = vld [vmem:[#allocation85_spill] sm:$0xff]  ;;  %v13080_v35 = vld [vmem:[#allocation86_spill] sm:$0xff] }
 0x1bf   :  { %1371 = vmatpush1.bf16.msra.mxu0 %v13075_v7  ;;  %1414 = vmatpush1.bf16.msra.mxu1 %v13076_v11  ;;  %v13083_v11 = vld [vmem:[#allocation89_spill] sm:$0xff]  ;;  %v13086_v7 = vld [vmem:[#allocation92_spill] sm:$0xff] }
 0x1c0   :  { %1426 = vmatprep.subr.bf16.mxu0 %v13077_v17  ;;  %1469 = vmatprep.subr.bf16.mxu1 %v13078_v22  ;;  %v13084_v17 = vld [vmem:[#allocation90_spill] sm:$0xff]  ;;  %v13085_v22 = vld [vmem:[#allocation91_spill] sm:$0xff] }
 0x1c2   :  { %1373 = vmatmul.mubr.bf16.vlgmr.msra.gmra.mrb[16].mxu0 %v9152_v6  ;;  %1416 = vmatmul.mubr.bf16.vlgmr.msra.gmra.mrb[16].mxu1 %v9152_v6 }
 0x1c3   :  { %1427 = vmatpush1.bf16.msra.mxu0 %v13079_v50  ;;  %1470 = vmatpush1.bf16.msra.mxu1 %v13080_v35  ;;  %v1086_v50 = vlaneseq  ;;  %v13088_v35 = vld [vmem:[#allocation94_spill] sm:$0xff] }
 0x1c4   :  { %1428 = vmatprep.subr.bf16.mxu0 %v13081_v24  ;;  %1471 = vmatprep.subr.bf16.mxu1 %v13082_v23  ;;  %v13089_v24 = vld [vmem:[#allocation95_spill] sm:$0xff]  ;;  %v13090_v23 = vld [vmem:[#allocation96_spill] sm:$0xff] }
 0x1c5   :  { %1458 = vmatprep.mubr.bf16.mxu0 %v9059_v12  ;;  %1501 = vmatprep.mubr.bf16.mxu1 %v9059_v12  ;;  %v1087_v12 = vshrl.u32 %v1086_v50, 7 }
 0x1c7   :  { %1429 = vmatpush1.bf16.msra.mxu0 %v13083_v11  ;;  %1472 = vmatpush1.bf16.msra.mxu1 %v13084_v17  ;;  %v13093_v11 = vld [vmem:[#allocation99_spill] sm:$0xff]  ;;  %v13094_v17 = vld [vmem:[#allocation100_spill] sm:$0xff]  ;;  %v9182_v62 = vsub.s32 1, %v1087_v12 }
 0x1c8   :  { %1430 = vmatprep.subr.bf16.mxu0 %v13085_v22  ;;  %1473 = vmatprep.subr.bf16.mxu1 %v13086_v7  ;;  %v13095_v22 = vld [vmem:[#allocation101_spill] sm:$0xff]  ;;  %v9179_v7 = vsub.s32 0, %v1087_v12  ;;  %v13102_v12 = vld [vmem:[#allocation106_spill] sm:$0xff] }
 0x1c9   :  { %13098 = vst [vmem:[#allocation123_spill] sm:$0xff] %v9182_v62 }
 0x1ca   :  { %13096 = vst [vmem:[#allocation122_spill] sm:$0xff] %v9179_v7 }
 0x1cb   :  { %1431 = vmatpush1.bf16.msra.mxu0 %v13087_v4  ;;  %1474 = vmatpush1.bf16.msra.mxu1 %v13088_v35  ;;  %v13097_v4 = vld [vmem:[#allocation102_spill] sm:$0xff]  ;;  %v1084_v35 = vld [vmem:[#allocation6] sm:$0x3] }
 0x1cc   :  { %1432 = vmatprep.subr.bf16.mxu0 %v13089_v24  ;;  %1475 = vmatprep.subr.bf16.mxu1 %v13090_v23  ;;  %v13099_v24 = vld [vmem:[#allocation103_spill] sm:$0xff] }
 0x1cf   :  { %1433 = vmatpush1.bf16.msra.mxu0 %v13091_v39  ;;  %1476 = vmatpush1.bf16.msra.mxu1 %v13092_v44  ;;  %v13100_v39 = vld [vmem:[#allocation104_spill] sm:$0xff] }
 0x1d0   :  { %1434 = vmatprep.subr.bf16.mxu0 %v13093_v11  ;;  %1477 = vmatprep.subr.bf16.mxu1 %v13094_v17  ;;  %v1089_v11 = vrot.slane %v1084_v35, %v9179_v7  ;;  %v13105_v7 = vld [vmem:[#allocation108_spill] sm:$0xff] }
 0x1d3   :  { %1435 = vmatpush1.bf16.msra.mxu0 %v13095_v22  ;;  %1478 = vmatpush1.bf16.msra.mxu1 %v13097_v4  ;;  %v13101_v22 = vld [vmem:[#allocation105_spill] sm:$0xff]  ;;  %v1093_v4 = vrot.slane %v1084_v35, %v9182_v62 }
 0x1d4   :  { %1436 = vmatprep.subr.bf16.mxu0 %v13099_v24  ;;  %1479 = vmatprep.subr.bf16.mxu1 %v13100_v39  ;;  %v13103_v24 = vld [vmem:[#allocation107_spill] sm:$0xff]  ;;  %v13104_v39 = vmax.f32 %v9084_v55, %v9087_v28  ;;  %v13109_v28 = vmax.f32 %v9103_v45, %v9108_v42  ;;  %v13117_v45 = vld [vmem:[#allocation116_spill] sm:$0xff] }
 0x1d5   :  { %v1020_v23 = vpop.f32.mrb[4].mxu0  ;;  %v1063_v50 = vpop.f32.mrb[4].mxu1  ;;  %v13115_v55 = vld [vmem:[#allocation115_spill] sm:$0xff] }
 0x1d6   :  { %v1022_v44 = vpop.f32.mrb[5].mxu0  ;;  %v1076_v61 = vmax.f32 %v1020_v23, %v1063_v50  ;;  %v1065_v17 = vpop.f32.mrb[5].mxu1 }
 0x1d7   :  { %v1024_v60 = vpop.f32.mrb[6].mxu0  ;;  %1437 = vmatpush1.bf16.msra.mxu0 %v13101_v22  ;;  %v1077_v59 = vmax.f32 %v1022_v44, %v1065_v17  ;;  %v1067_v53 = vpop.f32.mrb[6].mxu1  ;;  %1480 = vmatpush1.bf16.msra.mxu1 %v13102_v12  ;;  %v13106_v22 = vmax.f32 %v9089_v29, %v9093_v36  ;;  %v13107_v12 = vmax.f32 %v9095_v37, %v9100_v43  ;;  %v13112_v29 = vld [vmem:[#allocation112_spill] sm:$0xff] }
 0x1d8   :  { %v1026_v52 = vpop.f32.mrb[7].mxu0  ;;  %1438 = vmatprep.subr.bf16.mxu0 %v13103_v24  ;;  %v1080_v51 = vmax.f32 %v13104_v39, %v1076_v61  ;;  %v1078_v23 = vmax.f32 %v1024_v60, %v1067_v53  ;;  %v1069_v50 = vpop.f32.mrb[7].mxu1  ;;  %1481 = vmatprep.subr.bf16.mxu1 %v13105_v7  ;;  %v13110_v60 = vld [vmem:[#allocation110_spill] sm:$0xff]  ;;  %v13111_v61 = vld [vmem:[#allocation111_spill] sm:$0xff] }
 0x1d9   :  { %v1081_v44 = vmax.f32 %v13106_v22, %v1077_v59  ;;  %v1079_v17 = vmax.f32 %v1026_v52, %v1069_v50  ;;  %v13113_v59 = vld [vmem:[#allocation113_spill] sm:$0xff]  ;;  %v13114_v22 = vld [vmem:[#allocation114_spill] sm:$0xff] }
 0x1da   :  { %v1096_v35 = vadd.f32 %v1089_v11, %v1080_v51  ;;  %v1082_v62 = vmax.f32 %v13107_v12, %v1078_v23  ;;  %v13122_v23 = vld [vmem:[#allocation120_spill] sm:$0xff]  ;;  %v13124_v50 = vld [vmem:[#allocation125_spill] sm:$0xff] }
 0x1db   :  { %1439 = vmatpush1.bf16.msra.mxu0 %v13108_v34  ;;  %v1097_v24 = vadd.f32 %v1093_v4, %v1081_v44  ;;  %v1083_v53 = vmax.f32 %v13109_v28, %v1079_v17  ;;  %1482 = vmatpush1.bf16.msra.mxu1 %v13110_v60  ;;  %v13125_v44 = vld [vmem:[#allocation134_spill] sm:$0xff]  ;;  %v13128_v28 = vld [vmem:[#allocation33_spill] sm:$0xff] }
 0x1dc   :  { %1440 = vmatprep.subr.bf16.mxu0 %v13111_v61  ;;  %v1098_v39 = vadd.f32 %v1089_v11, %v1082_v62  ;;  %1483 = vmatprep.subr.bf16.mxu1 %v13112_v29  ;;  %v1100_v51 = vmax.f32 %v1096_v35, 0.0  ;;  %v13119_v62 = vld [vmem:[#allocation117_spill] sm:$0xff]  ;;  %v13120_v11 = vld [vmem:[#allocation118_spill] sm:$0xff]  ;;  %v13127_v35 = vld [vmem:[#allocation32_spill] sm:$0xff] }
 0x1dd   :  { %v1099_v36 = vadd.f32 %v1093_v4, %v1083_v53  ;;  %v1101_v37 = vmax.f32 %v1097_v24, 0.0  ;;  %v13121_v4 = vld [vmem:[#allocation119_spill] sm:$0xff]  ;;  %v13123_v24 = vld [vmem:[#allocation121_spill] sm:$0xff]  ;;  %v9251_v17 = vld [vmem:[%s12126_s0 + $0x10] ss:$28 sps:$4 sm:$0xff]  }
 0x1de   :  { %v1102_v52 = vmax.f32 %v1098_v39, 0.0  ;;  %v13129_v53 = vld [vmem:[#allocation34_spill] sm:$0xff]  ;;  %v13130_v39 = vld [vmem:[#allocation35_spill] sm:$0xff] }
 0x1df   :  { %1441 = vmatpush1.bf16.msra.mxu0 %v13113_v59  ;;  %v1103_v43 = vmax.f32 %v1099_v36, 0.0  ;;  %1484 = vmatpush1.bf16.msra.mxu1 %v13114_v22  ;;  %v13131_v36 = vld [vmem:[#allocation36_spill] sm:$0xff] }
 0x1e0   :  { %1442 = vmatprep.subr.bf16.mxu0 %v13115_v55  ;;  %v9211_v42 = vpack.c.bf16 %v1102_v52, %v1100_v51  ;;  %1485 = vmatprep.subr.bf16.mxu1 %v13117_v45  ;;  %v13132_v51 = vld [vmem:[#allocation37_spill] sm:$0xff]  ;;  %v13133_v52 = vld [vmem:[#allocation38_spill] sm:$0xff] }
 0x1e1   :  { %v9214_v12 = vpack.c.bf16 %v1103_v43, %v1101_v37  ;;  %v13134_v37 = vld [vmem:[#allocation39_spill] sm:$0xff] }
 0x1e2   :  { %13116 = vst [vmem:[#allocation124_spill] sm:$0xff] %v9211_v42  ;;  %v13135_v42 = vld [vmem:[#allocation40_spill] sm:$0xff] }
 0x1e3   :  { %13118 = vst [vmem:[#allocation126_spill] sm:$0xff] %v9214_v12  ;;  %1443 = vmatpush1.bf16.msra.mxu0 %v13119_v62  ;;  %1486 = vmatpush1.bf16.msra.mxu1 %v13120_v11 }
 0x1e4   :  { %1444 = vmatprep.subr.bf16.mxu0 %v13121_v4  ;;  %1487 = vmatprep.subr.bf16.mxu1 %v13122_v23 }
 0x1e7   :  { %1445 = vmatpush1.bf16.msra.mxu0 %v13123_v24  ;;  %1488 = vmatpush1.bf16.msra.mxu1 %v13040_v56 }
 0x1e8   :  { %1446 = vmatprep.subr.bf16.mxu0 %v13041_v47  ;;  %1489 = vmatprep.subr.bf16.mxu1 %v13042_v41 }
 0x1eb   :  { %1447 = vmatpush1.bf16.msra.mxu0 %v13124_v50  ;;  %1490 = vmatpush1.bf16.msra.mxu1 %v13044_v32 }
 0x1ec   :  { %1448 = vmatprep.subr.bf16.mxu0 %v13045_v63  ;;  %1491 = vmatprep.subr.bf16.mxu1 %v13046_v38 }
 0x1ef   :  { %1449 = vmatpush1.bf16.msra.mxu0 %v13047_v33  ;;  %1492 = vmatpush1.bf16.msra.mxu1 %v13048_v48 }
 0x1f0   :  { %1450 = vmatprep.subr.bf16.mxu0 %v13049_v40  ;;  %1493 = vmatprep.subr.bf16.mxu1 %v13050_v46 }
 0x1f3   :  { %1451 = vmatpush1.bf16.msra.mxu0 %v8863_v0  ;;  %1494 = vmatpush1.bf16.msra.mxu1 %v8867_v57 }
 0x1f4   :  { %1452 = vmatprep.subr.bf16.mxu0 %v8869_v58  ;;  %1495 = vmatprep.subr.bf16.mxu1 %v13051_v25 }
 0x1f7   :  { %1453 = vmatpush1.bf16.msra.mxu0 %v8875_v15  ;;  %1496 = vmatpush1.bf16.msra.mxu1 %v8879_v49 }
 0x1f8   :  { %1454 = vmatprep.subr.bf16.mxu0 %v8881_v30  ;;  %1497 = vmatprep.subr.bf16.mxu1 %v13125_v44 }
 0x1fb   :  { %1455 = vmatpush1.bf16.msra.mxu0 %v8887_v54  ;;  %1498 = vmatpush1.bf16.msra.mxu1 %v8891_v2 }
 0x1fc   :  { %1456 = vmatprep.subr.bf16.mxu0 %v8893_v31  ;;  %1499 = vmatprep.subr.bf16.mxu1 %v8896_v13 }
 0x1ff   :  { %1457 = vmatpush1.bf16.msra.mxu0 %v8899_v1  ;;  %1500 = vmatpush1.bf16.msra.mxu1 %v8903_v16 }
 0x200   :  { %1560 = vmatprep.subr.bf16.mxu0 %v8508_v3  ;;  %1603 = vmatprep.subr.bf16.mxu1 %v8512_v8  ;;  %v13203_v8 = vld [vmem:[#allocation123_spill] sm:$0xff] }
 0x202   :  { %1459 = vmatmul.mubr.bf16.vlgmr.msra.gmra.mrb[20].mxu0 %v9152_v6  ;;  %1502 = vmatmul.mubr.bf16.vlgmr.msra.gmra.mrb[20].mxu1 %v9152_v6  ;;  %v13126_v6 = vld [vmem:[#allocation31_spill] sm:$0xff] }
 0x203   :  { %1561 = vmatpush1.bf16.msra.mxu0 %v8510_v5  ;;  %1604 = vmatpush1.bf16.msra.mxu1 %v8514_v9 }
 0x204   :  { %1562 = vmatprep.subr.bf16.mxu0 %v8516_v10  ;;  %1605 = vmatprep.subr.bf16.mxu1 %v8519_v14  ;;  %v13149_v14 = vld [vmem:[#allocation54_spill] sm:$0xff]  ;;  %v13200_v10 = vld [vmem:[#allocation104_spill] sm:$0xff] }
 0x205   :  { %1592 = vmatprep.mubr.bf16.mxu0 %v9251_v17  ;;  %1635 = vmatprep.mubr.bf16.mxu1 %v9251_v17 }
 0x207   :  { %1563 = vmatpush1.bf16.msra.mxu0 %v8523_v18  ;;  %1606 = vmatpush1.bf16.msra.mxu1 %v8527_v19  ;;  %v13144_v19 = vld [vmem:[#allocation49_spill] sm:$0xff]  ;;  %v13147_v18 = vld [vmem:[#allocation52_spill] sm:$0xff] }
 0x208   :  { %1564 = vmatprep.subr.bf16.mxu0 %v8529_v20  ;;  %1607 = vmatprep.subr.bf16.mxu1 %v8532_v21  ;;  %v13140_v21 = vld [vmem:[#allocation45_spill] sm:$0xff]  ;;  %v13142_v20 = vld [vmem:[#allocation47_spill] sm:$0xff] }
 0x20b   :  { %1565 = vmatpush1.bf16.msra.mxu0 %v8535_v26  ;;  %1608 = vmatpush1.bf16.msra.mxu1 %v8539_v27  ;;  %v13139_v26 = vld [vmem:[#allocation44_spill] sm:$0xff] }
 0x20c   :  { %1566 = vmatprep.subr.bf16.mxu0 %v13126_v6  ;;  %1609 = vmatprep.subr.bf16.mxu1 %v13127_v35  ;;  %v13138_v6 = vld [vmem:[#allocation43_spill] sm:$0xff] }
 0x20f   :  { %1567 = vmatpush1.bf16.msra.mxu0 %v13128_v28  ;;  %1610 = vmatpush1.bf16.msra.mxu1 %v13129_v53  ;;  %v13137_v28 = vld [vmem:[#allocation42_spill] sm:$0xff]  ;;  %v13146_v53 = vld [vmem:[#allocation51_spill] sm:$0xff] }
 0x210   :  { %1568 = vmatprep.subr.bf16.mxu0 %v13130_v39  ;;  %1611 = vmatprep.subr.bf16.mxu1 %v13131_v36 }
 0x213   :  { %1569 = vmatpush1.bf16.msra.mxu0 %v13132_v51  ;;  %1612 = vmatpush1.bf16.msra.mxu1 %v13133_v52  ;;  %v13136_v51 = vld [vmem:[#allocation41_spill] sm:$0xff] }
 0x214   :  { %1570 = vmatprep.subr.bf16.mxu0 %v13134_v37  ;;  %1613 = vmatprep.subr.bf16.mxu1 %v13135_v42  ;;  %v13141_v37 = vld [vmem:[#allocation46_spill] sm:$0xff] }
 0x215   :  { %v9276_v43 = vpop.f32.mrb[8].mxu0  ;;  %v9279_v12 = vpop.f32.mrb[8].mxu1 }
 0x216   :  { %v9281_v35 = vpop.f32.mrb[9].mxu0  ;;  %v9285_v39 = vpop.f32.mrb[9].mxu1 }
 0x217   :  { %v9287_v36 = vpop.f32.mrb[10].mxu0  ;;  %1571 = vmatpush1.bf16.msra.mxu0 %v13136_v51  ;;  %v9292_v52 = vpop.f32.mrb[10].mxu1  ;;  %1614 = vmatpush1.bf16.msra.mxu1 %v13137_v28  ;;  %v13143_v28 = vld [vmem:[#allocation48_spill] sm:$0xff]  ;;  %v13150_v51 = vld [vmem:[#allocation55_spill] sm:$0xff] }
 0x218   :  { %v9295_v42 = vpop.f32.mrb[11].mxu0  ;;  %1572 = vmatprep.subr.bf16.mxu0 %v13138_v6  ;;  %v9300_v27 = vpop.f32.mrb[11].mxu1  ;;  %1615 = vmatprep.subr.bf16.mxu1 %v13139_v26  ;;  %v13145_v6 = vld [vmem:[#allocation50_spill] sm:$0xff]  ;;  %v13148_v26 = vld [vmem:[#allocation53_spill] sm:$0xff] }
 0x21b   :  { %1573 = vmatpush1.bf16.msra.mxu0 %v13140_v21  ;;  %1616 = vmatpush1.bf16.msra.mxu1 %v13141_v37  ;;  %v13151_v21 = vld [vmem:[#allocation56_spill] sm:$0xff]  ;;  %v13152_v37 = vld [vmem:[#allocation57_spill] sm:$0xff] }
 0x21c   :  { %1574 = vmatprep.subr.bf16.mxu0 %v13142_v20  ;;  %1617 = vmatprep.subr.bf16.mxu1 %v13143_v28  ;;  %v13153_v20 = vld [vmem:[#allocation58_spill] sm:$0xff]  ;;  %v13154_v28 = vld [vmem:[#allocation59_spill] sm:$0xff] }
 0x21f   :  { %1575 = vmatpush1.bf16.msra.mxu0 %v13144_v19  ;;  %1618 = vmatpush1.bf16.msra.mxu1 %v13145_v6  ;;  %v13155_v19 = vld [vmem:[#allocation60_spill] sm:$0xff]  ;;  %v13156_v6 = vld [vmem:[#allocation61_spill] sm:$0xff] }
 0x220   :  { %1576 = vmatprep.subr.bf16.mxu0 %v13146_v53  ;;  %1619 = vmatprep.subr.bf16.mxu1 %v13147_v18  ;;  %v13157_v53 = vld [vmem:[#allocation62_spill] sm:$0xff]  ;;  %v13158_v18 = vld [vmem:[#allocation63_spill] sm:$0xff] }
 0x223   :  { %1577 = vmatpush1.bf16.msra.mxu0 %v13148_v26  ;;  %1620 = vmatpush1.bf16.msra.mxu1 %v13149_v14  ;;  %v13159_v26 = vld [vmem:[#allocation64_spill] sm:$0xff]  ;;  %v13160_v14 = vld [vmem:[#allocation65_spill] sm:$0xff] }
 0x224   :  { %1578 = vmatprep.subr.bf16.mxu0 %v13150_v51  ;;  %1621 = vmatprep.subr.bf16.mxu1 %v13151_v21  ;;  %v13161_v51 = vld [vmem:[#allocation66_spill] sm:$0xff]  ;;  %v13162_v21 = vld [vmem:[#allocation67_spill] sm:$0xff] }
 0x227   :  { %1579 = vmatpush1.bf16.msra.mxu0 %v13152_v37  ;;  %1622 = vmatpush1.bf16.msra.mxu1 %v13153_v20  ;;  %v13163_v37 = vld [vmem:[#allocation68_spill] sm:$0xff]  ;;  %v13164_v20 = vld [vmem:[#allocation69_spill] sm:$0xff] }
 0x228   :  { %1580 = vmatprep.subr.bf16.mxu0 %v13154_v28  ;;  %1623 = vmatprep.subr.bf16.mxu1 %v13155_v19  ;;  %v13165_v28 = vld [vmem:[#allocation70_spill] sm:$0xff]  ;;  %v13166_v19 = vld [vmem:[#allocation71_spill] sm:$0xff] }
 0x22b   :  { %1581 = vmatpush1.bf16.msra.mxu0 %v13156_v6  ;;  %1624 = vmatpush1.bf16.msra.mxu1 %v13157_v53  ;;  %v13167_v6 = vld [vmem:[#allocation72_spill] sm:$0xff]  ;;  %v13168_v53 = vld [vmem:[#allocation73_spill] sm:$0xff] }
 0x22c   :  { %1582 = vmatprep.subr.bf16.mxu0 %v13158_v18  ;;  %1625 = vmatprep.subr.bf16.mxu1 %v13159_v26  ;;  %v13169_v18 = vld [vmem:[#allocation74_spill] sm:$0xff]  ;;  %v13170_v26 = vld [vmem:[#allocation75_spill] sm:$0xff] }
 0x22f   :  { %1583 = vmatpush1.bf16.msra.mxu0 %v13160_v14  ;;  %1626 = vmatpush1.bf16.msra.mxu1 %v13161_v51  ;;  %v13171_v14 = vld [vmem:[#allocation76_spill] sm:$0xff]  ;;  %v13172_v51 = vld [vmem:[#allocation77_spill] sm:$0xff] }
 0x230   :  { %1584 = vmatprep.subr.bf16.mxu0 %v13162_v21  ;;  %1627 = vmatprep.subr.bf16.mxu1 %v13163_v37  ;;  %v13173_v21 = vld [vmem:[#allocation78_spill] sm:$0xff]  ;;  %v13174_v37 = vld [vmem:[#allocation79_spill] sm:$0xff] }
 0x233   :  { %1585 = vmatpush1.bf16.msra.mxu0 %v13164_v20  ;;  %1628 = vmatpush1.bf16.msra.mxu1 %v13165_v28  ;;  %v13175_v20 = vld [vmem:[#allocation80_spill] sm:$0xff]  ;;  %v13194_v28 = vld [vmem:[#allocation98_spill] sm:$0xff] }
 0x234   :  { %1586 = vmatprep.subr.bf16.mxu0 %v13166_v19  ;;  %1629 = vmatprep.subr.bf16.mxu1 %v13167_v6  ;;  %v9344_v6 = vld [vmem:[%s12126_s0 + $0xc] ss:$28 sps:$4 sm:$0xff]  }
 0x235   :  { %13176 = vst [vmem:[#allocation127_spill] sm:$0xff] %v9344_v6  ;;  %v13189_v19 = vld [vmem:[#allocation93_spill] sm:$0xff] }
 0x237   :  { %1587 = vmatpush1.bf16.msra.mxu0 %v13168_v53  ;;  %1630 = vmatpush1.bf16.msra.mxu1 %v13169_v18  ;;  %v13177_v53 = vld [vmem:[#allocation81_spill] sm:$0xff]  ;;  %v13178_v18 = vld [vmem:[#allocation82_spill] sm:$0xff] }
 0x238   :  { %1588 = vmatprep.subr.bf16.mxu0 %v13170_v26  ;;  %1631 = vmatprep.subr.bf16.mxu1 %v13171_v14  ;;  %v13179_v26 = vld [vmem:[#allocation83_spill] sm:$0xff]  ;;  %v13180_v14 = vld [vmem:[#allocation84_spill] sm:$0xff] }
 0x23b   :  { %1589 = vmatpush1.bf16.msra.mxu0 %v13172_v51  ;;  %1632 = vmatpush1.bf16.msra.mxu1 %v13173_v21  ;;  %v13183_v21 = vld [vmem:[#allocation87_spill] sm:$0xff]  ;;  %v13184_v51 = vld [vmem:[#allocation88_spill] sm:$0xff] }
 0x23c   :  { %1590 = vmatprep.subr.bf16.mxu0 %v13174_v37  ;;  %1633 = vmatprep.subr.bf16.mxu1 %v13175_v20  ;;  %v13181_v37 = vld [vmem:[#allocation85_spill] sm:$0xff]  ;;  %v13182_v20 = vld [vmem:[#allocation86_spill] sm:$0xff] }
 0x23f   :  { %1591 = vmatpush1.bf16.msra.mxu0 %v13177_v53  ;;  %1634 = vmatpush1.bf16.msra.mxu1 %v13178_v18  ;;  %v13185_v18 = vld [vmem:[#allocation89_spill] sm:$0xff]  ;;  %v13188_v53 = vld [vmem:[#allocation92_spill] sm:$0xff] }
 0x240   :  { %1646 = vmatprep.subr.bf16.mxu0 %v13179_v26  ;;  %1689 = vmatprep.subr.bf16.mxu1 %v13180_v14  ;;  %v13186_v26 = vld [vmem:[#allocation90_spill] sm:$0xff]  ;;  %v13187_v14 = vld [vmem:[#allocation91_spill] sm:$0xff] }
 0x242   :  { %1593 = vmatmul.mubr.bf16.vlgmr.msra.gmra.mrb[24].mxu0 %v9344_v6  ;;  %1636 = vmatmul.mubr.bf16.vlgmr.msra.gmra.mrb[24].mxu1 %v9344_v6 }
 0x243   :  { %1647 = vmatpush1.bf16.msra.mxu0 %v13181_v37  ;;  %1690 = vmatpush1.bf16.msra.mxu1 %v13182_v20  ;;  %v13190_v37 = vld [vmem:[#allocation94_spill] sm:$0xff]  ;;  %v13191_v20 = vld [vmem:[#allocation95_spill] sm:$0xff] }
 0x244   :  { %1648 = vmatprep.subr.bf16.mxu0 %v13183_v21  ;;  %1691 = vmatprep.subr.bf16.mxu1 %v13184_v51  ;;  %v13192_v21 = vld [vmem:[#allocation96_spill] sm:$0xff]  ;;  %v13193_v51 = vld [vmem:[#allocation97_spill] sm:$0xff] }
 0x245   :  { %1678 = vmatprep.mubr.bf16.mxu0 %v9251_v17  ;;  %1721 = vmatprep.mubr.bf16.mxu1 %v9251_v17  ;;  %v13195_v17 = vld [vmem:[#allocation99_spill] sm:$0xff] }
 0x247   :  { %1649 = vmatpush1.bf16.msra.mxu0 %v13185_v18  ;;  %1692 = vmatpush1.bf16.msra.mxu1 %v13186_v26  ;;  %v13196_v18 = vld [vmem:[#allocation100_spill] sm:$0xff]  ;;  %v13197_v26 = vld [vmem:[#allocation101_spill] sm:$0xff] }
 0x248   :  { %1650 = vmatprep.subr.bf16.mxu0 %v13187_v14  ;;  %1693 = vmatprep.subr.bf16.mxu1 %v13188_v53  ;;  %v13198_v14 = vld [vmem:[#allocation102_spill] sm:$0xff]  ;;  %v1304_v53 = vld [vmem:[#allocation6 + $0x2] sm:$0x3] }
 0x24b   :  { %1651 = vmatpush1.bf16.msra.mxu0 %v13189_v19  ;;  %1694 = vmatpush1.bf16.msra.mxu1 %v13190_v37  ;;  %v13199_v19 = vld [vmem:[#allocation103_spill] sm:$0xff] }
 0x24c   :  { %1652 = vmatprep.subr.bf16.mxu0 %v13191_v20  ;;  %1695 = vmatprep.subr.bf16.mxu1 %v13192_v21 }
 0x24f   :  { %1653 = vmatpush1.bf16.msra.mxu0 %v13193_v51  ;;  %1696 = vmatpush1.bf16.msra.mxu1 %v13194_v28  ;;  %v13201_v51 = vld [vmem:[#allocation122_spill] sm:$0xff] }
 0x250   :  { %1654 = vmatprep.subr.bf16.mxu0 %v13195_v17  ;;  %1697 = vmatprep.subr.bf16.mxu1 %v13196_v18  ;;  %v1309_v5 = vrot.slane %v1304_v53, %v13201_v51  ;;  %v13202_v17 = vld [vmem:[#allocation105_spill] sm:$0xff] }
 0x253   :  { %1655 = vmatpush1.bf16.msra.mxu0 %v13197_v26  ;;  %1698 = vmatpush1.bf16.msra.mxu1 %v13198_v14  ;;  %v1313_v26 = vrot.slane %v1304_v53, %v13203_v8  ;;  %v13204_v14 = vld [vmem:[#allocation106_spill] sm:$0xff] }
 0x254   :  { %1656 = vmatprep.subr.bf16.mxu0 %v13199_v19  ;;  %1699 = vmatprep.subr.bf16.mxu1 %v13200_v10  ;;  %v13205_v19 = vld [vmem:[#allocation107_spill] sm:$0xff]  ;;  %v13206_v10 = vmax.f32 %v9276_v43, %v9279_v12  ;;  %v13220_v43 = vld [vmem:[#allocation24_spill] sm:$0xff] }
 0x255   :  { %v1240_v37 = vpop.f32.mrb[12].mxu0  ;;  %v1283_v20 = vpop.f32.mrb[12].mxu1 }
 0x256   :  { %v1242_v21 = vpop.f32.mrb[13].mxu0  ;;  %v1296_v9 = vmax.f32 %v1240_v37, %v1283_v20  ;;  %v1285_v28 = vpop.f32.mrb[13].mxu1 }
 0x257   :  { %v1244_v6 = vpop.f32.mrb[14].mxu0  ;;  %1657 = vmatpush1.bf16.msra.mxu0 %v13202_v17  ;;  %v1297_v18 = vmax.f32 %v1242_v21, %v1285_v28  ;;  %v1287_v3 = vpop.f32.mrb[14].mxu1  ;;  %1700 = vmatpush1.bf16.msra.mxu1 %v13204_v14  ;;  %v13207_v17 = vmax.f32 %v9281_v35, %v9285_v39  ;;  %v13208_v14 = vmax.f32 %v9287_v36, %v9292_v52  ;;  %v13216_v35 = vld [vmem:[#allocation127_spill] sm:$0xff]  ;;  %v13217_v39 = vld [vmem:[#allocation20_spill] sm:$0xff]  ;;  %v13218_v36 = vld [vmem:[#allocation22_spill] sm:$0xff] }
 0x258   :  { %v1246_v16 = vpop.f32.mrb[15].mxu0  ;;  %1658 = vmatprep.subr.bf16.mxu0 %v13205_v19  ;;  %v1300_v1 = vmax.f32 %v13206_v10, %v1296_v9  ;;  %v1298_v20 = vmax.f32 %v1244_v6, %v1287_v3  ;;  %v1289_v37 = vpop.f32.mrb[15].mxu1  ;;  %1701 = vmatprep.subr.bf16.mxu1 %v13105_v7  ;;  %v13209_v9 = vmax.f32 %v9295_v42, %v9300_v27  ;;  %v9439_v6 = vld [vmem:[%s12126_s0 + $0x14] ss:$28 sps:$4 sm:$0xff]  }
 0x259   :  { %v1301_v21 = vmax.f32 %v13207_v17, %v1297_v18  ;;  %v1299_v28 = vmax.f32 %v1246_v16, %v1289_v37  ;;  %v13219_v52 = vld [vmem:[#allocation23_spill] sm:$0xff]  ;;  %v13221_v17 = vld [vmem:[#allocation25_spill] sm:$0xff] }
 0x25a   :  { %v1316_v53 = vadd.f32 %v1309_v5, %v1300_v1  ;;  %v1302_v8 = vmax.f32 %v13208_v14, %v1298_v20  ;;  %v13222_v20 = vld [vmem:[#allocation26_spill] sm:$0xff]  ;;  %v13223_v37 = vld [vmem:[#allocation27_spill] sm:$0xff] }
 0x25b   :  { %1659 = vmatpush1.bf16.msra.mxu0 %v13108_v34  ;;  %v1317_v19 = vadd.f32 %v1313_v26, %v1301_v21  ;;  %v1303_v3 = vmax.f32 %v13209_v9, %v1299_v28  ;;  %1702 = vmatpush1.bf16.msra.mxu1 %v13110_v60  ;;  %v13224_v21 = vld [vmem:[#allocation28_spill] sm:$0xff]  ;;  %v13225_v28 = vld [vmem:[#allocation29_spill] sm:$0xff]  ;;  %v13227_v9 = vld [vmem:[#allocation31_spill] sm:$0xff] }
 0x25c   :  { %1660 = vmatprep.subr.bf16.mxu0 %v13111_v61  ;;  %v1318_v10 = vadd.f32 %v1309_v5, %v1302_v8  ;;  %1703 = vmatprep.subr.bf16.mxu1 %v13112_v29  ;;  %v1320_v1 = vmax.f32 %v1316_v53, 0.0  ;;  %v13212_v5 = vld [vmem:[#allocation135_spill] sm:$0xff]  ;;  %v13213_v8 = vld [vmem:[#allocation136_spill] sm:$0xff]  ;;  %v13226_v53 = vld [vmem:[#allocation30_spill] sm:$0xff] }
 0x25d   :  { %v1319_v18 = vadd.f32 %v1313_v26, %v1303_v3  ;;  %v1321_v14 = vmax.f32 %v1317_v19, 0.0  ;;  %v13214_v19 = vld [vmem:[#allocation19_spill] sm:$0xff]  ;;  %v13215_v26 = vld [vmem:[#allocation21_spill] sm:$0xff]  ;;  %v13228_v3 = vld [vmem:[#allocation32_spill] sm:$0xff] }
 0x25e   :  { %v1322_v16 = vmax.f32 %v1318_v10, 0.0  ;;  %v13229_v10 = vld [vmem:[#allocation33_spill] sm:$0xff] }
 0x25f   :  { %1661 = vmatpush1.bf16.msra.mxu0 %v13113_v59  ;;  %v1323_v12 = vmax.f32 %v1319_v18, 0.0  ;;  %1704 = vmatpush1.bf16.msra.mxu1 %v13114_v22  ;;  %v13230_v18 = vld [vmem:[#allocation34_spill] sm:$0xff] }
 0x260   :  { %1662 = vmatprep.subr.bf16.mxu0 %v13115_v55  ;;  %v9399_v27 = vpack.c.bf16 %v1322_v16, %v1320_v1  ;;  %1705 = vmatprep.subr.bf16.mxu1 %v13117_v45  ;;  %v13231_v1 = vld [vmem:[#allocation35_spill] sm:$0xff]  ;;  %v13232_v16 = vld [vmem:[#allocation36_spill] sm:$0xff] }
 0x261   :  { %v9402_v42 = vpack.c.bf16 %v1323_v12, %v1321_v14  ;;  %v13233_v14 = vld [vmem:[#allocation37_spill] sm:$0xff]  ;;  %v13234_v12 = vld [vmem:[#allocation38_spill] sm:$0xff] }
 0x262   :  { %13210 = vst [vmem:[#allocation128_spill] sm:$0xff] %v9399_v27 }
 0x263   :  { %13211 = vst [vmem:[#allocation129_spill] sm:$0xff] %v9402_v42  ;;  %1663 = vmatpush1.bf16.msra.mxu0 %v13119_v62  ;;  %1706 = vmatpush1.bf16.msra.mxu1 %v13120_v11  ;;  %v13236_v42 = vld [vmem:[#allocation40_spill] sm:$0xff] }
 0x264   :  { %1664 = vmatprep.subr.bf16.mxu0 %v13121_v4  ;;  %1707 = vmatprep.subr.bf16.mxu1 %v13122_v23 }
 0x267   :  { %1665 = vmatpush1.bf16.msra.mxu0 %v13123_v24  ;;  %1708 = vmatpush1.bf16.msra.mxu1 %v13040_v56 }
 0x268   :  { %1666 = vmatprep.subr.bf16.mxu0 %v13041_v47  ;;  %1709 = vmatprep.subr.bf16.mxu1 %v13042_v41 }
 0x26b   :  { %1667 = vmatpush1.bf16.msra.mxu0 %v13124_v50  ;;  %1710 = vmatpush1.bf16.msra.mxu1 %v13044_v32 }
 0x26c   :  { %1668 = vmatprep.subr.bf16.mxu0 %v13045_v63  ;;  %1711 = vmatprep.subr.bf16.mxu1 %v13046_v38 }
 0x26f   :  { %1669 = vmatpush1.bf16.msra.mxu0 %v13047_v33  ;;  %1712 = vmatpush1.bf16.msra.mxu1 %v13048_v48 }
 0x270   :  { %1670 = vmatprep.subr.bf16.mxu0 %v13049_v40  ;;  %1713 = vmatprep.subr.bf16.mxu1 %v13050_v46 }
 0x273   :  { %1671 = vmatpush1.bf16.msra.mxu0 %v8863_v0  ;;  %1714 = vmatpush1.bf16.msra.mxu1 %v8867_v57 }
 0x274   :  { %1672 = vmatprep.subr.bf16.mxu0 %v8869_v58  ;;  %1715 = vmatprep.subr.bf16.mxu1 %v13051_v25 }
 0x277   :  { %1673 = vmatpush1.bf16.msra.mxu0 %v8875_v15  ;;  %1716 = vmatpush1.bf16.msra.mxu1 %v8879_v49 }
 0x278   :  { %1674 = vmatprep.subr.bf16.mxu0 %v8881_v30  ;;  %1717 = vmatprep.subr.bf16.mxu1 %v13125_v44 }
 0x27b   :  { %1675 = vmatpush1.bf16.msra.mxu0 %v8887_v54  ;;  %1718 = vmatpush1.bf16.msra.mxu1 %v8891_v2 }
 0x27c   :  { %1676 = vmatprep.subr.bf16.mxu0 %v8893_v31  ;;  %1719 = vmatprep.subr.bf16.mxu1 %v8896_v13 }
 0x27f   :  { %1677 = vmatpush1.bf16.msra.mxu0 %v13212_v5  ;;  %1720 = vmatpush1.bf16.msra.mxu1 %v13213_v8 }
 0x280   :  { %1780 = vmatprep.subr.bf16.mxu0 %v13214_v19  ;;  %1823 = vmatprep.subr.bf16.mxu1 %v13215_v26  ;;  %v13303_v26 = vld [vmem:[#allocation123_spill] sm:$0xff] }
 0x282   :  { %1679 = vmatmul.mubr.bf16.vlgmr.msra.gmra.mrb[28].mxu0 %v13216_v35  ;;  %1722 = vmatmul.mubr.bf16.vlgmr.msra.gmra.mrb[28].mxu1 %v13216_v35  ;;  %v13235_v35 = vld [vmem:[#allocation39_spill] sm:$0xff] }
 0x283   :  { %1781 = vmatpush1.bf16.msra.mxu0 %v13217_v39  ;;  %1824 = vmatpush1.bf16.msra.mxu1 %v13218_v36  ;;  %v13301_v36 = vld [vmem:[#allocation104_spill] sm:$0xff] }
 0x284   :  { %1782 = vmatprep.subr.bf16.mxu0 %v13219_v52  ;;  %1825 = vmatprep.subr.bf16.mxu1 %v13220_v43  ;;  %v13248_v43 = vld [vmem:[#allocation52_spill] sm:$0xff]  ;;  %v13250_v52 = vld [vmem:[#allocation54_spill] sm:$0xff] }
 0x285   :  { %1812 = vmatprep.mubr.bf16.mxu0 %v9439_v6  ;;  %1855 = vmatprep.mubr.bf16.mxu1 %v9439_v6 }
 0x287   :  { %1783 = vmatpush1.bf16.msra.mxu0 %v13221_v17  ;;  %1826 = vmatpush1.bf16.msra.mxu1 %v13222_v20  ;;  %v13243_v20 = vld [vmem:[#allocation47_spill] sm:$0xff]  ;;  %v13245_v17 = vld [vmem:[#allocation49_spill] sm:$0xff] }
 0x288   :  { %1784 = vmatprep.subr.bf16.mxu0 %v13223_v37  ;;  %1827 = vmatprep.subr.bf16.mxu1 %v13224_v21  ;;  %v13240_v21 = vld [vmem:[#allocation44_spill] sm:$0xff]  ;;  %v13241_v37 = vld [vmem:[#allocation45_spill] sm:$0xff] }
 0x28b   :  { %1785 = vmatpush1.bf16.msra.mxu0 %v13225_v28  ;;  %1828 = vmatpush1.bf16.msra.mxu1 %v13226_v53  ;;  %v13239_v53 = vld [vmem:[#allocation43_spill] sm:$0xff] }
 0x28c   :  { %1786 = vmatprep.subr.bf16.mxu0 %v13227_v9  ;;  %1829 = vmatprep.subr.bf16.mxu1 %v13228_v3 }
 0x28f   :  { %1787 = vmatpush1.bf16.msra.mxu0 %v13229_v10  ;;  %1830 = vmatpush1.bf16.msra.mxu1 %v13230_v18  ;;  %v13238_v10 = vld [vmem:[#allocation42_spill] sm:$0xff]  ;;  %v13247_v18 = vld [vmem:[#allocation51_spill] sm:$0xff] }
 0x290   :  { %1788 = vmatprep.subr.bf16.mxu0 %v13231_v1  ;;  %1831 = vmatprep.subr.bf16.mxu1 %v13232_v16 }
 0x293   :  { %1789 = vmatpush1.bf16.msra.mxu0 %v13233_v14  ;;  %1832 = vmatpush1.bf16.msra.mxu1 %v13234_v12  ;;  %v13237_v14 = vld [vmem:[#allocation41_spill] sm:$0xff] }
 0x294   :  { %1790 = vmatprep.subr.bf16.mxu0 %v13235_v35  ;;  %1833 = vmatprep.subr.bf16.mxu1 %v13236_v42  ;;  %v13242_v35 = vld [vmem:[#allocation46_spill] sm:$0xff] }
 0x295   :  { %v9464_v27 = vpop.f32.mrb[16].mxu0  ;;  %v9467_v9 = vpop.f32.mrb[16].mxu1 }
 0x296   :  { %v9469_v3 = vpop.f32.mrb[17].mxu0  ;;  %v9473_v1 = vpop.f32.mrb[17].mxu1 }
 0x297   :  { %v9475_v16 = vpop.f32.mrb[18].mxu0  ;;  %1791 = vmatpush1.bf16.msra.mxu0 %v13237_v14  ;;  %v9480_v12 = vpop.f32.mrb[18].mxu1  ;;  %1834 = vmatpush1.bf16.msra.mxu1 %v13238_v10  ;;  %v13244_v10 = vld [vmem:[#allocation48_spill] sm:$0xff]  ;;  %v13251_v14 = vld [vmem:[#allocation55_spill] sm:$0xff] }
 0x298   :  { %v9483_v42 = vpop.f32.mrb[19].mxu0  ;;  %1792 = vmatprep.subr.bf16.mxu0 %v13239_v53  ;;  %v9488_v28 = vpop.f32.mrb[19].mxu1  ;;  %1835 = vmatprep.subr.bf16.mxu1 %v13240_v21  ;;  %v13246_v53 = vld [vmem:[#allocation50_spill] sm:$0xff]  ;;  %v13249_v21 = vld [vmem:[#allocation53_spill] sm:$0xff] }
 0x29b   :  { %1793 = vmatpush1.bf16.msra.mxu0 %v13241_v37  ;;  %1836 = vmatpush1.bf16.msra.mxu1 %v13242_v35  ;;  %v13252_v37 = vld [vmem:[#allocation56_spill] sm:$0xff]  ;;  %v13253_v35 = vld [vmem:[#allocation57_spill] sm:$0xff] }
 0x29c   :  { %1794 = vmatprep.subr.bf16.mxu0 %v13243_v20  ;;  %1837 = vmatprep.subr.bf16.mxu1 %v13244_v10  ;;  %v13254_v20 = vld [vmem:[#allocation58_spill] sm:$0xff]  ;;  %v13255_v10 = vld [vmem:[#allocation59_spill] sm:$0xff] }
 0x29f   :  { %1795 = vmatpush1.bf16.msra.mxu0 %v13245_v17  ;;  %1838 = vmatpush1.bf16.msra.mxu1 %v13246_v53  ;;  %v13256_v17 = vld [vmem:[#allocation60_spill] sm:$0xff]  ;;  %v13257_v53 = vld [vmem:[#allocation61_spill] sm:$0xff] }
 0x2a0   :  { %1796 = vmatprep.subr.bf16.mxu0 %v13247_v18  ;;  %1839 = vmatprep.subr.bf16.mxu1 %v13248_v43  ;;  %v13258_v18 = vld [vmem:[#allocation62_spill] sm:$0xff]  ;;  %v13259_v43 = vld [vmem:[#allocation63_spill] sm:$0xff] }
 0x2a3   :  { %1797 = vmatpush1.bf16.msra.mxu0 %v13249_v21  ;;  %1840 = vmatpush1.bf16.msra.mxu1 %v13250_v52  ;;  %v13260_v21 = vld [vmem:[#allocation64_spill] sm:$0xff]  ;;  %v13261_v52 = vld [vmem:[#allocation65_spill] sm:$0xff] }
 0x2a4   :  { %1798 = vmatprep.subr.bf16.mxu0 %v13251_v14  ;;  %1841 = vmatprep.subr.bf16.mxu1 %v13252_v37  ;;  %v13262_v14 = vld [vmem:[#allocation66_spill] sm:$0xff]  ;;  %v13263_v37 = vld [vmem:[#allocation67_spill] sm:$0xff] }
 0x2a7   :  { %1799 = vmatpush1.bf16.msra.mxu0 %v13253_v35  ;;  %1842 = vmatpush1.bf16.msra.mxu1 %v13254_v20  ;;  %v13264_v35 = vld [vmem:[#allocation68_spill] sm:$0xff]  ;;  %v13265_v20 = vld [vmem:[#allocation69_spill] sm:$0xff] }
 0x2a8   :  { %1800 = vmatprep.subr.bf16.mxu0 %v13255_v10  ;;  %1843 = vmatprep.subr.bf16.mxu1 %v13256_v17  ;;  %v13266_v10 = vld [vmem:[#allocation70_spill] sm:$0xff]  ;;  %v13267_v17 = vld [vmem:[#allocation71_spill] sm:$0xff] }
 0x2ab   :  { %1801 = vmatpush1.bf16.msra.mxu0 %v13257_v53  ;;  %1844 = vmatpush1.bf16.msra.mxu1 %v13258_v18  ;;  %v13268_v53 = vld [vmem:[#allocation72_spill] sm:$0xff]  ;;  %v13269_v18 = vld [vmem:[#allocation73_spill] sm:$0xff] }
 0x2ac   :  { %1802 = vmatprep.subr.bf16.mxu0 %v13259_v43  ;;  %1845 = vmatprep.subr.bf16.mxu1 %v13260_v21  ;;  %v13270_v43 = vld [vmem:[#allocation74_spill] sm:$0xff]  ;;  %v13271_v21 = vld [vmem:[#allocation75_spill] sm:$0xff] }
 0x2af   :  { %1803 = vmatpush1.bf16.msra.mxu0 %v13261_v52  ;;  %1846 = vmatpush1.bf16.msra.mxu1 %v13262_v14  ;;  %v13272_v52 = vld [vmem:[#allocation76_spill] sm:$0xff]  ;;  %v13273_v14 = vld [vmem:[#allocation77_spill] sm:$0xff] }
 0x2b0   :  { %1804 = vmatprep.subr.bf16.mxu0 %v13263_v37  ;;  %1847 = vmatprep.subr.bf16.mxu1 %v13264_v35  ;;  %v13274_v37 = vld [vmem:[#allocation78_spill] sm:$0xff]  ;;  %v13275_v35 = vld [vmem:[#allocation79_spill] sm:$0xff] }
 0x2b3   :  { %1805 = vmatpush1.bf16.msra.mxu0 %v13265_v20  ;;  %1848 = vmatpush1.bf16.msra.mxu1 %v13266_v10  ;;  %v13276_v20 = vld [vmem:[#allocation80_spill] sm:$0xff]  ;;  %v13295_v10 = vld [vmem:[#allocation98_spill] sm:$0xff] }
 0x2b4   :  { %1806 = vmatprep.subr.bf16.mxu0 %v13267_v17  ;;  %1849 = vmatprep.subr.bf16.mxu1 %v13268_v53  ;;  %v9532_v53 = vld [vmem:[%s12126_s0 + $0x10] ss:$28 sps:$4 sm:$0xff]   ;;  %v13290_v17 = vld [vmem:[#allocation93_spill] sm:$0xff] }
 0x2b5   :  { %13277 = vst [vmem:[#allocation130_spill] sm:$0xff] %v9532_v53 }
 0x2b7   :  { %1807 = vmatpush1.bf16.msra.mxu0 %v13269_v18  ;;  %1850 = vmatpush1.bf16.msra.mxu1 %v13270_v43  ;;  %v13278_v18 = vld [vmem:[#allocation81_spill] sm:$0xff]  ;;  %v13279_v43 = vld [vmem:[#allocation82_spill] sm:$0xff] }
 0x2b8   :  { %1808 = vmatprep.subr.bf16.mxu0 %v13271_v21  ;;  %1851 = vmatprep.subr.bf16.mxu1 %v13272_v52  ;;  %v13280_v21 = vld [vmem:[#allocation83_spill] sm:$0xff]  ;;  %v13281_v52 = vld [vmem:[#allocation84_spill] sm:$0xff] }
 0x2bb   :  { %1809 = vmatpush1.bf16.msra.mxu0 %v13273_v14  ;;  %1852 = vmatpush1.bf16.msra.mxu1 %v13274_v37  ;;  %v13284_v37 = vld [vmem:[#allocation87_spill] sm:$0xff]  ;;  %v13285_v14 = vld [vmem:[#allocation88_spill] sm:$0xff] }
 0x2bc   :  { %1810 = vmatprep.subr.bf16.mxu0 %v13275_v35  ;;  %1853 = vmatprep.subr.bf16.mxu1 %v13276_v20  ;;  %v13282_v35 = vld [vmem:[#allocation85_spill] sm:$0xff]  ;;  %v13283_v20 = vld [vmem:[#allocation86_spill] sm:$0xff] }
 0x2bf   :  { %1811 = vmatpush1.bf16.msra.mxu0 %v13278_v18  ;;  %1854 = vmatpush1.bf16.msra.mxu1 %v13279_v43  ;;  %v13286_v43 = vld [vmem:[#allocation89_spill] sm:$0xff]  ;;  %v13289_v18 = vld [vmem:[#allocation92_spill] sm:$0xff] }
 0x2c0   :  { %1866 = vmatprep.subr.bf16.mxu0 %v13280_v21  ;;  %1909 = vmatprep.subr.bf16.mxu1 %v13281_v52  ;;  %v13287_v21 = vld [vmem:[#allocation90_spill] sm:$0xff]  ;;  %v13288_v52 = vld [vmem:[#allocation91_spill] sm:$0xff] }
 0x2c2   :  { %1813 = vmatmul.mubr.bf16.vlgmr.msra.gmra.mrb[32].mxu0 %v9532_v53  ;;  %1856 = vmatmul.mubr.bf16.vlgmr.msra.gmra.mrb[32].mxu1 %v9532_v53 }
 0x2c3   :  { %1867 = vmatpush1.bf16.msra.mxu0 %v13282_v35  ;;  %1910 = vmatpush1.bf16.msra.mxu1 %v13283_v20  ;;  %v13291_v35 = vld [vmem:[#allocation94_spill] sm:$0xff]  ;;  %v13292_v20 = vld [vmem:[#allocation95_spill] sm:$0xff] }
 0x2c4   :  { %1868 = vmatprep.subr.bf16.mxu0 %v13284_v37  ;;  %1911 = vmatprep.subr.bf16.mxu1 %v13285_v14  ;;  %v13293_v37 = vld [vmem:[#allocation96_spill] sm:$0xff]  ;;  %v13294_v14 = vld [vmem:[#allocation97_spill] sm:$0xff] }
 0x2c5   :  { %1898 = vmatprep.mubr.bf16.mxu0 %v9439_v6  ;;  %1941 = vmatprep.mubr.bf16.mxu1 %v9439_v6  ;;  %v13296_v6 = vld [vmem:[#allocation99_spill] sm:$0xff] }
 0x2c7   :  { %1869 = vmatpush1.bf16.msra.mxu0 %v13286_v43  ;;  %1912 = vmatpush1.bf16.msra.mxu1 %v13287_v21  ;;  %v13297_v43 = vld [vmem:[#allocation100_spill] sm:$0xff]  ;;  %v13298_v21 = vld [vmem:[#allocation101_spill] sm:$0xff] }
 0x2c8   :  { %1870 = vmatprep.subr.bf16.mxu0 %v13288_v52  ;;  %1913 = vmatprep.subr.bf16.mxu1 %v13289_v18  ;;  %v13299_v52 = vld [vmem:[#allocation102_spill] sm:$0xff]  ;;  %v1524_v18 = vld [vmem:[#allocation6 + $0x4] sm:$0x3] }
 0x2cb   :  { %1871 = vmatpush1.bf16.msra.mxu0 %v13290_v17  ;;  %1914 = vmatpush1.bf16.msra.mxu1 %v13291_v35  ;;  %v13300_v17 = vld [vmem:[#allocation103_spill] sm:$0xff] }
 0x2cc   :  { %1872 = vmatprep.subr.bf16.mxu0 %v13292_v20  ;;  %1915 = vmatprep.subr.bf16.mxu1 %v13293_v37 }
 0x2cf   :  { %1873 = vmatpush1.bf16.msra.mxu0 %v13294_v14  ;;  %1916 = vmatpush1.bf16.msra.mxu1 %v13295_v10  ;;  %v1529_v14 = vrot.slane %v1524_v18, %v13201_v51 }
 0x2d0   :  { %1874 = vmatprep.subr.bf16.mxu0 %v13296_v6  ;;  %1917 = vmatprep.subr.bf16.mxu1 %v13297_v43  ;;  %v13302_v6 = vld [vmem:[#allocation105_spill] sm:$0xff] }
 0x2d3   :  { %1875 = vmatpush1.bf16.msra.mxu0 %v13298_v21  ;;  %1918 = vmatpush1.bf16.msra.mxu1 %v13299_v52  ;;  %v1533_v21 = vrot.slane %v1524_v18, %v13303_v26  ;;  %v13304_v52 = vld [vmem:[#allocation106_spill] sm:$0xff] }
 0x2d4   :  { %1876 = vmatprep.subr.bf16.mxu0 %v13300_v17  ;;  %1919 = vmatprep.subr.bf16.mxu1 %v13301_v36  ;;  %v13305_v17 = vld [vmem:[#allocation107_spill] sm:$0xff]  ;;  %v13306_v36 = vmax.f32 %v9464_v27, %v9467_v9  ;;  %v13309_v27 = vmax.f32 %v9483_v42, %v9488_v28 }
 0x2d5   :  { %v1460_v35 = vpop.f32.mrb[20].mxu0  ;;  %v1503_v20 = vpop.f32.mrb[20].mxu1  ;;  %v9627_v9 = vld [vmem:[%s12126_s0 + $0x18] ss:$28 sps:$4 sm:$0xff]  }
 0x2d6   :  { %v1462_v37 = vpop.f32.mrb[21].mxu0  ;;  %v1516_v39 = vmax.f32 %v1460_v35, %v1503_v20  ;;  %v1505_v10 = vpop.f32.mrb[21].mxu1 }
 0x2d7   :  { %v1464_v53 = vpop.f32.mrb[22].mxu0  ;;  %1877 = vmatpush1.bf16.msra.mxu0 %v13302_v6  ;;  %v1517_v43 = vmax.f32 %v1462_v37, %v1505_v10  ;;  %v1507_v19 = vpop.f32.mrb[22].mxu1  ;;  %1920 = vmatpush1.bf16.msra.mxu1 %v13304_v52  ;;  %v13307_v6 = vmax.f32 %v9469_v3, %v9473_v1  ;;  %v13308_v52 = vmax.f32 %v9475_v16, %v9480_v12  ;;  %v13316_v3 = vld [vmem:[#allocation130_spill] sm:$0xff]  ;;  %v13317_v1 = vld [vmem:[#allocation20_spill] sm:$0xff] }
 0x2d8   :  { %v1466_v8 = vpop.f32.mrb[23].mxu0  ;;  %1878 = vmatprep.subr.bf16.mxu0 %v13305_v17  ;;  %v1520_v5 = vmax.f32 %v13306_v36, %v1516_v39  ;;  %v1518_v20 = vmax.f32 %v1464_v53, %v1507_v19  ;;  %v1509_v35 = vpop.f32.mrb[23].mxu1  ;;  %1921 = vmatprep.subr.bf16.mxu1 %v13105_v7  ;;  %v13315_v53 = vld [vmem:[#allocation21_spill] sm:$0xff]  ;;  %v13318_v16 = vld [vmem:[#allocation22_spill] sm:$0xff]  ;;  %v13320_v12 = vld [vmem:[#allocation24_spill] sm:$0xff] }
 0x2d9   :  { %v1521_v37 = vmax.f32 %v13307_v6, %v1517_v43  ;;  %v1519_v10 = vmax.f32 %v1466_v8, %v1509_v35  ;;  %v13321_v6 = vld [vmem:[#allocation25_spill] sm:$0xff]  ;;  %v13323_v35 = vld [vmem:[#allocation27_spill] sm:$0xff] }
 0x2da   :  { %v1536_v18 = vadd.f32 %v1529_v14, %v1520_v5  ;;  %v1522_v26 = vmax.f32 %v13308_v52, %v1518_v20  ;;  %v13322_v20 = vld [vmem:[#allocation26_spill] sm:$0xff] }
 0x2db   :  { %1879 = vmatpush1.bf16.msra.mxu0 %v13108_v34  ;;  %v1537_v17 = vadd.f32 %v1533_v21, %v1521_v37  ;;  %v1523_v19 = vmax.f32 %v13309_v27, %v1519_v10  ;;  %1922 = vmatpush1.bf16.msra.mxu1 %v13110_v60  ;;  %v13324_v37 = vld [vmem:[#allocation28_spill] sm:$0xff]  ;;  %v13325_v10 = vld [vmem:[#allocation29_spill] sm:$0xff]  ;;  %v13327_v27 = vld [vmem:[#allocation31_spill] sm:$0xff] }
 0x2dc   :  { %1880 = vmatprep.subr.bf16.mxu0 %v13111_v61  ;;  %v1538_v39 = vadd.f32 %v1529_v14, %v1522_v26  ;;  %1923 = vmatprep.subr.bf16.mxu1 %v13112_v29  ;;  %v1540_v5 = vmax.f32 %v1536_v18, 0.0  ;;  %v13312_v26 = vld [vmem:[#allocation135_spill] sm:$0xff]  ;;  %v13326_v18 = vld [vmem:[#allocation30_spill] sm:$0xff] }
 0x2dd   :  { %v1539_v8 = vadd.f32 %v1533_v21, %v1523_v19  ;;  %v1541_v52 = vmax.f32 %v1537_v17, 0.0  ;;  %v13313_v17 = vld [vmem:[#allocation136_spill] sm:$0xff]  ;;  %v13314_v21 = vld [vmem:[#allocation19_spill] sm:$0xff] }
 0x2de   :  { %v1542_v36 = vmax.f32 %v1538_v39, 0.0  ;;  %v13319_v14 = vld [vmem:[#allocation23_spill] sm:$0xff]  ;;  %v13328_v19 = vld [vmem:[#allocation32_spill] sm:$0xff]  ;;  %v13329_v39 = vld [vmem:[#allocation33_spill] sm:$0xff] }
 0x2df   :  { %1881 = vmatpush1.bf16.msra.mxu0 %v13113_v59  ;;  %v1543_v43 = vmax.f32 %v1539_v8, 0.0  ;;  %1924 = vmatpush1.bf16.msra.mxu1 %v13114_v22  ;;  %v13330_v8 = vld [vmem:[#allocation34_spill] sm:$0xff] }
 0x2e0   :  { %1882 = vmatprep.subr.bf16.mxu0 %v13115_v55  ;;  %v9587_v42 = vpack.c.bf16 %v1542_v36, %v1540_v5  ;;  %1925 = vmatprep.subr.bf16.mxu1 %v13117_v45  ;;  %v13331_v5 = vld [vmem:[#allocation35_spill] sm:$0xff]  ;;  %v13332_v36 = vld [vmem:[#allocation36_spill] sm:$0xff] }
 0x2e1   :  { %v9590_v28 = vpack.c.bf16 %v1543_v43, %v1541_v52  ;;  %v13333_v52 = vld [vmem:[#allocation37_spill] sm:$0xff]  ;;  %v13334_v43 = vld [vmem:[#allocation38_spill] sm:$0xff] }
 0x2e2   :  { %13310 = vst [vmem:[#allocation131_spill] sm:$0xff] %v9587_v42 }
 0x2e3   :  { %13311 = vst [vmem:[#allocation132_spill] sm:$0xff] %v9590_v28  ;;  %1883 = vmatpush1.bf16.msra.mxu0 %v13119_v62  ;;  %1926 = vmatpush1.bf16.msra.mxu1 %v13120_v11  ;;  %v13403_v28 = vld [vmem:[#allocation123_spill] sm:$0xff] }
 0x2e4   :  { %1884 = vmatprep.subr.bf16.mxu0 %v13121_v4  ;;  %1927 = vmatprep.subr.bf16.mxu1 %v13122_v23 }
 0x2e7   :  { %1885 = vmatpush1.bf16.msra.mxu0 %v13123_v24  ;;  %1928 = vmatpush1.bf16.msra.mxu1 %v13040_v56 }
 0x2e8   :  { %1886 = vmatprep.subr.bf16.mxu0 %v13041_v47  ;;  %1929 = vmatprep.subr.bf16.mxu1 %v13042_v41 }
 0x2eb   :  { %1887 = vmatpush1.bf16.msra.mxu0 %v13124_v50  ;;  %1930 = vmatpush1.bf16.msra.mxu1 %v13044_v32 }
 0x2ec   :  { %1888 = vmatprep.subr.bf16.mxu0 %v13045_v63  ;;  %1931 = vmatprep.subr.bf16.mxu1 %v13046_v38 }
 0x2ef   :  { %1889 = vmatpush1.bf16.msra.mxu0 %v13047_v33  ;;  %1932 = vmatpush1.bf16.msra.mxu1 %v13048_v48 }
 0x2f0   :  { %1890 = vmatprep.subr.bf16.mxu0 %v13049_v40  ;;  %1933 = vmatprep.subr.bf16.mxu1 %v13050_v46 }
 0x2f3   :  { %1891 = vmatpush1.bf16.msra.mxu0 %v8863_v0  ;;  %1934 = vmatpush1.bf16.msra.mxu1 %v8867_v57 }
 0x2f4   :  { %1892 = vmatprep.subr.bf16.mxu0 %v8869_v58  ;;  %1935 = vmatprep.subr.bf16.mxu1 %v13051_v25 }
 0x2f7   :  { %1893 = vmatpush1.bf16.msra.mxu0 %v8875_v15  ;;  %1936 = vmatpush1.bf16.msra.mxu1 %v8879_v49 }
 0x2f8   :  { %1894 = vmatprep.subr.bf16.mxu0 %v8881_v30  ;;  %1937 = vmatprep.subr.bf16.mxu1 %v13125_v44 }
 0x2fb   :  { %1895 = vmatpush1.bf16.msra.mxu0 %v8887_v54  ;;  %1938 = vmatpush1.bf16.msra.mxu1 %v8891_v2 }
 0x2fc   :  { %1896 = vmatprep.subr.bf16.mxu0 %v8893_v31  ;;  %1939 = vmatprep.subr.bf16.mxu1 %v8896_v13 }
 0x2ff   :  { %1897 = vmatpush1.bf16.msra.mxu0 %v13312_v26  ;;  %1940 = vmatpush1.bf16.msra.mxu1 %v13313_v17 }
 0x300   :  { %2000 = vmatprep.subr.bf16.mxu0 %v13314_v21  ;;  %2043 = vmatprep.subr.bf16.mxu1 %v13315_v53  ;;  %v13335_v21 = vld [vmem:[#allocation39_spill] sm:$0xff] }
 0x302   :  { %1899 = vmatmul.mubr.bf16.vlgmr.msra.gmra.mrb[36].mxu0 %v13316_v3  ;;  %1942 = vmatmul.mubr.bf16.vlgmr.msra.gmra.mrb[36].mxu1 %v13316_v3  ;;  %v13336_v3 = vld [vmem:[#allocation40_spill] sm:$0xff] }
 0x303   :  { %2001 = vmatpush1.bf16.msra.mxu0 %v13317_v1  ;;  %2044 = vmatpush1.bf16.msra.mxu1 %v13318_v16 }
 0x304   :  { %2002 = vmatprep.subr.bf16.mxu0 %v13319_v14  ;;  %2045 = vmatprep.subr.bf16.mxu1 %v13320_v12 }
 0x305   :  { %2032 = vmatprep.mubr.bf16.mxu0 %v9627_v9  ;;  %2075 = vmatprep.mubr.bf16.mxu1 %v9627_v9 }
 0x307   :  { %2003 = vmatpush1.bf16.msra.mxu0 %v13321_v6  ;;  %2046 = vmatpush1.bf16.msra.mxu1 %v13322_v20  ;;  %v13337_v20 = vld [vmem:[#allocation41_spill] sm:$0xff] }
 0x308   :  { %2004 = vmatprep.subr.bf16.mxu0 %v13323_v35  ;;  %2047 = vmatprep.subr.bf16.mxu1 %v13324_v37  ;;  %v13401_v35 = vld [vmem:[#allocation104_spill] sm:$0xff] }
 0x30b   :  { %2005 = vmatpush1.bf16.msra.mxu0 %v13325_v10  ;;  %2048 = vmatpush1.bf16.msra.mxu1 %v13326_v18  ;;  %v13338_v10 = vld [vmem:[#allocation42_spill] sm:$0xff] }
 0x30c   :  { %2006 = vmatprep.subr.bf16.mxu0 %v13327_v27  ;;  %2049 = vmatprep.subr.bf16.mxu1 %v13328_v19  ;;  %v13339_v27 = vld [vmem:[#allocation43_spill] sm:$0xff]  ;;  %v13350_v19 = vld [vmem:[#allocation54_spill] sm:$0xff] }
 0x30f   :  { %2007 = vmatpush1.bf16.msra.mxu0 %v13329_v39  ;;  %2050 = vmatpush1.bf16.msra.mxu1 %v13330_v8  ;;  %v13340_v8 = vld [vmem:[#allocation44_spill] sm:$0xff] }
 0x310   :  { %2008 = vmatprep.subr.bf16.mxu0 %v13331_v5  ;;  %2051 = vmatprep.subr.bf16.mxu1 %v13332_v36  ;;  %v13341_v36 = vld [vmem:[#allocation45_spill] sm:$0xff]  ;;  %v13351_v5 = vld [vmem:[#allocation55_spill] sm:$0xff] }
 0x313   :  { %2009 = vmatpush1.bf16.msra.mxu0 %v13333_v52  ;;  %2052 = vmatpush1.bf16.msra.mxu1 %v13334_v43  ;;  %v13342_v52 = vld [vmem:[#allocation46_spill] sm:$0xff]  ;;  %v13343_v43 = vld [vmem:[#allocation47_spill] sm:$0xff] }
 0x314   :  { %2010 = vmatprep.subr.bf16.mxu0 %v13335_v21  ;;  %2053 = vmatprep.subr.bf16.mxu1 %v13336_v3  ;;  %v13344_v21 = vld [vmem:[#allocation48_spill] sm:$0xff]  ;;  %v13345_v3 = vld [vmem:[#allocation49_spill] sm:$0xff] }
 0x315   :  { %v9652_v53 = vpop.f32.mrb[24].mxu0  ;;  %v9655_v1 = vpop.f32.mrb[24].mxu1 }
 0x316   :  { %v9657_v16 = vpop.f32.mrb[25].mxu0  ;;  %v9661_v12 = vpop.f32.mrb[25].mxu1 }
 0x317   :  { %v9663_v6 = vpop.f32.mrb[26].mxu0  ;;  %2011 = vmatpush1.bf16.msra.mxu0 %v13337_v20  ;;  %v9668_v37 = vpop.f32.mrb[26].mxu1  ;;  %2054 = vmatpush1.bf16.msra.mxu1 %v13338_v10  ;;  %v13346_v20 = vld [vmem:[#allocation50_spill] sm:$0xff]  ;;  %v13347_v10 = vld [vmem:[#allocation51_spill] sm:$0xff] }
 0x318   :  { %v9671_v18 = vpop.f32.mrb[27].mxu0  ;;  %2012 = vmatprep.subr.bf16.mxu0 %v13339_v27  ;;  %v9676_v39 = vpop.f32.mrb[27].mxu1  ;;  %2055 = vmatprep.subr.bf16.mxu1 %v13340_v8  ;;  %v13348_v27 = vld [vmem:[#allocation52_spill] sm:$0xff]  ;;  %v13349_v8 = vld [vmem:[#allocation53_spill] sm:$0xff] }
 0x31b   :  { %2013 = vmatpush1.bf16.msra.mxu0 %v13341_v36  ;;  %2056 = vmatpush1.bf16.msra.mxu1 %v13342_v52  ;;  %v13352_v36 = vld [vmem:[#allocation56_spill] sm:$0xff]  ;;  %v13353_v52 = vld [vmem:[#allocation57_spill] sm:$0xff] }
 0x31c   :  { %2014 = vmatprep.subr.bf16.mxu0 %v13343_v43  ;;  %2057 = vmatprep.subr.bf16.mxu1 %v13344_v21  ;;  %v13354_v43 = vld [vmem:[#allocation58_spill] sm:$0xff]  ;;  %v13355_v21 = vld [vmem:[#allocation59_spill] sm:$0xff] }
 0x31f   :  { %2015 = vmatpush1.bf16.msra.mxu0 %v13345_v3  ;;  %2058 = vmatpush1.bf16.msra.mxu1 %v13346_v20  ;;  %v13356_v3 = vld [vmem:[#allocation60_spill] sm:$0xff]  ;;  %v13357_v20 = vld [vmem:[#allocation61_spill] sm:$0xff] }
 0x320   :  { %2016 = vmatprep.subr.bf16.mxu0 %v13347_v10  ;;  %2059 = vmatprep.subr.bf16.mxu1 %v13348_v27  ;;  %v13358_v10 = vld [vmem:[#allocation62_spill] sm:$0xff]  ;;  %v13359_v27 = vld [vmem:[#allocation63_spill] sm:$0xff] }
 0x323   :  { %2017 = vmatpush1.bf16.msra.mxu0 %v13349_v8  ;;  %2060 = vmatpush1.bf16.msra.mxu1 %v13350_v19  ;;  %v13360_v8 = vld [vmem:[#allocation64_spill] sm:$0xff]  ;;  %v13361_v19 = vld [vmem:[#allocation65_spill] sm:$0xff] }
 0x324   :  { %2018 = vmatprep.subr.bf16.mxu0 %v13351_v5  ;;  %2061 = vmatprep.subr.bf16.mxu1 %v13352_v36  ;;  %v13362_v5 = vld [vmem:[#allocation66_spill] sm:$0xff]  ;;  %v13363_v36 = vld [vmem:[#allocation67_spill] sm:$0xff] }
 0x327   :  { %2019 = vmatpush1.bf16.msra.mxu0 %v13353_v52  ;;  %2062 = vmatpush1.bf16.msra.mxu1 %v13354_v43  ;;  %v13364_v52 = vld [vmem:[#allocation68_spill] sm:$0xff]  ;;  %v13365_v43 = vld [vmem:[#allocation69_spill] sm:$0xff] }
 0x328   :  { %2020 = vmatprep.subr.bf16.mxu0 %v13355_v21  ;;  %2063 = vmatprep.subr.bf16.mxu1 %v13356_v3  ;;  %v13366_v21 = vld [vmem:[#allocation70_spill] sm:$0xff]  ;;  %v13367_v3 = vld [vmem:[#allocation71_spill] sm:$0xff] }
 0x32b   :  { %2021 = vmatpush1.bf16.msra.mxu0 %v13357_v20  ;;  %2064 = vmatpush1.bf16.msra.mxu1 %v13358_v10  ;;  %v13368_v20 = vld [vmem:[#allocation72_spill] sm:$0xff]  ;;  %v13369_v10 = vld [vmem:[#allocation73_spill] sm:$0xff] }
 0x32c   :  { %2022 = vmatprep.subr.bf16.mxu0 %v13359_v27  ;;  %2065 = vmatprep.subr.bf16.mxu1 %v13360_v8  ;;  %v13370_v27 = vld [vmem:[#allocation74_spill] sm:$0xff]  ;;  %v13371_v8 = vld [vmem:[#allocation75_spill] sm:$0xff] }
 0x32f   :  { %2023 = vmatpush1.bf16.msra.mxu0 %v13361_v19  ;;  %2066 = vmatpush1.bf16.msra.mxu1 %v13362_v5  ;;  %v13372_v19 = vld [vmem:[#allocation76_spill] sm:$0xff]  ;;  %v13373_v5 = vld [vmem:[#allocation77_spill] sm:$0xff] }
 0x330   :  { %2024 = vmatprep.subr.bf16.mxu0 %v13363_v36  ;;  %2067 = vmatprep.subr.bf16.mxu1 %v13364_v52  ;;  %v13374_v36 = vld [vmem:[#allocation78_spill] sm:$0xff]  ;;  %v13375_v52 = vld [vmem:[#allocation79_spill] sm:$0xff] }
 0x333   :  { %2025 = vmatpush1.bf16.msra.mxu0 %v13365_v43  ;;  %2068 = vmatpush1.bf16.msra.mxu1 %v13366_v21  ;;  %v13376_v43 = vld [vmem:[#allocation80_spill] sm:$0xff]  ;;  %v9720_v21 = vld [vmem:[%s12126_s0 + $0x14] ss:$28 sps:$4 sm:$0xff]  }
 0x334   :  { %2026 = vmatprep.subr.bf16.mxu0 %v13367_v3  ;;  %2069 = vmatprep.subr.bf16.mxu1 %v13368_v20  ;;  %13377 = vst [vmem:[#allocation133_spill] sm:$0xff] %v9720_v21  ;;  %v13378_v3 = vld [vmem:[#allocation81_spill] sm:$0xff]  ;;  %v13379_v20 = vld [vmem:[#allocation82_spill] sm:$0xff] }
 0x337   :  { %2027 = vmatpush1.bf16.msra.mxu0 %v13369_v10  ;;  %2070 = vmatpush1.bf16.msra.mxu1 %v13370_v27  ;;  %v13380_v10 = vld [vmem:[#allocation83_spill] sm:$0xff]  ;;  %v13381_v27 = vld [vmem:[#allocation84_spill] sm:$0xff] }
 0x338   :  { %2028 = vmatprep.subr.bf16.mxu0 %v13371_v8  ;;  %2071 = vmatprep.subr.bf16.mxu1 %v13372_v19  ;;  %v13382_v8 = vld [vmem:[#allocation85_spill] sm:$0xff]  ;;  %v13383_v19 = vld [vmem:[#allocation86_spill] sm:$0xff] }
 0x33b   :  { %2029 = vmatpush1.bf16.msra.mxu0 %v13373_v5  ;;  %2072 = vmatpush1.bf16.msra.mxu1 %v13374_v36  ;;  %v13384_v5 = vld [vmem:[#allocation87_spill] sm:$0xff]  ;;  %v13385_v36 = vld [vmem:[#allocation88_spill] sm:$0xff] }
 0x33c   :  { %2030 = vmatprep.subr.bf16.mxu0 %v13375_v52  ;;  %2073 = vmatprep.subr.bf16.mxu1 %v13376_v43  ;;  %v13386_v52 = vld [vmem:[#allocation89_spill] sm:$0xff]  ;;  %v13387_v43 = vld [vmem:[#allocation90_spill] sm:$0xff] }
 0x33f   :  { %2031 = vmatpush1.bf16.msra.mxu0 %v13378_v3  ;;  %2074 = vmatpush1.bf16.msra.mxu1 %v13379_v20  ;;  %v13388_v3 = vld [vmem:[#allocation91_spill] sm:$0xff]  ;;  %v13389_v20 = vld [vmem:[#allocation92_spill] sm:$0xff] }
 0x340   :  { %2086 = vmatprep.subr.bf16.mxu0 %v13380_v10  ;;  %2129 = vmatprep.subr.bf16.mxu1 %v13381_v27  ;;  %v13390_v10 = vld [vmem:[#allocation93_spill] sm:$0xff]  ;;  %v13391_v27 = vld [vmem:[#allocation94_spill] sm:$0xff] }
 0x342   :  { %2033 = vmatmul.mubr.bf16.vlgmr.msra.gmra.mrb[40].mxu0 %v9720_v21  ;;  %2076 = vmatmul.mubr.bf16.vlgmr.msra.gmra.mrb[40].mxu1 %v9720_v21 }
 0x343   :  { %2087 = vmatpush1.bf16.msra.mxu0 %v13382_v8  ;;  %2130 = vmatpush1.bf16.msra.mxu1 %v13383_v19  ;;  %v13392_v8 = vld [vmem:[#allocation95_spill] sm:$0xff]  ;;  %v13393_v19 = vld [vmem:[#allocation96_spill] sm:$0xff] }
 0x344   :  { %2088 = vmatprep.subr.bf16.mxu0 %v13384_v5  ;;  %2131 = vmatprep.subr.bf16.mxu1 %v13385_v36  ;;  %v13394_v5 = vld [vmem:[#allocation97_spill] sm:$0xff]  ;;  %v13395_v36 = vld [vmem:[#allocation98_spill] sm:$0xff] }
 0x345   :  { %2118 = vmatprep.mubr.bf16.mxu0 %v9627_v9  ;;  %2161 = vmatprep.mubr.bf16.mxu1 %v9627_v9  ;;  %v13396_v9 = vld [vmem:[#allocation99_spill] sm:$0xff] }
 0x347   :  { %2089 = vmatpush1.bf16.msra.mxu0 %v13386_v52  ;;  %2132 = vmatpush1.bf16.msra.mxu1 %v13387_v43  ;;  %v13397_v52 = vld [vmem:[#allocation100_spill] sm:$0xff]  ;;  %v13398_v43 = vld [vmem:[#allocation101_spill] sm:$0xff] }
 0x348   :  { %2090 = vmatprep.subr.bf16.mxu0 %v13388_v3  ;;  %2133 = vmatprep.subr.bf16.mxu1 %v13389_v20  ;;  %v13399_v3 = vld [vmem:[#allocation102_spill] sm:$0xff]  ;;  %v1744_v20 = vld [vmem:[#allocation6 + $0x6] sm:$0x3] }
 0x34b   :  { %2091 = vmatpush1.bf16.msra.mxu0 %v13390_v10  ;;  %2134 = vmatpush1.bf16.msra.mxu1 %v13391_v27  ;;  %v13400_v10 = vld [vmem:[#allocation103_spill] sm:$0xff] }
 0x34c   :  { %2092 = vmatprep.subr.bf16.mxu0 %v13392_v8  ;;  %2135 = vmatprep.subr.bf16.mxu1 %v13393_v19 }
 0x34f   :  { %2093 = vmatpush1.bf16.msra.mxu0 %v13394_v5  ;;  %2136 = vmatpush1.bf16.msra.mxu1 %v13395_v36  ;;  %v1749_v5 = vrot.slane %v1744_v20, %v13201_v51 }
 0x350   :  { %2094 = vmatprep.subr.bf16.mxu0 %v13396_v9  ;;  %2137 = vmatprep.subr.bf16.mxu1 %v13397_v52  ;;  %v13402_v9 = vld [vmem:[#allocation105_spill] sm:$0xff] }
 0x353   :  { %2095 = vmatpush1.bf16.msra.mxu0 %v13398_v43  ;;  %2138 = vmatpush1.bf16.msra.mxu1 %v13399_v3  ;;  %v1753_v43 = vrot.slane %v1744_v20, %v13403_v28  ;;  %v13404_v3 = vld [vmem:[#allocation106_spill] sm:$0xff] }
 0x354   :  { %2096 = vmatprep.subr.bf16.mxu0 %v13400_v10  ;;  %2139 = vmatprep.subr.bf16.mxu1 %v13401_v35  ;;  %v13405_v10 = vld [vmem:[#allocation107_spill] sm:$0xff]  ;;  %v13406_v35 = vmax.f32 %v9652_v53, %v9655_v1  ;;  %v13409_v53 = vmax.f32 %v9671_v18, %v9676_v39 }
 0x355   :  { %v1680_v27 = vpop.f32.mrb[28].mxu0  ;;  %v1723_v8 = vpop.f32.mrb[28].mxu1 }
 0x356   :  { %v1682_v19 = vpop.f32.mrb[29].mxu0  ;;  %v1736_v14 = vmax.f32 %v1680_v27, %v1723_v8  ;;  %v1725_v36 = vpop.f32.mrb[29].mxu1 }
 0x357   :  { %v1684_v42 = vpop.f32.mrb[30].mxu0  ;;  %2097 = vmatpush1.bf16.msra.mxu0 %v13402_v9  ;;  %v1737_v52 = vmax.f32 %v1682_v19, %v1725_v36  ;;  %v1727_v21 = vpop.f32.mrb[30].mxu1  ;;  %2140 = vmatpush1.bf16.msra.mxu1 %v13404_v3  ;;  %v13407_v9 = vmax.f32 %v9657_v16, %v9661_v12  ;;  %v13408_v3 = vmax.f32 %v9663_v6, %v9668_v37  ;;  %v2244_v12 = vld [vmem:[#allocation8 + $0x120] sm:$0xff]  ;;  %v2241_v6 = vld [vmem:[#allocation8 + $0x108] sm:$0xff] }
 0x358   :  { %v1686_v17 = vpop.f32.mrb[31].mxu0  ;;  %2098 = vmatprep.subr.bf16.mxu0 %v13405_v10  ;;  %v1740_v26 = vmax.f32 %v13406_v35, %v1736_v14  ;;  %v1738_v27 = vmax.f32 %v1684_v42, %v1727_v21  ;;  %v1729_v8 = vpop.f32.mrb[31].mxu1  ;;  %2141 = vmatprep.subr.bf16.mxu1 %v13105_v7  ;;  %v2245_v37 = vld [vmem:[#allocation8 + $0x128] sm:$0xff] }
 0x359   :  { %v1741_v19 = vmax.f32 %v13407_v9, %v1737_v52  ;;  %v1739_v36 = vmax.f32 %v1686_v17, %v1729_v8  ;;  %v2248_v52 = vld [vmem:[#allocation8 + $0x140] sm:$0xff]  ;;  %v2249_v35 = vld [vmem:[#allocation8 + $0x148] sm:$0xff]  ;;  %v9869_v9 = vcombine.low %v2241_v6, %v2245_v37 }
 0x35a   :  { %v1756_v20 = vadd.f32 %v1749_v5, %v1740_v26  ;;  %v1742_v28 = vmax.f32 %v13408_v3, %v1738_v27  ;;  %v2253_v27 = vld [vmem:[#allocation8 + $0x168] sm:$0xff]  ;;  %v2260_v3 = vld [vmem:[#allocation8 + $0x1a0] sm:$0xff] }
 0x35b   :  { %2099 = vmatpush1.bf16.msra.mxu0 %v13108_v34  ;;  %v1757_v10 = vadd.f32 %v1753_v43, %v1741_v19  ;;  %v1743_v42 = vmax.f32 %v13409_v53, %v1739_v36  ;;  %2142 = vmatpush1.bf16.msra.mxu1 %v13110_v60  ;;  %v9874_v36 = vcombine.high %v2249_v35, %v2253_v27  ;;  %v2261_v53 = vld [vmem:[#allocation8 + $0x1a8] sm:$0xff] }
 0x35c   :  { %2100 = vmatprep.subr.bf16.mxu0 %v13111_v61  ;;  %v1758_v7 = vadd.f32 %v1749_v5, %v1742_v28  ;;  %2143 = vmatprep.subr.bf16.mxu1 %v13112_v29  ;;  %v1760_v26 = vmax.f32 %v1756_v20, 0.0  ;;  %v13413_v29 = vld [vmem:[#allocation126_spill] sm:$0xff]  ;;  %v9862_v5 = vcombine.high %v2241_v6, %v2245_v37 }
 0x35d   :  { %v1759_v17 = vadd.f32 %v1753_v43, %v1743_v42  ;;  %v1761_v16 = vmax.f32 %v1757_v10, 0.0  ;;  %v2240_v28 = vld [vmem:[#allocation8 + $0x100] sm:$0xff]  ;;  %13415 = vst [vmem:[#allocation109_spill] sm:$0xff] %v9874_v36  ;;  %v2257_v10 = vld [vmem:[#allocation8 + $0x188] sm:$0xff] }
 0x35e   :  { %v1762_v1 = vmax.f32 %v1758_v7, 0.0  ;;  %v9859_v21 = vcombine.high %v2240_v28, %v2244_v12  ;;  %v2252_v43 = vld [vmem:[#allocation8 + $0x160] sm:$0xff]  ;;  %v9865_v8 = vcombine.low %v2240_v28, %v2244_v12  ;;  %v9881_v7 = vcombine.low %v2249_v35, %v2253_v27  ;;  %v2273_v28 = vld [vmem:[#allocation8 + $0x208] sm:$0xff] }
 0x35f   :  { %2101 = vmatpush1.bf16.msra.mxu0 %v13113_v59  ;;  %v1763_v14 = vmax.f32 %v1759_v17, 0.0  ;;  %2144 = vmatpush1.bf16.msra.mxu1 %v13114_v22  ;;  %v9871_v19 = vcombine.high %v2248_v52, %v2252_v43  ;;  %v2256_v20 = vld [vmem:[#allocation8 + $0x180] sm:$0xff]  ;;  %v9877_v42 = vcombine.low %v2248_v52, %v2252_v43  ;;  %v2277_v12 = vld [vmem:[#allocation8 + $0x228] sm:$0xff] }
 0x360   :  { %2102 = vmatprep.subr.bf16.mxu0 %v13115_v55  ;;  %v9775_v34 = vpack.c.bf16 %v1762_v1, %v1760_v26  ;;  %2145 = vmatprep.subr.bf16.mxu1 %v13117_v45  ;;  %v2232_v45 = vld [vmem:[#allocation8 + $0xc0] sm:$0xff]  ;;  %13417 = vst [vmem:[#allocation111_spill] sm:$0xff] %v9881_v7  ;;  %v9883_v17 = vcombine.high %v2256_v20, %v2260_v3 }
 0x361   :  { %v9778_v60 = vpack.c.bf16 %v1763_v14, %v1761_v16  ;;  %13414 = vst [vmem:[#allocation108_spill] sm:$0xff] %v9871_v19  ;;  %13416 = vst [vmem:[#allocation110_spill] sm:$0xff] %v9877_v42  ;;  %v9888_v1 = vcombine.high %v2257_v10, %v2261_v53  ;;  %v2264_v16 = vld [vmem:[#allocation8 + $0x1c0] sm:$0xff]  ;;  %v9934_v43 = vcombine.high %v2273_v28, %v2277_v12 }
 0x362   :  { %13418 = vst [vmem:[#allocation112_spill] sm:$0xff] %v9883_v17  ;;  %v2268_v14 = vld [vmem:[#allocation8 + $0x1e0] sm:$0xff] }
 0x363   :  { %2103 = vmatpush1.bf16.msra.mxu0 %v13119_v62  ;;  %2146 = vmatpush1.bf16.msra.mxu1 %v13120_v11  ;;  %v2236_v62 = vld [vmem:[#allocation8 + $0xe0] sm:$0xff]  ;;  %v2233_v11 = vld [vmem:[#allocation8 + $0xc8] sm:$0xff]  ;;  %13419 = vst [vmem:[#allocation113_spill] sm:$0xff] %v9888_v1  ;;  %v9925_v6 = vcombine.low %v2264_v16, %v2268_v14  ;;  %13427 = vst [vmem:[#allocation121_spill] sm:$0xff] %v9934_v43 }
 0x364   :  { %2104 = vmatprep.subr.bf16.mxu0 %v13121_v4  ;;  %2147 = vmatprep.subr.bf16.mxu1 %v13122_v23  ;;  %v2237_v4 = vld [vmem:[#allocation8 + $0xe8] sm:$0xff]  ;;  %v9853_v18 = vcombine.low %v2232_v45, %v2236_v62  ;;  %v2280_v35 = vld [vmem:[#allocation8 + $0x240] sm:$0xff] }
 0x365   :  { %v9857_v39 = vcombine.low %v2233_v11, %v2237_v4  ;;  %13424 = vst [vmem:[#allocation118_spill] sm:$0xff] %v9925_v6  ;;  %v2284_v27 = vld [vmem:[#allocation8 + $0x260] sm:$0xff] }
 0x367   :  { %2105 = vmatpush1.bf16.msra.mxu0 %v13123_v24  ;;  %2148 = vmatpush1.bf16.msra.mxu1 %v13040_v56  ;;  %v2221_v56 = vld [vmem:[#allocation8 + $0x68] sm:$0xff] }
 0x368   :  { %2106 = vmatprep.subr.bf16.mxu0 %v13041_v47  ;;  %2149 = vmatprep.subr.bf16.mxu1 %v13042_v41  ;;  %v13411_v47 = vld [vmem:[#allocation136_spill] sm:$0xff]  ;;  %v13412_v41 = vld [vmem:[#allocation133_spill] sm:$0xff] }
 0x36b   :  { %2107 = vmatpush1.bf16.msra.mxu0 %v13124_v50  ;;  %2150 = vmatpush1.bf16.msra.mxu1 %v13044_v32  ;;  %v9847_v50 = vcombine.high %v2232_v45, %v2236_v62  ;;  %v2272_v62 = vld [vmem:[#allocation8 + $0x200] sm:$0xff] }
 0x36c   :  { %2108 = vmatprep.subr.bf16.mxu0 %v13045_v63  ;;  %2151 = vmatprep.subr.bf16.mxu1 %v13046_v38  ;;  %v2212_v38 = vld [vmem:[#allocation8 + $0x20] sm:$0xff]  ;;  %v2213_v63 = vld [vmem:[#allocation8 + $0x28] sm:$0xff] }
 0x36f   :  { %2109 = vmatpush1.bf16.msra.mxu0 %v13047_v33  ;;  %2152 = vmatpush1.bf16.msra.mxu1 %v13048_v48  ;;  %v2208_v33 = vld [vmem:[#allocation8] sm:$0xff]  ;;  %v2225_v48 = vld [vmem:[#allocation8 + $0x88] sm:$0xff] }
 0x370   :  { %2110 = vmatprep.subr.bf16.mxu0 %v13049_v40  ;;  %2153 = vmatprep.subr.bf16.mxu1 %v13050_v46  ;;  %v2209_v40 = vld [vmem:[#allocation8 + $0x8] sm:$0xff] }
 0x371   :  { %v2229_v46 = vld [vmem:[#allocation8 + $0xa8] sm:$0xff] }
 0x372   :  { %v9837_v55 = vcombine.high %v2225_v48, %v2229_v46  ;;  %v9845_v24 = vcombine.low %v2225_v48, %v2229_v46  ;;  %v2293_v48 = vld [vmem:[#allocation8 + $0x2a8] sm:$0xff] }
 0x373   :  { %2111 = vmatpush1.bf16.msra.mxu0 %v8863_v0  ;;  %2154 = vmatpush1.bf16.msra.mxu1 %v8867_v57  ;;  %v9807_v0 = vcombine.high %v2208_v33, %v2212_v38  ;;  %v9810_v57 = vcombine.high %v2209_v40, %v2213_v63 }
 0x374   :  { %2112 = vmatprep.subr.bf16.mxu0 %v8869_v58  ;;  %2155 = vmatprep.subr.bf16.mxu1 %v13051_v25  ;;  %v2216_v58 = vld [vmem:[#allocation8 + $0x40] sm:$0xff]  ;;  %v2217_v25 = vld [vmem:[#allocation8 + $0x48] sm:$0xff] }
 0x375   :  { %v9823_v32 = vcombine.high %v2217_v25, %v2221_v56  ;;  %v9831_v59 = vcombine.low %v2217_v25, %v2221_v56  ;;  %v9901_v25 = vcombine.low %v2256_v20, %v2260_v3  ;;  %v2281_v20 = vld [vmem:[#allocation8 + $0x248] sm:$0xff]  ;;  %v2296_v56 = vld [vmem:[#allocation8 + $0x2c0] sm:$0xff] }
 0x376   :  { %v2285_v3 = vld [vmem:[#allocation8 + $0x268] sm:$0xff] }
 0x377   :  { %2113 = vmatpush1.bf16.msra.mxu0 %v8875_v15  ;;  %2156 = vmatpush1.bf16.msra.mxu1 %v8879_v49  ;;  %v2220_v15 = vld [vmem:[#allocation8 + $0x60] sm:$0xff]  ;;  %v13410_v49 = vld [vmem:[#allocation135_spill] sm:$0xff]  ;;  %13420 = vst [vmem:[#allocation114_spill] sm:$0xff] %v9901_v25 }
 0x378   :  { %2114 = vmatprep.subr.bf16.mxu0 %v8881_v30  ;;  %2157 = vmatprep.subr.bf16.mxu1 %v13125_v44  ;;  %v9813_v30 = vcombine.low %v2208_v33, %v2212_v38  ;;  %v9827_v61 = vcombine.low %v2216_v58, %v2220_v15  ;;  %v9850_v44 = vcombine.high %v2233_v11, %v2237_v4  ;;  %v2276_v11 = vld [vmem:[#allocation8 + $0x220] sm:$0xff]  ;;  %v2289_v4 = vld [vmem:[#allocation8 + $0x288] sm:$0xff] }
 0x379   :  { %v9931_v52 = vcombine.high %v2272_v62, %v2276_v11 }
 0x37b   :  { %2115 = vmatpush1.bf16.msra.mxu0 %v8887_v54  ;;  %2158 = vmatpush1.bf16.msra.mxu1 %v8891_v2  ;;  %v9817_v54 = vcombine.low %v2209_v40, %v2213_v63  ;;  %v9820_v2 = vcombine.high %v2216_v58, %v2220_v15  ;;  %v2265_v40 = vld [vmem:[#allocation8 + $0x1c8] sm:$0xff]  ;;  %13426 = vst [vmem:[#allocation120_spill] sm:$0xff] %v9931_v52  ;;  %v2300_v58 = vld [vmem:[#allocation8 + $0x2e0] sm:$0xff] }
 0x37c   :  { %2116 = vmatprep.subr.bf16.mxu0 %v8893_v31  ;;  %2159 = vmatprep.subr.bf16.mxu1 %v8896_v13  ;;  %v2224_v31 = vld [vmem:[#allocation8 + $0x80] sm:$0xff]  ;;  %v2269_v63 = vld [vmem:[#allocation8 + $0x1e8] sm:$0xff] }
 0x37d   :  { %v2228_v13 = vld [vmem:[#allocation8 + $0xa0] sm:$0xff]  ;;  %v9920_v45 = vcombine.high %v2265_v40, %v2269_v63  ;;  %v9929_v37 = vcombine.low %v2265_v40, %v2269_v63 }
 0x37e   :  { %v9833_v22 = vcombine.high %v2224_v31, %v2228_v13  ;;  %v9841_v23 = vcombine.low %v2224_v31, %v2228_v13  ;;  %v9911_v13 = vcombine.low %v2257_v10, %v2261_v53  ;;  %v9937_v10 = vcombine.low %v2272_v62, %v2276_v11  ;;  %v2288_v40 = vld [vmem:[#allocation8 + $0x280] sm:$0xff] }
 0x37f   :  { %2117 = vmatpush1.bf16.msra.mxu0 %v13410_v49  ;;  %2160 = vmatpush1.bf16.msra.mxu1 %v13411_v47  ;;  %13423 = vst [vmem:[#allocation117_spill] sm:$0xff] %v9920_v45  ;;  %13425 = vst [vmem:[#allocation119_spill] sm:$0xff] %v9929_v37  ;;  %v9941_v53 = vcombine.low %v2273_v28, %v2277_v12  ;;  %v2292_v63 = vld [vmem:[#allocation8 + $0x2a0] sm:$0xff]  ;;  %v9949_v62 = vcombine.low %v2280_v35, %v2284_v27 }
 0x380   :  { %5288 = vmatprep.subr.bf16.mxu0 %v9807_v0  ;;  %5460 = vmatprep.subr.bf16.mxu1 %v9810_v57  ;;  %13421 = vst [vmem:[#allocation115_spill] sm:$0xff] %v9911_v13  ;;  %13428 = vst [vmem:[#allocation125_spill] sm:$0xff] %v9937_v10  ;;  %v9953_v11 = vcombine.low %v2281_v20, %v2285_v3  ;;  %v9955_v28 = vcombine.high %v2288_v40, %v2292_v63 }
 0x381   :  { %13429 = vst [vmem:[#allocation134_spill] sm:$0xff] %v9941_v53  ;;  %13432 = vst [vmem:[#allocation21_spill] sm:$0xff] %v9949_v62  ;;  %v9958_v12 = vcombine.high %v2289_v4, %v2293_v48 }
 0x382   :  { %2119 = vmatmul.mubr.bf16.vlgmr.msra.gmra.mrb[44].mxu0 %v13412_v41  ;;  %2162 = vmatmul.mubr.bf16.vlgmr.msra.gmra.mrb[44].mxu1 %v13412_v41  ;;  %v9913_v41 = vcombine.high %v2264_v16, %v2268_v14  ;;  %v9943_v16 = vcombine.high %v2280_v35, %v2284_v27  ;;  %v9946_v14 = vcombine.high %v2281_v20, %v2285_v3 }
 0x383   :  { %5289 = vmatpush1.bf16.msra.mxu0 %v9813_v30  ;;  %5320 = vmatprep.mubr.bf16.mxu0 %v13413_v29  ;;  %13433 = vst [vmem:[#allocation130_spill] sm:$0xff] %v9953_v11  ;;  %13434 = vst [vmem:[#allocation20_spill] sm:$0xff] %v9955_v28  ;;  %v9961_v35 = vcombine.low %v2288_v40, %v2292_v63  ;;  %v9965_v27 = vcombine.low %v2289_v4, %v2293_v48 }
 0x384   :  { %5461 = vmatpush1.bf16.msra.mxu1 %v9817_v54  ;;  %5492 = vmatprep.mubr.bf16.mxu1 %v13413_v29  ;;  %13422 = vst [vmem:[#allocation116_spill] sm:$0xff] %v9913_v41  ;;  %13430 = vst [vmem:[#allocation127_spill] sm:$0xff] %v9943_v16  ;;  %v9967_v20 = vcombine.high %v2296_v56, %v2300_v58  ;;  %v9973_v40 = vcombine.low %v2296_v56, %v2300_v58 }
 0x385   :  { %5290 = vmatprep.subr.bf16.mxu0 %v9820_v2  ;;  %5462 = vmatprep.subr.bf16.mxu1 %v9823_v32  ;;  %13431 = vst [vmem:[#allocation19_spill] sm:$0xff] %v9946_v14  ;;  %13435 = vst [vmem:[#allocation22_spill] sm:$0xff] %v9958_v12 }
 0x386   :  { %13436 = vst [vmem:[#allocation23_spill] sm:$0xff] %v9961_v35  ;;  %13437 = vst [vmem:[#allocation24_spill] sm:$0xff] %v9965_v27 }
 0x387   :  { %5291 = vmatpush1.bf16.msra.mxu0 %v9827_v61  ;;  %13438 = vst [vmem:[#allocation25_spill] sm:$0xff] %v9967_v20  ;;  %13440 = vst [vmem:[#allocation27_spill] sm:$0xff] %v9973_v40 }
 0x388   :  { %5463 = vmatpush1.bf16.msra.mxu1 %v9831_v59  ;;  %5292 = vmatprep.subr.bf16.mxu0 %v9833_v22 }
 0x389   :  { %5464 = vmatprep.subr.bf16.mxu1 %v9837_v55 }
 0x38b   :  { %5293 = vmatpush1.bf16.msra.mxu0 %v9841_v23 }
 0x38c   :  { %5465 = vmatpush1.bf16.msra.mxu1 %v9845_v24  ;;  %5294 = vmatprep.subr.bf16.mxu0 %v9847_v50 }
 0x38d   :  { %5466 = vmatprep.subr.bf16.mxu1 %v9850_v44 }
 0x38f   :  { %5295 = vmatpush1.bf16.msra.mxu0 %v9853_v18 }
 0x390   :  { %5467 = vmatpush1.bf16.msra.mxu1 %v9857_v39  ;;  %5296 = vmatprep.subr.bf16.mxu0 %v9859_v21 }
 0x391   :  { %5468 = vmatprep.subr.bf16.mxu1 %v9862_v5 }
 0x393   :  { %5297 = vmatpush1.bf16.msra.mxu0 %v9865_v8 }
 0x394   :  { %5469 = vmatpush1.bf16.msra.mxu1 %v9869_v9  ;;  %5298 = vmatprep.subr.bf16.mxu0 %v9871_v19 }
 0x395   :  { %v9885_v26 = vpop.f32.mrb[32].mxu0  ;;  %5470 = vmatprep.subr.bf16.mxu1 %v9874_v36  ;;  %v9890_v33 = vpop.f32.mrb[32].mxu1 }
 0x396   :  { %v9892_v38 = vpop.f32.mrb[33].mxu0  ;;  %v9896_v15 = vpop.f32.mrb[33].mxu1 }
 0x397   :  { %v9898_v49 = vpop.f32.mrb[34].mxu0  ;;  %5299 = vmatpush1.bf16.msra.mxu0 %v9877_v42  ;;  %v9905_v47 = vpop.f32.mrb[34].mxu1 }
 0x398   :  { %5471 = vmatpush1.bf16.msra.mxu1 %v9881_v7  ;;  %v9908_v31 = vpop.f32.mrb[35].mxu0  ;;  %5300 = vmatprep.subr.bf16.mxu0 %v9883_v17  ;;  %v9917_v46 = vpop.f32.mrb[35].mxu1 }
 0x399   :  { %5472 = vmatprep.subr.bf16.mxu1 %v9888_v1 }
 0x39b   :  { %5301 = vmatpush1.bf16.msra.mxu0 %v9901_v25 }
 0x39c   :  { %5473 = vmatpush1.bf16.msra.mxu1 %v9911_v13  ;;  %5302 = vmatprep.subr.bf16.mxu0 %v9913_v41 }
 0x39d   :  { %5474 = vmatprep.subr.bf16.mxu1 %v9920_v45 }
 0x39f   :  { %5303 = vmatpush1.bf16.msra.mxu0 %v9925_v6  ;;  %v2373_v6 = vld [vmem:[#allocation8 + $0x528] sm:$0xff] }
 0x3a0   :  { %5475 = vmatpush1.bf16.msra.mxu1 %v9929_v37  ;;  %5304 = vmatprep.subr.bf16.mxu0 %v9931_v52  ;;  %v2301_v52 = vld [vmem:[#allocation8 + $0x2e8] sm:$0xff] }
 0x3a1   :  { %5476 = vmatprep.subr.bf16.mxu1 %v9934_v43  ;;  %v2297_v43 = vld [vmem:[#allocation8 + $0x2c8] sm:$0xff] }
 0x3a2   :  { %v9970_v3 = vcombine.high %v2297_v43, %v2301_v52  ;;  %v9977_v48 = vcombine.low %v2297_v43, %v2301_v52  ;;  %v2369_v37 = vld [vmem:[#allocation8 + $0x508] sm:$0xff] }
 0x3a3   :  { %5305 = vmatpush1.bf16.msra.mxu0 %v9937_v10  ;;  %v2309_v10 = vld [vmem:[#allocation8 + $0x328] sm:$0xff] }
 0x3a4   :  { %5477 = vmatpush1.bf16.msra.mxu1 %v9941_v53  ;;  %5306 = vmatprep.subr.bf16.mxu0 %v9943_v16  ;;  %13439 = vst [vmem:[#allocation26_spill] sm:$0xff] %v9970_v3  ;;  %v2308_v16 = vld [vmem:[#allocation8 + $0x320] sm:$0xff]  ;;  %v2305_v53 = vld [vmem:[#allocation8 + $0x308] sm:$0xff]  ;;  %13441 = vst [vmem:[#allocation28_spill] sm:$0xff] %v9977_v48 }
 0x3a5   :  { %5478 = vmatprep.subr.bf16.mxu1 %v9946_v14  ;;  %v2304_v14 = vld [vmem:[#allocation8 + $0x300] sm:$0xff]  ;;  %v9982_v63 = vcombine.high %v2305_v53, %v2309_v10  ;;  %v9989_v56 = vcombine.low %v2305_v53, %v2309_v10 }
 0x3a6   :  { %v9979_v4 = vcombine.high %v2304_v14, %v2308_v16  ;;  %v9985_v58 = vcombine.low %v2304_v14, %v2308_v16 }
 0x3a7   :  { %5307 = vmatpush1.bf16.msra.mxu0 %v9949_v62  ;;  %13443 = vst [vmem:[#allocation30_spill] sm:$0xff] %v9982_v63  ;;  %v2317_v62 = vld [vmem:[#allocation8 + $0x368] sm:$0xff]  ;;  %13445 = vst [vmem:[#allocation32_spill] sm:$0xff] %v9989_v56 }
 0x3a8   :  { %5479 = vmatpush1.bf16.msra.mxu1 %v9953_v11  ;;  %5308 = vmatprep.subr.bf16.mxu0 %v9955_v28  ;;  %13442 = vst [vmem:[#allocation29_spill] sm:$0xff] %v9979_v4  ;;  %v2316_v28 = vld [vmem:[#allocation8 + $0x360] sm:$0xff]  ;;  %v2313_v11 = vld [vmem:[#allocation8 + $0x348] sm:$0xff]  ;;  %13444 = vst [vmem:[#allocation31_spill] sm:$0xff] %v9985_v58 }
 0x3a9   :  { %5480 = vmatprep.subr.bf16.mxu1 %v9958_v12  ;;  %v2312_v12 = vld [vmem:[#allocation8 + $0x340] sm:$0xff]  ;;  %v9994_v43 = vcombine.high %v2313_v11, %v2317_v62  ;;  %v10001_v10 = vcombine.low %v2313_v11, %v2317_v62 }
 0x3aa   :  { %v9991_v52 = vcombine.high %v2312_v12, %v2316_v28  ;;  %v9997_v16 = vcombine.low %v2312_v12, %v2316_v28 }
 0x3ab   :  { %5309 = vmatpush1.bf16.msra.mxu0 %v9961_v35  ;;  %13447 = vst [vmem:[#allocation34_spill] sm:$0xff] %v9994_v43  ;;  %v2325_v35 = vld [vmem:[#allocation8 + $0x3a8] sm:$0xff]  ;;  %13449 = vst [vmem:[#allocation36_spill] sm:$0xff] %v10001_v10 }
 0x3ac   :  { %5481 = vmatpush1.bf16.msra.mxu1 %v9965_v27  ;;  %5310 = vmatprep.subr.bf16.mxu0 %v9967_v20  ;;  %13446 = vst [vmem:[#allocation33_spill] sm:$0xff] %v9991_v52  ;;  %v2324_v20 = vld [vmem:[#allocation8 + $0x3a0] sm:$0xff]  ;;  %v2321_v27 = vld [vmem:[#allocation8 + $0x388] sm:$0xff]  ;;  %13448 = vst [vmem:[#allocation35_spill] sm:$0xff] %v9997_v16 }
 0x3ad   :  { %5482 = vmatprep.subr.bf16.mxu1 %v9970_v3  ;;  %v2320_v3 = vld [vmem:[#allocation8 + $0x380] sm:$0xff]  ;;  %v10006_v14 = vcombine.high %v2321_v27, %v2325_v35  ;;  %v10013_v62 = vcombine.low %v2321_v27, %v2325_v35 }
 0x3ae   :  { %v10003_v53 = vcombine.high %v2320_v3, %v2324_v20  ;;  %v10009_v28 = vcombine.low %v2320_v3, %v2324_v20 }
 0x3af   :  { %5311 = vmatpush1.bf16.msra.mxu0 %v9973_v40  ;;  %13451 = vst [vmem:[#allocation38_spill] sm:$0xff] %v10006_v14  ;;  %v2333_v40 = vld [vmem:[#allocation8 + $0x3e8] sm:$0xff]  ;;  %13453 = vst [vmem:[#allocation40_spill] sm:$0xff] %v10013_v62 }
 0x3b0   :  { %5483 = vmatpush1.bf16.msra.mxu1 %v9977_v48  ;;  %5312 = vmatprep.subr.bf16.mxu0 %v9979_v4  ;;  %13450 = vst [vmem:[#allocation37_spill] sm:$0xff] %v10003_v53  ;;  %v2332_v4 = vld [vmem:[#allocation8 + $0x3e0] sm:$0xff]  ;;  %v2329_v48 = vld [vmem:[#allocation8 + $0x3c8] sm:$0xff]  ;;  %13452 = vst [vmem:[#allocation39_spill] sm:$0xff] %v10009_v28 }
 0x3b1   :  { %5484 = vmatprep.subr.bf16.mxu1 %v9982_v63  ;;  %v2328_v63 = vld [vmem:[#allocation8 + $0x3c0] sm:$0xff]  ;;  %v10018_v12 = vcombine.high %v2329_v48, %v2333_v40  ;;  %v10025_v35 = vcombine.low %v2329_v48, %v2333_v40 }
 0x3b2   :  { %v10015_v11 = vcombine.high %v2328_v63, %v2332_v4  ;;  %v10021_v20 = vcombine.low %v2328_v63, %v2332_v4  ;;  %v2345_v4 = vld [vmem:[#allocation8 + $0x448] sm:$0xff] }
 0x3b3   :  { %5313 = vmatpush1.bf16.msra.mxu0 %v9985_v58  ;;  %13455 = vst [vmem:[#allocation42_spill] sm:$0xff] %v10018_v12  ;;  %v2341_v58 = vld [vmem:[#allocation8 + $0x428] sm:$0xff]  ;;  %13457 = vst [vmem:[#allocation44_spill] sm:$0xff] %v10025_v35 }
 0x3b4   :  { %5485 = vmatpush1.bf16.msra.mxu1 %v9989_v56  ;;  %5314 = vmatprep.subr.bf16.mxu0 %v9991_v52  ;;  %13454 = vst [vmem:[#allocation41_spill] sm:$0xff] %v10015_v11  ;;  %v2340_v52 = vld [vmem:[#allocation8 + $0x420] sm:$0xff]  ;;  %v2337_v56 = vld [vmem:[#allocation8 + $0x408] sm:$0xff]  ;;  %13456 = vst [vmem:[#allocation43_spill] sm:$0xff] %v10021_v20 }
 0x3b5   :  { %5486 = vmatprep.subr.bf16.mxu1 %v9994_v43  ;;  %v2336_v43 = vld [vmem:[#allocation8 + $0x400] sm:$0xff]  ;;  %v10030_v3 = vcombine.high %v2337_v56, %v2341_v58  ;;  %v2349_v63 = vld [vmem:[#allocation8 + $0x468] sm:$0xff]  ;;  %v10037_v40 = vcombine.low %v2337_v56, %v2341_v58  ;;  %v13466_v58 = vld [vmem:[#allocation129_spill] sm:$0xff] }
 0x3b6   :  { %v10027_v27 = vcombine.high %v2336_v43, %v2340_v52  ;;  %v10051_v56 = vcombine.low %v2345_v4, %v2349_v63 }
 0x3b7   :  { %5315 = vmatpush1.bf16.msra.mxu0 %v9997_v16  ;;  %13459 = vst [vmem:[#allocation46_spill] sm:$0xff] %v10030_v3  ;;  %13461 = vst [vmem:[#allocation48_spill] sm:$0xff] %v10037_v40  ;;  %v2364_v16 = vld [vmem:[#allocation8 + $0x4e0] sm:$0xff] }
 0x3b8   :  { %5487 = vmatpush1.bf16.msra.mxu1 %v10001_v10  ;;  %5316 = vmatprep.subr.bf16.mxu0 %v10003_v53  ;;  %13458 = vst [vmem:[#allocation45_spill] sm:$0xff] %v10027_v27  ;;  %v2348_v53 = vld [vmem:[#allocation8 + $0x460] sm:$0xff]  ;;  %v10033_v10 = vcombine.low %v2336_v43, %v2340_v52  ;;  %v2353_v52 = vld [vmem:[#allocation8 + $0x488] sm:$0xff]  ;;  %13467 = vst [vmem:[#allocation52_spill] sm:$0xff] %v10051_v56 }
 0x3b9   :  { %5488 = vmatprep.subr.bf16.mxu1 %v10006_v14  ;;  %v2344_v14 = vld [vmem:[#allocation8 + $0x440] sm:$0xff]  ;;  %v2357_v43 = vld [vmem:[#allocation8 + $0x4a8] sm:$0xff] }
 0x3ba   :  { %13460 = vst [vmem:[#allocation47_spill] sm:$0xff] %v10033_v10  ;;  %v10040_v48 = vcombine.high %v2344_v14, %v2348_v53 }
 0x3bb   :  { %5317 = vmatpush1.bf16.msra.mxu0 %v10009_v28  ;;  %v10043_v28 = vcombine.high %v2345_v4, %v2349_v63  ;;  %v10065_v4 = vcombine.low %v2353_v52, %v2357_v43 }
 0x3bc   :  { %5489 = vmatpush1.bf16.msra.mxu1 %v10013_v62  ;;  %5318 = vmatprep.subr.bf16.mxu0 %v10015_v11  ;;  %13462 = vst [vmem:[#allocation49_spill] sm:$0xff] %v10040_v48  ;;  %v2356_v11 = vld [vmem:[#allocation8 + $0x4a0] sm:$0xff]  ;;  %v13463_v62 = vld [vmem:[#allocation124_spill] sm:$0xff] }
 0x3bd   :  { %5490 = vmatprep.subr.bf16.mxu1 %v10018_v12  ;;  %v2352_v12 = vld [vmem:[#allocation8 + $0x480] sm:$0xff]  ;;  %13464 = vst [vmem:[#allocation50_spill] sm:$0xff] %v10043_v28  ;;  %13471 = vst [vmem:[#allocation56_spill] sm:$0xff] %v10065_v4 }
 0x3bf   :  { %5319 = vmatpush1.bf16.msra.mxu0 %v10021_v20  ;;  %v2360_v20 = vld [vmem:[#allocation8 + $0x4c0] sm:$0xff] }
 0x3c0   :  { %5491 = vmatpush1.bf16.msra.mxu1 %v10025_v35  ;;  %5331 = vmatprep.subr.bf16.mxu0 %v10027_v27  ;;  %v10047_v35 = vcombine.low %v2344_v14, %v2348_v53  ;;  %v10057_v27 = vcombine.high %v2353_v52, %v2357_v43  ;;  %v2361_v53 = vld [vmem:[#allocation8 + $0x4c8] sm:$0xff]  ;;  %v10067_v63 = vcombine.high %v2360_v20, %v2364_v16 }
 0x3c1   :  { %5503 = vmatprep.subr.bf16.mxu1 %v10030_v3  ;;  %v10053_v3 = vcombine.high %v2352_v12, %v2356_v11  ;;  %v2365_v14 = vld [vmem:[#allocation8 + $0x4e8] sm:$0xff]  ;;  %v10082_v43 = vcombine.high %v2369_v37, %v2373_v6 }
 0x3c2   :  { %5321 = vmatmul.mubr.bf16.vlgmr.msra.gmra.mrb[48].mxu0 %v13463_v62  ;;  %13465 = vst [vmem:[#allocation51_spill] sm:$0xff] %v10047_v35  ;;  %13469 = vst [vmem:[#allocation54_spill] sm:$0xff] %v10057_v27 }
 0x3c3   :  { %5493 = vmatmul.mubr.bf16.vlgmr.msra.gmra.mrb[48].mxu1 %v13463_v62  ;;  %5332 = vmatpush1.bf16.msra.mxu0 %v10033_v10  ;;  %13468 = vst [vmem:[#allocation53_spill] sm:$0xff] %v10053_v3  ;;  %v10061_v10 = vcombine.low %v2352_v12, %v2356_v11  ;;  %13472 = vst [vmem:[#allocation57_spill] sm:$0xff] %v10067_v63  ;;  %v10073_v11 = vcombine.low %v2360_v20, %v2364_v16 }
 0x3c4   :  { %5363 = vmatprep.mubr.bf16.mxu0 %v13466_v58  ;;  %5504 = vmatpush1.bf16.msra.mxu1 %v10037_v40  ;;  %v2368_v40 = vld [vmem:[#allocation8 + $0x500] sm:$0xff]  ;;  %v10077_v12 = vcombine.low %v2361_v53, %v2365_v14  ;;  %13477 = vst [vmem:[#allocation62_spill] sm:$0xff] %v10082_v43  ;;  %v10089_v20 = vcombine.low %v2369_v37, %v2373_v6 }
 0x3c5   :  { %5535 = vmatprep.mubr.bf16.mxu1 %v13466_v58  ;;  %5333 = vmatprep.subr.bf16.mxu0 %v10040_v48  ;;  %13470 = vst [vmem:[#allocation55_spill] sm:$0xff] %v10061_v10  ;;  %v10070_v48 = vcombine.high %v2361_v53, %v2365_v14  ;;  %13474 = vst [vmem:[#allocation59_spill] sm:$0xff] %v10073_v11 }
 0x3c6   :  { %5505 = vmatprep.subr.bf16.mxu1 %v10043_v28  ;;  %v2372_v28 = vld [vmem:[#allocation8 + $0x520] sm:$0xff]  ;;  %13475 = vst [vmem:[#allocation60_spill] sm:$0xff] %v10077_v12  ;;  %13479 = vst [vmem:[#allocation64_spill] sm:$0xff] %v10089_v20 }
 0x3c7   :  { %5334 = vmatpush1.bf16.msra.mxu0 %v10047_v35  ;;  %13473 = vst [vmem:[#allocation58_spill] sm:$0xff] %v10070_v48  ;;  %v10079_v52 = vcombine.high %v2368_v40, %v2372_v28  ;;  %v2381_v35 = vld [vmem:[#allocation8 + $0x568] sm:$0xff]  ;;  %v10085_v16 = vcombine.low %v2368_v40, %v2372_v28  ;;  %v1964_v40 = vld [vmem:[#allocation6 + $0x8] sm:$0x3] }
 0x3c8   :  { %5506 = vmatpush1.bf16.msra.mxu1 %v10051_v56  ;;  %5335 = vmatprep.subr.bf16.mxu0 %v10053_v3  ;;  %v2380_v3 = vld [vmem:[#allocation8 + $0x560] sm:$0xff]  ;;  %v2377_v56 = vld [vmem:[#allocation8 + $0x548] sm:$0xff] }
 0x3c9   :  { %5507 = vmatprep.subr.bf16.mxu1 %v10057_v27  ;;  %13476 = vst [vmem:[#allocation61_spill] sm:$0xff] %v10079_v52  ;;  %v2376_v27 = vld [vmem:[#allocation8 + $0x540] sm:$0xff]  ;;  %13478 = vst [vmem:[#allocation63_spill] sm:$0xff] %v10085_v16  ;;  %v10094_v14 = vcombine.high %v2377_v56, %v2381_v35  ;;  %v10101_v6 = vcombine.low %v2377_v56, %v2381_v35 }
 0x3ca   :  { %v10091_v53 = vcombine.high %v2376_v27, %v2380_v3  ;;  %v10097_v28 = vcombine.low %v2376_v27, %v2380_v3  ;;  %v2393_v27 = vld [vmem:[#allocation8 + $0x5c8] sm:$0xff] }
 0x3cb   :  { %5336 = vmatpush1.bf16.msra.mxu0 %v10061_v10  ;;  %13481 = vst [vmem:[#allocation66_spill] sm:$0xff] %v10094_v14  ;;  %v2389_v10 = vld [vmem:[#allocation8 + $0x5a8] sm:$0xff]  ;;  %13483 = vst [vmem:[#allocation68_spill] sm:$0xff] %v10101_v6 }
 0x3cc   :  { %5508 = vmatpush1.bf16.msra.mxu1 %v10065_v4  ;;  %5337 = vmatprep.subr.bf16.mxu0 %v10067_v63  ;;  %13480 = vst [vmem:[#allocation65_spill] sm:$0xff] %v10091_v53  ;;  %v2388_v63 = vld [vmem:[#allocation8 + $0x5a0] sm:$0xff]  ;;  %v2385_v4 = vld [vmem:[#allocation8 + $0x588] sm:$0xff]  ;;  %13482 = vst [vmem:[#allocation67_spill] sm:$0xff] %v10097_v28 }
 0x3cd   :  { %5509 = vmatprep.subr.bf16.mxu1 %v10070_v48  ;;  %v2384_v48 = vld [vmem:[#allocation8 + $0x580] sm:$0xff]  ;;  %v2397_v3 = vld [vmem:[#allocation8 + $0x5e8] sm:$0xff]  ;;  %v10115_v7 = vcombine.low %v2385_v4, %v2389_v10 }
 0x3ce   :  { %v10103_v37 = vcombine.high %v2384_v48, %v2388_v63  ;;  %v10111_v25 = vcombine.low %v2384_v48, %v2388_v63  ;;  %v10123_v48 = vcombine.high %v2393_v27, %v2397_v3  ;;  %v2404_v63 = vld [vmem:[#allocation8 + $0x620] sm:$0xff] }
 0x3cf   :  { %5338 = vmatpush1.bf16.msra.mxu0 %v10073_v11  ;;  %v2396_v11 = vld [vmem:[#allocation8 + $0x5e0] sm:$0xff]  ;;  %13488 = vst [vmem:[#allocation72_spill] sm:$0xff] %v10115_v7 }
 0x3d0   :  { %5510 = vmatpush1.bf16.msra.mxu1 %v10077_v12  ;;  %5339 = vmatprep.subr.bf16.mxu0 %v10079_v52  ;;  %13484 = vst [vmem:[#allocation69_spill] sm:$0xff] %v10103_v37  ;;  %v10106_v52 = vcombine.high %v2385_v4, %v2389_v10  ;;  %v2392_v12 = vld [vmem:[#allocation8 + $0x5c0] sm:$0xff]  ;;  %13487 = vst [vmem:[#allocation71_spill] sm:$0xff] %v10111_v25  ;;  %v2401_v4 = vld [vmem:[#allocation8 + $0x608] sm:$0xff] }
 0x3d1   :  { %5511 = vmatprep.subr.bf16.mxu1 %v10082_v43  ;;  %13491 = vst [vmem:[#allocation74_spill] sm:$0xff] %v10123_v48 }
 0x3d2   :  { %13485 = vst [vmem:[#allocation70_spill] sm:$0xff] %v10106_v52 }
 0x3d3   :  { %5340 = vmatpush1.bf16.msra.mxu0 %v10085_v16 }
 0x3d4   :  { %5512 = vmatpush1.bf16.msra.mxu1 %v10089_v20  ;;  %5341 = vmatprep.subr.bf16.mxu0 %v10091_v53  ;;  %v1969_v20 = vrot.slane %v1964_v40, %v13201_v51  ;;  %v13486_v53 = vld [vmem:[#allocation123_spill] sm:$0xff] }
 0x3d5   :  { %v1900_v43 = vpop.f32.mrb[36].mxu0  ;;  %5513 = vmatprep.subr.bf16.mxu1 %v10094_v14  ;;  %v1943_v45 = vpop.f32.mrb[36].mxu1  ;;  %v1973_v35 = vrot.slane %v1964_v40, %v13486_v53 }
 0x3d6   :  { %v1902_v16 = vpop.f32.mrb[37].mxu0  ;;  %v1956_v41 = vmax.f32 %v1900_v43, %v1943_v45  ;;  %v1945_v13 = vpop.f32.mrb[37].mxu1  ;;  %v10117_v45 = vcombine.high %v2392_v12, %v2396_v11  ;;  %v13490_v43 = vmax.f32 %v9885_v26, %v9890_v33  ;;  %v13493_v26 = vmax.f32 %v9898_v49, %v9905_v47  ;;  %v2412_v49 = vld [vmem:[#allocation8 + $0x660] sm:$0xff] }
 0x3d7   :  { %v1904_v56 = vpop.f32.mrb[38].mxu0  ;;  %5342 = vmatpush1.bf16.msra.mxu0 %v10097_v28  ;;  %v1957_v14 = vmax.f32 %v1902_v16, %v1945_v13  ;;  %v1947_v1 = vpop.f32.mrb[38].mxu1  ;;  %v2400_v13 = vld [vmem:[#allocation8 + $0x600] sm:$0xff]  ;;  %v13492_v16 = vmax.f32 %v9892_v38, %v9896_v15 }
 0x3d8   :  { %5514 = vmatpush1.bf16.msra.mxu1 %v10101_v6  ;;  %v1906_v17 = vpop.f32.mrb[39].mxu0  ;;  %5343 = vmatprep.subr.bf16.mxu0 %v10103_v37  ;;  %13489 = vst [vmem:[#allocation73_spill] sm:$0xff] %v10117_v45  ;;  %v1960_v40 = vmax.f32 %v13490_v43, %v1956_v41  ;;  %v1958_v42 = vmax.f32 %v1904_v56, %v1947_v1  ;;  %v1949_v36 = vpop.f32.mrb[39].mxu1  ;;  %v2405_v6 = vld [vmem:[#allocation8 + $0x628] sm:$0xff]  ;;  %v2408_v15 = vld [vmem:[#allocation8 + $0x640] sm:$0xff] }
 0x3d9   :  { %5515 = vmatprep.subr.bf16.mxu1 %v10106_v52  ;;  %v1961_v37 = vmax.f32 %v13492_v16, %v1957_v14  ;;  %v1959_v10 = vmax.f32 %v1906_v17, %v1949_v36  ;;  %v10132_v1 = vcombine.low %v2392_v12, %v2396_v11  ;;  %v10134_v41 = vcombine.low %v2393_v27, %v2397_v3  ;;  %v2409_v11 = vld [vmem:[#allocation8 + $0x648] sm:$0xff]  ;;  %v2420_v16 = vld [vmem:[#allocation8 + $0x6a0] sm:$0xff] }
 0x3da   :  { %v1976_v28 = vadd.f32 %v1969_v20, %v1960_v40  ;;  %v1962_v33 = vmax.f32 %v13493_v26, %v1958_v42  ;;  %v13496_v43 = vmax.f32 %v9908_v31, %v9917_v46  ;;  %v10141_v36 = vcombine.high %v2400_v13, %v2404_v63  ;;  %v2413_v12 = vld [vmem:[#allocation8 + $0x668] sm:$0xff] }
 0x3db   :  { %5344 = vmatpush1.bf16.msra.mxu0 %v10111_v25  ;;  %13494 = vst [vmem:[#allocation75_spill] sm:$0xff] %v10132_v1  ;;  %13495 = vst [vmem:[#allocation76_spill] sm:$0xff] %v10134_v41  ;;  %v1977_v56 = vadd.f32 %v1973_v35, %v1961_v37  ;;  %v10144_v42 = vcombine.high %v2401_v4, %v2405_v6  ;;  %v10147_v31 = vcombine.low %v2400_v13, %v2404_v63  ;;  %v2417_v63 = vld [vmem:[#allocation8 + $0x688] sm:$0xff] }
 0x3dc   :  { %v1963_v38 = vmax.f32 %v13496_v43, %v1959_v10  ;;  %5516 = vmatpush1.bf16.msra.mxu1 %v10115_v7  ;;  %5345 = vmatprep.subr.bf16.mxu0 %v10117_v45  ;;  %13497 = vst [vmem:[#allocation77_spill] sm:$0xff] %v10141_v36  ;;  %v1978_v17 = vadd.f32 %v1969_v20, %v1962_v33  ;;  %v1980_v14 = vmax.f32 %v1976_v28, 0.0  ;;  %v2421_v10 = vld [vmem:[#allocation8 + $0x6a8] sm:$0xff]  ;;  %v2428_v43 = vld [vmem:[#allocation8 + $0x6e0] sm:$0xff] }
 0x3dd   :  { %5517 = vmatprep.subr.bf16.mxu1 %v10123_v48  ;;  %13498 = vst [vmem:[#allocation78_spill] sm:$0xff] %v10144_v42  ;;  %13499 = vst [vmem:[#allocation79_spill] sm:$0xff] %v10147_v31  ;;  %v1981_v46 = vmax.f32 %v1977_v56, 0.0  ;;  %v10151_v20 = vcombine.low %v2401_v4, %v2405_v6  ;;  %v10153_v3 = vcombine.high %v2408_v15, %v2412_v49  ;;  %v2424_v56 = vld [vmem:[#allocation8 + $0x6c0] sm:$0xff] }
 0x3de   :  { %v1979_v47 = vadd.f32 %v1973_v35, %v1963_v38  ;;  %v1982_v37 = vmax.f32 %v1978_v17, 0.0  ;;  %v10158_v28 = vcombine.high %v2409_v11, %v2413_v12  ;;  %v2416_v35 = vld [vmem:[#allocation8 + $0x680] sm:$0xff]  ;;  %v10163_v26 = vcombine.low %v2408_v15, %v2412_v49  ;;  %v2425_v38 = vld [vmem:[#allocation8 + $0x6c8] sm:$0xff] }
 0x3df   :  { %5346 = vmatpush1.bf16.msra.mxu0 %v10132_v1  ;;  %13500 = vst [vmem:[#allocation80_spill] sm:$0xff] %v10151_v20  ;;  %13501 = vst [vmem:[#allocation81_spill] sm:$0xff] %v10153_v3  ;;  %v10167_v6 = vcombine.low %v2409_v11, %v2413_v12  ;;  %v10169_v4 = vcombine.high %v2416_v35, %v2420_v16  ;;  %v10172_v33 = vcombine.high %v2417_v63, %v2421_v10  ;;  %v2429_v17 = vld [vmem:[#allocation8 + $0x6e8] sm:$0xff]  ;;  %v2432_v12 = vld [vmem:[#allocation8 + $0x700] sm:$0xff] }
 0x3e0   :  { %v1983_v27 = vmax.f32 %v1979_v47, 0.0  ;;  %5518 = vmatpush1.bf16.msra.mxu1 %v10134_v41  ;;  %5347 = vmatprep.subr.bf16.mxu0 %v10141_v36  ;;  %v10155_v40 = vpack.c.bf16 %v1982_v37, %v1980_v14  ;;  %13503 = vst [vmem:[#allocation83_spill] sm:$0xff] %v10158_v28  ;;  %13505 = vst [vmem:[#allocation85_spill] sm:$0xff] %v10163_v26  ;;  %v10175_v15 = vcombine.low %v2416_v35, %v2420_v16  ;;  %v2436_v14 = vld [vmem:[#allocation8 + $0x720] sm:$0xff]  ;;  %v2433_v37 = vld [vmem:[#allocation8 + $0x708] sm:$0xff] }
 0x3e1   :  { %5519 = vmatprep.subr.bf16.mxu1 %v10144_v42  ;;  %13506 = vst [vmem:[#allocation86_spill] sm:$0xff] %v10167_v6  ;;  %13507 = vst [vmem:[#allocation87_spill] sm:$0xff] %v10169_v4  ;;  %v10179_v49 = vcombine.low %v2417_v63, %v2421_v10  ;;  %v10181_v47 = vcombine.high %v2424_v56, %v2428_v43  ;;  %v10184_v11 = vcombine.high %v2425_v38, %v2429_v17  ;;  %v2440_v10 = vld [vmem:[#allocation8 + $0x740] sm:$0xff]  ;;  %v2537_v36 = vld [vmem:[#allocation8 + $0xa48] sm:$0xff] }
 0x3e2   :  { %13502 = vst [vmem:[#allocation82_spill] sm:$0xff] %v10155_v40  ;;  %v10160_v13 = vpack.c.bf16 %v1983_v27, %v1981_v46  ;;  %13508 = vst [vmem:[#allocation88_spill] sm:$0xff] %v10172_v33  ;;  %v2437_v46 = vld [vmem:[#allocation8 + $0x728] sm:$0xff]  ;;  %v10187_v27 = vcombine.low %v2424_v56, %v2428_v43  ;;  %v10191_v35 = vcombine.low %v2425_v38, %v2429_v17  ;;  %v2444_v40 = vld [vmem:[#allocation8 + $0x760] sm:$0xff] }
 0x3e3   :  { %5348 = vmatpush1.bf16.msra.mxu0 %v10147_v31  ;;  %13509 = vst [vmem:[#allocation89_spill] sm:$0xff] %v10175_v15  ;;  %13510 = vst [vmem:[#allocation90_spill] sm:$0xff] %v10179_v49  ;;  %v10193_v16 = vcombine.high %v2432_v12, %v2436_v14  ;;  %v10196_v63 = vcombine.high %v2433_v37, %v2437_v46  ;;  %v10199_v56 = vcombine.low %v2432_v12, %v2436_v14  ;;  %v2529_v31 = vld [vmem:[#allocation8 + $0xa08] sm:$0xff]  ;;  %v2536_v42 = vld [vmem:[#allocation8 + $0xa40] sm:$0xff] }
 0x3e4   :  { %13504 = vst [vmem:[#allocation84_spill] sm:$0xff] %v10160_v13  ;;  %5520 = vmatpush1.bf16.msra.mxu1 %v10151_v20  ;;  %5349 = vmatprep.subr.bf16.mxu0 %v10153_v3  ;;  %13511 = vst [vmem:[#allocation91_spill] sm:$0xff] %v10181_v47  ;;  %v2441_v13 = vld [vmem:[#allocation8 + $0x748] sm:$0xff]  ;;  %v10203_v43 = vcombine.low %v2433_v37, %v2437_v46  ;;  %v10205_v38 = vcombine.high %v2440_v10, %v2444_v40  ;;  %v2532_v20 = vld [vmem:[#allocation8 + $0xa20] sm:$0xff] }
 0x3e5   :  { %5521 = vmatprep.subr.bf16.mxu1 %v10158_v28  ;;  %13512 = vst [vmem:[#allocation92_spill] sm:$0xff] %v10184_v11  ;;  %13513 = vst [vmem:[#allocation93_spill] sm:$0xff] %v10187_v27  ;;  %v10211_v12 = vcombine.low %v2440_v10, %v2444_v40  ;;  %v2541_v41 = vld [vmem:[#allocation8 + $0xa68] sm:$0xff] }
 0x3e6   :  { %13514 = vst [vmem:[#allocation94_spill] sm:$0xff] %v10191_v35  ;;  %13515 = vst [vmem:[#allocation95_spill] sm:$0xff] %v10193_v16  ;;  %v2629_v1 = vld [vmem:[#allocation8 + $0xd28] sm:$0xff] }
 0x3e7   :  { %5350 = vmatpush1.bf16.msra.mxu0 %v10163_v26  ;;  %13516 = vst [vmem:[#allocation96_spill] sm:$0xff] %v10196_v63  ;;  %13517 = vst [vmem:[#allocation97_spill] sm:$0xff] %v10199_v56 }
 0x3e8   :  { %5522 = vmatpush1.bf16.msra.mxu1 %v10167_v6  ;;  %5351 = vmatprep.subr.bf16.mxu0 %v10169_v4  ;;  %13518 = vst [vmem:[#allocation98_spill] sm:$0xff] %v10203_v43  ;;  %13519 = vst [vmem:[#allocation99_spill] sm:$0xff] %v10205_v38  ;;  %v2497_v4 = vld [vmem:[#allocation8 + $0x908] sm:$0xff] }
 0x3e9   :  { %5523 = vmatprep.subr.bf16.mxu1 %v10172_v33  ;;  %v2445_v33 = vld [vmem:[#allocation8 + $0x768] sm:$0xff]  ;;  %13521 = vst [vmem:[#allocation101_spill] sm:$0xff] %v10211_v12 }
 0x3ea   :  { %v10208_v17 = vcombine.high %v2441_v13, %v2445_v33  ;;  %v10215_v14 = vcombine.low %v2441_v13, %v2445_v33  ;;  %v2501_v6 = vld [vmem:[#allocation8 + $0x928] sm:$0xff] }
 0x3eb   :  { %5352 = vmatpush1.bf16.msra.mxu0 %v10175_v15  ;;  %v2453_v15 = vld [vmem:[#allocation8 + $0x7a8] sm:$0xff] }
 0x3ec   :  { %5524 = vmatpush1.bf16.msra.mxu1 %v10179_v49  ;;  %5353 = vmatprep.subr.bf16.mxu0 %v10181_v47  ;;  %13520 = vst [vmem:[#allocation100_spill] sm:$0xff] %v10208_v17  ;;  %v2452_v47 = vld [vmem:[#allocation8 + $0x7a0] sm:$0xff]  ;;  %v2449_v49 = vld [vmem:[#allocation8 + $0x788] sm:$0xff]  ;;  %13522 = vst [vmem:[#allocation102_spill] sm:$0xff] %v10215_v14 }
 0x3ed   :  { %5525 = vmatprep.subr.bf16.mxu1 %v10184_v11  ;;  %v2448_v11 = vld [vmem:[#allocation8 + $0x780] sm:$0xff]  ;;  %v10220_v46 = vcombine.high %v2449_v49, %v2453_v15  ;;  %v10227_v13 = vcombine.low %v2449_v49, %v2453_v15 }
 0x3ee   :  { %v10217_v37 = vcombine.high %v2448_v11, %v2452_v47  ;;  %v10223_v40 = vcombine.low %v2448_v11, %v2452_v47 }
 0x3ef   :  { %5354 = vmatpush1.bf16.msra.mxu0 %v10187_v27  ;;  %13524 = vst [vmem:[#allocation104_spill] sm:$0xff] %v10220_v46  ;;  %v2461_v27 = vld [vmem:[#allocation8 + $0x7e8] sm:$0xff]  ;;  %13526 = vst [vmem:[#allocation106_spill] sm:$0xff] %v10227_v13 }
 0x3f0   :  { %5526 = vmatpush1.bf16.msra.mxu1 %v10191_v35  ;;  %5355 = vmatprep.subr.bf16.mxu0 %v10193_v16  ;;  %13523 = vst [vmem:[#allocation103_spill] sm:$0xff] %v10217_v37  ;;  %v2460_v16 = vld [vmem:[#allocation8 + $0x7e0] sm:$0xff]  ;;  %v2457_v35 = vld [vmem:[#allocation8 + $0x7c8] sm:$0xff]  ;;  %13525 = vst [vmem:[#allocation105_spill] sm:$0xff] %v10223_v40 }
 0x3f1   :  { %5527 = vmatprep.subr.bf16.mxu1 %v10196_v63  ;;  %v2456_v63 = vld [vmem:[#allocation8 + $0x7c0] sm:$0xff]  ;;  %v10232_v10 = vcombine.high %v2457_v35, %v2461_v27  ;;  %v10239_v15 = vcombine.low %v2457_v35, %v2461_v27 }
 0x3f2   :  { %v10229_v33 = vcombine.high %v2456_v63, %v2460_v16  ;;  %v10235_v47 = vcombine.low %v2456_v63, %v2460_v16  ;;  %v2473_v16 = vld [vmem:[#allocation8 + $0x848] sm:$0xff] }
 0x3f3   :  { %5356 = vmatpush1.bf16.msra.mxu0 %v10199_v56  ;;  %13528 = vst [vmem:[#allocation135_spill] sm:$0xff] %v10232_v10  ;;  %v2469_v56 = vld [vmem:[#allocation8 + $0x828] sm:$0xff]  ;;  %13530 = vst [vmem:[#allocation133_spill] sm:$0xff] %v10239_v15 }
 0x3f4   :  { %5528 = vmatpush1.bf16.msra.mxu1 %v10203_v43  ;;  %5357 = vmatprep.subr.bf16.mxu0 %v10205_v38  ;;  %13527 = vst [vmem:[#allocation107_spill] sm:$0xff] %v10229_v33  ;;  %v2468_v38 = vld [vmem:[#allocation8 + $0x820] sm:$0xff]  ;;  %v2465_v43 = vld [vmem:[#allocation8 + $0x808] sm:$0xff]  ;;  %13529 = vst [vmem:[#allocation136_spill] sm:$0xff] %v10235_v47 }
 0x3f5   :  { %5529 = vmatprep.subr.bf16.mxu1 %v10208_v17  ;;  %v2464_v17 = vld [vmem:[#allocation8 + $0x800] sm:$0xff]  ;;  %v10244_v11 = vcombine.high %v2465_v43, %v2469_v56  ;;  %v2477_v63 = vld [vmem:[#allocation8 + $0x868] sm:$0xff]  ;;  %v10251_v27 = vcombine.low %v2465_v43, %v2469_v56  ;;  %v13539_v56 = vld [vmem:[#allocation132_spill] sm:$0xff] }
 0x3f6   :  { %v10241_v49 = vcombine.high %v2464_v17, %v2468_v38  ;;  %v10265_v43 = vcombine.low %v2473_v16, %v2477_v63 }
 0x3f7   :  { %5358 = vmatpush1.bf16.msra.mxu0 %v10211_v12  ;;  %13532 = vst [vmem:[#allocation124_spill] sm:$0xff] %v10244_v11  ;;  %13534 = vst [vmem:[#allocation137_spill] sm:$0xff] %v10251_v27  ;;  %v2492_v12 = vld [vmem:[#allocation8 + $0x8e0] sm:$0xff] }
 0x3f8   :  { %5530 = vmatpush1.bf16.msra.mxu1 %v10215_v14  ;;  %5359 = vmatprep.subr.bf16.mxu0 %v10217_v37  ;;  %13531 = vst [vmem:[#allocation126_spill] sm:$0xff] %v10241_v49  ;;  %v2476_v37 = vld [vmem:[#allocation8 + $0x860] sm:$0xff]  ;;  %v10247_v14 = vcombine.low %v2464_v17, %v2468_v38  ;;  %v2481_v38 = vld [vmem:[#allocation8 + $0x888] sm:$0xff]  ;;  %13540 = vst [vmem:[#allocation132_spill] sm:$0xff] %v10265_v43 }
 0x3f9   :  { %5531 = vmatprep.subr.bf16.mxu1 %v10220_v46  ;;  %v2472_v46 = vld [vmem:[#allocation8 + $0x840] sm:$0xff]  ;;  %v2485_v17 = vld [vmem:[#allocation8 + $0x8a8] sm:$0xff] }
 0x3fa   :  { %13533 = vst [vmem:[#allocation129_spill] sm:$0xff] %v10247_v14  ;;  %v10254_v35 = vcombine.high %v2472_v46, %v2476_v37 }
 0x3fb   :  { %5360 = vmatpush1.bf16.msra.mxu0 %v10223_v40  ;;  %v10257_v40 = vcombine.high %v2473_v16, %v2477_v63  ;;  %v10279_v16 = vcombine.low %v2481_v38, %v2485_v17 }
 0x3fc   :  { %5532 = vmatpush1.bf16.msra.mxu1 %v10227_v13  ;;  %5361 = vmatprep.subr.bf16.mxu0 %v10229_v33  ;;  %13535 = vst [vmem:[#allocation138_spill] sm:$0xff] %v10254_v35  ;;  %v2484_v33 = vld [vmem:[#allocation8 + $0x8a0] sm:$0xff]  ;;  %v13536_v13 = vld [vmem:[#allocation128_spill] sm:$0xff] }
 0x3fd   :  { %5533 = vmatprep.subr.bf16.mxu1 %v10232_v10  ;;  %v2480_v10 = vld [vmem:[#allocation8 + $0x880] sm:$0xff]  ;;  %13537 = vst [vmem:[#allocation128_spill] sm:$0xff] %v10257_v40  ;;  %13544 = vst [vmem:[#allocation143_spill] sm:$0xff] %v10279_v16 }
 0x3ff   :  { %5362 = vmatpush1.bf16.msra.mxu0 %v10235_v47  ;;  %v2488_v47 = vld [vmem:[#allocation8 + $0x8c0] sm:$0xff] }
 0x400   :  { %5534 = vmatpush1.bf16.msra.mxu1 %v10239_v15  ;;  %5374 = vmatprep.subr.bf16.mxu0 %v10241_v49  ;;  %v10261_v15 = vcombine.low %v2472_v46, %v2476_v37  ;;  %v10271_v49 = vcombine.high %v2481_v38, %v2485_v17  ;;  %v2489_v37 = vld [vmem:[#allocation8 + $0x8c8] sm:$0xff]  ;;  %v10281_v63 = vcombine.high %v2488_v47, %v2492_v12 }
 0x401   :  { %5546 = vmatprep.subr.bf16.mxu1 %v10244_v11  ;;  %v10267_v11 = vcombine.high %v2480_v10, %v2484_v33  ;;  %v2493_v46 = vld [vmem:[#allocation8 + $0x8e8] sm:$0xff]  ;;  %v10296_v17 = vcombine.high %v2497_v4, %v2501_v6 }
 0x402   :  { %5364 = vmatmul.mubr.bf16.vlgmr.msra.gmra.mrb[48].mxu0 %v13536_v13  ;;  %13538 = vst [vmem:[#allocation139_spill] sm:$0xff] %v10261_v15  ;;  %13542 = vst [vmem:[#allocation141_spill] sm:$0xff] %v10271_v49 }
 0x403   :  { %5536 = vmatmul.mubr.bf16.vlgmr.msra.gmra.mrb[48].mxu1 %v13536_v13  ;;  %5375 = vmatpush1.bf16.msra.mxu0 %v10247_v14  ;;  %13541 = vst [vmem:[#allocation140_spill] sm:$0xff] %v10267_v11  ;;  %v10275_v14 = vcombine.low %v2480_v10, %v2484_v33  ;;  %13545 = vst [vmem:[#allocation144_spill] sm:$0xff] %v10281_v63  ;;  %v10287_v33 = vcombine.low %v2488_v47, %v2492_v12 }
 0x404   :  { %5406 = vmatprep.mubr.bf16.mxu0 %v13539_v56  ;;  %5547 = vmatpush1.bf16.msra.mxu1 %v10251_v27  ;;  %v2496_v27 = vld [vmem:[#allocation8 + $0x900] sm:$0xff]  ;;  %v10291_v10 = vcombine.low %v2489_v37, %v2493_v46  ;;  %13550 = vst [vmem:[#allocation149_spill] sm:$0xff] %v10296_v17  ;;  %v10303_v47 = vcombine.low %v2497_v4, %v2501_v6 }
 0x405   :  { %5578 = vmatprep.mubr.bf16.mxu1 %v13539_v56  ;;  %5376 = vmatprep.subr.bf16.mxu0 %v10254_v35  ;;  %13543 = vst [vmem:[#allocation142_spill] sm:$0xff] %v10275_v14  ;;  %v10284_v35 = vcombine.high %v2489_v37, %v2493_v46  ;;  %13547 = vst [vmem:[#allocation146_spill] sm:$0xff] %v10287_v33 }
 0x406   :  { %5548 = vmatprep.subr.bf16.mxu1 %v10257_v40  ;;  %v2500_v40 = vld [vmem:[#allocation8 + $0x920] sm:$0xff]  ;;  %13548 = vst [vmem:[#allocation147_spill] sm:$0xff] %v10291_v10  ;;  %13552 = vst [vmem:[#allocation151_spill] sm:$0xff] %v10303_v47 }
 0x407   :  { %5377 = vmatpush1.bf16.msra.mxu0 %v10261_v15  ;;  %13546 = vst [vmem:[#allocation145_spill] sm:$0xff] %v10284_v35  ;;  %v10293_v38 = vcombine.high %v2496_v27, %v2500_v40  ;;  %v2509_v15 = vld [vmem:[#allocation8 + $0x968] sm:$0xff]  ;;  %v10299_v12 = vcombine.low %v2496_v27, %v2500_v40 }
 0x408   :  { %5549 = vmatpush1.bf16.msra.mxu1 %v10265_v43  ;;  %5378 = vmatprep.subr.bf16.mxu0 %v10267_v11  ;;  %v2508_v11 = vld [vmem:[#allocation8 + $0x960] sm:$0xff]  ;;  %v2505_v43 = vld [vmem:[#allocation8 + $0x948] sm:$0xff] }
 0x409   :  { %5550 = vmatprep.subr.bf16.mxu1 %v10271_v49  ;;  %13549 = vst [vmem:[#allocation148_spill] sm:$0xff] %v10293_v38  ;;  %v2504_v49 = vld [vmem:[#allocation8 + $0x940] sm:$0xff]  ;;  %13551 = vst [vmem:[#allocation150_spill] sm:$0xff] %v10299_v12  ;;  %v10308_v46 = vcombine.high %v2505_v43, %v2509_v15  ;;  %v10315_v6 = vcombine.low %v2505_v43, %v2509_v15 }
 0x40a   :  { %v10305_v37 = vcombine.high %v2504_v49, %v2508_v11  ;;  %v10311_v40 = vcombine.low %v2504_v49, %v2508_v11  ;;  %v2521_v11 = vld [vmem:[#allocation8 + $0x9c8] sm:$0xff] }
 0x40b   :  { %5379 = vmatpush1.bf16.msra.mxu0 %v10275_v14  ;;  %13554 = vst [vmem:[#allocation153_spill] sm:$0xff] %v10308_v46  ;;  %v2517_v14 = vld [vmem:[#allocation8 + $0x9a8] sm:$0xff]  ;;  %13556 = vst [vmem:[#allocation155_spill] sm:$0xff] %v10315_v6 }
 0x40c   :  { %5551 = vmatpush1.bf16.msra.mxu1 %v10279_v16  ;;  %5380 = vmatprep.subr.bf16.mxu0 %v10281_v63  ;;  %13553 = vst [vmem:[#allocation152_spill] sm:$0xff] %v10305_v37  ;;  %v2516_v63 = vld [vmem:[#allocation8 + $0x9a0] sm:$0xff]  ;;  %v2513_v16 = vld [vmem:[#allocation8 + $0x988] sm:$0xff]  ;;  %13555 = vst [vmem:[#allocation154_spill] sm:$0xff] %v10311_v40 }
 0x40d   :  { %5552 = vmatprep.subr.bf16.mxu1 %v10284_v35  ;;  %v2512_v35 = vld [vmem:[#allocation8 + $0x980] sm:$0xff]  ;;  %v10345_v15 = vcombine.low %v2513_v16, %v2517_v14 }
 0x40e   :  { %v10317_v4 = vcombine.high %v2512_v35, %v2516_v63 }
 0x40f   :  { %5381 = vmatpush1.bf16.msra.mxu0 %v10287_v33  ;;  %13560 = vst [vmem:[#allocation159_spill] sm:$0xff] %v10345_v15 }
 0x410   :  { %5553 = vmatpush1.bf16.msra.mxu1 %v10291_v10  ;;  %5382 = vmatprep.subr.bf16.mxu0 %v10293_v38  ;;  %13557 = vst [vmem:[#allocation156_spill] sm:$0xff] %v10317_v4  ;;  %v2520_v38 = vld [vmem:[#allocation8 + $0x9c0] sm:$0xff] }
 0x411   :  { %5554 = vmatprep.subr.bf16.mxu1 %v10296_v17  ;;  %v10322_v17 = vcombine.high %v2513_v16, %v2517_v14  ;;  %v2524_v10 = vld [vmem:[#allocation8 + $0x9e0] sm:$0xff] }
 0x412   :  { %v10347_v3 = vcombine.high %v2520_v38, %v2524_v10  ;;  %v10359_v14 = vcombine.low %v2520_v38, %v2524_v10 }
 0x413   :  { %5383 = vmatpush1.bf16.msra.mxu0 %v10299_v12  ;;  %13558 = vst [vmem:[#allocation157_spill] sm:$0xff] %v10322_v17  ;;  %v2528_v12 = vld [vmem:[#allocation8 + $0xa00] sm:$0xff] }
 0x414   :  { %5555 = vmatpush1.bf16.msra.mxu1 %v10303_v47  ;;  %5384 = vmatprep.subr.bf16.mxu0 %v10305_v37  ;;  %v2525_v47 = vld [vmem:[#allocation8 + $0x9e8] sm:$0xff]  ;;  %13561 = vst [vmem:[#allocation160_spill] sm:$0xff] %v10347_v3  ;;  %13563 = vst [vmem:[#allocation162_spill] sm:$0xff] %v10359_v14  ;;  %v10371_v10 = vcombine.low %v2528_v12, %v2532_v20 }
 0x415   :  { %v10319_v27 = vpop.f32.mrb[40].mxu0  ;;  %5556 = vmatprep.subr.bf16.mxu1 %v10308_v46  ;;  %v10324_v33 = vpop.f32.mrb[40].mxu1  ;;  %v10335_v46 = vcombine.low %v2512_v35, %v2516_v63  ;;  %v10354_v63 = vcombine.high %v2521_v11, %v2525_v47  ;;  %v10363_v16 = vcombine.low %v2521_v11, %v2525_v47  ;;  %v10380_v11 = vcombine.high %v2537_v36, %v2541_v41 }
 0x416   :  { %v10326_v49 = vpop.f32.mrb[41].mxu0  ;;  %v10330_v43 = vpop.f32.mrb[41].mxu1  ;;  %13567 = vst [vmem:[#allocation166_spill] sm:$0xff] %v10371_v10 }
 0x417   :  { %v10332_v37 = vpop.f32.mrb[42].mxu0  ;;  %5385 = vmatpush1.bf16.msra.mxu0 %v10311_v40  ;;  %13559 = vst [vmem:[#allocation158_spill] sm:$0xff] %v10335_v46  ;;  %v10339_v26 = vpop.f32.mrb[42].mxu1  ;;  %13562 = vst [vmem:[#allocation161_spill] sm:$0xff] %v10354_v63  ;;  %v10365_v40 = vcombine.high %v2528_v12, %v2532_v20 }
 0x418   :  { %5557 = vmatpush1.bf16.msra.mxu1 %v10315_v6  ;;  %v10342_v28 = vpop.f32.mrb[43].mxu0  ;;  %5386 = vmatprep.subr.bf16.mxu0 %v10317_v4  ;;  %v10351_v35 = vpop.f32.mrb[43].mxu1  ;;  %v2533_v4 = vld [vmem:[#allocation8 + $0xa28] sm:$0xff]  ;;  %13564 = vst [vmem:[#allocation163_spill] sm:$0xff] %v10363_v16  ;;  %v2540_v6 = vld [vmem:[#allocation8 + $0xa60] sm:$0xff]  ;;  %13570 = vst [vmem:[#allocation169_spill] sm:$0xff] %v10380_v11 }
 0x419   :  { %5558 = vmatprep.subr.bf16.mxu1 %v10322_v17  ;;  %13565 = vst [vmem:[#allocation164_spill] sm:$0xff] %v10365_v40  ;;  %v10368_v17 = vcombine.high %v2529_v31, %v2533_v4  ;;  %v10375_v38 = vcombine.low %v2529_v31, %v2533_v4  ;;  %v10377_v47 = vcombine.high %v2536_v42, %v2540_v6 }
 0x41a   :  { %v10383_v20 = vcombine.low %v2536_v42, %v2540_v6  ;;  %v10387_v31 = vcombine.low %v2537_v36, %v2541_v41 }
 0x41b   :  { %5387 = vmatpush1.bf16.msra.mxu0 %v10335_v46  ;;  %13566 = vst [vmem:[#allocation165_spill] sm:$0xff] %v10368_v17  ;;  %13568 = vst [vmem:[#allocation167_spill] sm:$0xff] %v10375_v38  ;;  %v2549_v46 = vld [vmem:[#allocation8 + $0xaa8] sm:$0xff] }
 0x41c   :  { %5559 = vmatpush1.bf16.msra.mxu1 %v10345_v15  ;;  %5388 = vmatprep.subr.bf16.mxu0 %v10347_v3  ;;  %13569 = vst [vmem:[#allocation168_spill] sm:$0xff] %v10377_v47  ;;  %v2548_v3 = vld [vmem:[#allocation8 + $0xaa0] sm:$0xff]  ;;  %v2545_v15 = vld [vmem:[#allocation8 + $0xa88] sm:$0xff]  ;;  %13571 = vst [vmem:[#allocation170_spill] sm:$0xff] %v10383_v20 }
 0x41d   :  { %5560 = vmatprep.subr.bf16.mxu1 %v10354_v63  ;;  %v2544_v63 = vld [vmem:[#allocation8 + $0xa80] sm:$0xff]  ;;  %13572 = vst [vmem:[#allocation171_spill] sm:$0xff] %v10387_v31  ;;  %v10392_v4 = vcombine.high %v2545_v15, %v2549_v46  ;;  %v10399_v41 = vcombine.low %v2545_v15, %v2549_v46 }
 0x41e   :  { %v10389_v12 = vcombine.high %v2544_v63, %v2548_v3  ;;  %v10395_v42 = vcombine.low %v2544_v63, %v2548_v3 }
 0x41f   :  { %5389 = vmatpush1.bf16.msra.mxu0 %v10359_v14  ;;  %13574 = vst [vmem:[#allocation173_spill] sm:$0xff] %v10392_v4  ;;  %v2557_v14 = vld [vmem:[#allocation8 + $0xae8] sm:$0xff]  ;;  %13576 = vst [vmem:[#allocation175_spill] sm:$0xff] %v10399_v41 }
 0x420   :  { %5561 = vmatpush1.bf16.msra.mxu1 %v10363_v16  ;;  %5390 = vmatprep.subr.bf16.mxu0 %v10365_v40  ;;  %13573 = vst [vmem:[#allocation172_spill] sm:$0xff] %v10389_v12  ;;  %v2556_v40 = vld [vmem:[#allocation8 + $0xae0] sm:$0xff]  ;;  %v2553_v16 = vld [vmem:[#allocation8 + $0xac8] sm:$0xff]  ;;  %13575 = vst [vmem:[#allocation174_spill] sm:$0xff] %v10395_v42 }
 0x421   :  { %5562 = vmatprep.subr.bf16.mxu1 %v10368_v17  ;;  %v2552_v17 = vld [vmem:[#allocation8 + $0xac0] sm:$0xff]  ;;  %v10404_v6 = vcombine.high %v2553_v16, %v2557_v14  ;;  %v10411_v46 = vcombine.low %v2553_v16, %v2557_v14 }
 0x422   :  { %v10401_v36 = vcombine.high %v2552_v17, %v2556_v40  ;;  %v10407_v3 = vcombine.low %v2552_v17, %v2556_v40 }
 0x423   :  { %5391 = vmatpush1.bf16.msra.mxu0 %v10371_v10  ;;  %13578 = vst [vmem:[#allocation177_spill] sm:$0xff] %v10404_v6  ;;  %v2565_v10 = vld [vmem:[#allocation8 + $0xb28] sm:$0xff]  ;;  %13580 = vst [vmem:[#allocation179_spill] sm:$0xff] %v10411_v46 }
 0x424   :  { %5563 = vmatpush1.bf16.msra.mxu1 %v10375_v38  ;;  %5392 = vmatprep.subr.bf16.mxu0 %v10377_v47  ;;  %13577 = vst [vmem:[#allocation176_spill] sm:$0xff] %v10401_v36  ;;  %v2564_v47 = vld [vmem:[#allocation8 + $0xb20] sm:$0xff]  ;;  %v2561_v38 = vld [vmem:[#allocation8 + $0xb08] sm:$0xff]  ;;  %13579 = vst [vmem:[#allocation178_spill] sm:$0xff] %v10407_v3 }
 0x425   :  { %5564 = vmatprep.subr.bf16.mxu1 %v10380_v11  ;;  %v2560_v11 = vld [vmem:[#allocation8 + $0xb00] sm:$0xff]  ;;  %v10416_v63 = vcombine.high %v2561_v38, %v2565_v10  ;;  %v10423_v40 = vcombine.low %v2561_v38, %v2565_v10 }
 0x426   :  { %v10413_v15 = vcombine.high %v2560_v11, %v2564_v47  ;;  %v10419_v17 = vcombine.low %v2560_v11, %v2564_v47 }
 0x427   :  { %5393 = vmatpush1.bf16.msra.mxu0 %v10383_v20  ;;  %13582 = vst [vmem:[#allocation181_spill] sm:$0xff] %v10416_v63  ;;  %v2573_v20 = vld [vmem:[#allocation8 + $0xb68] sm:$0xff]  ;;  %13584 = vst [vmem:[#allocation183_spill] sm:$0xff] %v10423_v40 }
 0x428   :  { %5565 = vmatpush1.bf16.msra.mxu1 %v10387_v31  ;;  %5394 = vmatprep.subr.bf16.mxu0 %v10389_v12  ;;  %13581 = vst [vmem:[#allocation180_spill] sm:$0xff] %v10413_v15  ;;  %v2572_v12 = vld [vmem:[#allocation8 + $0xb60] sm:$0xff]  ;;  %v2569_v31 = vld [vmem:[#allocation8 + $0xb48] sm:$0xff]  ;;  %13583 = vst [vmem:[#allocation182_spill] sm:$0xff] %v10419_v17 }
 0x429   :  { %5566 = vmatprep.subr.bf16.mxu1 %v10392_v4  ;;  %v2568_v4 = vld [vmem:[#allocation8 + $0xb40] sm:$0xff]  ;;  %v10428_v16 = vcombine.high %v2569_v31, %v2573_v20  ;;  %v10435_v10 = vcombine.low %v2569_v31, %v2573_v20 }
 0x42a   :  { %v10425_v14 = vcombine.high %v2568_v4, %v2572_v12  ;;  %v10431_v47 = vcombine.low %v2568_v4, %v2572_v12 }
 0x42b   :  { %5395 = vmatpush1.bf16.msra.mxu0 %v10395_v42  ;;  %13586 = vst [vmem:[#allocation185_spill] sm:$0xff] %v10428_v16  ;;  %v2581_v42 = vld [vmem:[#allocation8 + $0xba8] sm:$0xff]  ;;  %13588 = vst [vmem:[#allocation187_spill] sm:$0xff] %v10435_v10 }
 0x42c   :  { %5567 = vmatpush1.bf16.msra.mxu1 %v10399_v41  ;;  %5396 = vmatprep.subr.bf16.mxu0 %v10401_v36  ;;  %13585 = vst [vmem:[#allocation184_spill] sm:$0xff] %v10425_v14  ;;  %v2580_v36 = vld [vmem:[#allocation8 + $0xba0] sm:$0xff]  ;;  %v2577_v41 = vld [vmem:[#allocation8 + $0xb88] sm:$0xff]  ;;  %13587 = vst [vmem:[#allocation186_spill] sm:$0xff] %v10431_v47 }
 0x42d   :  { %5568 = vmatprep.subr.bf16.mxu1 %v10404_v6  ;;  %v2576_v6 = vld [vmem:[#allocation8 + $0xb80] sm:$0xff]  ;;  %v10440_v11 = vcombine.high %v2577_v41, %v2581_v42  ;;  %v10447_v20 = vcombine.low %v2577_v41, %v2581_v42 }
 0x42e   :  { %v10437_v38 = vcombine.high %v2576_v6, %v2580_v36  ;;  %v10443_v12 = vcombine.low %v2576_v6, %v2580_v36 }
 0x42f   :  { %5397 = vmatpush1.bf16.msra.mxu0 %v10407_v3  ;;  %13590 = vst [vmem:[#allocation189_spill] sm:$0xff] %v10440_v11  ;;  %v2589_v3 = vld [vmem:[#allocation8 + $0xbe8] sm:$0xff]  ;;  %13592 = vst [vmem:[#allocation191_spill] sm:$0xff] %v10447_v20 }
 0x430   :  { %5569 = vmatpush1.bf16.msra.mxu1 %v10411_v46  ;;  %5398 = vmatprep.subr.bf16.mxu0 %v10413_v15  ;;  %13589 = vst [vmem:[#allocation188_spill] sm:$0xff] %v10437_v38  ;;  %v2588_v15 = vld [vmem:[#allocation8 + $0xbe0] sm:$0xff]  ;;  %v2585_v46 = vld [vmem:[#allocation8 + $0xbc8] sm:$0xff]  ;;  %13591 = vst [vmem:[#allocation190_spill] sm:$0xff] %v10443_v12 }
 0x431   :  { %5570 = vmatprep.subr.bf16.mxu1 %v10416_v63  ;;  %v2584_v63 = vld [vmem:[#allocation8 + $0xbc0] sm:$0xff]  ;;  %v10452_v4 = vcombine.high %v2585_v46, %v2589_v3  ;;  %v10459_v42 = vcombine.low %v2585_v46, %v2589_v3 }
 0x432   :  { %v10449_v31 = vcombine.high %v2584_v63, %v2588_v15  ;;  %v10455_v36 = vcombine.low %v2584_v63, %v2588_v15  ;;  %v2601_v15 = vld [vmem:[#allocation8 + $0xc48] sm:$0xff] }
 0x433   :  { %5399 = vmatpush1.bf16.msra.mxu0 %v10419_v17  ;;  %13594 = vst [vmem:[#allocation193_spill] sm:$0xff] %v10452_v4  ;;  %v2597_v17 = vld [vmem:[#allocation8 + $0xc28] sm:$0xff]  ;;  %13596 = vst [vmem:[#allocation195_spill] sm:$0xff] %v10459_v42 }
 0x434   :  { %5571 = vmatpush1.bf16.msra.mxu1 %v10423_v40  ;;  %5400 = vmatprep.subr.bf16.mxu0 %v10425_v14  ;;  %13593 = vst [vmem:[#allocation192_spill] sm:$0xff] %v10449_v31  ;;  %v2596_v14 = vld [vmem:[#allocation8 + $0xc20] sm:$0xff]  ;;  %v2593_v40 = vld [vmem:[#allocation8 + $0xc08] sm:$0xff]  ;;  %13595 = vst [vmem:[#allocation194_spill] sm:$0xff] %v10455_v36 }
 0x435   :  { %5572 = vmatprep.subr.bf16.mxu1 %v10428_v16  ;;  %v2592_v16 = vld [vmem:[#allocation8 + $0xc00] sm:$0xff]  ;;  %v10464_v6 = vcombine.high %v2593_v40, %v2597_v17  ;;  %v2605_v63 = vld [vmem:[#allocation8 + $0xc68] sm:$0xff]  ;;  %v10471_v3 = vcombine.low %v2593_v40, %v2597_v17 }
 0x436   :  { %v10461_v41 = vcombine.high %v2592_v16, %v2596_v14  ;;  %v10485_v17 = vcombine.low %v2601_v15, %v2605_v63 }
 0x437   :  { %5401 = vmatpush1.bf16.msra.mxu0 %v10431_v47  ;;  %13598 = vst [vmem:[#allocation197_spill] sm:$0xff] %v10464_v6  ;;  %13600 = vst [vmem:[#allocation199_spill] sm:$0xff] %v10471_v3  ;;  %v2625_v47 = vld [vmem:[#allocation8 + $0xd08] sm:$0xff] }
 0x438   :  { %5573 = vmatpush1.bf16.msra.mxu1 %v10435_v10  ;;  %5402 = vmatprep.subr.bf16.mxu0 %v10437_v38  ;;  %13597 = vst [vmem:[#allocation196_spill] sm:$0xff] %v10461_v41  ;;  %v2604_v38 = vld [vmem:[#allocation8 + $0xc60] sm:$0xff]  ;;  %v10467_v10 = vcombine.low %v2592_v16, %v2596_v14  ;;  %v2609_v14 = vld [vmem:[#allocation8 + $0xc88] sm:$0xff]  ;;  %13605 = vst [vmem:[#allocation202_spill] sm:$0xff] %v10485_v17 }
 0x439   :  { %5574 = vmatprep.subr.bf16.mxu1 %v10440_v11  ;;  %v2600_v11 = vld [vmem:[#allocation8 + $0xc40] sm:$0xff]  ;;  %v2613_v16 = vld [vmem:[#allocation8 + $0xca8] sm:$0xff] }
 0x43a   :  { %13599 = vst [vmem:[#allocation198_spill] sm:$0xff] %v10467_v10  ;;  %v10474_v46 = vcombine.high %v2600_v11, %v2604_v38 }
 0x43b   :  { %5403 = vmatpush1.bf16.msra.mxu0 %v10443_v12  ;;  %v10477_v12 = vcombine.high %v2601_v15, %v2605_v63  ;;  %v10499_v15 = vcombine.low %v2609_v14, %v2613_v16 }
 0x43c   :  { %5575 = vmatpush1.bf16.msra.mxu1 %v10447_v20  ;;  %5404 = vmatprep.subr.bf16.mxu0 %v10449_v31  ;;  %13601 = vst [vmem:[#allocation200_spill] sm:$0xff] %v10474_v46  ;;  %v2612_v31 = vld [vmem:[#allocation8 + $0xca0] sm:$0xff]  ;;  %v13602_v20 = vld [vmem:[#allocation131_spill] sm:$0xff] }
 0x43d   :  { %5576 = vmatprep.subr.bf16.mxu1 %v10452_v4  ;;  %v2608_v4 = vld [vmem:[#allocation8 + $0xc80] sm:$0xff]  ;;  %13603 = vst [vmem:[#allocation131_spill] sm:$0xff] %v10477_v12  ;;  %13609 = vst [vmem:[#allocation206_spill] sm:$0xff] %v10499_v15 }
 0x43e   :  { %v10487_v40 = vcombine.high %v2608_v4, %v2612_v31 }
 0x43f   :  { %5405 = vmatpush1.bf16.msra.mxu0 %v10455_v36  ;;  %v2620_v36 = vld [vmem:[#allocation8 + $0xce0] sm:$0xff] }
 0x440   :  { %5577 = vmatpush1.bf16.msra.mxu1 %v10459_v42  ;;  %5417 = vmatprep.subr.bf16.mxu0 %v10461_v41  ;;  %v10481_v42 = vcombine.low %v2600_v11, %v2604_v38  ;;  %13606 = vst [vmem:[#allocation203_spill] sm:$0xff] %v10487_v40  ;;  %v2616_v41 = vld [vmem:[#allocation8 + $0xcc0] sm:$0xff]  ;;  %v2617_v38 = vld [vmem:[#allocation8 + $0xcc8] sm:$0xff] }
 0x441   :  { %5589 = vmatprep.subr.bf16.mxu1 %v10464_v6  ;;  %v10491_v6 = vcombine.high %v2609_v14, %v2613_v16  ;;  %v2621_v11 = vld [vmem:[#allocation8 + $0xce8] sm:$0xff]  ;;  %v10501_v63 = vcombine.high %v2616_v41, %v2620_v36  ;;  %v10516_v16 = vcombine.high %v2625_v47, %v2629_v1 }
 0x442   :  { %5407 = vmatmul.mubr.bf16.vlgmr.msra.gmra.mrb[48].mxu0 %v13602_v20  ;;  %13604 = vst [vmem:[#allocation201_spill] sm:$0xff] %v10481_v42 }
 0x443   :  { %5579 = vmatmul.mubr.bf16.vlgmr.msra.gmra.mrb[48].mxu1 %v13602_v20  ;;  %5418 = vmatpush1.bf16.msra.mxu0 %v10467_v10  ;;  %13607 = vst [vmem:[#allocation204_spill] sm:$0xff] %v10491_v6  ;;  %v10495_v10 = vcombine.low %v2608_v4, %v2612_v31  ;;  %13610 = vst [vmem:[#allocation207_spill] sm:$0xff] %v10501_v63  ;;  %v10507_v31 = vcombine.low %v2616_v41, %v2620_v36 }
 0x444   :  { %5449 = vmatprep.mubr.bf16.mxu0 %v9778_v60  ;;  %5590 = vmatpush1.bf16.msra.mxu1 %v10471_v3  ;;  %v2624_v3 = vld [vmem:[#allocation8 + $0xd00] sm:$0xff]  ;;  %v10511_v4 = vcombine.low %v2617_v38, %v2621_v11  ;;  %13615 = vst [vmem:[#allocation212_spill] sm:$0xff] %v10516_v16  ;;  %v10523_v41 = vcombine.low %v2625_v47, %v2629_v1 }
 0x445   :  { %5621 = vmatprep.mubr.bf16.mxu1 %v9778_v60  ;;  %5419 = vmatprep.subr.bf16.mxu0 %v10474_v46  ;;  %13608 = vst [vmem:[#allocation205_spill] sm:$0xff] %v10495_v10  ;;  %v10504_v46 = vcombine.high %v2617_v38, %v2621_v11  ;;  %13612 = vst [vmem:[#allocation209_spill] sm:$0xff] %v10507_v31 }
 0x446   :  { %5591 = vmatprep.subr.bf16.mxu1 %v10477_v12  ;;  %v2628_v12 = vld [vmem:[#allocation8 + $0xd20] sm:$0xff]  ;;  %13613 = vst [vmem:[#allocation210_spill] sm:$0xff] %v10511_v4  ;;  %13617 = vst [vmem:[#allocation214_spill] sm:$0xff] %v10523_v41 }
 0x447   :  { %5420 = vmatpush1.bf16.msra.mxu0 %v10481_v42  ;;  %13611 = vst [vmem:[#allocation208_spill] sm:$0xff] %v10504_v46  ;;  %v10513_v14 = vcombine.high %v2624_v3, %v2628_v12  ;;  %v2637_v42 = vld [vmem:[#allocation8 + $0xd68] sm:$0xff]  ;;  %v10519_v36 = vcombine.low %v2624_v3, %v2628_v12  ;;  %v2184_v3 = vld [vmem:[#allocation6 + $0xa] sm:$0x3] }
 0x448   :  { %5592 = vmatpush1.bf16.msra.mxu1 %v10485_v17  ;;  %5421 = vmatprep.subr.bf16.mxu0 %v10487_v40  ;;  %v2636_v40 = vld [vmem:[#allocation8 + $0xd60] sm:$0xff]  ;;  %v2633_v17 = vld [vmem:[#allocation8 + $0xd48] sm:$0xff] }
 0x449   :  { %5593 = vmatprep.subr.bf16.mxu1 %v10491_v6  ;;  %13614 = vst [vmem:[#allocation211_spill] sm:$0xff] %v10513_v14  ;;  %v2632_v6 = vld [vmem:[#allocation8 + $0xd40] sm:$0xff]  ;;  %13616 = vst [vmem:[#allocation213_spill] sm:$0xff] %v10519_v36  ;;  %v10528_v11 = vcombine.high %v2633_v17, %v2637_v42  ;;  %v10535_v1 = vcombine.low %v2633_v17, %v2637_v42  ;;  %v2193_v42 = vrot.slane %v2184_v3, %v13486_v53 }
 0x44a   :  { %v10525_v38 = vcombine.high %v2632_v6, %v2636_v40  ;;  %v10531_v12 = vcombine.low %v2632_v6, %v2636_v40  ;;  %v2649_v6 = vld [vmem:[#allocation8 + $0xdc8] sm:$0xff] }
 0x44b   :  { %5422 = vmatpush1.bf16.msra.mxu0 %v10495_v10  ;;  %13619 = vst [vmem:[#allocation216_spill] sm:$0xff] %v10528_v11  ;;  %v2645_v10 = vld [vmem:[#allocation8 + $0xda8] sm:$0xff]  ;;  %13621 = vst [vmem:[#allocation218_spill] sm:$0xff] %v10535_v1 }
 0x44c   :  { %5594 = vmatpush1.bf16.msra.mxu1 %v10499_v15  ;;  %5423 = vmatprep.subr.bf16.mxu0 %v10501_v63  ;;  %13618 = vst [vmem:[#allocation215_spill] sm:$0xff] %v10525_v38  ;;  %v2644_v63 = vld [vmem:[#allocation8 + $0xda0] sm:$0xff]  ;;  %v2641_v15 = vld [vmem:[#allocation8 + $0xd88] sm:$0xff]  ;;  %13620 = vst [vmem:[#allocation217_spill] sm:$0xff] %v10531_v12 }
 0x44d   :  { %5595 = vmatprep.subr.bf16.mxu1 %v10504_v46  ;;  %v2640_v46 = vld [vmem:[#allocation8 + $0xd80] sm:$0xff]  ;;  %v2653_v40 = vld [vmem:[#allocation8 + $0xde8] sm:$0xff]  ;;  %v10549_v19 = vcombine.low %v2641_v15, %v2645_v10 }
 0x44e   :  { %v10537_v47 = vcombine.high %v2640_v46, %v2644_v63 }
 0x44f   :  { %5424 = vmatpush1.bf16.msra.mxu0 %v10507_v31  ;;  %v2652_v31 = vld [vmem:[#allocation8 + $0xde0] sm:$0xff] }
 0x450   :  { %5596 = vmatpush1.bf16.msra.mxu1 %v10511_v4  ;;  %5425 = vmatprep.subr.bf16.mxu0 %v10513_v14  ;;  %13622 = vst [vmem:[#allocation219_spill] sm:$0xff] %v10537_v47  ;;  %v10540_v14 = vcombine.high %v2641_v15, %v2645_v10  ;;  %v2648_v4 = vld [vmem:[#allocation8 + $0xdc0] sm:$0xff]  ;;  %v2657_v15 = vld [vmem:[#allocation8 + $0xe08] sm:$0xff] }
 0x451   :  { %5597 = vmatprep.subr.bf16.mxu1 %v10516_v16 }
 0x453   :  { %5426 = vmatpush1.bf16.msra.mxu0 %v10519_v36 }
 0x454   :  { %5598 = vmatpush1.bf16.msra.mxu1 %v10523_v41  ;;  %5427 = vmatprep.subr.bf16.mxu0 %v10525_v38  ;;  %v2189_v41 = vrot.slane %v2184_v3, %v13201_v51  ;;  %v10545_v38 = vcombine.low %v2640_v46, %v2644_v63  ;;  %v10557_v46 = vcombine.high %v2649_v6, %v2653_v40  ;;  %v2660_v63 = vld [vmem:[#allocation8 + $0xe20] sm:$0xff] }
 0x455   :  { %v2120_v16 = vpop.f32.mrb[44].mxu0  ;;  %5599 = vmatprep.subr.bf16.mxu1 %v10528_v11  ;;  %v2163_v48 = vpop.f32.mrb[44].mxu1 }
 0x456   :  { %v2122_v36 = vpop.f32.mrb[45].mxu0  ;;  %v2176_v45 = vmax.f32 %v2120_v16, %v2163_v48  ;;  %v2165_v7 = vpop.f32.mrb[45].mxu1  ;;  %v10551_v48 = vcombine.high %v2648_v4, %v2652_v31  ;;  %v13623_v16 = vmax.f32 %v10319_v27, %v10324_v33  ;;  %v13625_v33 = vmax.f32 %v10332_v37, %v10339_v26  ;;  %v2664_v26 = vld [vmem:[#allocation8 + $0xe40] sm:$0xff] }
 0x457   :  { %v2124_v17 = vpop.f32.mrb[46].mxu0  ;;  %5428 = vmatpush1.bf16.msra.mxu0 %v10531_v12  ;;  %v2177_v11 = vmax.f32 %v2122_v36, %v2165_v7  ;;  %v2167_v25 = vpop.f32.mrb[46].mxu1  ;;  %v2656_v7 = vld [vmem:[#allocation8 + $0xe00] sm:$0xff]  ;;  %v13624_v36 = vmax.f32 %v10326_v49, %v10330_v43  ;;  %v10568_v27 = vcombine.low %v2649_v6, %v2653_v40 }
 0x458   :  { %5600 = vmatpush1.bf16.msra.mxu1 %v10535_v1  ;;  %v2126_v52 = vpop.f32.mrb[47].mxu0  ;;  %5429 = vmatprep.subr.bf16.mxu0 %v10537_v47  ;;  %v2180_v3 = vmax.f32 %v13623_v16, %v2176_v45  ;;  %v2178_v53 = vmax.f32 %v2124_v17, %v2167_v25  ;;  %v2169_v51 = vpop.f32.mrb[47].mxu1  ;;  %v2661_v1 = vld [vmem:[#allocation8 + $0xe28] sm:$0xff]  ;;  %v10566_v25 = vcombine.low %v2648_v4, %v2652_v31  ;;  %v2668_v37 = vld [vmem:[#allocation8 + $0xe60] sm:$0xff] }
 0x459   :  { %5601 = vmatprep.subr.bf16.mxu1 %v10540_v14  ;;  %v2181_v47 = vmax.f32 %v13624_v36, %v2177_v11  ;;  %v2179_v10 = vmax.f32 %v2126_v52, %v2169_v51  ;;  %v13626_v16 = vmax.f32 %v10342_v28, %v10351_v35  ;;  %v10575_v51 = vcombine.high %v2656_v7, %v2660_v63  ;;  %v2665_v31 = vld [vmem:[#allocation8 + $0xe48] sm:$0xff]  ;;  %v2676_v36 = vld [vmem:[#allocation8 + $0xea0] sm:$0xff] }
 0x45a   :  { %v2196_v12 = vadd.f32 %v2189_v41, %v2180_v3  ;;  %v2182_v45 = vmax.f32 %v13625_v33, %v2178_v53  ;;  %v10578_v53 = vcombine.high %v2657_v15, %v2661_v1  ;;  %v2669_v4 = vld [vmem:[#allocation8 + $0xe68] sm:$0xff]  ;;  %v10581_v28 = vcombine.low %v2656_v7, %v2660_v63 }
 0x45b   :  { %5430 = vmatpush1.bf16.msra.mxu0 %v10545_v38  ;;  %v2197_v17 = vadd.f32 %v2193_v42, %v2181_v47  ;;  %v2183_v49 = vmax.f32 %v13626_v16, %v2179_v10  ;;  %v10587_v40 = vcombine.high %v2664_v26, %v2668_v37  ;;  %v2673_v63 = vld [vmem:[#allocation8 + $0xe88] sm:$0xff]  ;;  %v10597_v33 = vcombine.low %v2664_v26, %v2668_v37  ;;  %v2684_v16 = vld [vmem:[#allocation8 + $0xee0] sm:$0xff] }
 0x45c   :  { %5602 = vmatpush1.bf16.msra.mxu1 %v10549_v19  ;;  %5431 = vmatprep.subr.bf16.mxu0 %v10551_v48  ;;  %v2198_v52 = vadd.f32 %v2189_v41, %v2182_v45  ;;  %v2200_v11 = vmax.f32 %v2196_v12, 0.0  ;;  %v10585_v41 = vcombine.low %v2657_v15, %v2661_v1  ;;  %v10592_v12 = vcombine.high %v2665_v31, %v2669_v4  ;;  %v2677_v10 = vld [vmem:[#allocation8 + $0xea8] sm:$0xff] }
 0x45d   :  { %5603 = vmatprep.subr.bf16.mxu1 %v10557_v46  ;;  %v2199_v43 = vadd.f32 %v2193_v42, %v2183_v49  ;;  %v2201_v35 = vmax.f32 %v2197_v17, 0.0  ;;  %13627 = vst [vmem:[#allocation220_spill] sm:$0xff] %v10587_v40  ;;  %v2672_v42 = vld [vmem:[#allocation8 + $0xe80] sm:$0xff]  ;;  %13630 = vst [vmem:[#allocation223_spill] sm:$0xff] %v10597_v33  ;;  %v10601_v1 = vcombine.low %v2665_v31, %v2669_v4  ;;  %v2681_v49 = vld [vmem:[#allocation8 + $0xec8] sm:$0xff] }
 0x45e   :  { %v2202_v47 = vmax.f32 %v2198_v52, 0.0  ;;  %13629 = vst [vmem:[#allocation222_spill] sm:$0xff] %v10592_v12  ;;  %v10603_v15 = vcombine.high %v2672_v42, %v2676_v36  ;;  %v10606_v45 = vcombine.high %v2673_v63, %v2677_v10  ;;  %v2680_v17 = vld [vmem:[#allocation8 + $0xec0] sm:$0xff]  ;;  %v2685_v52 = vld [vmem:[#allocation8 + $0xee8] sm:$0xff]  ;;  %v10609_v26 = vcombine.low %v2672_v42, %v2676_v36 }
 0x45f   :  { %5432 = vmatpush1.bf16.msra.mxu0 %v10566_v25  ;;  %v2203_v6 = vmax.f32 %v2199_v43, 0.0  ;;  %13631 = vst [vmem:[#allocation224_spill] sm:$0xff] %v10601_v1  ;;  %v10613_v37 = vcombine.low %v2673_v63, %v2677_v10  ;;  %v10615_v43 = vcombine.high %v2680_v17, %v2684_v16  ;;  %v10618_v31 = vcombine.high %v2681_v49, %v2685_v52  ;;  %v2688_v4 = vld [vmem:[#allocation8 + $0xf00] sm:$0xff] }
 0x460   :  { %5604 = vmatpush1.bf16.msra.mxu1 %v10568_v27  ;;  %5433 = vmatprep.subr.bf16.mxu0 %v10575_v51  ;;  %v10589_v3 = vpack.c.bf16 %v2202_v47, %v2200_v11  ;;  %13632 = vst [vmem:[#allocation225_spill] sm:$0xff] %v10603_v15  ;;  %13633 = vst [vmem:[#allocation226_spill] sm:$0xff] %v10606_v45  ;;  %v2692_v11 = vld [vmem:[#allocation8 + $0xf20] sm:$0xff]  ;;  %v2689_v47 = vld [vmem:[#allocation8 + $0xf08] sm:$0xff]  ;;  %v10625_v42 = vcombine.low %v2681_v49, %v2685_v52 }
 0x461   :  { %5605 = vmatprep.subr.bf16.mxu1 %v10578_v53  ;;  %v10594_v7 = vpack.c.bf16 %v2203_v6, %v2201_v35  ;;  %13634 = vst [vmem:[#allocation227_spill] sm:$0xff] %v10609_v26  ;;  %13635 = vst [vmem:[#allocation228_spill] sm:$0xff] %v10613_v37  ;;  %v2693_v35 = vld [vmem:[#allocation8 + $0xf28] sm:$0xff]  ;;  %v10621_v6 = vcombine.low %v2680_v17, %v2684_v16  ;;  %v10627_v36 = vcombine.high %v2688_v4, %v2692_v11  ;;  %v2696_v10 = vld [vmem:[#allocation8 + $0xf40] sm:$0xff] }
 0x462   :  { %13628 = vst [vmem:[#allocation221_spill] sm:$0xff] %v10589_v3  ;;  %13636 = vst [vmem:[#allocation229_spill] sm:$0xff] %v10615_v43  ;;  %v10630_v63 = vcombine.high %v2689_v47, %v2693_v35  ;;  %v2700_v3 = vld [vmem:[#allocation8 + $0xf60] sm:$0xff]  ;;  %v10633_v17 = vcombine.low %v2688_v4, %v2692_v11  ;;  %v10637_v16 = vcombine.low %v2689_v47, %v2693_v35 }
 0x463   :  { %5434 = vmatpush1.bf16.msra.mxu0 %v10581_v28  ;;  %13637 = vst [vmem:[#allocation230_spill] sm:$0xff] %v10618_v31  ;;  %13638 = vst [vmem:[#allocation231_spill] sm:$0xff] %v10621_v6  ;;  %v10639_v49 = vcombine.high %v2696_v10, %v2700_v3  ;;  %v10645_v4 = vcombine.low %v2696_v10, %v2700_v3 }
 0x464   :  { %5606 = vmatpush1.bf16.msra.mxu1 %v10585_v41  ;;  %5435 = vmatprep.subr.bf16.mxu0 %v10587_v40  ;;  %13639 = vst [vmem:[#allocation232_spill] sm:$0xff] %v10625_v42  ;;  %13640 = vst [vmem:[#allocation233_spill] sm:$0xff] %v10627_v36  ;;  %v2671_v40 = vld [vmem:[#allocation8 + $0xe78] sm:$0xff] }
 0x465   :  { %5607 = vmatprep.subr.bf16.mxu1 %v10592_v12  ;;  %13641 = vst [vmem:[#allocation234_spill] sm:$0xff] %v10630_v63  ;;  %13642 = vst [vmem:[#allocation235_spill] sm:$0xff] %v10633_v17  ;;  %v2667_v12 = vld [vmem:[#allocation8 + $0xe58] sm:$0xff] }
 0x466   :  { %13643 = vst [vmem:[#allocation236_spill] sm:$0xff] %v10637_v16  ;;  %13644 = vst [vmem:[#allocation237_spill] sm:$0xff] %v10639_v49 }
 0x467   :  { %5436 = vmatpush1.bf16.msra.mxu0 %v10597_v33  ;;  %13646 = vst [vmem:[#allocation239_spill] sm:$0xff] %v10645_v4  ;;  %v2666_v33 = vld [vmem:[#allocation8 + $0xe50] sm:$0xff] }
 0x468   :  { %5608 = vmatpush1.bf16.msra.mxu1 %v10601_v1  ;;  %5437 = vmatprep.subr.bf16.mxu0 %v10603_v15  ;;  %v2701_v15 = vld [vmem:[#allocation8 + $0xf68] sm:$0xff]  ;;  %v2659_v1 = vld [vmem:[#allocation8 + $0xe18] sm:$0xff] }
 0x469   :  { %5609 = vmatprep.subr.bf16.mxu1 %v10606_v45  ;;  %v2697_v45 = vld [vmem:[#allocation8 + $0xf48] sm:$0xff] }
 0x46a   :  { %v10642_v52 = vcombine.high %v2697_v45, %v2701_v15  ;;  %v10649_v11 = vcombine.low %v2697_v45, %v2701_v15 }
 0x46b   :  { %5438 = vmatpush1.bf16.msra.mxu0 %v10609_v26  ;;  %v2709_v26 = vld [vmem:[#allocation8 + $0xfa8] sm:$0xff] }
 0x46c   :  { %5610 = vmatpush1.bf16.msra.mxu1 %v10613_v37  ;;  %5439 = vmatprep.subr.bf16.mxu0 %v10615_v43  ;;  %13645 = vst [vmem:[#allocation238_spill] sm:$0xff] %v10642_v52  ;;  %v2708_v43 = vld [vmem:[#allocation8 + $0xfa0] sm:$0xff]  ;;  %v2705_v37 = vld [vmem:[#allocation8 + $0xf88] sm:$0xff]  ;;  %13647 = vst [vmem:[#allocation240_spill] sm:$0xff] %v10649_v11 }
 0x46d   :  { %5611 = vmatprep.subr.bf16.mxu1 %v10618_v31  ;;  %v2704_v31 = vld [vmem:[#allocation8 + $0xf80] sm:$0xff]  ;;  %v10654_v35 = vcombine.high %v2705_v37, %v2709_v26  ;;  %v10661_v15 = vcombine.low %v2705_v37, %v2709_v26 }
 0x46e   :  { %v10651_v47 = vcombine.high %v2704_v31, %v2708_v43  ;;  %v10657_v3 = vcombine.low %v2704_v31, %v2708_v43 }
 0x46f   :  { %5440 = vmatpush1.bf16.msra.mxu0 %v10621_v6  ;;  %13649 = vst [vmem:[#allocation242_spill] sm:$0xff] %v10654_v35  ;;  %v2717_v6 = vld [vmem:[#allocation8 + $0xfe8] sm:$0xff]  ;;  %13651 = vst [vmem:[#allocation244_spill] sm:$0xff] %v10661_v15 }
 0x470   :  { %5612 = vmatpush1.bf16.msra.mxu1 %v10625_v42  ;;  %5441 = vmatprep.subr.bf16.mxu0 %v10627_v36  ;;  %13648 = vst [vmem:[#allocation241_spill] sm:$0xff] %v10651_v47  ;;  %v2716_v36 = vld [vmem:[#allocation8 + $0xfe0] sm:$0xff]  ;;  %v2713_v42 = vld [vmem:[#allocation8 + $0xfc8] sm:$0xff]  ;;  %13650 = vst [vmem:[#allocation243_spill] sm:$0xff] %v10657_v3 }
 0x471   :  { %5613 = vmatprep.subr.bf16.mxu1 %v10630_v63  ;;  %v2712_v63 = vld [vmem:[#allocation8 + $0xfc0] sm:$0xff]  ;;  %v10666_v10 = vcombine.high %v2713_v42, %v2717_v6  ;;  %v10673_v26 = vcombine.low %v2713_v42, %v2717_v6 }
 0x472   :  { %v10663_v45 = vcombine.high %v2712_v63, %v2716_v36  ;;  %v10669_v43 = vcombine.low %v2712_v63, %v2716_v36  ;;  %v2219_v36 = vld [vmem:[#allocation8 + $0x58] sm:$0xff] }
 0x473   :  { %5442 = vmatpush1.bf16.msra.mxu0 %v10633_v17  ;;  %13653 = vst [vmem:[#allocation246_spill] sm:$0xff] %v10666_v10  ;;  %v2215_v17 = vld [vmem:[#allocation8 + $0x38] sm:$0xff]  ;;  %13655 = vst [vmem:[#allocation248_spill] sm:$0xff] %v10673_v26 }
 0x474   :  { %5614 = vmatpush1.bf16.msra.mxu1 %v10637_v16  ;;  %5443 = vmatprep.subr.bf16.mxu0 %v10639_v49  ;;  %13652 = vst [vmem:[#allocation245_spill] sm:$0xff] %v10663_v45  ;;  %v2214_v49 = vld [vmem:[#allocation8 + $0x30] sm:$0xff]  ;;  %v2211_v16 = vld [vmem:[#allocation8 + $0x18] sm:$0xff]  ;;  %13654 = vst [vmem:[#allocation247_spill] sm:$0xff] %v10669_v43 }
 0x475   :  { %5615 = vmatprep.subr.bf16.mxu1 %v10642_v52  ;;  %v2210_v52 = vld [vmem:[#allocation8 + $0x10] sm:$0xff]  ;;  %v10678_v31 = vcombine.high %v2211_v16, %v2215_v17  ;;  %v2223_v63 = vld [vmem:[#allocation8 + $0x78] sm:$0xff]  ;;  %v10685_v6 = vcombine.low %v2211_v16, %v2215_v17 }
 0x476   :  { %v10675_v37 = vcombine.high %v2210_v52, %v2214_v49  ;;  %v10699_v17 = vcombine.low %v2219_v36, %v2223_v63 }
 0x477   :  { %5444 = vmatpush1.bf16.msra.mxu0 %v10645_v4  ;;  %13657 = vst [vmem:[#allocation250_spill] sm:$0xff] %v10678_v31  ;;  %13659 = vst [vmem:[#allocation252_spill] sm:$0xff] %v10685_v6  ;;  %v2662_v4 = vld [vmem:[#allocation8 + $0xe30] sm:$0xff] }
 0x478   :  { %5616 = vmatpush1.bf16.msra.mxu1 %v10649_v11  ;;  %5445 = vmatprep.subr.bf16.mxu0 %v10651_v47  ;;  %13656 = vst [vmem:[#allocation249_spill] sm:$0xff] %v10675_v37  ;;  %v2222_v47 = vld [vmem:[#allocation8 + $0x70] sm:$0xff]  ;;  %v10681_v11 = vcombine.low %v2210_v52, %v2214_v49  ;;  %v2227_v49 = vld [vmem:[#allocation8 + $0x98] sm:$0xff]  ;;  %13663 = vst [vmem:[#allocation256_spill] sm:$0xff] %v10699_v17 }
 0x479   :  { %5617 = vmatprep.subr.bf16.mxu1 %v10654_v35  ;;  %v2218_v35 = vld [vmem:[#allocation8 + $0x50] sm:$0xff]  ;;  %v2231_v52 = vld [vmem:[#allocation8 + $0xb8] sm:$0xff] }
 0x47a   :  { %13658 = vst [vmem:[#allocation251_spill] sm:$0xff] %v10681_v11  ;;  %v10688_v42 = vcombine.high %v2218_v35, %v2222_v47 }
 0x47b   :  { %5446 = vmatpush1.bf16.msra.mxu0 %v10657_v3  ;;  %v2247_v3 = vld [vmem:[#allocation8 + $0x138] sm:$0xff] }
 0x47c   :  { %5618 = vmatpush1.bf16.msra.mxu1 %v10661_v15  ;;  %5447 = vmatprep.subr.bf16.mxu0 %v10663_v45  ;;  %13660 = vst [vmem:[#allocation253_spill] sm:$0xff] %v10688_v42  ;;  %v2230_v45 = vld [vmem:[#allocation8 + $0xb0] sm:$0xff]  ;;  %v10691_v15 = vcombine.high %v2219_v36, %v2223_v63  ;;  %v10713_v36 = vcombine.low %v2227_v49, %v2231_v52 }
 0x47d   :  { %5619 = vmatprep.subr.bf16.mxu1 %v10666_v10  ;;  %v2226_v10 = vld [vmem:[#allocation8 + $0x90] sm:$0xff] }
 0x47e   :  { %13661 = vst [vmem:[#allocation254_spill] sm:$0xff] %v10691_v15  ;;  %v10701_v16 = vcombine.high %v2226_v10, %v2230_v45  ;;  %13667 = vst [vmem:[#allocation260_spill] sm:$0xff] %v10713_v36 }
 0x47f   :  { %5448 = vmatpush1.bf16.msra.mxu0 %v10669_v43  ;;  %v2238_v43 = vld [vmem:[#allocation8 + $0xf0] sm:$0xff] }
 0x480   :  { %5620 = vmatpush1.bf16.msra.mxu1 %v10673_v26  ;;  %5632 = vmatprep.subr.bf16.mxu0 %v10675_v37  ;;  %v10695_v26 = vcombine.low %v2218_v35, %v2222_v47  ;;  %13664 = vst [vmem:[#allocation257_spill] sm:$0xff] %v10701_v16  ;;  %v2234_v37 = vld [vmem:[#allocation8 + $0xd0] sm:$0xff]  ;;  %v2235_v47 = vld [vmem:[#allocation8 + $0xd8] sm:$0xff] }
 0x481   :  { %5804 = vmatprep.subr.bf16.mxu1 %v10678_v31  ;;  %v10705_v31 = vcombine.high %v2227_v49, %v2231_v52  ;;  %v2239_v35 = vld [vmem:[#allocation8 + $0xf8] sm:$0xff] }
 0x482   :  { %5450 = vmatmul.mubr.bf16.vlgmr.msra.gmra.mrb[48].mxu0 %v9775_v34  ;;  %13662 = vst [vmem:[#allocation255_spill] sm:$0xff] %v10695_v26  ;;  %v10718_v63 = vcombine.high %v2235_v47, %v2239_v35 }
 0x483   :  { %5622 = vmatmul.mubr.bf16.vlgmr.msra.gmra.mrb[48].mxu1 %v9775_v34  ;;  %5633 = vmatpush1.bf16.msra.mxu0 %v10681_v11  ;;  %13665 = vst [vmem:[#allocation258_spill] sm:$0xff] %v10705_v31  ;;  %v10709_v11 = vcombine.low %v2226_v10, %v2230_v45  ;;  %v10721_v45 = vcombine.low %v2234_v37, %v2238_v43 }
 0x484   :  { %5664 = vmatprep.mubr.bf16.mxu0 %v13413_v29  ;;  %5805 = vmatpush1.bf16.msra.mxu1 %v10685_v6  ;;  %13669 = vst [vmem:[#allocation262_spill] sm:$0xff] %v10718_v63  ;;  %v2243_v6 = vld [vmem:[#allocation8 + $0x118] sm:$0xff]  ;;  %v10725_v10 = vcombine.low %v2235_v47, %v2239_v35 }
 0x485   :  { %5836 = vmatprep.mubr.bf16.mxu1 %v13413_v29  ;;  %5634 = vmatprep.subr.bf16.mxu0 %v10688_v42  ;;  %13666 = vst [vmem:[#allocation259_spill] sm:$0xff] %v10709_v11  ;;  %v10715_v29 = vcombine.high %v2234_v37, %v2238_v43  ;;  %v2242_v42 = vld [vmem:[#allocation8 + $0x110] sm:$0xff]  ;;  %13670 = vst [vmem:[#allocation263_spill] sm:$0xff] %v10721_v45  ;;  %v10730_v52 = vcombine.high %v2243_v6, %v2247_v3 }
 0x486   :  { %5806 = vmatprep.subr.bf16.mxu1 %v10691_v15  ;;  %v2246_v15 = vld [vmem:[#allocation8 + $0x130] sm:$0xff]  ;;  %13671 = vst [vmem:[#allocation264_spill] sm:$0xff] %v10725_v10  ;;  %v10737_v37 = vcombine.low %v2243_v6, %v2247_v3 }
 0x487   :  { %5635 = vmatpush1.bf16.msra.mxu0 %v10695_v26  ;;  %13668 = vst [vmem:[#allocation261_spill] sm:$0xff] %v10715_v29  ;;  %v10727_v49 = vcombine.high %v2242_v42, %v2246_v15  ;;  %13673 = vst [vmem:[#allocation266_spill] sm:$0xff] %v10730_v52  ;;  %v2255_v26 = vld [vmem:[#allocation8 + $0x178] sm:$0xff]  ;;  %v10733_v43 = vcombine.low %v2242_v42, %v2246_v15 }
 0x488   :  { %5807 = vmatpush1.bf16.msra.mxu1 %v10699_v17  ;;  %5636 = vmatprep.subr.bf16.mxu0 %v10701_v16  ;;  %v2254_v16 = vld [vmem:[#allocation8 + $0x170] sm:$0xff]  ;;  %v2251_v17 = vld [vmem:[#allocation8 + $0x158] sm:$0xff]  ;;  %13675 = vst [vmem:[#allocation268_spill] sm:$0xff] %v10737_v37 }
 0x489   :  { %5808 = vmatprep.subr.bf16.mxu1 %v10705_v31  ;;  %13672 = vst [vmem:[#allocation265_spill] sm:$0xff] %v10727_v49  ;;  %v2250_v31 = vld [vmem:[#allocation8 + $0x150] sm:$0xff]  ;;  %13674 = vst [vmem:[#allocation267_spill] sm:$0xff] %v10733_v43  ;;  %v10742_v35 = vcombine.high %v2251_v17, %v2255_v26  ;;  %v10749_v3 = vcombine.low %v2251_v17, %v2255_v26 }
 0x48a   :  { %v10739_v47 = vcombine.high %v2250_v31, %v2254_v16  ;;  %v10745_v15 = vcombine.low %v2250_v31, %v2254_v16 }
 0x48b   :  { %5637 = vmatpush1.bf16.msra.mxu0 %v10709_v11  ;;  %13677 = vst [vmem:[#allocation270_spill] sm:$0xff] %v10742_v35  ;;  %v2263_v11 = vld [vmem:[#allocation8 + $0x1b8] sm:$0xff]  ;;  %13679 = vst [vmem:[#allocation272_spill] sm:$0xff] %v10749_v3 }
 0x48c   :  { %5809 = vmatpush1.bf16.msra.mxu1 %v10713_v36  ;;  %5638 = vmatprep.subr.bf16.mxu0 %v10715_v29  ;;  %13676 = vst [vmem:[#allocation269_spill] sm:$0xff] %v10739_v47  ;;  %v2262_v29 = vld [vmem:[#allocation8 + $0x1b0] sm:$0xff]  ;;  %v2259_v36 = vld [vmem:[#allocation8 + $0x198] sm:$0xff]  ;;  %13678 = vst [vmem:[#allocation271_spill] sm:$0xff] %v10745_v15 }
 0x48d   :  { %5810 = vmatprep.subr.bf16.mxu1 %v10718_v63  ;;  %v2258_v63 = vld [vmem:[#allocation8 + $0x190] sm:$0xff]  ;;  %v10754_v42 = vcombine.high %v2259_v36, %v2263_v11  ;;  %v10761_v26 = vcombine.low %v2259_v36, %v2263_v11 }
 0x48e   :  { %v10751_v6 = vcombine.high %v2258_v63, %v2262_v29  ;;  %v10757_v31 = vcombine.low %v2258_v63, %v2262_v29 }
 0x48f   :  { %5639 = vmatpush1.bf16.msra.mxu0 %v10721_v45  ;;  %13681 = vst [vmem:[#allocation274_spill] sm:$0xff] %v10754_v42  ;;  %v2271_v45 = vld [vmem:[#allocation8 + $0x1f8] sm:$0xff]  ;;  %13683 = vst [vmem:[#allocation276_spill] sm:$0xff] %v10761_v26 }
 0x490   :  { %5811 = vmatpush1.bf16.msra.mxu1 %v10725_v10  ;;  %5640 = vmatprep.subr.bf16.mxu0 %v10727_v49  ;;  %13680 = vst [vmem:[#allocation273_spill] sm:$0xff] %v10751_v6  ;;  %v2270_v49 = vld [vmem:[#allocation8 + $0x1f0] sm:$0xff]  ;;  %v2267_v10 = vld [vmem:[#allocation8 + $0x1d8] sm:$0xff]  ;;  %13682 = vst [vmem:[#allocation275_spill] sm:$0xff] %v10757_v31 }
 0x491   :  { %5812 = vmatprep.subr.bf16.mxu1 %v10730_v52  ;;  %v2266_v52 = vld [vmem:[#allocation8 + $0x1d0] sm:$0xff]  ;;  %v10766_v16 = vcombine.high %v2267_v10, %v2271_v45  ;;  %v10773_v11 = vcombine.low %v2267_v10, %v2271_v45 }
 0x492   :  { %v10763_v17 = vcombine.high %v2266_v52, %v2270_v49  ;;  %v10769_v29 = vcombine.low %v2266_v52, %v2270_v49 }
 0x493   :  { %5641 = vmatpush1.bf16.msra.mxu0 %v10733_v43  ;;  %13685 = vst [vmem:[#allocation278_spill] sm:$0xff] %v10766_v16  ;;  %v2279_v43 = vld [vmem:[#allocation8 + $0x238] sm:$0xff]  ;;  %13687 = vst [vmem:[#allocation280_spill] sm:$0xff] %v10773_v11 }
 0x494   :  { %5813 = vmatpush1.bf16.msra.mxu1 %v10737_v37  ;;  %5642 = vmatprep.subr.bf16.mxu0 %v10739_v47  ;;  %13684 = vst [vmem:[#allocation277_spill] sm:$0xff] %v10763_v17  ;;  %v2278_v47 = vld [vmem:[#allocation8 + $0x230] sm:$0xff]  ;;  %v2275_v37 = vld [vmem:[#allocation8 + $0x218] sm:$0xff]  ;;  %13686 = vst [vmem:[#allocation279_spill] sm:$0xff] %v10769_v29 }
 0x495   :  { %5814 = vmatprep.subr.bf16.mxu1 %v10742_v35  ;;  %v2274_v35 = vld [vmem:[#allocation8 + $0x210] sm:$0xff]  ;;  %v10778_v63 = vcombine.high %v2275_v37, %v2279_v43  ;;  %v10785_v45 = vcombine.low %v2275_v37, %v2279_v43 }
 0x496   :  { %v10775_v36 = vcombine.high %v2274_v35, %v2278_v47  ;;  %v10781_v49 = vcombine.low %v2274_v35, %v2278_v47 }
 0x497   :  { %5643 = vmatpush1.bf16.msra.mxu0 %v10745_v15  ;;  %13689 = vst [vmem:[#allocation282_spill] sm:$0xff] %v10778_v63  ;;  %v2287_v15 = vld [vmem:[#allocation8 + $0x278] sm:$0xff]  ;;  %13691 = vst [vmem:[#allocation284_spill] sm:$0xff] %v10785_v45 }
 0x498   :  { %5815 = vmatpush1.bf16.msra.mxu1 %v10749_v3  ;;  %5644 = vmatprep.subr.bf16.mxu0 %v10751_v6  ;;  %13688 = vst [vmem:[#allocation281_spill] sm:$0xff] %v10775_v36  ;;  %v2286_v6 = vld [vmem:[#allocation8 + $0x270] sm:$0xff]  ;;  %v2283_v3 = vld [vmem:[#allocation8 + $0x258] sm:$0xff]  ;;  %13690 = vst [vmem:[#allocation283_spill] sm:$0xff] %v10781_v49 }
 0x499   :  { %5816 = vmatprep.subr.bf16.mxu1 %v10754_v42  ;;  %v2282_v42 = vld [vmem:[#allocation8 + $0x250] sm:$0xff]  ;;  %v10790_v52 = vcombine.high %v2283_v3, %v2287_v15  ;;  %v10797_v43 = vcombine.low %v2283_v3, %v2287_v15 }
 0x49a   :  { %v10787_v10 = vcombine.high %v2282_v42, %v2286_v6  ;;  %v10793_v47 = vcombine.low %v2282_v42, %v2286_v6 }
 0x49b   :  { %5645 = vmatpush1.bf16.msra.mxu0 %v10757_v31  ;;  %13693 = vst [vmem:[#allocation286_spill] sm:$0xff] %v10790_v52  ;;  %v2295_v31 = vld [vmem:[#allocation8 + $0x2b8] sm:$0xff]  ;;  %13695 = vst [vmem:[#allocation288_spill] sm:$0xff] %v10797_v43 }
 0x49c   :  { %5817 = vmatpush1.bf16.msra.mxu1 %v10761_v26  ;;  %5646 = vmatprep.subr.bf16.mxu0 %v10763_v17  ;;  %13692 = vst [vmem:[#allocation285_spill] sm:$0xff] %v10787_v10  ;;  %v2294_v17 = vld [vmem:[#allocation8 + $0x2b0] sm:$0xff]  ;;  %v2291_v26 = vld [vmem:[#allocation8 + $0x298] sm:$0xff]  ;;  %13694 = vst [vmem:[#allocation287_spill] sm:$0xff] %v10793_v47 }
 0x49d   :  { %5818 = vmatprep.subr.bf16.mxu1 %v10766_v16  ;;  %v2290_v16 = vld [vmem:[#allocation8 + $0x290] sm:$0xff]  ;;  %v10802_v35 = vcombine.high %v2291_v26, %v2295_v31  ;;  %v10809_v15 = vcombine.low %v2291_v26, %v2295_v31 }
 0x49e   :  { %v10799_v37 = vcombine.high %v2290_v16, %v2294_v17  ;;  %v10805_v6 = vcombine.low %v2290_v16, %v2294_v17 }
 0x49f   :  { %5647 = vmatpush1.bf16.msra.mxu0 %v10769_v29  ;;  %13697 = vst [vmem:[#allocation290_spill] sm:$0xff] %v10802_v35  ;;  %v2303_v29 = vld [vmem:[#allocation8 + $0x2f8] sm:$0xff]  ;;  %13699 = vst [vmem:[#allocation292_spill] sm:$0xff] %v10809_v15 }
 0x4a0   :  { %5819 = vmatpush1.bf16.msra.mxu1 %v10773_v11  ;;  %5648 = vmatprep.subr.bf16.mxu0 %v10775_v36  ;;  %13696 = vst [vmem:[#allocation289_spill] sm:$0xff] %v10799_v37  ;;  %v2302_v36 = vld [vmem:[#allocation8 + $0x2f0] sm:$0xff]  ;;  %v2299_v11 = vld [vmem:[#allocation8 + $0x2d8] sm:$0xff]  ;;  %13698 = vst [vmem:[#allocation291_spill] sm:$0xff] %v10805_v6 }
 0x4a1   :  { %5820 = vmatprep.subr.bf16.mxu1 %v10778_v63  ;;  %v2298_v63 = vld [vmem:[#allocation8 + $0x2d0] sm:$0xff]  ;;  %v10814_v42 = vcombine.high %v2299_v11, %v2303_v29  ;;  %v10821_v31 = vcombine.low %v2299_v11, %v2303_v29 }
 0x4a2   :  { %v10811_v3 = vcombine.high %v2298_v63, %v2302_v36  ;;  %v10817_v17 = vcombine.low %v2298_v63, %v2302_v36 }
 0x4a3   :  { %5649 = vmatpush1.bf16.msra.mxu0 %v10781_v49  ;;  %13701 = vst [vmem:[#allocation294_spill] sm:$0xff] %v10814_v42  ;;  %v2311_v49 = vld [vmem:[#allocation8 + $0x338] sm:$0xff]  ;;  %13703 = vst [vmem:[#allocation296_spill] sm:$0xff] %v10821_v31 }
 0x4a4   :  { %5821 = vmatpush1.bf16.msra.mxu1 %v10785_v45  ;;  %5650 = vmatprep.subr.bf16.mxu0 %v10787_v10  ;;  %13700 = vst [vmem:[#allocation293_spill] sm:$0xff] %v10811_v3  ;;  %v2310_v10 = vld [vmem:[#allocation8 + $0x330] sm:$0xff]  ;;  %v2307_v45 = vld [vmem:[#allocation8 + $0x318] sm:$0xff]  ;;  %13702 = vst [vmem:[#allocation295_spill] sm:$0xff] %v10817_v17 }
 0x4a5   :  { %5822 = vmatprep.subr.bf16.mxu1 %v10790_v52  ;;  %v2306_v52 = vld [vmem:[#allocation8 + $0x310] sm:$0xff]  ;;  %v10826_v16 = vcombine.high %v2307_v45, %v2311_v49  ;;  %v10833_v29 = vcombine.low %v2307_v45, %v2311_v49 }
 0x4a6   :  { %v10823_v26 = vcombine.high %v2306_v52, %v2310_v10  ;;  %v10829_v36 = vcombine.low %v2306_v52, %v2310_v10 }
 0x4a7   :  { %5651 = vmatpush1.bf16.msra.mxu0 %v10793_v47  ;;  %13705 = vst [vmem:[#allocation298_spill] sm:$0xff] %v10826_v16  ;;  %v2319_v47 = vld [vmem:[#allocation8 + $0x378] sm:$0xff]  ;;  %13707 = vst [vmem:[#allocation300_spill] sm:$0xff] %v10833_v29 }
 0x4a8   :  { %5823 = vmatpush1.bf16.msra.mxu1 %v10797_v43  ;;  %5652 = vmatprep.subr.bf16.mxu0 %v10799_v37  ;;  %13704 = vst [vmem:[#allocation297_spill] sm:$0xff] %v10823_v26  ;;  %v2318_v37 = vld [vmem:[#allocation8 + $0x370] sm:$0xff]  ;;  %v2315_v43 = vld [vmem:[#allocation8 + $0x358] sm:$0xff]  ;;  %13706 = vst [vmem:[#allocation299_spill] sm:$0xff] %v10829_v36 }
 0x4a9   :  { %5824 = vmatprep.subr.bf16.mxu1 %v10802_v35  ;;  %v2314_v35 = vld [vmem:[#allocation8 + $0x350] sm:$0xff]  ;;  %v10838_v63 = vcombine.high %v2315_v43, %v2319_v47  ;;  %v10845_v49 = vcombine.low %v2315_v43, %v2319_v47 }
 0x4aa   :  { %v10835_v11 = vcombine.high %v2314_v35, %v2318_v37  ;;  %v10841_v10 = vcombine.low %v2314_v35, %v2318_v37 }
 0x4ab   :  { %5653 = vmatpush1.bf16.msra.mxu0 %v10805_v6  ;;  %13709 = vst [vmem:[#allocation302_spill] sm:$0xff] %v10838_v63  ;;  %v2327_v6 = vld [vmem:[#allocation8 + $0x3b8] sm:$0xff]  ;;  %13711 = vst [vmem:[#allocation304_spill] sm:$0xff] %v10845_v49 }
 0x4ac   :  { %5825 = vmatpush1.bf16.msra.mxu1 %v10809_v15  ;;  %5654 = vmatprep.subr.bf16.mxu0 %v10811_v3  ;;  %13708 = vst [vmem:[#allocation301_spill] sm:$0xff] %v10835_v11  ;;  %v2326_v3 = vld [vmem:[#allocation8 + $0x3b0] sm:$0xff]  ;;  %v2323_v15 = vld [vmem:[#allocation8 + $0x398] sm:$0xff]  ;;  %13710 = vst [vmem:[#allocation303_spill] sm:$0xff] %v10841_v10 }
 0x4ad   :  { %5826 = vmatprep.subr.bf16.mxu1 %v10814_v42  ;;  %v2322_v42 = vld [vmem:[#allocation8 + $0x390] sm:$0xff]  ;;  %v10850_v52 = vcombine.high %v2323_v15, %v2327_v6  ;;  %v10857_v47 = vcombine.low %v2323_v15, %v2327_v6 }
 0x4ae   :  { %v10847_v45 = vcombine.high %v2322_v42, %v2326_v3  ;;  %v10853_v37 = vcombine.low %v2322_v42, %v2326_v3 }
 0x4af   :  { %5655 = vmatpush1.bf16.msra.mxu0 %v10817_v17  ;;  %13713 = vst [vmem:[#allocation306_spill] sm:$0xff] %v10850_v52  ;;  %v2335_v17 = vld [vmem:[#allocation8 + $0x3f8] sm:$0xff]  ;;  %13715 = vst [vmem:[#allocation308_spill] sm:$0xff] %v10857_v47 }
 0x4b0   :  { %5827 = vmatpush1.bf16.msra.mxu1 %v10821_v31  ;;  %5656 = vmatprep.subr.bf16.mxu0 %v10823_v26  ;;  %13712 = vst [vmem:[#allocation305_spill] sm:$0xff] %v10847_v45  ;;  %v2334_v26 = vld [vmem:[#allocation8 + $0x3f0] sm:$0xff]  ;;  %v2331_v31 = vld [vmem:[#allocation8 + $0x3d8] sm:$0xff]  ;;  %13714 = vst [vmem:[#allocation307_spill] sm:$0xff] %v10853_v37 }
 0x4b1   :  { %5828 = vmatprep.subr.bf16.mxu1 %v10826_v16  ;;  %v2330_v16 = vld [vmem:[#allocation8 + $0x3d0] sm:$0xff]  ;;  %v10862_v35 = vcombine.high %v2331_v31, %v2335_v17  ;;  %v10869_v6 = vcombine.low %v2331_v31, %v2335_v17 }
 0x4b2   :  { %v10859_v43 = vcombine.high %v2330_v16, %v2334_v26  ;;  %v10865_v3 = vcombine.low %v2330_v16, %v2334_v26  ;;  %v2347_v26 = vld [vmem:[#allocation8 + $0x458] sm:$0xff] }
 0x4b3   :  { %5657 = vmatpush1.bf16.msra.mxu0 %v10829_v36  ;;  %13717 = vst [vmem:[#allocation310_spill] sm:$0xff] %v10862_v35  ;;  %v2343_v36 = vld [vmem:[#allocation8 + $0x438] sm:$0xff]  ;;  %13719 = vst [vmem:[#allocation312_spill] sm:$0xff] %v10869_v6 }
 0x4b4   :  { %5829 = vmatpush1.bf16.msra.mxu1 %v10833_v29  ;;  %5658 = vmatprep.subr.bf16.mxu0 %v10835_v11  ;;  %13716 = vst [vmem:[#allocation309_spill] sm:$0xff] %v10859_v43  ;;  %v2342_v11 = vld [vmem:[#allocation8 + $0x430] sm:$0xff]  ;;  %v2339_v29 = vld [vmem:[#allocation8 + $0x418] sm:$0xff]  ;;  %13718 = vst [vmem:[#allocation311_spill] sm:$0xff] %v10865_v3 }
 0x4b5   :  { %5830 = vmatprep.subr.bf16.mxu1 %v10838_v63  ;;  %v2338_v63 = vld [vmem:[#allocation8 + $0x410] sm:$0xff]  ;;  %v10874_v42 = vcombine.high %v2339_v29, %v2343_v36  ;;  %v2351_v16 = vld [vmem:[#allocation8 + $0x478] sm:$0xff]  ;;  %v10881_v17 = vcombine.low %v2339_v29, %v2343_v36 }
 0x4b6   :  { %v10871_v15 = vcombine.high %v2338_v63, %v2342_v11  ;;  %v10895_v36 = vcombine.low %v2347_v26, %v2351_v16 }
 0x4b7   :  { %5659 = vmatpush1.bf16.msra.mxu0 %v10841_v10  ;;  %13721 = vst [vmem:[#allocation314_spill] sm:$0xff] %v10874_v42  ;;  %13723 = vst [vmem:[#allocation316_spill] sm:$0xff] %v10881_v17 }
 0x4b8   :  { %5831 = vmatpush1.bf16.msra.mxu1 %v10845_v49  ;;  %5660 = vmatprep.subr.bf16.mxu0 %v10847_v45  ;;  %13720 = vst [vmem:[#allocation313_spill] sm:$0xff] %v10871_v15  ;;  %v2350_v45 = vld [vmem:[#allocation8 + $0x470] sm:$0xff]  ;;  %v10877_v49 = vcombine.low %v2338_v63, %v2342_v11  ;;  %v2355_v11 = vld [vmem:[#allocation8 + $0x498] sm:$0xff]  ;;  %13727 = vst [vmem:[#allocation320_spill] sm:$0xff] %v10895_v36 }
 0x4b9   :  { %5832 = vmatprep.subr.bf16.mxu1 %v10850_v52  ;;  %v2346_v52 = vld [vmem:[#allocation8 + $0x450] sm:$0xff]  ;;  %v2359_v63 = vld [vmem:[#allocation8 + $0x4b8] sm:$0xff] }
 0x4ba   :  { %13722 = vst [vmem:[#allocation315_spill] sm:$0xff] %v10877_v49  ;;  %v10884_v31 = vcombine.high %v2346_v52, %v2350_v45 }
 0x4bb   :  { %5661 = vmatpush1.bf16.msra.mxu0 %v10853_v37 }
 0x4bc   :  { %5833 = vmatpush1.bf16.msra.mxu1 %v10857_v47  ;;  %5662 = vmatprep.subr.bf16.mxu0 %v10859_v43  ;;  %13724 = vst [vmem:[#allocation317_spill] sm:$0xff] %v10884_v31  ;;  %v2358_v43 = vld [vmem:[#allocation8 + $0x4b0] sm:$0xff]  ;;  %v10887_v47 = vcombine.high %v2347_v26, %v2351_v16  ;;  %v10909_v26 = vcombine.low %v2355_v11, %v2359_v63 }
 0x4bd   :  { %5834 = vmatprep.subr.bf16.mxu1 %v10862_v35  ;;  %v2354_v35 = vld [vmem:[#allocation8 + $0x490] sm:$0xff] }
 0x4be   :  { %13725 = vst [vmem:[#allocation318_spill] sm:$0xff] %v10887_v47  ;;  %v10897_v29 = vcombine.high %v2354_v35, %v2358_v43  ;;  %13731 = vst [vmem:[#allocation324_spill] sm:$0xff] %v10909_v26 }
 0x4bf   :  { %5663 = vmatpush1.bf16.msra.mxu0 %v10865_v3  ;;  %v2375_v3 = vld [vmem:[#allocation8 + $0x538] sm:$0xff] }
 0x4c0   :  { %5835 = vmatpush1.bf16.msra.mxu1 %v10869_v6  ;;  %5675 = vmatprep.subr.bf16.mxu0 %v10871_v15  ;;  %v10891_v6 = vcombine.low %v2346_v52, %v2350_v45  ;;  %13728 = vst [vmem:[#allocation321_spill] sm:$0xff] %v10897_v29  ;;  %v2362_v15 = vld [vmem:[#allocation8 + $0x4d0] sm:$0xff]  ;;  %v2363_v45 = vld [vmem:[#allocation8 + $0x4d8] sm:$0xff] }
 0x4c1   :  { %5847 = vmatprep.subr.bf16.mxu1 %v10874_v42  ;;  %v10901_v42 = vcombine.high %v2355_v11, %v2359_v63  ;;  %v2367_v52 = vld [vmem:[#allocation8 + $0x4f8] sm:$0xff] }
 0x4c2   :  { %5665 = vmatmul.mubr.bf16.vlgmr.msra.gmra.mrb[52].mxu0 %v13463_v62  ;;  %13726 = vst [vmem:[#allocation319_spill] sm:$0xff] %v10891_v6  ;;  %v10914_v16 = vcombine.high %v2363_v45, %v2367_v52 }
 0x4c3   :  { %5837 = vmatmul.mubr.bf16.vlgmr.msra.gmra.mrb[52].mxu1 %v13463_v62  ;;  %5676 = vmatpush1.bf16.msra.mxu0 %v10877_v49  ;;  %13729 = vst [vmem:[#allocation322_spill] sm:$0xff] %v10901_v42  ;;  %v2366_v62 = vld [vmem:[#allocation8 + $0x4f0] sm:$0xff]  ;;  %v10905_v49 = vcombine.low %v2354_v35, %v2358_v43  ;;  %v10921_v35 = vcombine.low %v2363_v45, %v2367_v52 }
 0x4c4   :  { %5707 = vmatprep.mubr.bf16.mxu0 %v13466_v58  ;;  %5848 = vmatpush1.bf16.msra.mxu1 %v10881_v17  ;;  %13733 = vst [vmem:[#allocation326_spill] sm:$0xff] %v10914_v16  ;;  %v2371_v17 = vld [vmem:[#allocation8 + $0x518] sm:$0xff]  ;;  %v10917_v43 = vcombine.low %v2362_v15, %v2366_v62 }
 0x4c5   :  { %5879 = vmatprep.mubr.bf16.mxu1 %v13466_v58  ;;  %5677 = vmatprep.subr.bf16.mxu0 %v10884_v31  ;;  %13730 = vst [vmem:[#allocation323_spill] sm:$0xff] %v10905_v49  ;;  %v10911_v58 = vcombine.high %v2362_v15, %v2366_v62  ;;  %v2370_v31 = vld [vmem:[#allocation8 + $0x510] sm:$0xff]  ;;  %13735 = vst [vmem:[#allocation328_spill] sm:$0xff] %v10921_v35  ;;  %v10926_v63 = vcombine.high %v2371_v17, %v2375_v3 }
 0x4c6   :  { %5849 = vmatprep.subr.bf16.mxu1 %v10887_v47  ;;  %v2374_v47 = vld [vmem:[#allocation8 + $0x530] sm:$0xff]  ;;  %13734 = vst [vmem:[#allocation327_spill] sm:$0xff] %v10917_v43  ;;  %v10933_v62 = vcombine.low %v2371_v17, %v2375_v3 }
 0x4c7   :  { %5678 = vmatpush1.bf16.msra.mxu0 %v10891_v6  ;;  %13732 = vst [vmem:[#allocation325_spill] sm:$0xff] %v10911_v58  ;;  %v10923_v11 = vcombine.high %v2370_v31, %v2374_v47  ;;  %13737 = vst [vmem:[#allocation330_spill] sm:$0xff] %v10926_v63  ;;  %v2383_v6 = vld [vmem:[#allocation8 + $0x578] sm:$0xff]  ;;  %v10929_v15 = vcombine.low %v2370_v31, %v2374_v47 }
 0x4c8   :  { %5850 = vmatpush1.bf16.msra.mxu1 %v10895_v36  ;;  %5679 = vmatprep.subr.bf16.mxu0 %v10897_v29  ;;  %v2382_v29 = vld [vmem:[#allocation8 + $0x570] sm:$0xff]  ;;  %v2379_v36 = vld [vmem:[#allocation8 + $0x558] sm:$0xff]  ;;  %13739 = vst [vmem:[#allocation332_spill] sm:$0xff] %v10933_v62 }
 0x4c9   :  { %5851 = vmatprep.subr.bf16.mxu1 %v10901_v42  ;;  %13736 = vst [vmem:[#allocation329_spill] sm:$0xff] %v10923_v11  ;;  %v2378_v42 = vld [vmem:[#allocation8 + $0x550] sm:$0xff]  ;;  %13738 = vst [vmem:[#allocation331_spill] sm:$0xff] %v10929_v15  ;;  %v10938_v52 = vcombine.high %v2379_v36, %v2383_v6  ;;  %v10945_v3 = vcombine.low %v2379_v36, %v2383_v6 }
 0x4ca   :  { %v10935_v45 = vcombine.high %v2378_v42, %v2382_v29  ;;  %v10941_v47 = vcombine.low %v2378_v42, %v2382_v29 }
 0x4cb   :  { %5680 = vmatpush1.bf16.msra.mxu0 %v10905_v49  ;;  %13741 = vst [vmem:[#allocation334_spill] sm:$0xff] %v10938_v52  ;;  %v2391_v49 = vld [vmem:[#allocation8 + $0x5b8] sm:$0xff]  ;;  %13743 = vst [vmem:[#allocation336_spill] sm:$0xff] %v10945_v3 }
 0x4cc   :  { %5852 = vmatpush1.bf16.msra.mxu1 %v10909_v26  ;;  %5681 = vmatprep.subr.bf16.mxu0 %v10911_v58  ;;  %13740 = vst [vmem:[#allocation333_spill] sm:$0xff] %v10935_v45  ;;  %v2390_v58 = vld [vmem:[#allocation8 + $0x5b0] sm:$0xff]  ;;  %v2387_v26 = vld [vmem:[#allocation8 + $0x598] sm:$0xff]  ;;  %13742 = vst [vmem:[#allocation335_spill] sm:$0xff] %v10941_v47 }
 0x4cd   :  { %5853 = vmatprep.subr.bf16.mxu1 %v10914_v16  ;;  %v2386_v16 = vld [vmem:[#allocation8 + $0x590] sm:$0xff]  ;;  %v10950_v31 = vcombine.high %v2387_v26, %v2391_v49  ;;  %v10957_v6 = vcombine.low %v2387_v26, %v2391_v49 }
 0x4ce   :  { %v10947_v17 = vcombine.high %v2386_v16, %v2390_v58  ;;  %v10953_v42 = vcombine.low %v2386_v16, %v2390_v58 }
 0x4cf   :  { %5682 = vmatpush1.bf16.msra.mxu0 %v10917_v43  ;;  %13745 = vst [vmem:[#allocation338_spill] sm:$0xff] %v10950_v31  ;;  %v2399_v43 = vld [vmem:[#allocation8 + $0x5f8] sm:$0xff]  ;;  %13747 = vst [vmem:[#allocation340_spill] sm:$0xff] %v10957_v6 }
 0x4d0   :  { %5854 = vmatpush1.bf16.msra.mxu1 %v10921_v35  ;;  %5683 = vmatprep.subr.bf16.mxu0 %v10923_v11  ;;  %13744 = vst [vmem:[#allocation337_spill] sm:$0xff] %v10947_v17  ;;  %v2398_v11 = vld [vmem:[#allocation8 + $0x5f0] sm:$0xff]  ;;  %v2395_v35 = vld [vmem:[#allocation8 + $0x5d8] sm:$0xff]  ;;  %13746 = vst [vmem:[#allocation339_spill] sm:$0xff] %v10953_v42 }
 0x4d1   :  { %5855 = vmatprep.subr.bf16.mxu1 %v10926_v63  ;;  %v2394_v63 = vld [vmem:[#allocation8 + $0x5d0] sm:$0xff]  ;;  %v10962_v29 = vcombine.high %v2395_v35, %v2399_v43  ;;  %v10969_v49 = vcombine.low %v2395_v35, %v2399_v43 }
 0x4d2   :  { %v10959_v36 = vcombine.high %v2394_v63, %v2398_v11  ;;  %v10965_v58 = vcombine.low %v2394_v63, %v2398_v11 }
 0x4d3   :  { %5684 = vmatpush1.bf16.msra.mxu0 %v10929_v15  ;;  %13749 = vst [vmem:[#allocation342_spill] sm:$0xff] %v10962_v29  ;;  %v2407_v15 = vld [vmem:[#allocation8 + $0x638] sm:$0xff]  ;;  %13751 = vst [vmem:[#allocation344_spill] sm:$0xff] %v10969_v49 }
 0x4d4   :  { %5856 = vmatpush1.bf16.msra.mxu1 %v10933_v62  ;;  %5685 = vmatprep.subr.bf16.mxu0 %v10935_v45  ;;  %13748 = vst [vmem:[#allocation341_spill] sm:$0xff] %v10959_v36  ;;  %v2406_v45 = vld [vmem:[#allocation8 + $0x630] sm:$0xff]  ;;  %v2403_v62 = vld [vmem:[#allocation8 + $0x618] sm:$0xff]  ;;  %13750 = vst [vmem:[#allocation343_spill] sm:$0xff] %v10965_v58 }
 0x4d5   :  { %5857 = vmatprep.subr.bf16.mxu1 %v10938_v52  ;;  %v2402_v52 = vld [vmem:[#allocation8 + $0x610] sm:$0xff]  ;;  %v10974_v16 = vcombine.high %v2403_v62, %v2407_v15  ;;  %v10981_v43 = vcombine.low %v2403_v62, %v2407_v15 }
 0x4d6   :  { %v10971_v26 = vcombine.high %v2402_v52, %v2406_v45  ;;  %v10977_v11 = vcombine.low %v2402_v52, %v2406_v45 }
 0x4d7   :  { %5686 = vmatpush1.bf16.msra.mxu0 %v10941_v47  ;;  %13753 = vst [vmem:[#allocation346_spill] sm:$0xff] %v10974_v16  ;;  %v2415_v47 = vld [vmem:[#allocation8 + $0x678] sm:$0xff]  ;;  %13755 = vst [vmem:[#allocation348_spill] sm:$0xff] %v10981_v43 }
 0x4d8   :  { %5858 = vmatpush1.bf16.msra.mxu1 %v10945_v3  ;;  %5687 = vmatprep.subr.bf16.mxu0 %v10947_v17  ;;  %13752 = vst [vmem:[#allocation345_spill] sm:$0xff] %v10971_v26  ;;  %v2414_v17 = vld [vmem:[#allocation8 + $0x670] sm:$0xff]  ;;  %v2411_v3 = vld [vmem:[#allocation8 + $0x658] sm:$0xff]  ;;  %13754 = vst [vmem:[#allocation347_spill] sm:$0xff] %v10977_v11 }
 0x4d9   :  { %5859 = vmatprep.subr.bf16.mxu1 %v10950_v31  ;;  %v2410_v31 = vld [vmem:[#allocation8 + $0x650] sm:$0xff]  ;;  %v10986_v63 = vcombine.high %v2411_v3, %v2415_v47  ;;  %v10993_v15 = vcombine.low %v2411_v3, %v2415_v47 }
 0x4da   :  { %v10983_v35 = vcombine.high %v2410_v31, %v2414_v17  ;;  %v10989_v45 = vcombine.low %v2410_v31, %v2414_v17 }
 0x4db   :  { %5688 = vmatpush1.bf16.msra.mxu0 %v10953_v42  ;;  %13757 = vst [vmem:[#allocation350_spill] sm:$0xff] %v10986_v63  ;;  %v2423_v42 = vld [vmem:[#allocation8 + $0x6b8] sm:$0xff]  ;;  %13759 = vst [vmem:[#allocation352_spill] sm:$0xff] %v10993_v15 }
 0x4dc   :  { %5860 = vmatpush1.bf16.msra.mxu1 %v10957_v6  ;;  %5689 = vmatprep.subr.bf16.mxu0 %v10959_v36  ;;  %13756 = vst [vmem:[#allocation349_spill] sm:$0xff] %v10983_v35  ;;  %v2422_v36 = vld [vmem:[#allocation8 + $0x6b0] sm:$0xff]  ;;  %v2419_v6 = vld [vmem:[#allocation8 + $0x698] sm:$0xff]  ;;  %13758 = vst [vmem:[#allocation351_spill] sm:$0xff] %v10989_v45 }
 0x4dd   :  { %5861 = vmatprep.subr.bf16.mxu1 %v10962_v29  ;;  %v2418_v29 = vld [vmem:[#allocation8 + $0x690] sm:$0xff]  ;;  %v10998_v52 = vcombine.high %v2419_v6, %v2423_v42  ;;  %v11005_v47 = vcombine.low %v2419_v6, %v2423_v42 }
 0x4de   :  { %v10995_v62 = vcombine.high %v2418_v29, %v2422_v36  ;;  %v11001_v17 = vcombine.low %v2418_v29, %v2422_v36 }
 0x4df   :  { %5690 = vmatpush1.bf16.msra.mxu0 %v10965_v58  ;;  %13761 = vst [vmem:[#allocation354_spill] sm:$0xff] %v10998_v52  ;;  %v2431_v58 = vld [vmem:[#allocation8 + $0x6f8] sm:$0xff]  ;;  %13763 = vst [vmem:[#allocation356_spill] sm:$0xff] %v11005_v47 }
 0x4e0   :  { %5862 = vmatpush1.bf16.msra.mxu1 %v10969_v49  ;;  %5691 = vmatprep.subr.bf16.mxu0 %v10971_v26  ;;  %13760 = vst [vmem:[#allocation353_spill] sm:$0xff] %v10995_v62  ;;  %v2430_v26 = vld [vmem:[#allocation8 + $0x6f0] sm:$0xff]  ;;  %v2427_v49 = vld [vmem:[#allocation8 + $0x6d8] sm:$0xff]  ;;  %13762 = vst [vmem:[#allocation355_spill] sm:$0xff] %v11001_v17 }
 0x4e1   :  { %5863 = vmatprep.subr.bf16.mxu1 %v10974_v16  ;;  %v2426_v16 = vld [vmem:[#allocation8 + $0x6d0] sm:$0xff]  ;;  %v11010_v31 = vcombine.high %v2427_v49, %v2431_v58  ;;  %v11017_v42 = vcombine.low %v2427_v49, %v2431_v58 }
 0x4e2   :  { %v11007_v3 = vcombine.high %v2426_v16, %v2430_v26  ;;  %v11013_v36 = vcombine.low %v2426_v16, %v2430_v26 }
 0x4e3   :  { %5692 = vmatpush1.bf16.msra.mxu0 %v10977_v11  ;;  %13765 = vst [vmem:[#allocation358_spill] sm:$0xff] %v11010_v31  ;;  %v2439_v11 = vld [vmem:[#allocation8 + $0x738] sm:$0xff]  ;;  %13767 = vst [vmem:[#allocation360_spill] sm:$0xff] %v11017_v42 }
 0x4e4   :  { %5864 = vmatpush1.bf16.msra.mxu1 %v10981_v43  ;;  %5693 = vmatprep.subr.bf16.mxu0 %v10983_v35  ;;  %13764 = vst [vmem:[#allocation357_spill] sm:$0xff] %v11007_v3  ;;  %v2438_v35 = vld [vmem:[#allocation8 + $0x730] sm:$0xff]  ;;  %v2435_v43 = vld [vmem:[#allocation8 + $0x718] sm:$0xff]  ;;  %13766 = vst [vmem:[#allocation359_spill] sm:$0xff] %v11013_v36 }
 0x4e5   :  { %5865 = vmatprep.subr.bf16.mxu1 %v10986_v63  ;;  %v2434_v63 = vld [vmem:[#allocation8 + $0x710] sm:$0xff]  ;;  %v11022_v29 = vcombine.high %v2435_v43, %v2439_v11  ;;  %v11029_v58 = vcombine.low %v2435_v43, %v2439_v11 }
 0x4e6   :  { %v11019_v6 = vcombine.high %v2434_v63, %v2438_v35  ;;  %v11025_v26 = vcombine.low %v2434_v63, %v2438_v35 }
 0x4e7   :  { %5694 = vmatpush1.bf16.msra.mxu0 %v10989_v45  ;;  %13769 = vst [vmem:[#allocation362_spill] sm:$0xff] %v11022_v29  ;;  %v2447_v45 = vld [vmem:[#allocation8 + $0x778] sm:$0xff]  ;;  %13771 = vst [vmem:[#allocation364_spill] sm:$0xff] %v11029_v58 }
 0x4e8   :  { %5866 = vmatpush1.bf16.msra.mxu1 %v10993_v15  ;;  %5695 = vmatprep.subr.bf16.mxu0 %v10995_v62  ;;  %13768 = vst [vmem:[#allocation361_spill] sm:$0xff] %v11019_v6  ;;  %v2446_v62 = vld [vmem:[#allocation8 + $0x770] sm:$0xff]  ;;  %v2443_v15 = vld [vmem:[#allocation8 + $0x758] sm:$0xff]  ;;  %13770 = vst [vmem:[#allocation363_spill] sm:$0xff] %v11025_v26 }
 0x4e9   :  { %5867 = vmatprep.subr.bf16.mxu1 %v10998_v52  ;;  %v2442_v52 = vld [vmem:[#allocation8 + $0x750] sm:$0xff]  ;;  %v11034_v16 = vcombine.high %v2443_v15, %v2447_v45  ;;  %v11041_v11 = vcombine.low %v2443_v15, %v2447_v45 }
 0x4ea   :  { %v11031_v49 = vcombine.high %v2442_v52, %v2446_v62  ;;  %v11037_v35 = vcombine.low %v2442_v52, %v2446_v62 }
 0x4eb   :  { %5696 = vmatpush1.bf16.msra.mxu0 %v11001_v17  ;;  %13773 = vst [vmem:[#allocation366_spill] sm:$0xff] %v11034_v16  ;;  %v2455_v17 = vld [vmem:[#allocation8 + $0x7b8] sm:$0xff]  ;;  %13775 = vst [vmem:[#allocation368_spill] sm:$0xff] %v11041_v11 }
 0x4ec   :  { %5868 = vmatpush1.bf16.msra.mxu1 %v11005_v47  ;;  %5697 = vmatprep.subr.bf16.mxu0 %v11007_v3  ;;  %13772 = vst [vmem:[#allocation365_spill] sm:$0xff] %v11031_v49  ;;  %v2454_v3 = vld [vmem:[#allocation8 + $0x7b0] sm:$0xff]  ;;  %v2451_v47 = vld [vmem:[#allocation8 + $0x798] sm:$0xff]  ;;  %13774 = vst [vmem:[#allocation367_spill] sm:$0xff] %v11037_v35 }
 0x4ed   :  { %5869 = vmatprep.subr.bf16.mxu1 %v11010_v31  ;;  %v2450_v31 = vld [vmem:[#allocation8 + $0x790] sm:$0xff]  ;;  %v11046_v63 = vcombine.high %v2451_v47, %v2455_v17  ;;  %v11053_v45 = vcombine.low %v2451_v47, %v2455_v17 }
 0x4ee   :  { %v11043_v43 = vcombine.high %v2450_v31, %v2454_v3  ;;  %v11049_v62 = vcombine.low %v2450_v31, %v2454_v3 }
 0x4ef   :  { %5698 = vmatpush1.bf16.msra.mxu0 %v11013_v36  ;;  %13777 = vst [vmem:[#allocation370_spill] sm:$0xff] %v11046_v63  ;;  %v2463_v36 = vld [vmem:[#allocation8 + $0x7f8] sm:$0xff]  ;;  %13779 = vst [vmem:[#allocation372_spill] sm:$0xff] %v11053_v45 }
 0x4f0   :  { %5870 = vmatpush1.bf16.msra.mxu1 %v11017_v42  ;;  %5699 = vmatprep.subr.bf16.mxu0 %v11019_v6  ;;  %13776 = vst [vmem:[#allocation369_spill] sm:$0xff] %v11043_v43  ;;  %v2462_v6 = vld [vmem:[#allocation8 + $0x7f0] sm:$0xff]  ;;  %v2459_v42 = vld [vmem:[#allocation8 + $0x7d8] sm:$0xff]  ;;  %13778 = vst [vmem:[#allocation371_spill] sm:$0xff] %v11049_v62 }
 0x4f1   :  { %5871 = vmatprep.subr.bf16.mxu1 %v11022_v29  ;;  %v2458_v29 = vld [vmem:[#allocation8 + $0x7d0] sm:$0xff]  ;;  %v11058_v52 = vcombine.high %v2459_v42, %v2463_v36  ;;  %v11065_v17 = vcombine.low %v2459_v42, %v2463_v36 }
 0x4f2   :  { %v11055_v15 = vcombine.high %v2458_v29, %v2462_v6  ;;  %v11061_v3 = vcombine.low %v2458_v29, %v2462_v6  ;;  %v2475_v6 = vld [vmem:[#allocation8 + $0x858] sm:$0xff] }
 0x4f3   :  { %5700 = vmatpush1.bf16.msra.mxu0 %v11025_v26  ;;  %13781 = vst [vmem:[#allocation374_spill] sm:$0xff] %v11058_v52  ;;  %v2471_v26 = vld [vmem:[#allocation8 + $0x838] sm:$0xff]  ;;  %13783 = vst [vmem:[#allocation376_spill] sm:$0xff] %v11065_v17 }
 0x4f4   :  { %5872 = vmatpush1.bf16.msra.mxu1 %v11029_v58  ;;  %5701 = vmatprep.subr.bf16.mxu0 %v11031_v49  ;;  %13780 = vst [vmem:[#allocation373_spill] sm:$0xff] %v11055_v15  ;;  %v2470_v49 = vld [vmem:[#allocation8 + $0x830] sm:$0xff]  ;;  %v2467_v58 = vld [vmem:[#allocation8 + $0x818] sm:$0xff]  ;;  %13782 = vst [vmem:[#allocation375_spill] sm:$0xff] %v11061_v3 }
 0x4f5   :  { %5873 = vmatprep.subr.bf16.mxu1 %v11034_v16  ;;  %v2466_v16 = vld [vmem:[#allocation8 + $0x810] sm:$0xff]  ;;  %v11070_v31 = vcombine.high %v2467_v58, %v2471_v26  ;;  %v2479_v29 = vld [vmem:[#allocation8 + $0x878] sm:$0xff]  ;;  %v11077_v36 = vcombine.low %v2467_v58, %v2471_v26 }
 0x4f6   :  { %v11067_v47 = vcombine.high %v2466_v16, %v2470_v49  ;;  %v11091_v26 = vcombine.low %v2475_v6, %v2479_v29 }
 0x4f7   :  { %5702 = vmatpush1.bf16.msra.mxu0 %v11037_v35  ;;  %13785 = vst [vmem:[#allocation378_spill] sm:$0xff] %v11070_v31  ;;  %13787 = vst [vmem:[#allocation380_spill] sm:$0xff] %v11077_v36 }
 0x4f8   :  { %5874 = vmatpush1.bf16.msra.mxu1 %v11041_v11  ;;  %5703 = vmatprep.subr.bf16.mxu0 %v11043_v43  ;;  %13784 = vst [vmem:[#allocation377_spill] sm:$0xff] %v11067_v47  ;;  %v2478_v43 = vld [vmem:[#allocation8 + $0x870] sm:$0xff]  ;;  %v11073_v11 = vcombine.low %v2466_v16, %v2470_v49  ;;  %v2483_v49 = vld [vmem:[#allocation8 + $0x898] sm:$0xff]  ;;  %13791 = vst [vmem:[#allocation384_spill] sm:$0xff] %v11091_v26 }
 0x4f9   :  { %5875 = vmatprep.subr.bf16.mxu1 %v11046_v63  ;;  %v2474_v63 = vld [vmem:[#allocation8 + $0x850] sm:$0xff]  ;;  %v2487_v16 = vld [vmem:[#allocation8 + $0x8b8] sm:$0xff] }
 0x4fa   :  { %13786 = vst [vmem:[#allocation379_spill] sm:$0xff] %v11073_v11  ;;  %v11080_v42 = vcombine.high %v2474_v63, %v2478_v43 }
 0x4fb   :  { %5704 = vmatpush1.bf16.msra.mxu0 %v11049_v62  ;;  %v2503_v62 = vld [vmem:[#allocation8 + $0x938] sm:$0xff] }
 0x4fc   :  { %5876 = vmatpush1.bf16.msra.mxu1 %v11053_v45  ;;  %5705 = vmatprep.subr.bf16.mxu0 %v11055_v15  ;;  %13788 = vst [vmem:[#allocation381_spill] sm:$0xff] %v11080_v42  ;;  %v2486_v15 = vld [vmem:[#allocation8 + $0x8b0] sm:$0xff]  ;;  %v11083_v45 = vcombine.high %v2475_v6, %v2479_v29  ;;  %v11105_v6 = vcombine.low %v2483_v49, %v2487_v16 }
 0x4fd   :  { %5877 = vmatprep.subr.bf16.mxu1 %v11058_v52  ;;  %v2482_v52 = vld [vmem:[#allocation8 + $0x890] sm:$0xff] }
 0x4fe   :  { %13789 = vst [vmem:[#allocation382_spill] sm:$0xff] %v11083_v45  ;;  %v11093_v58 = vcombine.high %v2482_v52, %v2486_v15  ;;  %13795 = vst [vmem:[#allocation388_spill] sm:$0xff] %v11105_v6 }
 0x4ff   :  { %5706 = vmatpush1.bf16.msra.mxu0 %v11061_v3  ;;  %v2499_v3 = vld [vmem:[#allocation8 + $0x918] sm:$0xff] }
 0x500   :  { %5878 = vmatpush1.bf16.msra.mxu1 %v11065_v17  ;;  %5718 = vmatprep.subr.bf16.mxu0 %v11067_v47  ;;  %v11087_v17 = vcombine.low %v2474_v63, %v2478_v43  ;;  %13792 = vst [vmem:[#allocation385_spill] sm:$0xff] %v11093_v58  ;;  %v2490_v47 = vld [vmem:[#allocation8 + $0x8d0] sm:$0xff]  ;;  %v2491_v43 = vld [vmem:[#allocation8 + $0x8d8] sm:$0xff] }
 0x501   :  { %5890 = vmatprep.subr.bf16.mxu1 %v11070_v31  ;;  %v11097_v31 = vcombine.high %v2483_v49, %v2487_v16  ;;  %v2495_v63 = vld [vmem:[#allocation8 + $0x8f8] sm:$0xff]  ;;  %v11122_v16 = vcombine.high %v2499_v3, %v2503_v62 }
 0x502   :  { %5708 = vmatmul.mubr.bf16.vlgmr.msra.gmra.mrb[52].mxu0 %v13536_v13  ;;  %13790 = vst [vmem:[#allocation383_spill] sm:$0xff] %v11087_v17 }
 0x503   :  { %5880 = vmatmul.mubr.bf16.vlgmr.msra.gmra.mrb[52].mxu1 %v13536_v13  ;;  %5719 = vmatpush1.bf16.msra.mxu0 %v11073_v11  ;;  %13793 = vst [vmem:[#allocation386_spill] sm:$0xff] %v11097_v31  ;;  %v2494_v13 = vld [vmem:[#allocation8 + $0x8f0] sm:$0xff]  ;;  %v11101_v11 = vcombine.low %v2482_v52, %v2486_v15  ;;  %v11117_v52 = vcombine.low %v2491_v43, %v2495_v63  ;;  %13801 = vst [vmem:[#allocation394_spill] sm:$0xff] %v11122_v16 }
 0x504   :  { %5750 = vmatprep.mubr.bf16.mxu0 %v13539_v56  ;;  %5891 = vmatpush1.bf16.msra.mxu1 %v11077_v36  ;;  %v11107_v29 = vcombine.high %v2490_v47, %v2494_v13  ;;  %v2498_v36 = vld [vmem:[#allocation8 + $0x910] sm:$0xff]  ;;  %v11113_v15 = vcombine.low %v2490_v47, %v2494_v13  ;;  %v11129_v13 = vcombine.low %v2499_v3, %v2503_v62 }
 0x505   :  { %5922 = vmatprep.mubr.bf16.mxu1 %v13539_v56  ;;  %5720 = vmatprep.subr.bf16.mxu0 %v11080_v42  ;;  %13794 = vst [vmem:[#allocation387_spill] sm:$0xff] %v11101_v11  ;;  %v11110_v42 = vcombine.high %v2491_v43, %v2495_v63  ;;  %13799 = vst [vmem:[#allocation392_spill] sm:$0xff] %v11117_v52 }
 0x506   :  { %5892 = vmatprep.subr.bf16.mxu1 %v11083_v45  ;;  %13796 = vst [vmem:[#allocation389_spill] sm:$0xff] %v11107_v29  ;;  %v2502_v45 = vld [vmem:[#allocation8 + $0x930] sm:$0xff]  ;;  %13798 = vst [vmem:[#allocation391_spill] sm:$0xff] %v11113_v15 }
 0x507   :  { %5721 = vmatpush1.bf16.msra.mxu0 %v11087_v17  ;;  %13797 = vst [vmem:[#allocation390_spill] sm:$0xff] %v11110_v42  ;;  %v11119_v49 = vcombine.high %v2498_v36, %v2502_v45  ;;  %v2511_v17 = vld [vmem:[#allocation8 + $0x978] sm:$0xff]  ;;  %v11125_v47 = vcombine.low %v2498_v36, %v2502_v45  ;;  %13803 = vst [vmem:[#allocation396_spill] sm:$0xff] %v11129_v13 }
 0x508   :  { %5893 = vmatpush1.bf16.msra.mxu1 %v11091_v26  ;;  %5722 = vmatprep.subr.bf16.mxu0 %v11093_v58  ;;  %v2510_v58 = vld [vmem:[#allocation8 + $0x970] sm:$0xff]  ;;  %v2507_v26 = vld [vmem:[#allocation8 + $0x958] sm:$0xff] }
 0x509   :  { %5894 = vmatprep.subr.bf16.mxu1 %v11097_v31  ;;  %13800 = vst [vmem:[#allocation393_spill] sm:$0xff] %v11119_v49  ;;  %v2506_v31 = vld [vmem:[#allocation8 + $0x950] sm:$0xff]  ;;  %13802 = vst [vmem:[#allocation395_spill] sm:$0xff] %v11125_v47  ;;  %v11134_v63 = vcombine.high %v2507_v26, %v2511_v17  ;;  %v11141_v62 = vcombine.low %v2507_v26, %v2511_v17 }
 0x50a   :  { %v11131_v43 = vcombine.high %v2506_v31, %v2510_v58  ;;  %v11137_v45 = vcombine.low %v2506_v31, %v2510_v58 }
 0x50b   :  { %5723 = vmatpush1.bf16.msra.mxu0 %v11101_v11  ;;  %13805 = vst [vmem:[#allocation398_spill] sm:$0xff] %v11134_v63  ;;  %v2519_v11 = vld [vmem:[#allocation8 + $0x9b8] sm:$0xff]  ;;  %13807 = vst [vmem:[#allocation400_spill] sm:$0xff] %v11141_v62 }
 0x50c   :  { %5895 = vmatpush1.bf16.msra.mxu1 %v11105_v6  ;;  %5724 = vmatprep.subr.bf16.mxu0 %v11107_v29  ;;  %13804 = vst [vmem:[#allocation397_spill] sm:$0xff] %v11131_v43  ;;  %v2518_v29 = vld [vmem:[#allocation8 + $0x9b0] sm:$0xff]  ;;  %v2515_v6 = vld [vmem:[#allocation8 + $0x998] sm:$0xff]  ;;  %13806 = vst [vmem:[#allocation399_spill] sm:$0xff] %v11137_v45 }
 0x50d   :  { %5896 = vmatprep.subr.bf16.mxu1 %v11110_v42  ;;  %v2514_v42 = vld [vmem:[#allocation8 + $0x990] sm:$0xff]  ;;  %v11146_v36 = vcombine.high %v2515_v6, %v2519_v11  ;;  %v11153_v17 = vcombine.low %v2515_v6, %v2519_v11 }
 0x50e   :  { %v11143_v3 = vcombine.high %v2514_v42, %v2518_v29  ;;  %v11149_v31 = vcombine.low %v2514_v42, %v2518_v29 }
 0x50f   :  { %5725 = vmatpush1.bf16.msra.mxu0 %v11113_v15  ;;  %13809 = vst [vmem:[#allocation402_spill] sm:$0xff] %v11146_v36  ;;  %v2527_v15 = vld [vmem:[#allocation8 + $0x9f8] sm:$0xff]  ;;  %13811 = vst [vmem:[#allocation404_spill] sm:$0xff] %v11153_v17 }
 0x510   :  { %5897 = vmatpush1.bf16.msra.mxu1 %v11117_v52  ;;  %5726 = vmatprep.subr.bf16.mxu0 %v11119_v49  ;;  %13808 = vst [vmem:[#allocation401_spill] sm:$0xff] %v11143_v3  ;;  %v2526_v49 = vld [vmem:[#allocation8 + $0x9f0] sm:$0xff]  ;;  %v2523_v52 = vld [vmem:[#allocation8 + $0x9d8] sm:$0xff]  ;;  %13810 = vst [vmem:[#allocation403_spill] sm:$0xff] %v11149_v31 }
 0x511   :  { %5898 = vmatprep.subr.bf16.mxu1 %v11122_v16  ;;  %v2522_v16 = vld [vmem:[#allocation8 + $0x9d0] sm:$0xff]  ;;  %v11158_v58 = vcombine.high %v2523_v52, %v2527_v15  ;;  %v11165_v11 = vcombine.low %v2523_v52, %v2527_v15 }
 0x512   :  { %v11155_v26 = vcombine.high %v2522_v16, %v2526_v49  ;;  %v11161_v42 = vcombine.low %v2522_v16, %v2526_v49 }
 0x513   :  { %5727 = vmatpush1.bf16.msra.mxu0 %v11125_v47  ;;  %13813 = vst [vmem:[#allocation406_spill] sm:$0xff] %v11158_v58  ;;  %v2535_v47 = vld [vmem:[#allocation8 + $0xa38] sm:$0xff]  ;;  %13815 = vst [vmem:[#allocation408_spill] sm:$0xff] %v11165_v11 }
 0x514   :  { %5899 = vmatpush1.bf16.msra.mxu1 %v11129_v13  ;;  %5728 = vmatprep.subr.bf16.mxu0 %v11131_v43  ;;  %13812 = vst [vmem:[#allocation405_spill] sm:$0xff] %v11155_v26  ;;  %v2534_v43 = vld [vmem:[#allocation8 + $0xa30] sm:$0xff]  ;;  %v2531_v13 = vld [vmem:[#allocation8 + $0xa18] sm:$0xff]  ;;  %13814 = vst [vmem:[#allocation407_spill] sm:$0xff] %v11161_v42 }
 0x515   :  { %5900 = vmatprep.subr.bf16.mxu1 %v11134_v63  ;;  %v2530_v63 = vld [vmem:[#allocation8 + $0xa10] sm:$0xff]  ;;  %v11170_v29 = vcombine.high %v2531_v13, %v2535_v47  ;;  %v11177_v15 = vcombine.low %v2531_v13, %v2535_v47 }
 0x516   :  { %v11167_v6 = vcombine.high %v2530_v63, %v2534_v43  ;;  %v11173_v49 = vcombine.low %v2530_v63, %v2534_v43 }
 0x517   :  { %5729 = vmatpush1.bf16.msra.mxu0 %v11137_v45  ;;  %13817 = vst [vmem:[#allocation410_spill] sm:$0xff] %v11170_v29  ;;  %v2543_v45 = vld [vmem:[#allocation8 + $0xa78] sm:$0xff]  ;;  %13819 = vst [vmem:[#allocation412_spill] sm:$0xff] %v11177_v15 }
 0x518   :  { %5901 = vmatpush1.bf16.msra.mxu1 %v11141_v62  ;;  %5730 = vmatprep.subr.bf16.mxu0 %v11143_v3  ;;  %13816 = vst [vmem:[#allocation409_spill] sm:$0xff] %v11167_v6  ;;  %v2542_v3 = vld [vmem:[#allocation8 + $0xa70] sm:$0xff]  ;;  %v2539_v62 = vld [vmem:[#allocation8 + $0xa58] sm:$0xff]  ;;  %13818 = vst [vmem:[#allocation411_spill] sm:$0xff] %v11173_v49 }
 0x519   :  { %5902 = vmatprep.subr.bf16.mxu1 %v11146_v36  ;;  %v2538_v36 = vld [vmem:[#allocation8 + $0xa50] sm:$0xff]  ;;  %v11182_v16 = vcombine.high %v2539_v62, %v2543_v45  ;;  %v11189_v47 = vcombine.low %v2539_v62, %v2543_v45 }
 0x51a   :  { %v11179_v52 = vcombine.high %v2538_v36, %v2542_v3  ;;  %v11185_v43 = vcombine.low %v2538_v36, %v2542_v3 }
 0x51b   :  { %5731 = vmatpush1.bf16.msra.mxu0 %v11149_v31  ;;  %13821 = vst [vmem:[#allocation414_spill] sm:$0xff] %v11182_v16  ;;  %v2551_v31 = vld [vmem:[#allocation8 + $0xab8] sm:$0xff]  ;;  %13823 = vst [vmem:[#allocation416_spill] sm:$0xff] %v11189_v47 }
 0x51c   :  { %5903 = vmatpush1.bf16.msra.mxu1 %v11153_v17  ;;  %5732 = vmatprep.subr.bf16.mxu0 %v11155_v26  ;;  %13820 = vst [vmem:[#allocation413_spill] sm:$0xff] %v11179_v52  ;;  %v2550_v26 = vld [vmem:[#allocation8 + $0xab0] sm:$0xff]  ;;  %v2547_v17 = vld [vmem:[#allocation8 + $0xa98] sm:$0xff]  ;;  %13822 = vst [vmem:[#allocation415_spill] sm:$0xff] %v11185_v43 }
 0x51d   :  { %5904 = vmatprep.subr.bf16.mxu1 %v11158_v58  ;;  %v2546_v58 = vld [vmem:[#allocation8 + $0xa90] sm:$0xff]  ;;  %v11194_v63 = vcombine.high %v2547_v17, %v2551_v31  ;;  %v11201_v45 = vcombine.low %v2547_v17, %v2551_v31 }
 0x51e   :  { %v11191_v13 = vcombine.high %v2546_v58, %v2550_v26  ;;  %v11197_v3 = vcombine.low %v2546_v58, %v2550_v26 }
 0x51f   :  { %5733 = vmatpush1.bf16.msra.mxu0 %v11161_v42  ;;  %13825 = vst [vmem:[#allocation418_spill] sm:$0xff] %v11194_v63  ;;  %v2559_v42 = vld [vmem:[#allocation8 + $0xaf8] sm:$0xff]  ;;  %13827 = vst [vmem:[#allocation420_spill] sm:$0xff] %v11201_v45 }
 0x520   :  { %5905 = vmatpush1.bf16.msra.mxu1 %v11165_v11  ;;  %5734 = vmatprep.subr.bf16.mxu0 %v11167_v6  ;;  %13824 = vst [vmem:[#allocation417_spill] sm:$0xff] %v11191_v13  ;;  %v2558_v6 = vld [vmem:[#allocation8 + $0xaf0] sm:$0xff]  ;;  %v2555_v11 = vld [vmem:[#allocation8 + $0xad8] sm:$0xff]  ;;  %13826 = vst [vmem:[#allocation419_spill] sm:$0xff] %v11197_v3 }
 0x521   :  { %5906 = vmatprep.subr.bf16.mxu1 %v11170_v29  ;;  %v2554_v29 = vld [vmem:[#allocation8 + $0xad0] sm:$0xff]  ;;  %v11206_v36 = vcombine.high %v2555_v11, %v2559_v42  ;;  %v11213_v31 = vcombine.low %v2555_v11, %v2559_v42 }
 0x522   :  { %v11203_v62 = vcombine.high %v2554_v29, %v2558_v6  ;;  %v11209_v26 = vcombine.low %v2554_v29, %v2558_v6 }
 0x523   :  { %5735 = vmatpush1.bf16.msra.mxu0 %v11173_v49  ;;  %13829 = vst [vmem:[#allocation422_spill] sm:$0xff] %v11206_v36  ;;  %v2567_v49 = vld [vmem:[#allocation8 + $0xb38] sm:$0xff]  ;;  %13831 = vst [vmem:[#allocation424_spill] sm:$0xff] %v11213_v31 }
 0x524   :  { %5907 = vmatpush1.bf16.msra.mxu1 %v11177_v15  ;;  %5736 = vmatprep.subr.bf16.mxu0 %v11179_v52  ;;  %13828 = vst [vmem:[#allocation421_spill] sm:$0xff] %v11203_v62  ;;  %v2566_v52 = vld [vmem:[#allocation8 + $0xb30] sm:$0xff]  ;;  %v2563_v15 = vld [vmem:[#allocation8 + $0xb18] sm:$0xff]  ;;  %13830 = vst [vmem:[#allocation423_spill] sm:$0xff] %v11209_v26 }
 0x525   :  { %5908 = vmatprep.subr.bf16.mxu1 %v11182_v16  ;;  %v2562_v16 = vld [vmem:[#allocation8 + $0xb10] sm:$0xff]  ;;  %v11218_v58 = vcombine.high %v2563_v15, %v2567_v49  ;;  %v11225_v42 = vcombine.low %v2563_v15, %v2567_v49 }
 0x526   :  { %v11215_v17 = vcombine.high %v2562_v16, %v2566_v52  ;;  %v11221_v6 = vcombine.low %v2562_v16, %v2566_v52 }
 0x527   :  { %5737 = vmatpush1.bf16.msra.mxu0 %v11185_v43  ;;  %13833 = vst [vmem:[#allocation426_spill] sm:$0xff] %v11218_v58  ;;  %v2575_v43 = vld [vmem:[#allocation8 + $0xb78] sm:$0xff]  ;;  %13835 = vst [vmem:[#allocation428_spill] sm:$0xff] %v11225_v42 }
 0x528   :  { %5909 = vmatpush1.bf16.msra.mxu1 %v11189_v47  ;;  %5738 = vmatprep.subr.bf16.mxu0 %v11191_v13  ;;  %13832 = vst [vmem:[#allocation425_spill] sm:$0xff] %v11215_v17  ;;  %v2574_v13 = vld [vmem:[#allocation8 + $0xb70] sm:$0xff]  ;;  %v2571_v47 = vld [vmem:[#allocation8 + $0xb58] sm:$0xff]  ;;  %13834 = vst [vmem:[#allocation427_spill] sm:$0xff] %v11221_v6 }
 0x529   :  { %5910 = vmatprep.subr.bf16.mxu1 %v11194_v63  ;;  %v2570_v63 = vld [vmem:[#allocation8 + $0xb50] sm:$0xff]  ;;  %v11230_v29 = vcombine.high %v2571_v47, %v2575_v43  ;;  %v11237_v49 = vcombine.low %v2571_v47, %v2575_v43 }
 0x52a   :  { %v11227_v11 = vcombine.high %v2570_v63, %v2574_v13  ;;  %v11233_v52 = vcombine.low %v2570_v63, %v2574_v13 }
 0x52b   :  { %5739 = vmatpush1.bf16.msra.mxu0 %v11197_v3  ;;  %13837 = vst [vmem:[#allocation430_spill] sm:$0xff] %v11230_v29  ;;  %v2583_v3 = vld [vmem:[#allocation8 + $0xbb8] sm:$0xff]  ;;  %13839 = vst [vmem:[#allocation432_spill] sm:$0xff] %v11237_v49 }
 0x52c   :  { %5911 = vmatpush1.bf16.msra.mxu1 %v11201_v45  ;;  %5740 = vmatprep.subr.bf16.mxu0 %v11203_v62  ;;  %13836 = vst [vmem:[#allocation429_spill] sm:$0xff] %v11227_v11  ;;  %v2582_v62 = vld [vmem:[#allocation8 + $0xbb0] sm:$0xff]  ;;  %v2579_v45 = vld [vmem:[#allocation8 + $0xb98] sm:$0xff]  ;;  %13838 = vst [vmem:[#allocation431_spill] sm:$0xff] %v11233_v52 }
 0x52d   :  { %5912 = vmatprep.subr.bf16.mxu1 %v11206_v36  ;;  %v2578_v36 = vld [vmem:[#allocation8 + $0xb90] sm:$0xff]  ;;  %v11242_v16 = vcombine.high %v2579_v45, %v2583_v3  ;;  %v11249_v43 = vcombine.low %v2579_v45, %v2583_v3 }
 0x52e   :  { %v11239_v15 = vcombine.high %v2578_v36, %v2582_v62  ;;  %v11245_v13 = vcombine.low %v2578_v36, %v2582_v62 }
 0x52f   :  { %5741 = vmatpush1.bf16.msra.mxu0 %v11209_v26  ;;  %13841 = vst [vmem:[#allocation434_spill] sm:$0xff] %v11242_v16  ;;  %v2591_v26 = vld [vmem:[#allocation8 + $0xbf8] sm:$0xff]  ;;  %13843 = vst [vmem:[#allocation436_spill] sm:$0xff] %v11249_v43 }
 0x530   :  { %5913 = vmatpush1.bf16.msra.mxu1 %v11213_v31  ;;  %5742 = vmatprep.subr.bf16.mxu0 %v11215_v17  ;;  %13840 = vst [vmem:[#allocation433_spill] sm:$0xff] %v11239_v15  ;;  %v2590_v17 = vld [vmem:[#allocation8 + $0xbf0] sm:$0xff]  ;;  %v2587_v31 = vld [vmem:[#allocation8 + $0xbd8] sm:$0xff]  ;;  %13842 = vst [vmem:[#allocation435_spill] sm:$0xff] %v11245_v13 }
 0x531   :  { %5914 = vmatprep.subr.bf16.mxu1 %v11218_v58  ;;  %v2586_v58 = vld [vmem:[#allocation8 + $0xbd0] sm:$0xff]  ;;  %v11254_v63 = vcombine.high %v2587_v31, %v2591_v26  ;;  %v11261_v3 = vcombine.low %v2587_v31, %v2591_v26 }
 0x532   :  { %v11251_v47 = vcombine.high %v2586_v58, %v2590_v17  ;;  %v11257_v62 = vcombine.low %v2586_v58, %v2590_v17  ;;  %v2603_v17 = vld [vmem:[#allocation8 + $0xc58] sm:$0xff] }
 0x533   :  { %5743 = vmatpush1.bf16.msra.mxu0 %v11221_v6  ;;  %13845 = vst [vmem:[#allocation438_spill] sm:$0xff] %v11254_v63  ;;  %v2599_v6 = vld [vmem:[#allocation8 + $0xc38] sm:$0xff]  ;;  %13847 = vst [vmem:[#allocation440_spill] sm:$0xff] %v11261_v3 }
 0x534   :  { %5915 = vmatpush1.bf16.msra.mxu1 %v11225_v42  ;;  %5744 = vmatprep.subr.bf16.mxu0 %v11227_v11  ;;  %13844 = vst [vmem:[#allocation437_spill] sm:$0xff] %v11251_v47  ;;  %v2598_v11 = vld [vmem:[#allocation8 + $0xc30] sm:$0xff]  ;;  %v2595_v42 = vld [vmem:[#allocation8 + $0xc18] sm:$0xff]  ;;  %13846 = vst [vmem:[#allocation439_spill] sm:$0xff] %v11257_v62 }
 0x535   :  { %5916 = vmatprep.subr.bf16.mxu1 %v11230_v29  ;;  %v2594_v29 = vld [vmem:[#allocation8 + $0xc10] sm:$0xff]  ;;  %v11266_v36 = vcombine.high %v2595_v42, %v2599_v6  ;;  %v2607_v58 = vld [vmem:[#allocation8 + $0xc78] sm:$0xff]  ;;  %v11273_v26 = vcombine.low %v2595_v42, %v2599_v6 }
 0x536   :  { %v11263_v45 = vcombine.high %v2594_v29, %v2598_v11  ;;  %v11287_v6 = vcombine.low %v2603_v17, %v2607_v58 }
 0x537   :  { %5745 = vmatpush1.bf16.msra.mxu0 %v11233_v52  ;;  %13849 = vst [vmem:[#allocation442_spill] sm:$0xff] %v11266_v36  ;;  %13851 = vst [vmem:[#allocation444_spill] sm:$0xff] %v11273_v26  ;;  %v2631_v52 = vld [vmem:[#allocation8 + $0xd38] sm:$0xff] }
 0x538   :  { %5917 = vmatpush1.bf16.msra.mxu1 %v11237_v49  ;;  %5746 = vmatprep.subr.bf16.mxu0 %v11239_v15  ;;  %13848 = vst [vmem:[#allocation441_spill] sm:$0xff] %v11263_v45  ;;  %v2606_v15 = vld [vmem:[#allocation8 + $0xc70] sm:$0xff]  ;;  %v11269_v49 = vcombine.low %v2594_v29, %v2598_v11  ;;  %v2611_v11 = vld [vmem:[#allocation8 + $0xc98] sm:$0xff]  ;;  %13855 = vst [vmem:[#allocation448_spill] sm:$0xff] %v11287_v6 }
 0x539   :  { %5918 = vmatprep.subr.bf16.mxu1 %v11242_v16  ;;  %v2602_v16 = vld [vmem:[#allocation8 + $0xc50] sm:$0xff]  ;;  %v2615_v29 = vld [vmem:[#allocation8 + $0xcb8] sm:$0xff] }
 0x53a   :  { %13850 = vst [vmem:[#allocation443_spill] sm:$0xff] %v11269_v49  ;;  %v11276_v31 = vcombine.high %v2602_v16, %v2606_v15 }
 0x53b   :  { %5747 = vmatpush1.bf16.msra.mxu0 %v11245_v13  ;;  %v2627_v13 = vld [vmem:[#allocation8 + $0xd18] sm:$0xff] }
 0x53c   :  { %5919 = vmatpush1.bf16.msra.mxu1 %v11249_v43  ;;  %5748 = vmatprep.subr.bf16.mxu0 %v11251_v47  ;;  %13852 = vst [vmem:[#allocation445_spill] sm:$0xff] %v11276_v31  ;;  %v2614_v47 = vld [vmem:[#allocation8 + $0xcb0] sm:$0xff]  ;;  %v11279_v43 = vcombine.high %v2603_v17, %v2607_v58  ;;  %v11301_v17 = vcombine.low %v2611_v11, %v2615_v29 }
 0x53d   :  { %5920 = vmatprep.subr.bf16.mxu1 %v11254_v63  ;;  %v2610_v63 = vld [vmem:[#allocation8 + $0xc90] sm:$0xff] }
 0x53e   :  { %13853 = vst [vmem:[#allocation446_spill] sm:$0xff] %v11279_v43  ;;  %v11289_v42 = vcombine.high %v2610_v63, %v2614_v47  ;;  %13859 = vst [vmem:[#allocation452_spill] sm:$0xff] %v11301_v17 }
 0x53f   :  { %5749 = vmatpush1.bf16.msra.mxu0 %v11257_v62  ;;  %v2622_v62 = vld [vmem:[#allocation8 + $0xcf0] sm:$0xff] }
 0x540   :  { %5921 = vmatpush1.bf16.msra.mxu1 %v11261_v3  ;;  %5761 = vmatprep.subr.bf16.mxu0 %v11263_v45  ;;  %v11283_v3 = vcombine.low %v2602_v16, %v2606_v15  ;;  %13856 = vst [vmem:[#allocation449_spill] sm:$0xff] %v11289_v42  ;;  %v2618_v45 = vld [vmem:[#allocation8 + $0xcd0] sm:$0xff]  ;;  %v2619_v15 = vld [vmem:[#allocation8 + $0xcd8] sm:$0xff] }
 0x541   :  { %5933 = vmatprep.subr.bf16.mxu1 %v11266_v36  ;;  %v11293_v36 = vcombine.high %v2611_v11, %v2615_v29  ;;  %v2623_v16 = vld [vmem:[#allocation8 + $0xcf8] sm:$0xff]  ;;  %v11303_v58 = vcombine.high %v2618_v45, %v2622_v62  ;;  %v11318_v29 = vcombine.high %v2627_v13, %v2631_v52 }
 0x542   :  { %5751 = vmatmul.mubr.bf16.vlgmr.msra.gmra.mrb[52].mxu0 %v13602_v20  ;;  %13854 = vst [vmem:[#allocation447_spill] sm:$0xff] %v11283_v3 }
 0x543   :  { %5923 = vmatmul.mubr.bf16.vlgmr.msra.gmra.mrb[52].mxu1 %v13602_v20  ;;  %5762 = vmatpush1.bf16.msra.mxu0 %v11269_v49  ;;  %13857 = vst [vmem:[#allocation450_spill] sm:$0xff] %v11293_v36  ;;  %v11297_v49 = vcombine.low %v2610_v63, %v2614_v47  ;;  %13860 = vst [vmem:[#allocation453_spill] sm:$0xff] %v11303_v58  ;;  %v11309_v47 = vcombine.low %v2618_v45, %v2622_v62 }
 0x544   :  { %5793 = vmatprep.mubr.bf16.mxu0 %v9778_v60  ;;  %5934 = vmatpush1.bf16.msra.mxu1 %v11273_v26  ;;  %v2626_v26 = vld [vmem:[#allocation8 + $0xd10] sm:$0xff]  ;;  %v11313_v63 = vcombine.low %v2619_v15, %v2623_v16  ;;  %13865 = vst [vmem:[#allocation458_spill] sm:$0xff] %v11318_v29  ;;  %v11325_v45 = vcombine.low %v2627_v13, %v2631_v52 }
 0x545   :  { %5965 = vmatprep.mubr.bf16.mxu1 %v9778_v60  ;;  %5763 = vmatprep.subr.bf16.mxu0 %v11276_v31  ;;  %13858 = vst [vmem:[#allocation451_spill] sm:$0xff] %v11297_v49  ;;  %v11306_v31 = vcombine.high %v2619_v15, %v2623_v16  ;;  %13862 = vst [vmem:[#allocation455_spill] sm:$0xff] %v11309_v47 }
 0x546   :  { %5935 = vmatprep.subr.bf16.mxu1 %v11279_v43  ;;  %v2630_v43 = vld [vmem:[#allocation8 + $0xd30] sm:$0xff]  ;;  %13863 = vst [vmem:[#allocation456_spill] sm:$0xff] %v11313_v63  ;;  %13867 = vst [vmem:[#allocation460_spill] sm:$0xff] %v11325_v45 }
 0x547   :  { %5764 = vmatpush1.bf16.msra.mxu0 %v11283_v3  ;;  %13861 = vst [vmem:[#allocation454_spill] sm:$0xff] %v11306_v31  ;;  %v11315_v11 = vcombine.high %v2626_v26, %v2630_v43  ;;  %v2639_v3 = vld [vmem:[#allocation8 + $0xd78] sm:$0xff]  ;;  %v11321_v62 = vcombine.low %v2626_v26, %v2630_v43 }
 0x548   :  { %5936 = vmatpush1.bf16.msra.mxu1 %v11287_v6  ;;  %5765 = vmatprep.subr.bf16.mxu0 %v11289_v42  ;;  %v2638_v42 = vld [vmem:[#allocation8 + $0xd70] sm:$0xff]  ;;  %v2635_v6 = vld [vmem:[#allocation8 + $0xd58] sm:$0xff] }
 0x549   :  { %5937 = vmatprep.subr.bf16.mxu1 %v11293_v36  ;;  %13864 = vst [vmem:[#allocation457_spill] sm:$0xff] %v11315_v11  ;;  %v2634_v36 = vld [vmem:[#allocation8 + $0xd50] sm:$0xff]  ;;  %13866 = vst [vmem:[#allocation459_spill] sm:$0xff] %v11321_v62  ;;  %v11330_v16 = vcombine.high %v2635_v6, %v2639_v3  ;;  %v11337_v52 = vcombine.low %v2635_v6, %v2639_v3 }
 0x54a   :  { %v11327_v15 = vcombine.high %v2634_v36, %v2638_v42  ;;  %v11333_v43 = vcombine.low %v2634_v36, %v2638_v42  ;;  %v2651_v42 = vld [vmem:[#allocation8 + $0xdd8] sm:$0xff] }
 0x54b   :  { %5766 = vmatpush1.bf16.msra.mxu0 %v11297_v49  ;;  %13869 = vst [vmem:[#allocation462_spill] sm:$0xff] %v11330_v16  ;;  %v2647_v49 = vld [vmem:[#allocation8 + $0xdb8] sm:$0xff]  ;;  %13871 = vst [vmem:[#allocation464_spill] sm:$0xff] %v11337_v52 }
 0x54c   :  { %5938 = vmatpush1.bf16.msra.mxu1 %v11301_v17  ;;  %5767 = vmatprep.subr.bf16.mxu0 %v11303_v58  ;;  %13868 = vst [vmem:[#allocation461_spill] sm:$0xff] %v11327_v15  ;;  %v2646_v58 = vld [vmem:[#allocation8 + $0xdb0] sm:$0xff]  ;;  %v2643_v17 = vld [vmem:[#allocation8 + $0xd98] sm:$0xff]  ;;  %13870 = vst [vmem:[#allocation463_spill] sm:$0xff] %v11333_v43 }
 0x54d   :  { %5939 = vmatprep.subr.bf16.mxu1 %v11306_v31  ;;  %v2642_v31 = vld [vmem:[#allocation8 + $0xd90] sm:$0xff]  ;;  %v11367_v3 = vcombine.low %v2643_v17, %v2647_v49 }
 0x54e   :  { %v11339_v13 = vcombine.high %v2642_v31, %v2646_v58 }
 0x54f   :  { %5768 = vmatpush1.bf16.msra.mxu0 %v11309_v47  ;;  %13875 = vst [vmem:[#allocation468_spill] sm:$0xff] %v11367_v3 }
 0x550   :  { %5940 = vmatpush1.bf16.msra.mxu1 %v11313_v63  ;;  %5769 = vmatprep.subr.bf16.mxu0 %v11315_v11  ;;  %13872 = vst [vmem:[#allocation465_spill] sm:$0xff] %v11339_v13  ;;  %v2650_v11 = vld [vmem:[#allocation8 + $0xdd0] sm:$0xff] }
 0x551   :  { %5941 = vmatprep.subr.bf16.mxu1 %v11318_v29  ;;  %v11344_v29 = vcombine.high %v2643_v17, %v2647_v49  ;;  %v2654_v63 = vld [vmem:[#allocation8 + $0xdf0] sm:$0xff] }
 0x552   :  { %v11369_v10 = vcombine.high %v2650_v11, %v2654_v63  ;;  %v11381_v49 = vcombine.low %v2650_v11, %v2654_v63 }
 0x553   :  { %5770 = vmatpush1.bf16.msra.mxu0 %v11321_v62  ;;  %13873 = vst [vmem:[#allocation466_spill] sm:$0xff] %v11344_v29  ;;  %v2658_v62 = vld [vmem:[#allocation8 + $0xe10] sm:$0xff] }
 0x554   :  { %5942 = vmatpush1.bf16.msra.mxu1 %v11325_v45  ;;  %5771 = vmatprep.subr.bf16.mxu0 %v11327_v15  ;;  %v2655_v45 = vld [vmem:[#allocation8 + $0xdf8] sm:$0xff]  ;;  %13876 = vst [vmem:[#allocation469_spill] sm:$0xff] %v11369_v10  ;;  %13878 = vst [vmem:[#allocation471_spill] sm:$0xff] %v11381_v49  ;;  %v11393_v63 = vcombine.low %v2658_v62, %v2662_v4 }
 0x555   :  { %v11341_v26 = vpop.f32.mrb[48].mxu0  ;;  %5943 = vmatprep.subr.bf16.mxu1 %v11330_v16  ;;  %v11357_v16 = vcombine.low %v2642_v31, %v2646_v58  ;;  %v11376_v58 = vcombine.high %v2651_v42, %v2655_v45  ;;  %v11385_v17 = vcombine.low %v2651_v42, %v2655_v45  ;;  %v11402_v42 = vcombine.high %v2667_v12, %v2671_v40 }
 0x556   :  { %v11346_v47 = vpop.f32.mrb[48].mxu1  ;;  %v11348_v36 = vpop.f32.mrb[49].mxu0  ;;  %13882 = vst [vmem:[#allocation475_spill] sm:$0xff] %v11393_v63 }
 0x557   :  { %v11352_v6 = vpop.f32.mrb[49].mxu1  ;;  %v11354_v15 = vpop.f32.mrb[50].mxu0  ;;  %5772 = vmatpush1.bf16.msra.mxu0 %v11333_v43  ;;  %13874 = vst [vmem:[#allocation467_spill] sm:$0xff] %v11357_v16  ;;  %13877 = vst [vmem:[#allocation470_spill] sm:$0xff] %v11376_v58  ;;  %v11387_v43 = vcombine.high %v2658_v62, %v2662_v4 }
 0x558   :  { %v11361_v35 = vpop.f32.mrb[50].mxu1  ;;  %5944 = vmatpush1.bf16.msra.mxu1 %v11337_v52  ;;  %v11364_v37 = vpop.f32.mrb[51].mxu0  ;;  %5773 = vmatprep.subr.bf16.mxu0 %v11339_v13  ;;  %v2663_v13 = vld [vmem:[#allocation8 + $0xe38] sm:$0xff]  ;;  %13879 = vst [vmem:[#allocation472_spill] sm:$0xff] %v11385_v17  ;;  %v2670_v52 = vld [vmem:[#allocation8 + $0xe70] sm:$0xff]  ;;  %13885 = vst [vmem:[#allocation478_spill] sm:$0xff] %v11402_v42 }
 0x559   :  { %v11373_v31 = vpop.f32.mrb[51].mxu1  ;;  %5945 = vmatprep.subr.bf16.mxu1 %v11344_v29  ;;  %13880 = vst [vmem:[#allocation473_spill] sm:$0xff] %v11387_v43  ;;  %v11390_v29 = vcombine.high %v2659_v1, %v2663_v13  ;;  %v11397_v11 = vcombine.low %v2659_v1, %v2663_v13  ;;  %v11399_v45 = vcombine.high %v2666_v33, %v2670_v52 }
 0x55a   :  { %v11405_v4 = vcombine.low %v2666_v33, %v2670_v52  ;;  %v11409_v1 = vcombine.low %v2667_v12, %v2671_v40 }
 0x55b   :  { %5774 = vmatpush1.bf16.msra.mxu0 %v11357_v16  ;;  %13881 = vst [vmem:[#allocation474_spill] sm:$0xff] %v11390_v29  ;;  %13883 = vst [vmem:[#allocation476_spill] sm:$0xff] %v11397_v11  ;;  %v2679_v16 = vld [vmem:[#allocation8 + $0xeb8] sm:$0xff] }
 0x55c   :  { %5946 = vmatpush1.bf16.msra.mxu1 %v11367_v3  ;;  %5775 = vmatprep.subr.bf16.mxu0 %v11369_v10  ;;  %13884 = vst [vmem:[#allocation477_spill] sm:$0xff] %v11399_v45  ;;  %v2678_v10 = vld [vmem:[#allocation8 + $0xeb0] sm:$0xff]  ;;  %v2675_v3 = vld [vmem:[#allocation8 + $0xe98] sm:$0xff]  ;;  %13886 = vst [vmem:[#allocation479_spill] sm:$0xff] %v11405_v4 }
 0x55d   :  { %5947 = vmatprep.subr.bf16.mxu1 %v11376_v58  ;;  %v2674_v58 = vld [vmem:[#allocation8 + $0xe90] sm:$0xff]  ;;  %13887 = vst [vmem:[#allocation480_spill] sm:$0xff] %v11409_v1  ;;  %v11414_v13 = vcombine.high %v2675_v3, %v2679_v16  ;;  %v11421_v40 = vcombine.low %v2675_v3, %v2679_v16 }
 0x55e   :  { %v11411_v62 = vcombine.high %v2674_v58, %v2678_v10  ;;  %v11417_v33 = vcombine.low %v2674_v58, %v2678_v10 }
 0x55f   :  { %5776 = vmatpush1.bf16.msra.mxu0 %v11381_v49  ;;  %13889 = vst [vmem:[#allocation482_spill] sm:$0xff] %v11414_v13  ;;  %v2687_v49 = vld [vmem:[#allocation8 + $0xef8] sm:$0xff]  ;;  %13891 = vst [vmem:[#allocation484_spill] sm:$0xff] %v11421_v40 }
 0x560   :  { %5948 = vmatpush1.bf16.msra.mxu1 %v11385_v17  ;;  %5777 = vmatprep.subr.bf16.mxu0 %v11387_v43  ;;  %13888 = vst [vmem:[#allocation481_spill] sm:$0xff] %v11411_v62  ;;  %v2686_v43 = vld [vmem:[#allocation8 + $0xef0] sm:$0xff]  ;;  %v2683_v17 = vld [vmem:[#allocation8 + $0xed8] sm:$0xff]  ;;  %13890 = vst [vmem:[#allocation483_spill] sm:$0xff] %v11417_v33 }
 0x561   :  { %5949 = vmatprep.subr.bf16.mxu1 %v11390_v29  ;;  %v2682_v29 = vld [vmem:[#allocation8 + $0xed0] sm:$0xff]  ;;  %v11426_v52 = vcombine.high %v2683_v17, %v2687_v49  ;;  %v11433_v16 = vcombine.low %v2683_v17, %v2687_v49 }
 0x562   :  { %v11423_v12 = vcombine.high %v2682_v29, %v2686_v43  ;;  %v11429_v10 = vcombine.low %v2682_v29, %v2686_v43 }
 0x563   :  { %5778 = vmatpush1.bf16.msra.mxu0 %v11393_v63  ;;  %13893 = vst [vmem:[#allocation486_spill] sm:$0xff] %v11426_v52  ;;  %v2695_v63 = vld [vmem:[#allocation8 + $0xf38] sm:$0xff]  ;;  %13895 = vst [vmem:[#allocation488_spill] sm:$0xff] %v11433_v16 }
 0x564   :  { %5950 = vmatpush1.bf16.msra.mxu1 %v11397_v11  ;;  %5779 = vmatprep.subr.bf16.mxu0 %v11399_v45  ;;  %13892 = vst [vmem:[#allocation485_spill] sm:$0xff] %v11423_v12  ;;  %v2694_v45 = vld [vmem:[#allocation8 + $0xf30] sm:$0xff]  ;;  %v2691_v11 = vld [vmem:[#allocation8 + $0xf18] sm:$0xff]  ;;  %13894 = vst [vmem:[#allocation487_spill] sm:$0xff] %v11429_v10 }
 0x565   :  { %5951 = vmatprep.subr.bf16.mxu1 %v11402_v42  ;;  %v2690_v42 = vld [vmem:[#allocation8 + $0xf10] sm:$0xff]  ;;  %v11438_v58 = vcombine.high %v2691_v11, %v2695_v63  ;;  %v11445_v43 = vcombine.low %v2691_v11, %v2695_v63 }
 0x566   :  { %v11435_v3 = vcombine.high %v2690_v42, %v2694_v45  ;;  %v11441_v29 = vcombine.low %v2690_v42, %v2694_v45 }
 0x567   :  { %5780 = vmatpush1.bf16.msra.mxu0 %v11405_v4  ;;  %13897 = vst [vmem:[#allocation490_spill] sm:$0xff] %v11438_v58  ;;  %v2703_v4 = vld [vmem:[#allocation8 + $0xf78] sm:$0xff] }
 0x568   :  { %5952 = vmatpush1.bf16.msra.mxu1 %v11409_v1  ;;  %5781 = vmatprep.subr.bf16.mxu0 %v11411_v62  ;;  %13896 = vst [vmem:[#allocation489_spill] sm:$0xff] %v11435_v3  ;;  %v2702_v62 = vld [vmem:[#allocation8 + $0xf70] sm:$0xff]  ;;  %v2699_v1 = vld [vmem:[#allocation8 + $0xf58] sm:$0xff] }
 0x569   :  { %5953 = vmatprep.subr.bf16.mxu1 %v11414_v13  ;;  %v2698_v13 = vld [vmem:[#allocation8 + $0xf50] sm:$0xff]  ;;  %v11450_v17 = vcombine.high %v2699_v1, %v2703_v4  ;;  %v11457_v63 = vcombine.low %v2699_v1, %v2703_v4 }
 0x56a   :  { %v11447_v49 = vcombine.high %v2698_v13, %v2702_v62  ;;  %v11453_v45 = vcombine.low %v2698_v13, %v2702_v62 }
 0x56b   :  { %5782 = vmatpush1.bf16.msra.mxu0 %v11417_v33  ;;  %13898 = vst [vmem:[#allocation491_spill] sm:$0xff] %v11450_v17  ;;  %v2711_v33 = vld [vmem:[#allocation8 + $0xfb8] sm:$0xff] }
 0x56c   :  { %5954 = vmatpush1.bf16.msra.mxu1 %v11421_v40  ;;  %5783 = vmatprep.subr.bf16.mxu0 %v11423_v12  ;;  %v2710_v12 = vld [vmem:[#allocation8 + $0xfb0] sm:$0xff]  ;;  %v2707_v40 = vld [vmem:[#allocation8 + $0xf98] sm:$0xff] }
 0x56d   :  { %5955 = vmatprep.subr.bf16.mxu1 %v11426_v52  ;;  %v2706_v52 = vld [vmem:[#allocation8 + $0xf90] sm:$0xff]  ;;  %v11462_v42 = vcombine.high %v2707_v40, %v2711_v33  ;;  %v11469_v4 = vcombine.low %v2707_v40, %v2711_v33  ;;  %v13920_v40 = vld [vmem:[#allocation22_spill] sm:$0xff] }
 0x56e   :  { %v11459_v11 = vcombine.high %v2706_v52, %v2710_v12  ;;  %v11465_v62 = vcombine.low %v2706_v52, %v2710_v12  ;;  %v13919_v33 = vld [vmem:[#allocation20_spill] sm:$0xff]  ;;  %v13921_v52 = vld [vmem:[#allocation23_spill] sm:$0xff] }
 0x56f   :  { %5784 = vmatpush1.bf16.msra.mxu0 %v11429_v10  ;;  %v2719_v10 = vld [vmem:[#allocation8 + $0xff8] sm:$0xff] }
 0x570   :  { %5956 = vmatpush1.bf16.msra.mxu1 %v11433_v16  ;;  %5785 = vmatprep.subr.bf16.mxu0 %v11435_v3  ;;  %v2718_v3 = vld [vmem:[#allocation8 + $0xff0] sm:$0xff]  ;;  %v2715_v16 = vld [vmem:[#allocation8 + $0xfd8] sm:$0xff] }
 0x571   :  { %5957 = vmatprep.subr.bf16.mxu1 %v11438_v58  ;;  %v2714_v58 = vld [vmem:[#allocation8 + $0xfd0] sm:$0xff]  ;;  %v11474_v13 = vcombine.high %v2715_v16, %v2719_v10  ;;  %v11481_v12 = vcombine.low %v2715_v16, %v2719_v10  ;;  %v13923_v16 = vld [vmem:[#allocation25_spill] sm:$0xff] }
 0x572   :  { %v11471_v1 = vcombine.high %v2714_v58, %v2718_v3  ;;  %v13922_v10 = vld [vmem:[#allocation24_spill] sm:$0xff] }
 0x573   :  { %5786 = vmatpush1.bf16.msra.mxu0 %v11441_v29 }
 0x574   :  { %5958 = vmatpush1.bf16.msra.mxu1 %v11445_v43  ;;  %5787 = vmatprep.subr.bf16.mxu0 %v11447_v49 }
 0x575   :  { %5959 = vmatprep.subr.bf16.mxu1 %v11450_v17  ;;  %v11477_v17 = vcombine.low %v2714_v58, %v2718_v3  ;;  %v13924_v3 = vld [vmem:[#allocation26_spill] sm:$0xff]  ;;  %v13925_v58 = vld [vmem:[#allocation27_spill] sm:$0xff] }
 0x577   :  { %5788 = vmatpush1.bf16.msra.mxu0 %v11453_v45 }
 0x578   :  { %5960 = vmatpush1.bf16.msra.mxu1 %v11457_v63  ;;  %5789 = vmatprep.subr.bf16.mxu0 %v11459_v11 }
 0x579   :  { %5961 = vmatprep.subr.bf16.mxu1 %v11462_v42 }
 0x57b   :  { %5790 = vmatpush1.bf16.msra.mxu0 %v11465_v62 }
 0x57c   :  { %5962 = vmatpush1.bf16.msra.mxu1 %v11469_v4  ;;  %5791 = vmatprep.subr.bf16.mxu0 %v11471_v1 }
 0x57d   :  { %5963 = vmatprep.subr.bf16.mxu1 %v11474_v13 }
 0x57f   :  { %5792 = vmatpush1.bf16.msra.mxu0 %v11477_v17 }
 0x580   :  { %5964 = vmatpush1.bf16.msra.mxu1 %v11481_v12  ;;  %6020 = vmatprep.subr.bf16.mxu0 %v9807_v0  ;;  %v13899_v0 = vld [vmem:[#allocation108_spill] sm:$0xff] }
 0x581   :  { %6192 = vmatprep.subr.bf16.mxu1 %v9810_v57  ;;  %v13900_v57 = vld [vmem:[#allocation109_spill] sm:$0xff] }
 0x582   :  { %5794 = vmatmul.mubr.bf16.vlgmr.msra.gmra.mrb[52].mxu0 %v9775_v34 }
 0x583   :  { %5966 = vmatmul.mubr.bf16.vlgmr.msra.gmra.mrb[52].mxu1 %v9775_v34  ;;  %6021 = vmatpush1.bf16.msra.mxu0 %v9813_v30  ;;  %v13901_v30 = vld [vmem:[#allocation110_spill] sm:$0xff] }
 0x584   :  { %6052 = vmatprep.mubr.bf16.mxu0 %v13539_v56  ;;  %6193 = vmatpush1.bf16.msra.mxu1 %v9817_v54  ;;  %v13902_v54 = vld [vmem:[#allocation111_spill] sm:$0xff] }
 0x585   :  { %6224 = vmatprep.mubr.bf16.mxu1 %v13539_v56  ;;  %6022 = vmatprep.subr.bf16.mxu0 %v9820_v2  ;;  %v13903_v2 = vld [vmem:[#allocation112_spill] sm:$0xff] }
 0x586   :  { %6194 = vmatprep.subr.bf16.mxu1 %v9823_v32  ;;  %v13904_v32 = vld [vmem:[#allocation113_spill] sm:$0xff] }
 0x587   :  { %6023 = vmatpush1.bf16.msra.mxu0 %v9827_v61  ;;  %v13905_v61 = vld [vmem:[#allocation114_spill] sm:$0xff] }
 0x588   :  { %6195 = vmatpush1.bf16.msra.mxu1 %v9831_v59  ;;  %6024 = vmatprep.subr.bf16.mxu0 %v9833_v22  ;;  %v13906_v59 = vld [vmem:[#allocation115_spill] sm:$0xff]  ;;  %v13907_v22 = vld [vmem:[#allocation116_spill] sm:$0xff] }
 0x589   :  { %6196 = vmatprep.subr.bf16.mxu1 %v9837_v55  ;;  %v13908_v55 = vld [vmem:[#allocation117_spill] sm:$0xff] }
 0x58b   :  { %6025 = vmatpush1.bf16.msra.mxu0 %v9841_v23  ;;  %v13909_v23 = vld [vmem:[#allocation118_spill] sm:$0xff] }
 0x58c   :  { %6197 = vmatpush1.bf16.msra.mxu1 %v9845_v24  ;;  %6026 = vmatprep.subr.bf16.mxu0 %v9847_v50  ;;  %v13910_v24 = vld [vmem:[#allocation119_spill] sm:$0xff]  ;;  %v13911_v50 = vld [vmem:[#allocation120_spill] sm:$0xff] }
 0x58d   :  { %6198 = vmatprep.subr.bf16.mxu1 %v9850_v44  ;;  %v13912_v44 = vld [vmem:[#allocation121_spill] sm:$0xff] }
 0x58f   :  { %6027 = vmatpush1.bf16.msra.mxu0 %v9853_v18  ;;  %v13913_v18 = vld [vmem:[#allocation125_spill] sm:$0xff] }
 0x590   :  { %6199 = vmatpush1.bf16.msra.mxu1 %v9857_v39  ;;  %6028 = vmatprep.subr.bf16.mxu0 %v9859_v21  ;;  %v13914_v39 = vld [vmem:[#allocation134_spill] sm:$0xff]  ;;  %v13915_v21 = vld [vmem:[#allocation127_spill] sm:$0xff] }
 0x591   :  { %6200 = vmatprep.subr.bf16.mxu1 %v9862_v5  ;;  %v13916_v5 = vld [vmem:[#allocation19_spill] sm:$0xff] }
 0x593   :  { %6029 = vmatpush1.bf16.msra.mxu0 %v9865_v8  ;;  %v13917_v8 = vld [vmem:[#allocation21_spill] sm:$0xff] }
 0x594   :  { %6201 = vmatpush1.bf16.msra.mxu1 %v9869_v9  ;;  %6030 = vmatprep.subr.bf16.mxu0 %v13899_v0  ;;  %v13918_v9 = vld [vmem:[#allocation130_spill] sm:$0xff]  ;;  %v13926_v0 = vld [vmem:[#allocation28_spill] sm:$0xff] }
 0x595   :  { %6202 = vmatprep.subr.bf16.mxu1 %v13900_v57  ;;  %v13927_v57 = vld [vmem:[#allocation29_spill] sm:$0xff] }
 0x597   :  { %6031 = vmatpush1.bf16.msra.mxu0 %v13901_v30  ;;  %v13928_v30 = vld [vmem:[#allocation30_spill] sm:$0xff] }
 0x598   :  { %6203 = vmatpush1.bf16.msra.mxu1 %v13902_v54  ;;  %6032 = vmatprep.subr.bf16.mxu0 %v13903_v2  ;;  %v13929_v54 = vld [vmem:[#allocation31_spill] sm:$0xff]  ;;  %v13930_v2 = vld [vmem:[#allocation32_spill] sm:$0xff] }
 0x599   :  { %6204 = vmatprep.subr.bf16.mxu1 %v13904_v32  ;;  %v13931_v32 = vld [vmem:[#allocation33_spill] sm:$0xff] }
 0x59b   :  { %6033 = vmatpush1.bf16.msra.mxu0 %v13905_v61  ;;  %v13932_v61 = vld [vmem:[#allocation34_spill] sm:$0xff] }
 0x59c   :  { %6205 = vmatpush1.bf16.msra.mxu1 %v13906_v59  ;;  %6034 = vmatprep.subr.bf16.mxu0 %v13907_v22  ;;  %v13933_v59 = vld [vmem:[#allocation35_spill] sm:$0xff]  ;;  %v13934_v22 = vld [vmem:[#allocation36_spill] sm:$0xff] }
 0x59d   :  { %6206 = vmatprep.subr.bf16.mxu1 %v13908_v55  ;;  %v13935_v55 = vld [vmem:[#allocation37_spill] sm:$0xff] }
 0x59f   :  { %6035 = vmatpush1.bf16.msra.mxu0 %v13909_v23  ;;  %v13936_v23 = vld [vmem:[#allocation38_spill] sm:$0xff] }
 0x5a0   :  { %6207 = vmatpush1.bf16.msra.mxu1 %v13910_v24  ;;  %6036 = vmatprep.subr.bf16.mxu0 %v13911_v50  ;;  %v13937_v24 = vld [vmem:[#allocation39_spill] sm:$0xff]  ;;  %v13938_v50 = vld [vmem:[#allocation40_spill] sm:$0xff] }
 0x5a1   :  { %6208 = vmatprep.subr.bf16.mxu1 %v13912_v44  ;;  %v13939_v44 = vld [vmem:[#allocation41_spill] sm:$0xff] }
 0x5a3   :  { %6037 = vmatpush1.bf16.msra.mxu0 %v13913_v18  ;;  %v13940_v18 = vld [vmem:[#allocation42_spill] sm:$0xff] }
 0x5a4   :  { %6209 = vmatpush1.bf16.msra.mxu1 %v13914_v39  ;;  %6038 = vmatprep.subr.bf16.mxu0 %v13915_v21  ;;  %v13941_v39 = vld [vmem:[#allocation43_spill] sm:$0xff]  ;;  %v13942_v21 = vld [vmem:[#allocation44_spill] sm:$0xff] }
 0x5a5   :  { %6210 = vmatprep.subr.bf16.mxu1 %v13916_v5  ;;  %v13943_v5 = vld [vmem:[#allocation45_spill] sm:$0xff] }
 0x5a7   :  { %6039 = vmatpush1.bf16.msra.mxu0 %v13917_v8  ;;  %v13944_v8 = vld [vmem:[#allocation46_spill] sm:$0xff] }
 0x5a8   :  { %6211 = vmatpush1.bf16.msra.mxu1 %v13918_v9  ;;  %6040 = vmatprep.subr.bf16.mxu0 %v13919_v33  ;;  %v13945_v9 = vld [vmem:[#allocation47_spill] sm:$0xff]  ;;  %v13946_v33 = vld [vmem:[#allocation48_spill] sm:$0xff] }
 0x5a9   :  { %6212 = vmatprep.subr.bf16.mxu1 %v13920_v40  ;;  %v13947_v40 = vld [vmem:[#allocation49_spill] sm:$0xff] }
 0x5ab   :  { %6041 = vmatpush1.bf16.msra.mxu0 %v13921_v52  ;;  %v13948_v52 = vld [vmem:[#allocation50_spill] sm:$0xff] }
 0x5ac   :  { %6213 = vmatpush1.bf16.msra.mxu1 %v13922_v10  ;;  %6042 = vmatprep.subr.bf16.mxu0 %v13923_v16  ;;  %v13949_v10 = vld [vmem:[#allocation51_spill] sm:$0xff]  ;;  %v13950_v16 = vld [vmem:[#allocation52_spill] sm:$0xff] }
 0x5ad   :  { %6214 = vmatprep.subr.bf16.mxu1 %v13924_v3  ;;  %v13951_v3 = vld [vmem:[#allocation53_spill] sm:$0xff] }
 0x5af   :  { %6043 = vmatpush1.bf16.msra.mxu0 %v13925_v58  ;;  %v13952_v58 = vld [vmem:[#allocation54_spill] sm:$0xff] }
 0x5b0   :  { %6215 = vmatpush1.bf16.msra.mxu1 %v13926_v0  ;;  %6044 = vmatprep.subr.bf16.mxu0 %v13927_v57  ;;  %v13953_v0 = vld [vmem:[#allocation55_spill] sm:$0xff]  ;;  %v13954_v57 = vld [vmem:[#allocation56_spill] sm:$0xff] }
 0x5b1   :  { %6216 = vmatprep.subr.bf16.mxu1 %v13928_v30  ;;  %v13955_v30 = vld [vmem:[#allocation57_spill] sm:$0xff] }
 0x5b3   :  { %6045 = vmatpush1.bf16.msra.mxu0 %v13929_v54  ;;  %v13956_v54 = vld [vmem:[#allocation58_spill] sm:$0xff] }
 0x5b4   :  { %6217 = vmatpush1.bf16.msra.mxu1 %v13930_v2  ;;  %6046 = vmatprep.subr.bf16.mxu0 %v13931_v32  ;;  %v13957_v2 = vld [vmem:[#allocation59_spill] sm:$0xff]  ;;  %v13958_v32 = vld [vmem:[#allocation60_spill] sm:$0xff] }
 0x5b5   :  { %6218 = vmatprep.subr.bf16.mxu1 %v13932_v61  ;;  %v13959_v61 = vld [vmem:[#allocation61_spill] sm:$0xff] }
 0x5b7   :  { %6047 = vmatpush1.bf16.msra.mxu0 %v13933_v59  ;;  %v13960_v59 = vld [vmem:[#allocation62_spill] sm:$0xff] }
 0x5b8   :  { %6219 = vmatpush1.bf16.msra.mxu1 %v13934_v22  ;;  %6048 = vmatprep.subr.bf16.mxu0 %v13935_v55  ;;  %v13961_v22 = vld [vmem:[#allocation63_spill] sm:$0xff]  ;;  %v13962_v55 = vld [vmem:[#allocation64_spill] sm:$0xff] }
 0x5b9   :  { %6220 = vmatprep.subr.bf16.mxu1 %v13936_v23  ;;  %v13963_v23 = vld [vmem:[#allocation65_spill] sm:$0xff] }
 0x5bb   :  { %6049 = vmatpush1.bf16.msra.mxu0 %v13937_v24  ;;  %v13964_v24 = vld [vmem:[#allocation66_spill] sm:$0xff] }
 0x5bc   :  { %6221 = vmatpush1.bf16.msra.mxu1 %v13938_v50  ;;  %6050 = vmatprep.subr.bf16.mxu0 %v13939_v44  ;;  %v13965_v50 = vld [vmem:[#allocation67_spill] sm:$0xff]  ;;  %v13966_v44 = vld [vmem:[#allocation68_spill] sm:$0xff] }
 0x5bd   :  { %6222 = vmatprep.subr.bf16.mxu1 %v13940_v18  ;;  %v13967_v18 = vld [vmem:[#allocation69_spill] sm:$0xff] }
 0x5bf   :  { %6051 = vmatpush1.bf16.msra.mxu0 %v13941_v39  ;;  %v13968_v39 = vld [vmem:[#allocation70_spill] sm:$0xff] }
 0x5c0   :  { %6223 = vmatpush1.bf16.msra.mxu1 %v13942_v21  ;;  %6063 = vmatprep.subr.bf16.mxu0 %v13943_v5  ;;  %v13969_v21 = vld [vmem:[#allocation71_spill] sm:$0xff]  ;;  %v13970_v5 = vld [vmem:[#allocation72_spill] sm:$0xff] }
 0x5c1   :  { %6235 = vmatprep.subr.bf16.mxu1 %v13944_v8  ;;  %v13971_v8 = vld [vmem:[#allocation73_spill] sm:$0xff] }
 0x5c2   :  { %6053 = vmatmul.mubr.bf16.vlgmr.msra.gmra.mrb[56].mxu0 %v13602_v20 }
 0x5c3   :  { %6225 = vmatmul.mubr.bf16.vlgmr.msra.gmra.mrb[56].mxu1 %v13602_v20  ;;  %6064 = vmatpush1.bf16.msra.mxu0 %v13945_v9  ;;  %v13972_v9 = vld [vmem:[#allocation74_spill] sm:$0xff] }
 0x5c4   :  { %6095 = vmatprep.mubr.bf16.mxu0 %v9778_v60  ;;  %6236 = vmatpush1.bf16.msra.mxu1 %v13946_v33  ;;  %v13973_v33 = vld [vmem:[#allocation75_spill] sm:$0xff] }
 0x5c5   :  { %6267 = vmatprep.mubr.bf16.mxu1 %v9778_v60  ;;  %6065 = vmatprep.subr.bf16.mxu0 %v13947_v40  ;;  %v13974_v40 = vld [vmem:[#allocation76_spill] sm:$0xff] }
 0x5c6   :  { %6237 = vmatprep.subr.bf16.mxu1 %v13948_v52  ;;  %v13975_v52 = vld [vmem:[#allocation77_spill] sm:$0xff] }
 0x5c7   :  { %6066 = vmatpush1.bf16.msra.mxu0 %v13949_v10  ;;  %v13976_v10 = vld [vmem:[#allocation78_spill] sm:$0xff] }
 0x5c8   :  { %6238 = vmatpush1.bf16.msra.mxu1 %v13950_v16  ;;  %6067 = vmatprep.subr.bf16.mxu0 %v13951_v3  ;;  %v13977_v16 = vld [vmem:[#allocation79_spill] sm:$0xff]  ;;  %v13978_v3 = vld [vmem:[#allocation80_spill] sm:$0xff] }
 0x5c9   :  { %6239 = vmatprep.subr.bf16.mxu1 %v13952_v58  ;;  %v13979_v58 = vld [vmem:[#allocation81_spill] sm:$0xff] }
 0x5cb   :  { %6068 = vmatpush1.bf16.msra.mxu0 %v13953_v0  ;;  %v13980_v0 = vld [vmem:[#allocation83_spill] sm:$0xff] }
 0x5cc   :  { %6240 = vmatpush1.bf16.msra.mxu1 %v13954_v57  ;;  %6069 = vmatprep.subr.bf16.mxu0 %v13955_v30  ;;  %v13981_v57 = vld [vmem:[#allocation85_spill] sm:$0xff]  ;;  %v13982_v30 = vld [vmem:[#allocation86_spill] sm:$0xff] }
 0x5cd   :  { %6241 = vmatprep.subr.bf16.mxu1 %v13956_v54  ;;  %v13983_v54 = vld [vmem:[#allocation87_spill] sm:$0xff] }
 0x5cf   :  { %6070 = vmatpush1.bf16.msra.mxu0 %v13957_v2  ;;  %v13984_v2 = vld [vmem:[#allocation88_spill] sm:$0xff] }
 0x5d0   :  { %6242 = vmatpush1.bf16.msra.mxu1 %v13958_v32  ;;  %6071 = vmatprep.subr.bf16.mxu0 %v13959_v61  ;;  %v13985_v32 = vld [vmem:[#allocation89_spill] sm:$0xff]  ;;  %v13986_v61 = vld [vmem:[#allocation90_spill] sm:$0xff] }
 0x5d1   :  { %6243 = vmatprep.subr.bf16.mxu1 %v13960_v59  ;;  %v13987_v59 = vld [vmem:[#allocation91_spill] sm:$0xff] }
 0x5d3   :  { %6072 = vmatpush1.bf16.msra.mxu0 %v13961_v22  ;;  %v13988_v22 = vld [vmem:[#allocation92_spill] sm:$0xff] }
 0x5d4   :  { %6244 = vmatpush1.bf16.msra.mxu1 %v13962_v55  ;;  %6073 = vmatprep.subr.bf16.mxu0 %v13963_v23  ;;  %v13989_v55 = vld [vmem:[#allocation93_spill] sm:$0xff]  ;;  %v13990_v23 = vld [vmem:[#allocation94_spill] sm:$0xff] }
 0x5d5   :  { %6245 = vmatprep.subr.bf16.mxu1 %v13964_v24  ;;  %v13991_v24 = vld [vmem:[#allocation95_spill] sm:$0xff] }
 0x5d7   :  { %6074 = vmatpush1.bf16.msra.mxu0 %v13965_v50  ;;  %v13992_v50 = vld [vmem:[#allocation96_spill] sm:$0xff] }
 0x5d8   :  { %6246 = vmatpush1.bf16.msra.mxu1 %v13966_v44  ;;  %6075 = vmatprep.subr.bf16.mxu0 %v13967_v18  ;;  %v13993_v44 = vld [vmem:[#allocation97_spill] sm:$0xff]  ;;  %v13994_v18 = vld [vmem:[#allocation98_spill] sm:$0xff] }
 0x5d9   :  { %6247 = vmatprep.subr.bf16.mxu1 %v13968_v39  ;;  %v13995_v39 = vld [vmem:[#allocation99_spill] sm:$0xff] }
 0x5db   :  { %6076 = vmatpush1.bf16.msra.mxu0 %v13969_v21  ;;  %v13996_v21 = vld [vmem:[#allocation100_spill] sm:$0xff] }
 0x5dc   :  { %6248 = vmatpush1.bf16.msra.mxu1 %v13970_v5  ;;  %6077 = vmatprep.subr.bf16.mxu0 %v13971_v8  ;;  %v13997_v5 = vld [vmem:[#allocation101_spill] sm:$0xff]  ;;  %v13998_v8 = vld [vmem:[#allocation102_spill] sm:$0xff] }
 0x5dd   :  { %6249 = vmatprep.subr.bf16.mxu1 %v13972_v9  ;;  %v13999_v9 = vld [vmem:[#allocation103_spill] sm:$0xff] }
 0x5df   :  { %6078 = vmatpush1.bf16.msra.mxu0 %v13973_v33  ;;  %v14000_v33 = vld [vmem:[#allocation104_spill] sm:$0xff] }
 0x5e0   :  { %6250 = vmatpush1.bf16.msra.mxu1 %v13974_v40  ;;  %6079 = vmatprep.subr.bf16.mxu0 %v13975_v52  ;;  %v14001_v40 = vld [vmem:[#allocation105_spill] sm:$0xff]  ;;  %v14002_v52 = vld [vmem:[#allocation106_spill] sm:$0xff] }
 0x5e1   :  { %6251 = vmatprep.subr.bf16.mxu1 %v13976_v10  ;;  %v14003_v10 = vld [vmem:[#allocation107_spill] sm:$0xff] }
 0x5e3   :  { %6080 = vmatpush1.bf16.msra.mxu0 %v13977_v16  ;;  %v14004_v16 = vld [vmem:[#allocation135_spill] sm:$0xff] }
 0x5e4   :  { %6252 = vmatpush1.bf16.msra.mxu1 %v13978_v3  ;;  %6081 = vmatprep.subr.bf16.mxu0 %v13979_v58  ;;  %v14005_v3 = vld [vmem:[#allocation136_spill] sm:$0xff]  ;;  %v14006_v58 = vld [vmem:[#allocation133_spill] sm:$0xff] }
 0x5e5   :  { %6253 = vmatprep.subr.bf16.mxu1 %v13980_v0  ;;  %v14007_v0 = vld [vmem:[#allocation126_spill] sm:$0xff] }
 0x5e7   :  { %6082 = vmatpush1.bf16.msra.mxu0 %v13981_v57  ;;  %v14008_v57 = vld [vmem:[#allocation124_spill] sm:$0xff] }
 0x5e8   :  { %6254 = vmatpush1.bf16.msra.mxu1 %v13982_v30  ;;  %6083 = vmatprep.subr.bf16.mxu0 %v13983_v54  ;;  %v14009_v30 = vld [vmem:[#allocation129_spill] sm:$0xff]  ;;  %v14010_v54 = vld [vmem:[#allocation84_spill] sm:$0xff] }
 0x5e9   :  { %6255 = vmatprep.subr.bf16.mxu1 %v13984_v2  ;;  %v14011_v2 = vld [vmem:[#allocation137_spill] sm:$0xff] }
 0x5eb   :  { %6084 = vmatpush1.bf16.msra.mxu0 %v13985_v32  ;;  %v14012_v32 = vld [vmem:[#allocation138_spill] sm:$0xff] }
 0x5ec   :  { %6256 = vmatpush1.bf16.msra.mxu1 %v13986_v61  ;;  %6085 = vmatprep.subr.bf16.mxu0 %v13987_v59  ;;  %v14013_v61 = vld [vmem:[#allocation128_spill] sm:$0xff]  ;;  %v14014_v59 = vld [vmem:[#allocation139_spill] sm:$0xff] }
 0x5ed   :  { %6257 = vmatprep.subr.bf16.mxu1 %v13988_v22  ;;  %v14015_v22 = vld [vmem:[#allocation132_spill] sm:$0xff] }
 0x5ef   :  { %6086 = vmatpush1.bf16.msra.mxu0 %v13989_v55  ;;  %v14016_v55 = vld [vmem:[#allocation140_spill] sm:$0xff] }
 0x5f0   :  { %6258 = vmatpush1.bf16.msra.mxu1 %v13990_v23  ;;  %6087 = vmatprep.subr.bf16.mxu0 %v13991_v24  ;;  %v14017_v23 = vld [vmem:[#allocation141_spill] sm:$0xff]  ;;  %v14018_v24 = vld [vmem:[#allocation142_spill] sm:$0xff] }
 0x5f1   :  { %6259 = vmatprep.subr.bf16.mxu1 %v13992_v50  ;;  %v14019_v50 = vld [vmem:[#allocation143_spill] sm:$0xff] }
 0x5f3   :  { %6088 = vmatpush1.bf16.msra.mxu0 %v13993_v44  ;;  %v14020_v44 = vld [vmem:[#allocation144_spill] sm:$0xff] }
 0x5f4   :  { %6260 = vmatpush1.bf16.msra.mxu1 %v13994_v18  ;;  %6089 = vmatprep.subr.bf16.mxu0 %v13995_v39  ;;  %v14021_v18 = vld [vmem:[#allocation145_spill] sm:$0xff]  ;;  %v14022_v39 = vld [vmem:[#allocation146_spill] sm:$0xff] }
 0x5f5   :  { %6261 = vmatprep.subr.bf16.mxu1 %v13996_v21  ;;  %v14023_v21 = vld [vmem:[#allocation147_spill] sm:$0xff] }
 0x5f7   :  { %6090 = vmatpush1.bf16.msra.mxu0 %v13997_v5  ;;  %v14024_v5 = vld [vmem:[#allocation148_spill] sm:$0xff] }
 0x5f8   :  { %6262 = vmatpush1.bf16.msra.mxu1 %v13998_v8  ;;  %6091 = vmatprep.subr.bf16.mxu0 %v13999_v9  ;;  %v14025_v8 = vld [vmem:[#allocation149_spill] sm:$0xff]  ;;  %v14026_v9 = vld [vmem:[#allocation150_spill] sm:$0xff] }
 0x5f9   :  { %6263 = vmatprep.subr.bf16.mxu1 %v14000_v33  ;;  %v14027_v33 = vld [vmem:[#allocation151_spill] sm:$0xff] }
 0x5fb   :  { %6092 = vmatpush1.bf16.msra.mxu0 %v14001_v40  ;;  %v14028_v40 = vld [vmem:[#allocation152_spill] sm:$0xff] }
 0x5fc   :  { %6264 = vmatpush1.bf16.msra.mxu1 %v14002_v52  ;;  %6093 = vmatprep.subr.bf16.mxu0 %v14003_v10  ;;  %v14029_v52 = vld [vmem:[#allocation153_spill] sm:$0xff]  ;;  %v14030_v10 = vld [vmem:[#allocation154_spill] sm:$0xff] }
 0x5fd   :  { %6265 = vmatprep.subr.bf16.mxu1 %v14004_v16  ;;  %v14031_v16 = vld [vmem:[#allocation155_spill] sm:$0xff] }
 0x5ff   :  { %6094 = vmatpush1.bf16.msra.mxu0 %v14005_v3  ;;  %v14032_v3 = vld [vmem:[#allocation156_spill] sm:$0xff] }
 0x600   :  { %6266 = vmatpush1.bf16.msra.mxu1 %v14006_v58  ;;  %6106 = vmatprep.subr.bf16.mxu0 %v14007_v0  ;;  %v14033_v58 = vld [vmem:[#allocation157_spill] sm:$0xff]  ;;  %v14034_v0 = vld [vmem:[#allocation158_spill] sm:$0xff] }
 0x601   :  { %6278 = vmatprep.subr.bf16.mxu1 %v14008_v57  ;;  %v14035_v57 = vld [vmem:[#allocation159_spill] sm:$0xff] }
 0x602   :  { %6096 = vmatmul.mubr.bf16.vlgmr.msra.gmra.mrb[56].mxu0 %v9775_v34 }
 0x603   :  { %6268 = vmatmul.mubr.bf16.vlgmr.msra.gmra.mrb[56].mxu1 %v9775_v34  ;;  %6107 = vmatpush1.bf16.msra.mxu0 %v14009_v30  ;;  %v14036_v30 = vld [vmem:[#allocation160_spill] sm:$0xff] }
 0x604   :  { %6138 = vmatprep.mubr.bf16.mxu0 %v14010_v54  ;;  %6279 = vmatpush1.bf16.msra.mxu1 %v14011_v2  ;;  %v14037_v2 = vld [vmem:[#allocation161_spill] sm:$0xff] }
 0x605   :  { %6310 = vmatprep.mubr.bf16.mxu1 %v14010_v54  ;;  %6108 = vmatprep.subr.bf16.mxu0 %v14012_v32  ;;  %v14038_v32 = vld [vmem:[#allocation162_spill] sm:$0xff] }
 0x606   :  { %6280 = vmatprep.subr.bf16.mxu1 %v14013_v61  ;;  %v14039_v61 = vld [vmem:[#allocation163_spill] sm:$0xff] }
 0x607   :  { %6109 = vmatpush1.bf16.msra.mxu0 %v14014_v59  ;;  %v14040_v59 = vld [vmem:[#allocation164_spill] sm:$0xff] }
 0x608   :  { %6281 = vmatpush1.bf16.msra.mxu1 %v14015_v22  ;;  %6110 = vmatprep.subr.bf16.mxu0 %v14016_v55  ;;  %v14041_v22 = vld [vmem:[#allocation165_spill] sm:$0xff]  ;;  %v14042_v55 = vld [vmem:[#allocation166_spill] sm:$0xff] }
 0x609   :  { %6282 = vmatprep.subr.bf16.mxu1 %v14017_v23  ;;  %v14043_v23 = vld [vmem:[#allocation167_spill] sm:$0xff] }
 0x60b   :  { %6111 = vmatpush1.bf16.msra.mxu0 %v14018_v24  ;;  %v14044_v24 = vld [vmem:[#allocation168_spill] sm:$0xff] }
 0x60c   :  { %6283 = vmatpush1.bf16.msra.mxu1 %v14019_v50  ;;  %6112 = vmatprep.subr.bf16.mxu0 %v14020_v44  ;;  %v14045_v50 = vld [vmem:[#allocation169_spill] sm:$0xff]  ;;  %v14046_v44 = vld [vmem:[#allocation170_spill] sm:$0xff] }
 0x60d   :  { %6284 = vmatprep.subr.bf16.mxu1 %v14021_v18  ;;  %v14047_v18 = vld [vmem:[#allocation171_spill] sm:$0xff] }
 0x60f   :  { %6113 = vmatpush1.bf16.msra.mxu0 %v14022_v39  ;;  %v14048_v39 = vld [vmem:[#allocation172_spill] sm:$0xff] }
 0x610   :  { %6285 = vmatpush1.bf16.msra.mxu1 %v14023_v21  ;;  %6114 = vmatprep.subr.bf16.mxu0 %v14024_v5  ;;  %v14049_v21 = vld [vmem:[#allocation173_spill] sm:$0xff]  ;;  %v14050_v5 = vld [vmem:[#allocation174_spill] sm:$0xff] }
 0x611   :  { %6286 = vmatprep.subr.bf16.mxu1 %v14025_v8  ;;  %v14051_v8 = vld [vmem:[#allocation175_spill] sm:$0xff] }
 0x613   :  { %6115 = vmatpush1.bf16.msra.mxu0 %v14026_v9  ;;  %v14052_v9 = vld [vmem:[#allocation176_spill] sm:$0xff] }
 0x614   :  { %6287 = vmatpush1.bf16.msra.mxu1 %v14027_v33  ;;  %6116 = vmatprep.subr.bf16.mxu0 %v14028_v40  ;;  %v14053_v33 = vld [vmem:[#allocation177_spill] sm:$0xff]  ;;  %v14054_v40 = vld [vmem:[#allocation178_spill] sm:$0xff] }
 0x615   :  { %6288 = vmatprep.subr.bf16.mxu1 %v14029_v52  ;;  %v14055_v52 = vld [vmem:[#allocation179_spill] sm:$0xff] }
 0x617   :  { %6117 = vmatpush1.bf16.msra.mxu0 %v14030_v10  ;;  %v14056_v10 = vld [vmem:[#allocation180_spill] sm:$0xff] }
 0x618   :  { %6289 = vmatpush1.bf16.msra.mxu1 %v14031_v16  ;;  %6118 = vmatprep.subr.bf16.mxu0 %v14032_v3  ;;  %v14057_v16 = vld [vmem:[#allocation181_spill] sm:$0xff]  ;;  %v14058_v3 = vld [vmem:[#allocation182_spill] sm:$0xff] }
 0x619   :  { %6290 = vmatprep.subr.bf16.mxu1 %v14033_v58  ;;  %v14059_v58 = vld [vmem:[#allocation183_spill] sm:$0xff] }
 0x61b   :  { %6119 = vmatpush1.bf16.msra.mxu0 %v14034_v0  ;;  %v14060_v0 = vld [vmem:[#allocation184_spill] sm:$0xff] }
 0x61c   :  { %6291 = vmatpush1.bf16.msra.mxu1 %v14035_v57  ;;  %6120 = vmatprep.subr.bf16.mxu0 %v14036_v30  ;;  %v14061_v57 = vld [vmem:[#allocation185_spill] sm:$0xff]  ;;  %v14062_v30 = vld [vmem:[#allocation186_spill] sm:$0xff] }
 0x61d   :  { %6292 = vmatprep.subr.bf16.mxu1 %v14037_v2  ;;  %v14063_v2 = vld [vmem:[#allocation187_spill] sm:$0xff] }
 0x61f   :  { %6121 = vmatpush1.bf16.msra.mxu0 %v14038_v32  ;;  %v14064_v32 = vld [vmem:[#allocation188_spill] sm:$0xff] }
 0x620   :  { %6293 = vmatpush1.bf16.msra.mxu1 %v14039_v61  ;;  %6122 = vmatprep.subr.bf16.mxu0 %v14040_v59  ;;  %v14065_v61 = vld [vmem:[#allocation189_spill] sm:$0xff]  ;;  %v14066_v59 = vld [vmem:[#allocation190_spill] sm:$0xff] }
 0x621   :  { %6294 = vmatprep.subr.bf16.mxu1 %v14041_v22  ;;  %v14067_v22 = vld [vmem:[#allocation191_spill] sm:$0xff] }
 0x623   :  { %6123 = vmatpush1.bf16.msra.mxu0 %v14042_v55  ;;  %v14068_v55 = vld [vmem:[#allocation192_spill] sm:$0xff] }
 0x624   :  { %6295 = vmatpush1.bf16.msra.mxu1 %v14043_v23  ;;  %6124 = vmatprep.subr.bf16.mxu0 %v14044_v24  ;;  %v14069_v23 = vld [vmem:[#allocation193_spill] sm:$0xff]  ;;  %v14070_v24 = vld [vmem:[#allocation194_spill] sm:$0xff] }
 0x625   :  { %6296 = vmatprep.subr.bf16.mxu1 %v14045_v50  ;;  %v14071_v50 = vld [vmem:[#allocation195_spill] sm:$0xff] }
 0x627   :  { %6125 = vmatpush1.bf16.msra.mxu0 %v14046_v44  ;;  %v14072_v44 = vld [vmem:[#allocation196_spill] sm:$0xff] }
 0x628   :  { %6297 = vmatpush1.bf16.msra.mxu1 %v14047_v18  ;;  %6126 = vmatprep.subr.bf16.mxu0 %v14048_v39  ;;  %v14073_v18 = vld [vmem:[#allocation197_spill] sm:$0xff]  ;;  %v14074_v39 = vld [vmem:[#allocation82_spill] sm:$0xff] }
 0x629   :  { %6298 = vmatprep.subr.bf16.mxu1 %v14049_v21  ;;  %v14075_v21 = vld [vmem:[#allocation198_spill] sm:$0xff] }
 0x62b   :  { %6127 = vmatpush1.bf16.msra.mxu0 %v14050_v5  ;;  %v14076_v5 = vld [vmem:[#allocation199_spill] sm:$0xff] }
 0x62c   :  { %6299 = vmatpush1.bf16.msra.mxu1 %v14051_v8  ;;  %6128 = vmatprep.subr.bf16.mxu0 %v14052_v9  ;;  %v14077_v8 = vld [vmem:[#allocation200_spill] sm:$0xff]  ;;  %v14078_v9 = vld [vmem:[#allocation131_spill] sm:$0xff] }
 0x62d   :  { %6300 = vmatprep.subr.bf16.mxu1 %v14053_v33  ;;  %v14079_v33 = vld [vmem:[#allocation201_spill] sm:$0xff] }
 0x62f   :  { %6129 = vmatpush1.bf16.msra.mxu0 %v14054_v40  ;;  %v14080_v40 = vld [vmem:[#allocation202_spill] sm:$0xff] }
 0x630   :  { %6301 = vmatpush1.bf16.msra.mxu1 %v14055_v52  ;;  %6130 = vmatprep.subr.bf16.mxu0 %v14056_v10  ;;  %v14081_v52 = vld [vmem:[#allocation203_spill] sm:$0xff]  ;;  %v14082_v10 = vld [vmem:[#allocation204_spill] sm:$0xff] }
 0x631   :  { %6302 = vmatprep.subr.bf16.mxu1 %v14057_v16  ;;  %v14083_v16 = vld [vmem:[#allocation205_spill] sm:$0xff] }
 0x633   :  { %6131 = vmatpush1.bf16.msra.mxu0 %v14058_v3  ;;  %v14084_v3 = vld [vmem:[#allocation206_spill] sm:$0xff] }
 0x634   :  { %6303 = vmatpush1.bf16.msra.mxu1 %v14059_v58  ;;  %6132 = vmatprep.subr.bf16.mxu0 %v14060_v0  ;;  %v14085_v58 = vld [vmem:[#allocation207_spill] sm:$0xff]  ;;  %v14086_v0 = vld [vmem:[#allocation208_spill] sm:$0xff] }
 0x635   :  { %6304 = vmatprep.subr.bf16.mxu1 %v14061_v57  ;;  %v14087_v57 = vld [vmem:[#allocation209_spill] sm:$0xff] }
 0x637   :  { %6133 = vmatpush1.bf16.msra.mxu0 %v14062_v30  ;;  %v14088_v30 = vld [vmem:[#allocation210_spill] sm:$0xff] }
 0x638   :  { %6305 = vmatpush1.bf16.msra.mxu1 %v14063_v2  ;;  %6134 = vmatprep.subr.bf16.mxu0 %v14064_v32  ;;  %v14089_v2 = vld [vmem:[#allocation211_spill] sm:$0xff]  ;;  %v14090_v32 = vld [vmem:[#allocation212_spill] sm:$0xff] }
 0x639   :  { %6306 = vmatprep.subr.bf16.mxu1 %v14065_v61  ;;  %v14091_v61 = vld [vmem:[#allocation213_spill] sm:$0xff] }
 0x63b   :  { %6135 = vmatpush1.bf16.msra.mxu0 %v14066_v59  ;;  %v14092_v59 = vld [vmem:[#allocation214_spill] sm:$0xff] }
 0x63c   :  { %6307 = vmatpush1.bf16.msra.mxu1 %v14067_v22  ;;  %6136 = vmatprep.subr.bf16.mxu0 %v14068_v55  ;;  %v5988_v22 = vld [vmem:[#allocation9] sm:$0x3]  ;;  %v14093_v55 = vld [vmem:[#allocation215_spill] sm:$0xff] }
 0x63d   :  { %6308 = vmatprep.subr.bf16.mxu1 %v14069_v23 }
 0x63f   :  { %6137 = vmatpush1.bf16.msra.mxu0 %v14070_v24  ;;  %v14094_v24 = vld [vmem:[#allocation216_spill] sm:$0xff] }
 0x640   :  { %6309 = vmatpush1.bf16.msra.mxu1 %v14071_v50  ;;  %6149 = vmatprep.subr.bf16.mxu0 %v14072_v44 }
 0x641   :  { %6321 = vmatprep.subr.bf16.mxu1 %v14073_v18 }
 0x642   :  { %6139 = vmatmul.mubr.bf16.vlgmr.msra.gmra.mrb[56].mxu0 %v14074_v39 }
 0x643   :  { %6311 = vmatmul.mubr.bf16.vlgmr.msra.gmra.mrb[56].mxu1 %v14074_v39  ;;  %6150 = vmatpush1.bf16.msra.mxu0 %v14075_v21  ;;  %v14095_v21 = vld [vmem:[#allocation122_spill] sm:$0xff] }
 0x644   :  { %6181 = vmatprep.mubr.bf16.mxu0 %v10594_v7  ;;  %6322 = vmatpush1.bf16.msra.mxu1 %v14076_v5  ;;  %v5993_v5 = vrot.slane %v5988_v22, %v14095_v21 }
 0x645   :  { %6353 = vmatprep.mubr.bf16.mxu1 %v10594_v7  ;;  %6151 = vmatprep.subr.bf16.mxu0 %v14077_v8 }
 0x646   :  { %6323 = vmatprep.subr.bf16.mxu1 %v14078_v9 }
 0x647   :  { %6152 = vmatpush1.bf16.msra.mxu0 %v14079_v33  ;;  %v14096_v33 = vld [vmem:[#allocation217_spill] sm:$0xff] }
 0x648   :  { %6324 = vmatpush1.bf16.msra.mxu1 %v14080_v40  ;;  %6153 = vmatprep.subr.bf16.mxu0 %v14081_v52  ;;  %v14097_v52 = vld [vmem:[#allocation123_spill] sm:$0xff] }
 0x649   :  { %6325 = vmatprep.subr.bf16.mxu1 %v14082_v10  ;;  %v5997_v10 = vrot.slane %v5988_v22, %v14097_v52 }
 0x64b   :  { %6154 = vmatpush1.bf16.msra.mxu0 %v14083_v16 }
 0x64c   :  { %6326 = vmatpush1.bf16.msra.mxu1 %v14084_v3  ;;  %6155 = vmatprep.subr.bf16.mxu0 %v14085_v58  ;;  %v14098_v3 = vld [vmem:[#allocation218_spill] sm:$0xff] }
 0x64d   :  { %6327 = vmatprep.subr.bf16.mxu1 %v14086_v0  ;;  %v14099_v0 = vld [vmem:[#allocation219_spill] sm:$0xff] }
 0x64f   :  { %6156 = vmatpush1.bf16.msra.mxu0 %v14087_v57  ;;  %v14100_v57 = vmax.f32 %v11341_v26, %v11346_v47  ;;  %v14103_v47 = vmax.f32 %v11364_v37, %v11373_v31  ;;  %v14107_v37 = vld [vmem:[#allocation224_spill] sm:$0xff]  ;;  %v14110_v31 = vld [vmem:[#allocation227_spill] sm:$0xff] }
 0x650   :  { %6328 = vmatpush1.bf16.msra.mxu1 %v14088_v30  ;;  %6157 = vmatprep.subr.bf16.mxu0 %v14089_v2 }
 0x651   :  { %6329 = vmatprep.subr.bf16.mxu1 %v14090_v32 }
 0x653   :  { %6158 = vmatpush1.bf16.msra.mxu0 %v14091_v61  ;;  %v14101_v61 = vmax.f32 %v11348_v36, %v11352_v6 }
 0x654   :  { %6330 = vmatpush1.bf16.msra.mxu1 %v14092_v59  ;;  %6159 = vmatprep.subr.bf16.mxu0 %v14093_v55 }
 0x655   :  { %v5795_v23 = vpop.f32.mrb[52].mxu0  ;;  %6331 = vmatprep.subr.bf16.mxu1 %v14094_v24 }
 0x656   :  { %v5967_v50 = vpop.f32.mrb[52].mxu1  ;;  %v5797_v44 = vpop.f32.mrb[53].mxu0 }
 0x657   :  { %v5980_v18 = vmax.f32 %v5795_v23, %v5967_v50  ;;  %v5969_v8 = vpop.f32.mrb[53].mxu1  ;;  %v5799_v9 = vpop.f32.mrb[54].mxu0  ;;  %6160 = vmatpush1.bf16.msra.mxu0 %v14096_v33  ;;  %v14102_v23 = vmax.f32 %v11354_v15, %v11361_v35  ;;  %v14118_v33 = vld [vmem:[#allocation235_spill] sm:$0xff] }
 0x658   :  { %v5981_v40 = vmax.f32 %v5797_v44, %v5969_v8  ;;  %v5971_v16 = vpop.f32.mrb[54].mxu1  ;;  %6332 = vmatpush1.bf16.msra.mxu1 %v14098_v3  ;;  %v5801_v58 = vpop.f32.mrb[55].mxu0  ;;  %6161 = vmatprep.subr.bf16.mxu0 %v14099_v0  ;;  %v14116_v8 = vld [vmem:[#allocation233_spill] sm:$0xff]  ;;  %v14122_v3 = vld [vmem:[#allocation239_spill] sm:$0xff] }
 0x659   :  { %v5984_v30 = vmax.f32 %v14100_v57, %v5980_v18  ;;  %v5982_v2 = vmax.f32 %v5799_v9, %v5971_v16  ;;  %v5973_v32 = vpop.f32.mrb[55].mxu1  ;;  %6333 = vmatprep.subr.bf16.mxu1 %v10540_v14  ;;  %v14112_v18 = vld [vmem:[#allocation229_spill] sm:$0xff]  ;;  %v14117_v9 = vld [vmem:[#allocation234_spill] sm:$0xff] }
 0x65a   :  { %v5985_v59 = vmax.f32 %v14101_v61, %v5981_v40  ;;  %v5983_v55 = vmax.f32 %v5801_v58, %v5973_v32  ;;  %v14119_v40 = vld [vmem:[#allocation236_spill] sm:$0xff]  ;;  %v14121_v16 = vld [vmem:[#allocation238_spill] sm:$0xff]  ;;  %v14124_v0 = vld [vmem:[#allocation241_spill] sm:$0xff] }
 0x65b   :  { %v6000_v22 = vadd.f32 %v5993_v5, %v5984_v30  ;;  %v5986_v24 = vmax.f32 %v14102_v23, %v5982_v2  ;;  %6162 = vmatpush1.bf16.msra.mxu0 %v10545_v38  ;;  %v14123_v58 = vld [vmem:[#allocation240_spill] sm:$0xff]  ;;  %v14125_v57 = vld [vmem:[#allocation242_spill] sm:$0xff]  ;;  %v14126_v30 = vld [vmem:[#allocation243_spill] sm:$0xff] }
 0x65c   :  { %v6001_v50 = vadd.f32 %v5997_v10, %v5985_v59  ;;  %v5987_v26 = vmax.f32 %v14103_v47, %v5983_v55  ;;  %6334 = vmatpush1.bf16.msra.mxu1 %v10549_v19  ;;  %6163 = vmatprep.subr.bf16.mxu0 %v10551_v48  ;;  %v14104_v48 = vld [vmem:[#allocation220_spill] sm:$0xff]  ;;  %v14128_v32 = vld [vmem:[#allocation245_spill] sm:$0xff]  ;;  %v14129_v61 = vld [vmem:[#allocation246_spill] sm:$0xff] }
 0x65d   :  { %v6002_v14 = vadd.f32 %v5993_v5, %v5986_v24  ;;  %6335 = vmatprep.subr.bf16.mxu1 %v10557_v46  ;;  %v6004_v6 = vmax.f32 %v6000_v22, 0.0  ;;  %v14105_v46 = vld [vmem:[#allocation222_spill] sm:$0xff]  ;;  %v14115_v5 = vld [vmem:[#allocation232_spill] sm:$0xff]  ;;  %v14130_v59 = vld [vmem:[#allocation247_spill] sm:$0xff] }
 0x65e   :  { %v6003_v36 = vadd.f32 %v5997_v10, %v5987_v26  ;;  %v6005_v35 = vmax.f32 %v6001_v50, 0.0  ;;  %v14120_v10 = vld [vmem:[#allocation237_spill] sm:$0xff]  ;;  %v14127_v2 = vld [vmem:[#allocation244_spill] sm:$0xff]  ;;  %v14133_v23 = vld [vmem:[#allocation250_spill] sm:$0xff] }
 0x65f   :  { %v6006_v44 = vmax.f32 %v6002_v14, 0.0  ;;  %6164 = vmatpush1.bf16.msra.mxu0 %v10566_v25  ;;  %v14106_v25 = vld [vmem:[#allocation223_spill] sm:$0xff]  ;;  %v14131_v55 = vld [vmem:[#allocation248_spill] sm:$0xff]  ;;  %v14132_v22 = vld [vmem:[#allocation249_spill] sm:$0xff] }
 0x660   :  { %v6007_v15 = vmax.f32 %v6003_v36, 0.0  ;;  %6336 = vmatpush1.bf16.msra.mxu1 %v10568_v27  ;;  %6165 = vmatprep.subr.bf16.mxu0 %v10575_v51  ;;  %v14108_v27 = vld [vmem:[#allocation225_spill] sm:$0xff]  ;;  %v14109_v51 = vld [vmem:[#allocation226_spill] sm:$0xff]  ;;  %v14135_v50 = vld [vmem:[#allocation251_spill] sm:$0xff] }
 0x661   :  { %v11741_v38 = vpack.c.bf16 %v6006_v44, %v6004_v6  ;;  %6337 = vmatprep.subr.bf16.mxu1 %v10578_v53  ;;  %v14111_v53 = vld [vmem:[#allocation228_spill] sm:$0xff]  ;;  %v14134_v24 = vld [vmem:[#allocation221_spill] sm:$0xff]  ;;  %v14138_v14 = vld [vmem:[#allocation254_spill] sm:$0xff] }
 0x662   :  { %v11744_v19 = vpack.c.bf16 %v6007_v15, %v6005_v35  ;;  %v14136_v47 = vld [vmem:[#allocation252_spill] sm:$0xff]  ;;  %v14137_v26 = vld [vmem:[#allocation253_spill] sm:$0xff]  ;;  %v14139_v36 = vld [vmem:[#allocation255_spill] sm:$0xff] }
 0x663   :  { %6166 = vmatpush1.bf16.msra.mxu0 %v10581_v28  ;;  %v14113_v28 = vld [vmem:[#allocation230_spill] sm:$0xff]  ;;  %v14140_v6 = vld [vmem:[#allocation256_spill] sm:$0xff]  ;;  %v14141_v44 = vld [vmem:[#allocation257_spill] sm:$0xff] }
 0x664   :  { %6338 = vmatpush1.bf16.msra.mxu1 %v10585_v41  ;;  %6167 = vmatprep.subr.bf16.mxu0 %v14104_v48  ;;  %v14114_v41 = vld [vmem:[#allocation231_spill] sm:$0xff]  ;;  %v14142_v35 = vld [vmem:[#allocation258_spill] sm:$0xff]  ;;  %v14144_v48 = vld [vmem:[#allocation260_spill] sm:$0xff] }
 0x665   :  { %6339 = vmatprep.subr.bf16.mxu1 %v14105_v46  ;;  %v14143_v15 = vld [vmem:[#allocation259_spill] sm:$0xff]  ;;  %v14145_v46 = vld [vmem:[#allocation261_spill] sm:$0xff] }
 0x667   :  { %6168 = vmatpush1.bf16.msra.mxu0 %v14106_v25  ;;  %v14146_v25 = vld [vmem:[#allocation262_spill] sm:$0xff] }
 0x668   :  { %6340 = vmatpush1.bf16.msra.mxu1 %v14107_v37  ;;  %6169 = vmatprep.subr.bf16.mxu0 %v14108_v27  ;;  %v14148_v37 = vld [vmem:[#allocation264_spill] sm:$0xff]  ;;  %v14149_v27 = vld [vmem:[#allocation265_spill] sm:$0xff] }
 0x669   :  { %6341 = vmatprep.subr.bf16.mxu1 %v14109_v51  ;;  %v14150_v51 = vld [vmem:[#allocation266_spill] sm:$0xff] }
 0x66b   :  { %6170 = vmatpush1.bf16.msra.mxu0 %v14110_v31  ;;  %v14151_v31 = vld [vmem:[#allocation267_spill] sm:$0xff] }
 0x66c   :  { %6342 = vmatpush1.bf16.msra.mxu1 %v14111_v53  ;;  %6171 = vmatprep.subr.bf16.mxu0 %v14112_v18  ;;  %v14152_v53 = vld [vmem:[#allocation268_spill] sm:$0xff]  ;;  %v14153_v18 = vld [vmem:[#allocation269_spill] sm:$0xff] }
 0x66d   :  { %6343 = vmatprep.subr.bf16.mxu1 %v14113_v28  ;;  %v14154_v28 = vld [vmem:[#allocation270_spill] sm:$0xff] }
 0x66f   :  { %6172 = vmatpush1.bf16.msra.mxu0 %v14114_v41  ;;  %v14155_v41 = vld [vmem:[#allocation271_spill] sm:$0xff] }
 0x670   :  { %6344 = vmatpush1.bf16.msra.mxu1 %v14115_v5  ;;  %6173 = vmatprep.subr.bf16.mxu0 %v14116_v8  ;;  %v14156_v5 = vld [vmem:[#allocation272_spill] sm:$0xff]  ;;  %v14157_v8 = vld [vmem:[#allocation273_spill] sm:$0xff] }
 0x671   :  { %6345 = vmatprep.subr.bf16.mxu1 %v14117_v9  ;;  %v14158_v9 = vld [vmem:[#allocation274_spill] sm:$0xff] }
 0x673   :  { %6174 = vmatpush1.bf16.msra.mxu0 %v14118_v33  ;;  %v14159_v33 = vld [vmem:[#allocation275_spill] sm:$0xff] }
 0x674   :  { %6346 = vmatpush1.bf16.msra.mxu1 %v14119_v40  ;;  %6175 = vmatprep.subr.bf16.mxu0 %v14120_v10  ;;  %v14160_v40 = vld [vmem:[#allocation276_spill] sm:$0xff]  ;;  %v14161_v10 = vld [vmem:[#allocation277_spill] sm:$0xff] }
 0x675   :  { %6347 = vmatprep.subr.bf16.mxu1 %v14121_v16  ;;  %v14162_v16 = vld [vmem:[#allocation278_spill] sm:$0xff] }
 0x677   :  { %6176 = vmatpush1.bf16.msra.mxu0 %v14122_v3  ;;  %v14163_v3 = vld [vmem:[#allocation279_spill] sm:$0xff] }
 0x678   :  { %6348 = vmatpush1.bf16.msra.mxu1 %v14123_v58  ;;  %6177 = vmatprep.subr.bf16.mxu0 %v14124_v0  ;;  %v14164_v58 = vld [vmem:[#allocation280_spill] sm:$0xff]  ;;  %v14165_v0 = vld [vmem:[#allocation281_spill] sm:$0xff] }
 0x679   :  { %6349 = vmatprep.subr.bf16.mxu1 %v14125_v57  ;;  %v14166_v57 = vld [vmem:[#allocation282_spill] sm:$0xff] }
 0x67b   :  { %6178 = vmatpush1.bf16.msra.mxu0 %v14126_v30  ;;  %v14167_v30 = vld [vmem:[#allocation283_spill] sm:$0xff] }
 0x67c   :  { %6350 = vmatpush1.bf16.msra.mxu1 %v14127_v2  ;;  %6179 = vmatprep.subr.bf16.mxu0 %v14128_v32  ;;  %v14168_v2 = vld [vmem:[#allocation284_spill] sm:$0xff]  ;;  %v14169_v32 = vld [vmem:[#allocation285_spill] sm:$0xff] }
 0x67d   :  { %6351 = vmatprep.subr.bf16.mxu1 %v14129_v61  ;;  %v14170_v61 = vld [vmem:[#allocation286_spill] sm:$0xff] }
 0x67f   :  { %6180 = vmatpush1.bf16.msra.mxu0 %v14130_v59  ;;  %v14171_v59 = vld [vmem:[#allocation287_spill] sm:$0xff] }
 0x680   :  { %6352 = vmatpush1.bf16.msra.mxu1 %v14131_v55  ;;  %6364 = vmatprep.subr.bf16.mxu0 %v14132_v22  ;;  %v14172_v55 = vld [vmem:[#allocation288_spill] sm:$0xff]  ;;  %v14173_v22 = vld [vmem:[#allocation289_spill] sm:$0xff] }
 0x681   :  { %6536 = vmatprep.subr.bf16.mxu1 %v14133_v23  ;;  %v14174_v23 = vld [vmem:[#allocation290_spill] sm:$0xff] }
 0x682   :  { %6182 = vmatmul.mubr.bf16.vlgmr.msra.gmra.mrb[56].mxu0 %v14134_v24 }
 0x683   :  { %6354 = vmatmul.mubr.bf16.vlgmr.msra.gmra.mrb[56].mxu1 %v14134_v24  ;;  %6365 = vmatpush1.bf16.msra.mxu0 %v14135_v50  ;;  %v14175_v50 = vld [vmem:[#allocation291_spill] sm:$0xff] }
 0x684   :  { %6396 = vmatprep.mubr.bf16.mxu0 %v13539_v56  ;;  %6537 = vmatpush1.bf16.msra.mxu1 %v14136_v47  ;;  %v14176_v47 = vld [vmem:[#allocation292_spill] sm:$0xff] }
 0x685   :  { %6568 = vmatprep.mubr.bf16.mxu1 %v13539_v56  ;;  %6366 = vmatprep.subr.bf16.mxu0 %v14137_v26  ;;  %v14147_v56 = vld [vmem:[#allocation263_spill] sm:$0xff]  ;;  %v14177_v26 = vld [vmem:[#allocation293_spill] sm:$0xff] }
 0x686   :  { %6538 = vmatprep.subr.bf16.mxu1 %v14138_v14  ;;  %v14178_v14 = vld [vmem:[#allocation294_spill] sm:$0xff] }
 0x687   :  { %6367 = vmatpush1.bf16.msra.mxu0 %v14139_v36  ;;  %v14179_v36 = vld [vmem:[#allocation295_spill] sm:$0xff] }
 0x688   :  { %6539 = vmatpush1.bf16.msra.mxu1 %v14140_v6  ;;  %6368 = vmatprep.subr.bf16.mxu0 %v14141_v44  ;;  %v14180_v6 = vld [vmem:[#allocation296_spill] sm:$0xff]  ;;  %v14181_v44 = vld [vmem:[#allocation297_spill] sm:$0xff] }
 0x689   :  { %6540 = vmatprep.subr.bf16.mxu1 %v14142_v35  ;;  %v14182_v35 = vld [vmem:[#allocation298_spill] sm:$0xff] }
 0x68b   :  { %6369 = vmatpush1.bf16.msra.mxu0 %v14143_v15  ;;  %v14183_v15 = vld [vmem:[#allocation299_spill] sm:$0xff] }
 0x68c   :  { %6541 = vmatpush1.bf16.msra.mxu1 %v14144_v48  ;;  %6370 = vmatprep.subr.bf16.mxu0 %v14145_v46  ;;  %v14184_v48 = vld [vmem:[#allocation300_spill] sm:$0xff]  ;;  %v14185_v46 = vld [vmem:[#allocation301_spill] sm:$0xff] }
 0x68d   :  { %6542 = vmatprep.subr.bf16.mxu1 %v14146_v25  ;;  %v14186_v25 = vld [vmem:[#allocation302_spill] sm:$0xff] }
 0x68f   :  { %6371 = vmatpush1.bf16.msra.mxu0 %v14147_v56  ;;  %v14187_v56 = vld [vmem:[#allocation303_spill] sm:$0xff] }
 0x690   :  { %6543 = vmatpush1.bf16.msra.mxu1 %v14148_v37  ;;  %6372 = vmatprep.subr.bf16.mxu0 %v14149_v27  ;;  %v14188_v37 = vld [vmem:[#allocation304_spill] sm:$0xff]  ;;  %v14189_v27 = vld [vmem:[#allocation305_spill] sm:$0xff] }
 0x691   :  { %6544 = vmatprep.subr.bf16.mxu1 %v14150_v51  ;;  %v14190_v51 = vld [vmem:[#allocation306_spill] sm:$0xff] }
 0x693   :  { %6373 = vmatpush1.bf16.msra.mxu0 %v14151_v31  ;;  %v14191_v31 = vld [vmem:[#allocation307_spill] sm:$0xff] }
 0x694   :  { %6545 = vmatpush1.bf16.msra.mxu1 %v14152_v53  ;;  %6374 = vmatprep.subr.bf16.mxu0 %v14153_v18  ;;  %v14192_v53 = vld [vmem:[#allocation308_spill] sm:$0xff]  ;;  %v14193_v18 = vld [vmem:[#allocation309_spill] sm:$0xff] }
 0x695   :  { %6546 = vmatprep.subr.bf16.mxu1 %v14154_v28  ;;  %v14194_v28 = vld [vmem:[#allocation310_spill] sm:$0xff] }
 0x697   :  { %6375 = vmatpush1.bf16.msra.mxu0 %v14155_v41  ;;  %v14195_v41 = vld [vmem:[#allocation311_spill] sm:$0xff] }
 0x698   :  { %6547 = vmatpush1.bf16.msra.mxu1 %v14156_v5  ;;  %6376 = vmatprep.subr.bf16.mxu0 %v14157_v8  ;;  %v14196_v5 = vld [vmem:[#allocation312_spill] sm:$0xff]  ;;  %v14197_v8 = vld [vmem:[#allocation313_spill] sm:$0xff] }
 0x699   :  { %6548 = vmatprep.subr.bf16.mxu1 %v14158_v9  ;;  %v14198_v9 = vld [vmem:[#allocation314_spill] sm:$0xff] }
 0x69b   :  { %6377 = vmatpush1.bf16.msra.mxu0 %v14159_v33  ;;  %v14199_v33 = vld [vmem:[#allocation315_spill] sm:$0xff] }
 0x69c   :  { %6549 = vmatpush1.bf16.msra.mxu1 %v14160_v40  ;;  %6378 = vmatprep.subr.bf16.mxu0 %v14161_v10  ;;  %v14200_v40 = vld [vmem:[#allocation316_spill] sm:$0xff]  ;;  %v14201_v10 = vld [vmem:[#allocation317_spill] sm:$0xff] }
 0x69d   :  { %6550 = vmatprep.subr.bf16.mxu1 %v14162_v16  ;;  %v14202_v16 = vld [vmem:[#allocation318_spill] sm:$0xff] }
 0x69f   :  { %6379 = vmatpush1.bf16.msra.mxu0 %v14163_v3  ;;  %v14203_v3 = vld [vmem:[#allocation319_spill] sm:$0xff] }
 0x6a0   :  { %6551 = vmatpush1.bf16.msra.mxu1 %v14164_v58  ;;  %6380 = vmatprep.subr.bf16.mxu0 %v14165_v0  ;;  %v14204_v58 = vld [vmem:[#allocation320_spill] sm:$0xff]  ;;  %v14205_v0 = vld [vmem:[#allocation321_spill] sm:$0xff] }
 0x6a1   :  { %6552 = vmatprep.subr.bf16.mxu1 %v14166_v57  ;;  %v14206_v57 = vld [vmem:[#allocation322_spill] sm:$0xff] }
 0x6a3   :  { %6381 = vmatpush1.bf16.msra.mxu0 %v14167_v30  ;;  %v14208_v30 = vld [vmem:[#allocation324_spill] sm:$0xff] }
 0x6a4   :  { %6553 = vmatpush1.bf16.msra.mxu1 %v14168_v2  ;;  %6382 = vmatprep.subr.bf16.mxu0 %v14169_v32  ;;  %v14209_v2 = vld [vmem:[#allocation325_spill] sm:$0xff]  ;;  %v14210_v32 = vld [vmem:[#allocation326_spill] sm:$0xff] }
 0x6a5   :  { %6554 = vmatprep.subr.bf16.mxu1 %v14170_v61  ;;  %v14212_v61 = vld [vmem:[#allocation328_spill] sm:$0xff] }
 0x6a7   :  { %6383 = vmatpush1.bf16.msra.mxu0 %v14171_v59  ;;  %v14213_v59 = vld [vmem:[#allocation329_spill] sm:$0xff] }
 0x6a8   :  { %6555 = vmatpush1.bf16.msra.mxu1 %v14172_v55  ;;  %6384 = vmatprep.subr.bf16.mxu0 %v14173_v22  ;;  %v14214_v55 = vld [vmem:[#allocation330_spill] sm:$0xff]  ;;  %v14215_v22 = vld [vmem:[#allocation331_spill] sm:$0xff] }
 0x6a9   :  { %6556 = vmatprep.subr.bf16.mxu1 %v14174_v23  ;;  %v14216_v23 = vld [vmem:[#allocation332_spill] sm:$0xff] }
 0x6ab   :  { %6385 = vmatpush1.bf16.msra.mxu0 %v14175_v50  ;;  %v14217_v50 = vld [vmem:[#allocation333_spill] sm:$0xff] }
 0x6ac   :  { %6557 = vmatpush1.bf16.msra.mxu1 %v14176_v47  ;;  %6386 = vmatprep.subr.bf16.mxu0 %v14177_v26  ;;  %v14218_v47 = vld [vmem:[#allocation334_spill] sm:$0xff]  ;;  %v14219_v26 = vld [vmem:[#allocation335_spill] sm:$0xff] }
 0x6ad   :  { %6558 = vmatprep.subr.bf16.mxu1 %v14178_v14  ;;  %v14220_v14 = vld [vmem:[#allocation336_spill] sm:$0xff] }
 0x6af   :  { %6387 = vmatpush1.bf16.msra.mxu0 %v14179_v36  ;;  %v14221_v36 = vld [vmem:[#allocation337_spill] sm:$0xff] }
 0x6b0   :  { %6559 = vmatpush1.bf16.msra.mxu1 %v14180_v6  ;;  %6388 = vmatprep.subr.bf16.mxu0 %v14181_v44  ;;  %v14222_v6 = vld [vmem:[#allocation338_spill] sm:$0xff]  ;;  %v14223_v44 = vld [vmem:[#allocation339_spill] sm:$0xff] }
 0x6b1   :  { %6560 = vmatprep.subr.bf16.mxu1 %v14182_v35  ;;  %v14224_v35 = vld [vmem:[#allocation340_spill] sm:$0xff] }
 0x6b3   :  { %6389 = vmatpush1.bf16.msra.mxu0 %v14183_v15  ;;  %v14225_v15 = vld [vmem:[#allocation341_spill] sm:$0xff] }
 0x6b4   :  { %6561 = vmatpush1.bf16.msra.mxu1 %v14184_v48  ;;  %6390 = vmatprep.subr.bf16.mxu0 %v14185_v46  ;;  %v14226_v48 = vld [vmem:[#allocation342_spill] sm:$0xff]  ;;  %v14227_v46 = vld [vmem:[#allocation343_spill] sm:$0xff] }
 0x6b5   :  { %6562 = vmatprep.subr.bf16.mxu1 %v14186_v25  ;;  %v14228_v25 = vld [vmem:[#allocation344_spill] sm:$0xff] }
 0x6b7   :  { %6391 = vmatpush1.bf16.msra.mxu0 %v14187_v56  ;;  %v14229_v56 = vld [vmem:[#allocation345_spill] sm:$0xff] }
 0x6b8   :  { %6563 = vmatpush1.bf16.msra.mxu1 %v14188_v37  ;;  %6392 = vmatprep.subr.bf16.mxu0 %v14189_v27  ;;  %v14230_v37 = vld [vmem:[#allocation346_spill] sm:$0xff]  ;;  %v14231_v27 = vld [vmem:[#allocation347_spill] sm:$0xff] }
 0x6b9   :  { %6564 = vmatprep.subr.bf16.mxu1 %v14190_v51  ;;  %v14232_v51 = vld [vmem:[#allocation348_spill] sm:$0xff] }
 0x6bb   :  { %6393 = vmatpush1.bf16.msra.mxu0 %v14191_v31  ;;  %v14233_v31 = vld [vmem:[#allocation349_spill] sm:$0xff] }
 0x6bc   :  { %6565 = vmatpush1.bf16.msra.mxu1 %v14192_v53  ;;  %6394 = vmatprep.subr.bf16.mxu0 %v14193_v18  ;;  %v14234_v53 = vld [vmem:[#allocation350_spill] sm:$0xff]  ;;  %v14235_v18 = vld [vmem:[#allocation351_spill] sm:$0xff] }
 0x6bd   :  { %6566 = vmatprep.subr.bf16.mxu1 %v14194_v28  ;;  %v14236_v28 = vld [vmem:[#allocation352_spill] sm:$0xff] }
 0x6bf   :  { %6395 = vmatpush1.bf16.msra.mxu0 %v14195_v41  ;;  %v14237_v41 = vld [vmem:[#allocation353_spill] sm:$0xff] }
 0x6c0   :  { %6567 = vmatpush1.bf16.msra.mxu1 %v14196_v5  ;;  %6407 = vmatprep.subr.bf16.mxu0 %v14197_v8  ;;  %v14238_v5 = vld [vmem:[#allocation354_spill] sm:$0xff]  ;;  %v14239_v8 = vld [vmem:[#allocation355_spill] sm:$0xff] }
 0x6c1   :  { %6579 = vmatprep.subr.bf16.mxu1 %v14198_v9  ;;  %v14240_v9 = vld [vmem:[#allocation356_spill] sm:$0xff] }
 0x6c2   :  { %6397 = vmatmul.mubr.bf16.vlgmr.msra.gmra.mrb[60].mxu0 %v13602_v20 }
 0x6c3   :  { %6569 = vmatmul.mubr.bf16.vlgmr.msra.gmra.mrb[60].mxu1 %v13602_v20  ;;  %6408 = vmatpush1.bf16.msra.mxu0 %v14199_v33  ;;  %v14207_v20 = vld [vmem:[#allocation323_spill] sm:$0xff]  ;;  %v14241_v33 = vld [vmem:[#allocation357_spill] sm:$0xff] }
 0x6c4   :  { %6439 = vmatprep.mubr.bf16.mxu0 %v9778_v60  ;;  %6580 = vmatpush1.bf16.msra.mxu1 %v14200_v40  ;;  %v14242_v40 = vld [vmem:[#allocation358_spill] sm:$0xff] }
 0x6c5   :  { %6611 = vmatprep.mubr.bf16.mxu1 %v9778_v60  ;;  %6409 = vmatprep.subr.bf16.mxu0 %v14201_v10  ;;  %v14211_v60 = vld [vmem:[#allocation327_spill] sm:$0xff] }
 0x6c6   :  { %6581 = vmatprep.subr.bf16.mxu1 %v14202_v16  ;;  %v14243_v10 = vld [vmem:[#allocation359_spill] sm:$0xff]  ;;  %v14244_v16 = vld [vmem:[#allocation360_spill] sm:$0xff] }
 0x6c7   :  { %6410 = vmatpush1.bf16.msra.mxu0 %v14203_v3  ;;  %v14245_v3 = vld [vmem:[#allocation361_spill] sm:$0xff] }
 0x6c8   :  { %6582 = vmatpush1.bf16.msra.mxu1 %v14204_v58  ;;  %6411 = vmatprep.subr.bf16.mxu0 %v14205_v0  ;;  %v14246_v58 = vld [vmem:[#allocation362_spill] sm:$0xff]  ;;  %v14247_v0 = vld [vmem:[#allocation363_spill] sm:$0xff] }
 0x6c9   :  { %6583 = vmatprep.subr.bf16.mxu1 %v14206_v57  ;;  %v14248_v57 = vld [vmem:[#allocation364_spill] sm:$0xff] }
 0x6cb   :  { %6412 = vmatpush1.bf16.msra.mxu0 %v14207_v20  ;;  %v14249_v20 = vld [vmem:[#allocation365_spill] sm:$0xff] }
 0x6cc   :  { %6584 = vmatpush1.bf16.msra.mxu1 %v14208_v30  ;;  %6413 = vmatprep.subr.bf16.mxu0 %v14209_v2  ;;  %v14250_v30 = vld [vmem:[#allocation366_spill] sm:$0xff]  ;;  %v14251_v2 = vld [vmem:[#allocation367_spill] sm:$0xff] }
 0x6cd   :  { %6585 = vmatprep.subr.bf16.mxu1 %v14210_v32  ;;  %v14252_v32 = vld [vmem:[#allocation368_spill] sm:$0xff] }
 0x6cf   :  { %6414 = vmatpush1.bf16.msra.mxu0 %v14211_v60  ;;  %v14253_v60 = vld [vmem:[#allocation369_spill] sm:$0xff] }
 0x6d0   :  { %6586 = vmatpush1.bf16.msra.mxu1 %v14212_v61  ;;  %6415 = vmatprep.subr.bf16.mxu0 %v14213_v59  ;;  %v14254_v61 = vld [vmem:[#allocation370_spill] sm:$0xff]  ;;  %v14255_v59 = vld [vmem:[#allocation371_spill] sm:$0xff] }
 0x6d1   :  { %6587 = vmatprep.subr.bf16.mxu1 %v14214_v55  ;;  %v14256_v55 = vld [vmem:[#allocation372_spill] sm:$0xff] }
 0x6d3   :  { %6416 = vmatpush1.bf16.msra.mxu0 %v14215_v22  ;;  %v14257_v22 = vld [vmem:[#allocation373_spill] sm:$0xff] }
 0x6d4   :  { %6588 = vmatpush1.bf16.msra.mxu1 %v14216_v23  ;;  %6417 = vmatprep.subr.bf16.mxu0 %v14217_v50  ;;  %v14258_v23 = vld [vmem:[#allocation374_spill] sm:$0xff]  ;;  %v14259_v50 = vld [vmem:[#allocation375_spill] sm:$0xff] }
 0x6d5   :  { %6589 = vmatprep.subr.bf16.mxu1 %v14218_v47  ;;  %v14260_v47 = vld [vmem:[#allocation376_spill] sm:$0xff] }
 0x6d7   :  { %6418 = vmatpush1.bf16.msra.mxu0 %v14219_v26  ;;  %v14261_v26 = vld [vmem:[#allocation377_spill] sm:$0xff] }
 0x6d8   :  { %6590 = vmatpush1.bf16.msra.mxu1 %v14220_v14  ;;  %6419 = vmatprep.subr.bf16.mxu0 %v14221_v36  ;;  %v14262_v14 = vld [vmem:[#allocation378_spill] sm:$0xff]  ;;  %v14263_v36 = vld [vmem:[#allocation379_spill] sm:$0xff] }
 0x6d9   :  { %6591 = vmatprep.subr.bf16.mxu1 %v14222_v6  ;;  %v14264_v6 = vld [vmem:[#allocation380_spill] sm:$0xff] }
 0x6db   :  { %6420 = vmatpush1.bf16.msra.mxu0 %v14223_v44  ;;  %v14265_v44 = vld [vmem:[#allocation381_spill] sm:$0xff] }
 0x6dc   :  { %6592 = vmatpush1.bf16.msra.mxu1 %v14224_v35  ;;  %6421 = vmatprep.subr.bf16.mxu0 %v14225_v15  ;;  %v14266_v35 = vld [vmem:[#allocation382_spill] sm:$0xff]  ;;  %v14267_v15 = vld [vmem:[#allocation383_spill] sm:$0xff] }
 0x6dd   :  { %6593 = vmatprep.subr.bf16.mxu1 %v14226_v48  ;;  %v14268_v48 = vld [vmem:[#allocation384_spill] sm:$0xff] }
 0x6df   :  { %6422 = vmatpush1.bf16.msra.mxu0 %v14227_v46  ;;  %v14269_v46 = vld [vmem:[#allocation385_spill] sm:$0xff] }
 0x6e0   :  { %6594 = vmatpush1.bf16.msra.mxu1 %v14228_v25  ;;  %6423 = vmatprep.subr.bf16.mxu0 %v14229_v56  ;;  %v14270_v25 = vld [vmem:[#allocation386_spill] sm:$0xff]  ;;  %v14272_v56 = vld [vmem:[#allocation388_spill] sm:$0xff] }
 0x6e1   :  { %6595 = vmatprep.subr.bf16.mxu1 %v14230_v37  ;;  %v14273_v37 = vld [vmem:[#allocation389_spill] sm:$0xff] }
 0x6e3   :  { %6424 = vmatpush1.bf16.msra.mxu0 %v14231_v27  ;;  %v14274_v27 = vld [vmem:[#allocation390_spill] sm:$0xff] }
 0x6e4   :  { %6596 = vmatpush1.bf16.msra.mxu1 %v14232_v51  ;;  %6425 = vmatprep.subr.bf16.mxu0 %v14233_v31  ;;  %v14276_v51 = vld [vmem:[#allocation392_spill] sm:$0xff]  ;;  %v14277_v31 = vld [vmem:[#allocation393_spill] sm:$0xff] }
 0x6e5   :  { %6597 = vmatprep.subr.bf16.mxu1 %v14234_v53  ;;  %v14278_v53 = vld [vmem:[#allocation394_spill] sm:$0xff] }
 0x6e7   :  { %6426 = vmatpush1.bf16.msra.mxu0 %v14235_v18  ;;  %v14279_v18 = vld [vmem:[#allocation395_spill] sm:$0xff] }
 0x6e8   :  { %6598 = vmatpush1.bf16.msra.mxu1 %v14236_v28  ;;  %6427 = vmatprep.subr.bf16.mxu0 %v14237_v41  ;;  %v14280_v28 = vld [vmem:[#allocation396_spill] sm:$0xff]  ;;  %v14281_v41 = vld [vmem:[#allocation397_spill] sm:$0xff] }
 0x6e9   :  { %6599 = vmatprep.subr.bf16.mxu1 %v14238_v5  ;;  %v14282_v5 = vld [vmem:[#allocation398_spill] sm:$0xff] }
 0x6eb   :  { %6428 = vmatpush1.bf16.msra.mxu0 %v14239_v8  ;;  %v14283_v8 = vld [vmem:[#allocation399_spill] sm:$0xff] }
 0x6ec   :  { %6600 = vmatpush1.bf16.msra.mxu1 %v14240_v9  ;;  %6429 = vmatprep.subr.bf16.mxu0 %v14241_v33  ;;  %v14284_v9 = vld [vmem:[#allocation400_spill] sm:$0xff]  ;;  %v14285_v33 = vld [vmem:[#allocation401_spill] sm:$0xff] }
 0x6ed   :  { %6601 = vmatprep.subr.bf16.mxu1 %v14242_v40  ;;  %v14286_v40 = vld [vmem:[#allocation402_spill] sm:$0xff] }
 0x6ef   :  { %6430 = vmatpush1.bf16.msra.mxu0 %v14243_v10  ;;  %v14287_v10 = vld [vmem:[#allocation403_spill] sm:$0xff] }
 0x6f0   :  { %6602 = vmatpush1.bf16.msra.mxu1 %v14244_v16  ;;  %6431 = vmatprep.subr.bf16.mxu0 %v14245_v3  ;;  %v14288_v16 = vld [vmem:[#allocation404_spill] sm:$0xff]  ;;  %v14289_v3 = vld [vmem:[#allocation405_spill] sm:$0xff] }
 0x6f1   :  { %6603 = vmatprep.subr.bf16.mxu1 %v14246_v58  ;;  %v14290_v58 = vld [vmem:[#allocation406_spill] sm:$0xff] }
 0x6f3   :  { %6432 = vmatpush1.bf16.msra.mxu0 %v14247_v0  ;;  %v14291_v0 = vld [vmem:[#allocation407_spill] sm:$0xff] }
 0x6f4   :  { %6604 = vmatpush1.bf16.msra.mxu1 %v14248_v57  ;;  %6433 = vmatprep.subr.bf16.mxu0 %v14249_v20  ;;  %v14292_v57 = vld [vmem:[#allocation408_spill] sm:$0xff]  ;;  %v14293_v20 = vld [vmem:[#allocation409_spill] sm:$0xff] }
 0x6f5   :  { %6605 = vmatprep.subr.bf16.mxu1 %v14250_v30  ;;  %v14294_v30 = vld [vmem:[#allocation410_spill] sm:$0xff] }
 0x6f7   :  { %6434 = vmatpush1.bf16.msra.mxu0 %v14251_v2  ;;  %v14295_v2 = vld [vmem:[#allocation411_spill] sm:$0xff] }
 0x6f8   :  { %6606 = vmatpush1.bf16.msra.mxu1 %v14252_v32  ;;  %6435 = vmatprep.subr.bf16.mxu0 %v14253_v60  ;;  %v14296_v32 = vld [vmem:[#allocation412_spill] sm:$0xff]  ;;  %v14297_v60 = vld [vmem:[#allocation413_spill] sm:$0xff] }
 0x6f9   :  { %6607 = vmatprep.subr.bf16.mxu1 %v14254_v61  ;;  %v14298_v61 = vld [vmem:[#allocation414_spill] sm:$0xff] }
 0x6fb   :  { %6436 = vmatpush1.bf16.msra.mxu0 %v14255_v59  ;;  %v14299_v59 = vld [vmem:[#allocation415_spill] sm:$0xff] }
 0x6fc   :  { %6608 = vmatpush1.bf16.msra.mxu1 %v14256_v55  ;;  %6437 = vmatprep.subr.bf16.mxu0 %v14257_v22  ;;  %v14300_v55 = vld [vmem:[#allocation416_spill] sm:$0xff]  ;;  %v14301_v22 = vld [vmem:[#allocation417_spill] sm:$0xff] }
 0x6fd   :  { %6609 = vmatprep.subr.bf16.mxu1 %v14258_v23  ;;  %v14302_v23 = vld [vmem:[#allocation418_spill] sm:$0xff] }
 0x6ff   :  { %6438 = vmatpush1.bf16.msra.mxu0 %v14259_v50  ;;  %v14303_v50 = vld [vmem:[#allocation419_spill] sm:$0xff] }
 0x700   :  { %6610 = vmatpush1.bf16.msra.mxu1 %v14260_v47  ;;  %6450 = vmatprep.subr.bf16.mxu0 %v14261_v26  ;;  %v14304_v47 = vld [vmem:[#allocation420_spill] sm:$0xff]  ;;  %v14305_v26 = vld [vmem:[#allocation421_spill] sm:$0xff] }
 0x701   :  { %6622 = vmatprep.subr.bf16.mxu1 %v14262_v14  ;;  %v14306_v14 = vld [vmem:[#allocation422_spill] sm:$0xff] }
 0x702   :  { %6440 = vmatmul.mubr.bf16.vlgmr.msra.gmra.mrb[60].mxu0 %v9775_v34 }
 0x703   :  { %6612 = vmatmul.mubr.bf16.vlgmr.msra.gmra.mrb[60].mxu1 %v9775_v34  ;;  %6451 = vmatpush1.bf16.msra.mxu0 %v14263_v36  ;;  %v14271_v34 = vld [vmem:[#allocation387_spill] sm:$0xff] }
 0x704   :  { %6482 = vmatprep.mubr.bf16.mxu0 %v14010_v54  ;;  %6623 = vmatpush1.bf16.msra.mxu1 %v14264_v6  ;;  %v14307_v36 = vld [vmem:[#allocation423_spill] sm:$0xff]  ;;  %v14308_v6 = vld [vmem:[#allocation424_spill] sm:$0xff] }
 0x705   :  { %6654 = vmatprep.mubr.bf16.mxu1 %v14010_v54  ;;  %6452 = vmatprep.subr.bf16.mxu0 %v14265_v44  ;;  %v14275_v54 = vld [vmem:[#allocation391_spill] sm:$0xff]  ;;  %v14309_v44 = vld [vmem:[#allocation425_spill] sm:$0xff] }
 0x706   :  { %6624 = vmatprep.subr.bf16.mxu1 %v14266_v35  ;;  %v14310_v35 = vld [vmem:[#allocation426_spill] sm:$0xff] }
 0x707   :  { %6453 = vmatpush1.bf16.msra.mxu0 %v14267_v15  ;;  %v14311_v15 = vld [vmem:[#allocation427_spill] sm:$0xff] }
 0x708   :  { %6625 = vmatpush1.bf16.msra.mxu1 %v14268_v48  ;;  %6454 = vmatprep.subr.bf16.mxu0 %v14269_v46  ;;  %v14312_v48 = vld [vmem:[#allocation428_spill] sm:$0xff]  ;;  %v14313_v46 = vld [vmem:[#allocation429_spill] sm:$0xff] }
 0x709   :  { %6626 = vmatprep.subr.bf16.mxu1 %v14270_v25  ;;  %v14314_v25 = vld [vmem:[#allocation430_spill] sm:$0xff] }
 0x70b   :  { %6455 = vmatpush1.bf16.msra.mxu0 %v14271_v34  ;;  %v14315_v34 = vld [vmem:[#allocation431_spill] sm:$0xff] }
 0x70c   :  { %6627 = vmatpush1.bf16.msra.mxu1 %v14272_v56  ;;  %6456 = vmatprep.subr.bf16.mxu0 %v14273_v37  ;;  %v14316_v56 = vld [vmem:[#allocation432_spill] sm:$0xff]  ;;  %v14317_v37 = vld [vmem:[#allocation433_spill] sm:$0xff] }
 0x70d   :  { %6628 = vmatprep.subr.bf16.mxu1 %v14274_v27  ;;  %v14318_v27 = vld [vmem:[#allocation434_spill] sm:$0xff] }
 0x70f   :  { %6457 = vmatpush1.bf16.msra.mxu0 %v14275_v54  ;;  %v14319_v54 = vld [vmem:[#allocation435_spill] sm:$0xff] }
 0x710   :  { %6629 = vmatpush1.bf16.msra.mxu1 %v14276_v51  ;;  %6458 = vmatprep.subr.bf16.mxu0 %v14277_v31  ;;  %v14320_v51 = vld [vmem:[#allocation436_spill] sm:$0xff]  ;;  %v14321_v31 = vld [vmem:[#allocation437_spill] sm:$0xff] }
 0x711   :  { %6630 = vmatprep.subr.bf16.mxu1 %v14278_v53  ;;  %v14322_v53 = vld [vmem:[#allocation438_spill] sm:$0xff] }
 0x713   :  { %6459 = vmatpush1.bf16.msra.mxu0 %v14279_v18  ;;  %v14323_v18 = vld [vmem:[#allocation439_spill] sm:$0xff] }
 0x714   :  { %6631 = vmatpush1.bf16.msra.mxu1 %v14280_v28  ;;  %6460 = vmatprep.subr.bf16.mxu0 %v14281_v41  ;;  %v14324_v28 = vld [vmem:[#allocation440_spill] sm:$0xff]  ;;  %v14325_v41 = vld [vmem:[#allocation441_spill] sm:$0xff] }
 0x715   :  { %6632 = vmatprep.subr.bf16.mxu1 %v14282_v5  ;;  %v14326_v5 = vld [vmem:[#allocation442_spill] sm:$0xff] }
 0x717   :  { %6461 = vmatpush1.bf16.msra.mxu0 %v14283_v8  ;;  %v14327_v8 = vld [vmem:[#allocation443_spill] sm:$0xff] }
 0x718   :  { %6633 = vmatpush1.bf16.msra.mxu1 %v14284_v9  ;;  %6462 = vmatprep.subr.bf16.mxu0 %v14285_v33  ;;  %v14328_v9 = vld [vmem:[#allocation444_spill] sm:$0xff]  ;;  %v14329_v33 = vld [vmem:[#allocation445_spill] sm:$0xff] }
 0x719   :  { %6634 = vmatprep.subr.bf16.mxu1 %v14286_v40  ;;  %v14330_v40 = vld [vmem:[#allocation446_spill] sm:$0xff] }
 0x71b   :  { %6463 = vmatpush1.bf16.msra.mxu0 %v14287_v10  ;;  %v14331_v10 = vld [vmem:[#allocation447_spill] sm:$0xff] }
 0x71c   :  { %6635 = vmatpush1.bf16.msra.mxu1 %v14288_v16  ;;  %6464 = vmatprep.subr.bf16.mxu0 %v14289_v3  ;;  %v14332_v16 = vld [vmem:[#allocation448_spill] sm:$0xff]  ;;  %v14333_v3 = vld [vmem:[#allocation449_spill] sm:$0xff] }
 0x71d   :  { %6636 = vmatprep.subr.bf16.mxu1 %v14290_v58  ;;  %v14334_v58 = vld [vmem:[#allocation450_spill] sm:$0xff] }
 0x71f   :  { %6465 = vmatpush1.bf16.msra.mxu0 %v14291_v0  ;;  %v14336_v0 = vld [vmem:[#allocation452_spill] sm:$0xff] }
 0x720   :  { %6637 = vmatpush1.bf16.msra.mxu1 %v14292_v57  ;;  %6466 = vmatprep.subr.bf16.mxu0 %v14293_v20  ;;  %v14337_v57 = vld [vmem:[#allocation453_spill] sm:$0xff]  ;;  %v14338_v20 = vld [vmem:[#allocation454_spill] sm:$0xff] }
 0x721   :  { %6638 = vmatprep.subr.bf16.mxu1 %v14294_v30  ;;  %v14340_v30 = vld [vmem:[#allocation456_spill] sm:$0xff] }
 0x723   :  { %6467 = vmatpush1.bf16.msra.mxu0 %v14295_v2  ;;  %v14341_v2 = vld [vmem:[#allocation457_spill] sm:$0xff] }
 0x724   :  { %6639 = vmatpush1.bf16.msra.mxu1 %v14296_v32  ;;  %6468 = vmatprep.subr.bf16.mxu0 %v14297_v60  ;;  %v14342_v32 = vld [vmem:[#allocation458_spill] sm:$0xff]  ;;  %v14343_v60 = vld [vmem:[#allocation459_spill] sm:$0xff] }
 0x725   :  { %6640 = vmatprep.subr.bf16.mxu1 %v14298_v61  ;;  %v14344_v61 = vld [vmem:[#allocation460_spill] sm:$0xff] }
 0x727   :  { %6469 = vmatpush1.bf16.msra.mxu0 %v14299_v59  ;;  %v14345_v59 = vld [vmem:[#allocation461_spill] sm:$0xff] }
 0x728   :  { %6641 = vmatpush1.bf16.msra.mxu1 %v14300_v55  ;;  %6470 = vmatprep.subr.bf16.mxu0 %v14301_v22  ;;  %v14346_v22 = vld [vmem:[#allocation462_spill] sm:$0xff] }
 0x729   :  { %6642 = vmatprep.subr.bf16.mxu1 %v14302_v23 }
 0x72b   :  { %6471 = vmatpush1.bf16.msra.mxu0 %v14303_v50 }
 0x72c   :  { %6643 = vmatpush1.bf16.msra.mxu1 %v14304_v47  ;;  %6472 = vmatprep.subr.bf16.mxu0 %v14305_v26 }
 0x72d   :  { %6644 = vmatprep.subr.bf16.mxu1 %v14306_v14 }
 0x72f   :  { %6473 = vmatpush1.bf16.msra.mxu0 %v14307_v36  ;;  %v14347_v36 = vld [vmem:[#allocation463_spill] sm:$0xff] }
 0x730   :  { %6645 = vmatpush1.bf16.msra.mxu1 %v14308_v6  ;;  %6474 = vmatprep.subr.bf16.mxu0 %v14309_v44 }
 0x731   :  { %6646 = vmatprep.subr.bf16.mxu1 %v14310_v35  ;;  %v14348_v35 = vld [vmem:[#allocation464_spill] sm:$0xff] }
 0x733   :  { %6475 = vmatpush1.bf16.msra.mxu0 %v14311_v15 }
 0x734   :  { %6647 = vmatpush1.bf16.msra.mxu1 %v14312_v48  ;;  %6476 = vmatprep.subr.bf16.mxu0 %v14313_v46  ;;  %v14349_v48 = vld [vmem:[#allocation465_spill] sm:$0xff] }
 0x735   :  { %6648 = vmatprep.subr.bf16.mxu1 %v14314_v25 }
 0x737   :  { %6477 = vmatpush1.bf16.msra.mxu0 %v14315_v34  ;;  %v14350_v34 = vld [vmem:[#allocation466_spill] sm:$0xff] }
 0x738   :  { %6649 = vmatpush1.bf16.msra.mxu1 %v14316_v56  ;;  %6478 = vmatprep.subr.bf16.mxu0 %v14317_v37  ;;  %v14351_v37 = vld [vmem:[#allocation467_spill] sm:$0xff] }
 0x739   :  { %6650 = vmatprep.subr.bf16.mxu1 %v14318_v27  ;;  %v14352_v27 = vld [vmem:[#allocation468_spill] sm:$0xff] }
 0x73b   :  { %6479 = vmatpush1.bf16.msra.mxu0 %v14319_v54  ;;  %v14353_v54 = vld [vmem:[#allocation469_spill] sm:$0xff] }
 0x73c   :  { %6651 = vmatpush1.bf16.msra.mxu1 %v14320_v51  ;;  %6480 = vmatprep.subr.bf16.mxu0 %v14321_v31  ;;  %v14354_v51 = vld [vmem:[#allocation470_spill] sm:$0xff]  ;;  %v14355_v31 = vld [vmem:[#allocation471_spill] sm:$0xff] }
 0x73d   :  { %6652 = vmatprep.subr.bf16.mxu1 %v14322_v53  ;;  %v14356_v53 = vld [vmem:[#allocation472_spill] sm:$0xff] }
 0x73f   :  { %6481 = vmatpush1.bf16.msra.mxu0 %v14323_v18  ;;  %v14357_v18 = vld [vmem:[#allocation473_spill] sm:$0xff] }
 0x740   :  { %6653 = vmatpush1.bf16.msra.mxu1 %v14324_v28  ;;  %6493 = vmatprep.subr.bf16.mxu0 %v14325_v41  ;;  %v14358_v28 = vld [vmem:[#allocation474_spill] sm:$0xff]  ;;  %v14359_v41 = vld [vmem:[#allocation475_spill] sm:$0xff] }
 0x741   :  { %6665 = vmatprep.subr.bf16.mxu1 %v14326_v5  ;;  %v14360_v5 = vld [vmem:[#allocation476_spill] sm:$0xff] }
 0x742   :  { %6483 = vmatmul.mubr.bf16.vlgmr.msra.gmra.mrb[60].mxu0 %v14074_v39 }
 0x743   :  { %6655 = vmatmul.mubr.bf16.vlgmr.msra.gmra.mrb[60].mxu1 %v14074_v39  ;;  %6494 = vmatpush1.bf16.msra.mxu0 %v14327_v8  ;;  %v14335_v39 = vld [vmem:[#allocation451_spill] sm:$0xff]  ;;  %v14361_v8 = vld [vmem:[#allocation477_spill] sm:$0xff] }
 0x744   :  { %6525 = vmatprep.mubr.bf16.mxu0 %v10594_v7  ;;  %6666 = vmatpush1.bf16.msra.mxu1 %v14328_v9  ;;  %v14362_v9 = vld [vmem:[#allocation478_spill] sm:$0xff] }
 0x745   :  { %6697 = vmatprep.mubr.bf16.mxu1 %v10594_v7  ;;  %6495 = vmatprep.subr.bf16.mxu0 %v14329_v33  ;;  %v14339_v7 = vld [vmem:[#allocation455_spill] sm:$0xff] }
 0x746   :  { %6667 = vmatprep.subr.bf16.mxu1 %v14330_v40  ;;  %v14363_v33 = vld [vmem:[#allocation479_spill] sm:$0xff]  ;;  %v14364_v40 = vld [vmem:[#allocation480_spill] sm:$0xff] }
 0x747   :  { %6496 = vmatpush1.bf16.msra.mxu0 %v14331_v10  ;;  %v14365_v10 = vld [vmem:[#allocation481_spill] sm:$0xff] }
 0x748   :  { %6668 = vmatpush1.bf16.msra.mxu1 %v14332_v16  ;;  %6497 = vmatprep.subr.bf16.mxu0 %v14333_v3  ;;  %v14366_v16 = vld [vmem:[#allocation482_spill] sm:$0xff]  ;;  %v14367_v3 = vld [vmem:[#allocation483_spill] sm:$0xff] }
 0x749   :  { %6669 = vmatprep.subr.bf16.mxu1 %v14334_v58  ;;  %v14368_v58 = vld [vmem:[#allocation484_spill] sm:$0xff] }
 0x74b   :  { %6498 = vmatpush1.bf16.msra.mxu0 %v14335_v39  ;;  %v14369_v39 = vld [vmem:[#allocation485_spill] sm:$0xff] }
 0x74c   :  { %6670 = vmatpush1.bf16.msra.mxu1 %v14336_v0  ;;  %6499 = vmatprep.subr.bf16.mxu0 %v14337_v57  ;;  %v14370_v0 = vld [vmem:[#allocation486_spill] sm:$0xff]  ;;  %v14371_v57 = vld [vmem:[#allocation487_spill] sm:$0xff] }
 0x74d   :  { %6671 = vmatprep.subr.bf16.mxu1 %v14338_v20  ;;  %v14372_v20 = vld [vmem:[#allocation488_spill] sm:$0xff] }
 0x74f   :  { %6500 = vmatpush1.bf16.msra.mxu0 %v14339_v7  ;;  %v14373_v7 = vld [vmem:[#allocation489_spill] sm:$0xff] }
 0x750   :  { %6672 = vmatpush1.bf16.msra.mxu1 %v14340_v30  ;;  %6501 = vmatprep.subr.bf16.mxu0 %v14341_v2  ;;  %v14374_v30 = vld [vmem:[#allocation490_spill] sm:$0xff]  ;;  %v14375_v2 = vld [vmem:[#allocation491_spill] sm:$0xff] }
 0x751   :  { %6673 = vmatprep.subr.bf16.mxu1 %v14342_v32  ;;  %v8159_v32 = vld [vmem:[#allocation11 + $0xd8] sm:$0xff]  }
 0x753   :  { %6502 = vmatpush1.bf16.msra.mxu0 %v14343_v60  ;;  %v8145_v60 = vld [vmem:[#allocation11 + $0x60] sm:$0xff]  }
 0x754   :  { %6674 = vmatpush1.bf16.msra.mxu1 %v14344_v61  ;;  %6503 = vmatprep.subr.bf16.mxu0 %v14345_v59  ;;  %v8161_v61 = vld [vmem:[#allocation11 + $0xe0] sm:$0xff]  }
 0x755   :  { %v12005_v55 = vpop.f32.mrb[56].mxu0  ;;  %6675 = vmatprep.subr.bf16.mxu1 %v14346_v22  ;;  %v8146_v59 = vld [vmem:[#allocation11 + $0x20] sm:$0xff]   ;;  %v8147_v22 = vld [vmem:[#allocation11 + $0x68] sm:$0xff]  }
 0x756   :  { %v12008_v23 = vpop.f32.mrb[56].mxu1  ;;  %v12010_v50 = vpop.f32.mrb[57].mxu0 }
 0x757   :  { %v6708_v47 = vmax.f32 %v12005_v55, %v12008_v23  ;;  %v12014_v26 = vpop.f32.mrb[57].mxu1  ;;  %v12016_v14 = vpop.f32.mrb[58].mxu0  ;;  %6504 = vmatpush1.bf16.msra.mxu0 %v14347_v36  ;;  %v8148_v36 = vld [vmem:[#allocation11 + $0x28] sm:$0xff]  }
 0x758   :  { %v6709_v6 = vmax.f32 %v12010_v50, %v12014_v26  ;;  %v12021_v44 = vpop.f32.mrb[58].mxu1  ;;  %6676 = vmatpush1.bf16.msra.mxu1 %v14348_v35  ;;  %v12024_v15 = vpop.f32.mrb[59].mxu0  ;;  %6505 = vmatprep.subr.bf16.mxu0 %v14349_v48  ;;  %v8149_v35 = vld [vmem:[#allocation11 + $0x70] sm:$0xff]  }
 0x759   :  { %v6710_v46 = vmax.f32 %v12016_v14, %v12021_v44  ;;  %v12029_v25 = vpop.f32.mrb[59].mxu1  ;;  %6677 = vmatprep.subr.bf16.mxu1 %v14350_v34  ;;  %v8150_v48 = vld [vmem:[#allocation11 + $0x30] sm:$0xff]   ;;  %v8151_v34 = vld [vmem:[#allocation11 + $0x78] sm:$0xff]  }
 0x75a   :  { %v6711_v56 = vmax.f32 %v12024_v15, %v12029_v25  ;;  %v8174_v15 = vld [vmem:[%s12133_s7 + $0x28] sm:$0xff]   ;;  %v8175_v25 = vld [vmem:[%s12133_s7 + $0x30] sm:$0xff]  }
 0x75b   :  { %6506 = vmatpush1.bf16.msra.mxu0 %v14351_v37  ;;  %v8152_v37 = vld [vmem:[#allocation11 + $0x38] sm:$0xff]  }
 0x75c   :  { %6678 = vmatpush1.bf16.msra.mxu1 %v14352_v27  ;;  %6507 = vmatprep.subr.bf16.mxu0 %v14353_v54  ;;  %v8162_v27 = vld [vmem:[#allocation11 + $0xa0] sm:$0xff]   ;;  %v8163_v54 = vld [vmem:[#allocation11 + $0xe8] sm:$0xff]  }
 0x75d   :  { %6679 = vmatprep.subr.bf16.mxu1 %v14354_v51  ;;  %v8164_v51 = vld [vmem:[#allocation11 + $0xa8] sm:$0xff]  }
 0x75f   :  { %6508 = vmatpush1.bf16.msra.mxu0 %v14355_v31  ;;  %v8165_v31 = vld [vmem:[#allocation11 + $0xf0] sm:$0xff]  }
 0x760   :  { %6680 = vmatpush1.bf16.msra.mxu1 %v14356_v53  ;;  %6509 = vmatprep.subr.bf16.mxu0 %v14357_v18  ;;  %v8166_v53 = vld [vmem:[#allocation11 + $0xb0] sm:$0xff]   ;;  %v8167_v18 = vld [vmem:[#allocation11 + $0xf8] sm:$0xff]  }
 0x761   :  { %6681 = vmatprep.subr.bf16.mxu1 %v14358_v28  ;;  %v8168_v28 = vld [vmem:[#allocation11 + $0xb8] sm:$0xff]  }
 0x763   :  { %6510 = vmatpush1.bf16.msra.mxu0 %v14359_v41  ;;  %v8169_v41 = vld [vmem:[%s12133_s7] sm:$0xff]  }
 0x764   :  { %6682 = vmatpush1.bf16.msra.mxu1 %v14360_v5  ;;  %6511 = vmatprep.subr.bf16.mxu0 %v14361_v8  ;;  %v8358_v5 = vmov 0.0   ;;  %v8171_v8 = vld [vmem:[%s12133_s7 + $0x10] sm:$0xff]  }
 0x765   :  { %6683 = vmatprep.subr.bf16.mxu1 %v14362_v9  ;;  %v8172_v9 = vld [vmem:[%s12133_s7 + $0x18] sm:$0xff]  }
 0x767   :  { %6512 = vmatpush1.bf16.msra.mxu0 %v14363_v33  ;;  %v8173_v33 = vld [vmem:[%s12133_s7 + $0x20] sm:$0xff]  }
 0x768   :  { %6684 = vmatpush1.bf16.msra.mxu1 %v14364_v40  ;;  %6513 = vmatprep.subr.bf16.mxu0 %v14365_v10  ;;  %v6720_v40 = vld [vmem:[#allocation9 + $0x2] sm:$0x3] }
 0x769   :  { %6685 = vmatprep.subr.bf16.mxu1 %v14366_v16 }
 0x76b   :  { %6514 = vmatpush1.bf16.msra.mxu0 %v14367_v3 }
 0x76c   :  { %6686 = vmatpush1.bf16.msra.mxu1 %v14368_v58  ;;  %6515 = vmatprep.subr.bf16.mxu0 %v14369_v39  ;;  %v6725_v39 = vrot.slane %v6720_v40, %v14095_v21 }
 0x76d   :  { %6687 = vmatprep.subr.bf16.mxu1 %v14370_v0 }
 0x76f   :  { %6516 = vmatpush1.bf16.msra.mxu0 %v14371_v57 }
 0x770   :  { %6688 = vmatpush1.bf16.msra.mxu1 %v14372_v20  ;;  %6517 = vmatprep.subr.bf16.mxu0 %v14373_v7  ;;  %v6729_v7 = vrot.slane %v6720_v40, %v14097_v52 }
 0x771   :  { %6689 = vmatprep.subr.bf16.mxu1 %v14374_v30 }
 0x773   :  { %6518 = vmatpush1.bf16.msra.mxu0 %v11441_v29  ;;  %v8137_v29 = vld [vmem:[#allocation11 + $0x40] sm:$0xff]  }
 0x774   :  { %6690 = vmatpush1.bf16.msra.mxu1 %v11445_v43  ;;  %6519 = vmatprep.subr.bf16.mxu0 %v11447_v49  ;;  %v8153_v43 = vld [vmem:[#allocation11 + $0xc0] sm:$0xff]  }
 0x775   :  { %6691 = vmatprep.subr.bf16.mxu1 %v14375_v2  ;;  %v8138_v49 = vld [vmem:[#allocation11] sm:$0xff]  }
 0x777   :  { %6520 = vmatpush1.bf16.msra.mxu0 %v11453_v45  ;;  %v8139_v45 = vld [vmem:[#allocation11 + $0x48] sm:$0xff]  }
 0x778   :  { %6692 = vmatpush1.bf16.msra.mxu1 %v11457_v63  ;;  %6521 = vmatprep.subr.bf16.mxu0 %v11459_v11  ;;  %v8154_v63 = vld [vmem:[#allocation11 + $0x80] sm:$0xff]   ;;  %v8155_v11 = vld [vmem:[#allocation11 + $0xc8] sm:$0xff]  }
 0x779   :  { %6693 = vmatprep.subr.bf16.mxu1 %v11462_v42  ;;  %v8140_v42 = vld [vmem:[#allocation11 + $0x8] sm:$0xff]  }
 0x77b   :  { %6522 = vmatpush1.bf16.msra.mxu0 %v11465_v62  ;;  %v8141_v62 = vld [vmem:[#allocation11 + $0x50] sm:$0xff]  }
 0x77c   :  { %6694 = vmatpush1.bf16.msra.mxu1 %v11469_v4  ;;  %6523 = vmatprep.subr.bf16.mxu0 %v11471_v1  ;;  %v8157_v4 = vld [vmem:[#allocation11 + $0xd0] sm:$0xff]  }
 0x77d   :  { %6695 = vmatprep.subr.bf16.mxu1 %v11474_v13  ;;  %v8142_v1 = vld [vmem:[#allocation11 + $0x10] sm:$0xff]   ;;  %v8143_v13 = vld [vmem:[#allocation11 + $0x58] sm:$0xff]  }
 0x77f   :  { %6524 = vmatpush1.bf16.msra.mxu0 %v11477_v17  ;;  %v8156_v17 = vld [vmem:[#allocation11 + $0x88] sm:$0xff]  }
 0x780   :  { %6696 = vmatpush1.bf16.msra.mxu1 %v11481_v12  ;;  %7937 = vmatprep.subr.bf16.mxu0 %v8137_v29  ;;  %v8158_v12 = vld [vmem:[#allocation11 + $0x90] sm:$0xff]  }
 0x781   :  { %7959 = vmatprep.subr.bf16.mxu1 %v8153_v43 }
 0x782   :  { %6526 = vmatmul.mubr.bf16.vlgmr.msra.gmra.mrb[60].mxu0 %v14134_v24 }
 0x783   :  { %6698 = vmatmul.mubr.bf16.vlgmr.msra.gmra.mrb[60].mxu1 %v14134_v24  ;;  %7938 = vmatpush3.bf16.msra.mxu0 %v8138_v49  ;;  %v8144_v24 = vld [vmem:[#allocation11 + $0x18] sm:$0xff]  }
 0x784   :  { %7043 = vmatprep.mubr.bf16.mxu0 %v11744_v19  ;;  %7939 = vmatprep.subr.bf16.mxu0 %v8139_v45  ;;  %v8160_v19 = vld [vmem:[#allocation11 + $0x98] sm:$0xff]  }
 0x785   :  { %7960 = vmatpush3.bf16.msra.mxu1 %v8154_v63 }
 0x786   :  { %7961 = vmatprep.subr.bf16.mxu1 %v8155_v11 }
 0x787   :  { %7940 = vmatpush3.bf16.msra.mxu0 %v8140_v42 }
 0x788   :  { %7941 = vmatprep.subr.bf16.mxu0 %v8141_v62 }
 0x789   :  { %7962 = vmatpush3.bf16.msra.mxu1 %v8156_v17 }
 0x78a   :  { %7963 = vmatprep.subr.bf16.mxu1 %v8157_v4 }
 0x78b   :  { %7942 = vmatpush3.bf16.msra.mxu0 %v8142_v1 }
 0x78c   :  { %7943 = vmatprep.subr.bf16.mxu0 %v8143_v13 }
 0x78d   :  { %7964 = vmatpush3.bf16.msra.mxu1 %v8158_v12  ;;  %v7895_v12 = vld [vmem:[#allocation12] ss:$0 sm:$0xff] }
 0x78e   :  { %7965 = vmatprep.subr.bf16.mxu1 %v8159_v32 }
 0x78f   :  { %7944 = vmatpush3.bf16.msra.mxu0 %v8144_v24 }
 0x790   :  { %7945 = vmatprep.subr.bf16.mxu0 %v8145_v60 }
 0x791   :  { %7966 = vmatpush3.bf16.msra.mxu1 %v8160_v19 }
 0x792   :  { %7967 = vmatprep.subr.bf16.mxu1 %v8161_v61 }
 0x793   :  { %7946 = vmatpush3.bf16.msra.mxu0 %v8146_v59 }
 0x794   :  { %7947 = vmatprep.subr.bf16.mxu0 %v8147_v22 }
 0x795   :  { %7968 = vmatpush3.bf16.msra.mxu1 %v8162_v27 }
 0x796   :  { %7969 = vmatprep.subr.bf16.mxu1 %v8163_v54  ;;  %v7928_v54 = vld [vmem:[#allocation14] ss:$0 sm:$0xff] }
 0x797   :  { %7948 = vmatpush3.bf16.msra.mxu0 %v8148_v36 }
 0x798   :  { %7949 = vmatprep.subr.bf16.mxu0 %v8149_v35 }
 0x799   :  { %7970 = vmatpush3.bf16.msra.mxu1 %v8164_v51 }
 0x79a   :  { %7971 = vmatprep.subr.bf16.mxu1 %v8165_v31 }
 0x79b   :  { %7950 = vmatpush3.bf16.msra.mxu0 %v8150_v48 }
 0x79c   :  { %7951 = vmatprep.subr.bf16.mxu0 %v8151_v34 }
 0x79d   :  { %7972 = vmatpush3.bf16.msra.mxu1 %v8166_v53 }
 0x79e   :  { %7973 = vmatprep.subr.bf16.mxu1 %v8167_v18 }
 0x79f   :  { %7952 = vmatpush3.bf16.msra.mxu0 %v8152_v37 }
 0x7a0   :  { %7990 = vmatprep.subr.bf16.mxu0 %v8358_v5 }
 0x7a1   :  { %7974 = vmatpush3.bf16.msra.mxu1 %v8168_v28 }
 0x7a2   :  { %7044 = vmatmul.mubr.bf16.vlgmr.msra.gmra.mrb[64].mxu0 %v11741_v38  ;;  %v8170_v38 = vld [vmem:[%s12133_s7 + $0x8] sm:$0xff]  }
 0x7a3   :  { %7991 = vmatpush3.bf16.msra.mxu0 %v8169_v41  ;;  %8006 = vmatprep.mubr.msk.bf16.mxu0 %vm8359_vm0, %v8358_v5 }
 0x7a4   :  { %7992 = vmatprep.subr.bf16.mxu0 %v8358_v5 }
 0x7a7   :  { %7993 = vmatpush3.bf16.msra.mxu0 %v8170_v38 }
 0x7a8   :  { %7994 = vmatprep.subr.bf16.mxu0 %v8358_v5 }
 0x7ab   :  { %7995 = vmatpush3.bf16.msra.mxu0 %v8171_v8 }
 0x7ac   :  { %7996 = vmatprep.subr.bf16.mxu0 %v8358_v5 }
 0x7af   :  { %7997 = vmatpush3.bf16.msra.mxu0 %v8172_v9 }
 0x7b0   :  { %7998 = vmatprep.subr.bf16.mxu0 %v8358_v5 }
 0x7b3   :  { %7999 = vmatpush3.bf16.msra.mxu0 %v8173_v33 }
 0x7b4   :  { %8000 = vmatprep.subr.bf16.mxu0 %v8358_v5 }
 0x7b7   :  { %8001 = vmatpush3.bf16.msra.mxu0 %v8174_v15 }
 0x7b8   :  { %8002 = vmatprep.subr.bf16.mxu0 %v8358_v5 }
 0x7bb   :  { %8003 = vmatpush3.bf16.msra.mxu0 %v8175_v25 }
 0x7bc   :  { %8004 = vmatprep.subr.bf16.mxu0 %v8358_v5 }
 0x855   :  { %v6527_v10 = vpop.f32.mrb[60].mxu0 }
 0x856   :  { %v6699_v16 = vpop.f32.mrb[60].mxu1  ;;  %v6529_v3 = vpop.f32.mrb[61].mxu0 }
 0x857   :  { %v6712_v58 = vmax.f32 %v6527_v10, %v6699_v16  ;;  %v6701_v0 = vpop.f32.mrb[61].mxu1  ;;  %v6531_v57 = vpop.f32.mrb[62].mxu0 }
 0x858   :  { %v6713_v20 = vmax.f32 %v6529_v3, %v6701_v0  ;;  %v6703_v30 = vpop.f32.mrb[62].mxu1  ;;  %v6533_v2 = vpop.f32.mrb[63].mxu0 }
 0x859   :  { %v6716_v29 = vmax.f32 %v6708_v47, %v6712_v58  ;;  %v6714_v43 = vmax.f32 %v6531_v57, %v6703_v30  ;;  %v6705_v49 = vpop.f32.mrb[63].mxu1 }
 0x85a   :  { %v6717_v45 = vmax.f32 %v6709_v6, %v6713_v20  ;;  %v6715_v63 = vmax.f32 %v6533_v2, %v6705_v49 }
 0x85b   :  { %v6732_v11 = vadd.f32 %v6725_v39, %v6716_v29  ;;  %v6718_v21 = vmax.f32 %v6710_v46, %v6714_v43 }
 0x85c   :  { %v6733_v42 = vadd.f32 %v6729_v7, %v6717_v45  ;;  %v6719_v52 = vmax.f32 %v6711_v56, %v6715_v63  ;;  %v8176_v56 = vld [vmem:[%s12133_s7 + $0x38] sm:$0xff]  }
 0x85d   :  { %v6734_v62 = vadd.f32 %v6725_v39, %v6718_v21  ;;  %v6736_v23 = vmax.f32 %v6732_v11, 0.0  ;;  %8005 = vmatpush3.bf16.msra.mxu0 %v8176_v56 }
 0x85e   :  { %v6735_v55 = vadd.f32 %v6729_v7, %v6719_v52  ;;  %v6737_v17 = vmax.f32 %v6733_v42, 0.0 }
 0x85f   :  { %v6738_v47 = vmax.f32 %v6734_v62, 0.0 }
 0x860   :  { %v6739_v4 = vmax.f32 %v6735_v55, 0.0 }
 0x861   :  { %v6740_v1 = vpack.c.bf16 %v6738_v47, %v6736_v23 }
 0x862   :  { %v6741_v50 = vpack.c.bf16 %v6739_v4, %v6737_v17 }
 0x864   :  { %7084 = vmatprep.mubr.bf16.mxu1 %v6741_v50 }
 0x865   :  { %7085 = vmatmul.mubr.bf16.vlgmr.msra.gmra.mrb[64].mxu1 %v6740_v1 }
 0x875   :  { %v7953_v26 = vpop.f32.mrb[64].mxu0 }
 0x876   :  { %v7954_v6 = vpop.f32.mrb[65].mxu0 }
 0x877   :  { %v7955_v13 = vadd.f32 %v7954_v6, %v7953_v26  ;;  %v7956_v14 = vpop.f32.mrb[66].mxu0 }
 0x878   :  { %v7957_v44 = vpop.f32.mrb[67].mxu0 }
 0x879   :  { %v7958_v46 = vadd.f32 %v7957_v44, %v7956_v14  ;;  %v7046_v60 = vadd.f32 %v7955_v13, %v7895_v12 }
 0x87b   :  { %v7049_v22 = vadd.f32 %v7958_v46, %v7895_v12 }
 0x938   :  { %v7975_v32 = vpop.f32.mrb[64].mxu1 }
 0x939   :  { %v7976_v24 = vpop.f32.mrb[65].mxu1 }
 0x93a   :  { %v7977_v19 = vadd.f32 %v7976_v24, %v7975_v32  ;;  %v7978_v61 = vpop.f32.mrb[66].mxu1 }
 0x93b   :  { %v7979_v59 = vpop.f32.mrb[67].mxu1 }
 0x93c   :  { %v7087_v36 = vadd.f32 %v7977_v19, %v7046_v60  ;;  %v7980_v35 = vadd.f32 %v7979_v59, %v7978_v61 }
 0x93e   :  { %v7090_v48 = vadd.f32 %v7980_v35, %v7049_v22  ;;  %v7093_v34 = vmax.f32 %v7087_v36, 0.0 }
 0x940   :  { %v7094_v37 = vmax.f32 %v7090_v48, 0.0 }
 0x942   :  { %v7095_v27 = vpack.c.bf16 %v7094_v37, %v7093_v34 }
 0x944   :  { %8007 = vmatmul.mubr.bf16.vlgmr.msra.gmra.mrb[68].mxu0 %v7095_v27 }
 0xa17   :  { %v7201_v51 = vpop.f32.mrb[68].mxu0 }
 0xa18   :  { %v7202_v31 = vadd.f32 %v7928_v54, %v7201_v51  ;;  %v8008_v53 = vpop.f32.mrb[69].mxu0 }
 0xa19   :  { %v7204_v18 = vpop.f32.mrb[70].mxu0 }
 0xa1a   :  { %v7205_v28 = vadd.f32 %v7928_v54, %v7204_v18  ;;  %v8009_v41 = vpop.f32.mrb[71].mxu0  ;;  %v7209_v5 = vsel %vm7208_vm1, %v7202_v31, -inf }
 0xa1b   :  { %7210 = vmax.xlane.f32.xlu0 %v7209_v5 }
 0xa1c   :  { %v7212_v38 = vsel %vm7208_vm1, %v7205_v28, -inf }
 0xa1f   :  { %7213 = vmax.xlane.f32.xlu0 %v7212_v38 }
 0xaa8   :  { %v7211_v8 = vpop.xlane.xlu0 %7210 }
 0xaa9   :  { %v7215_v9 = vsub.f32 %v7202_v31, %v7211_v8 }
 0xaab   :  { %v7217_v33 = vmul.f32 1.442695, %v7215_v9 }
 0xaac   :  { %v7214_v40 = vpop.xlane.xlu0 %7213 }
 0xaad   :  { %8177 = vpow2.f32 %v7217_v33  ;;  %v7216_v10 = vsub.f32 %v7205_v28, %v7214_v40 }
 0xaaf   :  { %v7219_v16 = vmul.f32 1.442695, %v7216_v10 }
 0xab1   :  { %8179 = vpow2.f32 %v7219_v16 }
 0xab7   :  { %v8178_v3 = vpop.eup %8177 }
 0xab8   :  { %v7221_v58 = vsel %vm7208_vm1, %v8178_v3, 0.0 }
 0xab9   :  { %7222 = vadd.xlane.f32.xlu1 %v7221_v58 }
 0xabb   :  { %v8180_v39 = vpop.eup %8179 }
 0xabc   :  { %v7224_v0 = vsel %vm7208_vm1, %v8180_v39, 0.0 }
 0xabd   :  { %7225 = vadd.xlane.f32.xlu1 %v7224_v0 }
 0xb46   :  { %v7223_v57 = vpop.xlane.xlu1 %7222 }
 0xb47   :  { %8181 = vlog2.f32 %v7223_v57 }
 0xb4a   :  { %v7226_v20 = vpop.xlane.xlu1 %7225 }
 0xb4b   :  { %8183 = vlog2.f32 %v7226_v20 }
 0xb51   :  { %v8182_v7 = vpop.eup %8181 }
 0xb52   :  { %v7228_v30 = vmul.f32 0.6931472, %v8182_v7 }
 0xb54   :  { %v7231_v2 = vsub.f32 %v7215_v9, %v7228_v30 }
 0xb55   :  { %v8184_v29 = vpop.eup %8183 }
 0xb56   :  { %7233 = vst.msk [vmem:[%s12135_s9] sm:$0xff] %vm7208_vm1, %v7231_v2  ;;  %v7230_v43 = vmul.f32 0.6931472, %v8184_v29 }
 0xb58   :  { %v7232_v49 = vsub.f32 %v7216_v10, %v7230_v43 }
 0xb5a   :  { %7234 = vst.msk [vmem:[%s12135_s9 + $0x8] sm:$0xff] %vm7208_vm1, %v7232_v49 }
 0xb5b   :  { %7239 = vsyncpa [#allocation5], 1 }
 0xb5c   :  { %7240 = vsyncpa [#allocation7], 1 }
 0xb5d   :  { %7241 = vsyncpa [#allocation10], 1 }
 0xb5e   :  { %7242 = vsyncpa [#allocation13], 1 }

</bundles_post_ra>
